<compile_context>
chip_gen: v7x
topology: tpu7x:2x2x1
jax: 0.10.0
libtpu: 0.0.40
codegen_flags: <defaults>
</compile_context>

<pallas_src>
import functools

import jax
import jax.numpy as jnp
from jax import lax
from jax.experimental import pallas as pl
from jax.experimental.pallas import tpu as pltpu

LANES = 128     # padded channel width for every layer (lane-dense outputs)


# ------------------------------ fused Pallas kernel ------------------------------

def _fused_cnn_kernel(xp_ref, w1_ref, b1_ref, w2_ref, b2_ref,
                      wf1_ref, bf1_ref, wf2_ref, bf2_ref,
                      out_ref,
                      c1h_ref, p1_ref, p1w_ref, c2h_ref, p2_ref, p2f_ref):
    """Entire CNNMnist forward on VMEM-resident data.

    xp_ref : (N*24*24, K1)   conv1 im2col patches, cols ordered (kh, kw, cin), K1 padded
    w1_ref : (K1, 128)       conv1 weights, rows ordered (kh, kw, cin)
    w2_ref : (25*128, 128)   conv2 weights, rows ordered (kh, kw, cin_pad)
    wf1_ref: (16*128, 128)   fc1 weights, rows ordered (h, w, cin_pad)
    wf2_ref: (128, 128)      fc2 weights
    b*_ref : (1, 128)        biases (zero padded)
    out_ref: (N, 128)        padded logits (lane-dense single store)
    scratch: c1h (N,12,24,128), p1 (N,12,12,128), p1w (N,12,8,640),
             c2h (N,4,8,128),  p2 (N,4,4,128),   p2f (N,2048)
    """
    f32 = jnp.float32
    n = out_ref.shape[0]

    # -------------- conv1: 5x5 VALID, 28 -> 24 — a single MXU matmul --------------
    acc1 = jnp.dot(xp_ref[...], w1_ref[...], preferred_element_type=f32) + b1_ref[...]
    # acc1: (n*24*24, 128), rows ordered (n, h, w)

    # -------------- maxpool 2x2 + ReLU: 24 -> 12 --------------
    # H direction: aligned reshape (h split into pairs) + static index (free vreg pick).
    a5 = acc1.reshape(n, 12, 2, 24, LANES)
    c1h_ref[...] = jnp.maximum(a5[:, :, 0, :, :], a5[:, :, 1, :, :])    # (n,12,24,128)
    # W direction: stride-2 reads from the VMEM scratch buffer.
    wa = c1h_ref[:, :, pl.ds(0, 12, 2), :]
    wb = c1h_ref[:, :, pl.ds(1, 12, 2), :]
    p1_ref[...] = jnp.maximum(jnp.maximum(wa, wb), 0.0)                 # (n,12,12,128)

    # -------------- conv2: 5x5 VALID, 12 -> 8 --------------
    # Pack the 5 kw taps into the lane dimension (aligned 128-lane stores), then do
    # 5 K=640 matmuls (one per kh) instead of 25 K=128 tap matmuls.
    # TODO(synk): conv2_drop (Dropout2d) is identity in eval mode; not applied.
    for kw in range(5):
        p1w_ref[:, :, :, kw * LANES:(kw + 1) * LANES] = p1_ref[:, :, kw:kw + 8, :]
    acc2 = jnp.zeros((n * 8 * 8, LANES), f32)
    for kh in range(5):
        xs = p1w_ref[:, kh:kh + 8, :, :].reshape(n * 8 * 8, 5 * LANES)
        wt = w2_ref[kh * 5 * LANES:(kh + 1) * 5 * LANES, :]             # rows (kw, cin)
        acc2 = acc2 + jnp.dot(xs, wt, preferred_element_type=f32)
    acc2 = acc2 + b2_ref[...]

    # -------------- maxpool 2x2 + ReLU: 8 -> 4 --------------
    a5b = acc2.reshape(n, 4, 2, 8, LANES)
    c2h_ref[...] = jnp.maximum(a5b[:, :, 0, :, :], a5b[:, :, 1, :, :])  # (n,4,8,128)
    wa2 = c2h_ref[:, :, pl.ds(0, 4, 2), :]
    wb2 = c2h_ref[:, :, pl.ds(1, 4, 2), :]
    p2_ref[...] = jnp.maximum(jnp.maximum(wa2, wb2), 0.0)               # (n,4,4,128)

    # -------------- fc1 (320 -> 50) + ReLU — a single MXU matmul --------------
    # PyTorch's NCHW flatten is folded into wf1's row permutation, so we only need to
    # lay the 16 spatial positions out as aligned 128-lane blocks of a (n, 2048) slab.
    for pos in range(16):
        hh, ww = pos // 4, pos % 4
        p2f_ref[:, pos * LANES:(pos + 1) * LANES] = p2_ref[:, hh, ww, :]
    h1 = jnp.dot(p2f_ref[...], wf1_ref[...], preferred_element_type=f32) + bf1_ref[...]
    h1 = jnp.maximum(h1, 0.0)
    # TODO(synk): F.dropout is identity in eval mode (training=False); not applied.

    # -------------- fc2 (50 -> num_classes, padded to 128 lanes) --------------
    out = jnp.dot(h1, wf2_ref[...], preferred_element_type=f32) + bf2_ref[...]
    out_ref[...] = out.astype(out_ref.dtype)


# ------------------------------ parameter preparation ------------------------------

def init_params(key, num_channels=1, num_classes=10):
    """Deterministic init mimicking PyTorch's default U(-1/sqrt(fan_in), +)."""
    ks = jax.random.split(key, 8)

    def u(k, shape, fan_in):
        bound = 1.0 / float(fan_in) ** 0.5
        return jax.random.uniform(k, shape, jnp.float32, -bound, bound)

    return {
        "conv1_w": u(ks[0], (10, num_channels, 5, 5), num_channels * 25),
        "conv1_b": u(ks[1], (10,), num_channels * 25),
        "conv2_w": u(ks[2], (20, 10, 5, 5), 10 * 25),
        "conv2_b": u(ks[3], (20,), 10 * 25),
        "fc1_w":   u(ks[4], (50, 320), 320),
        "fc1_b":   u(ks[5], (50,), 320),
        "fc2_w":   u(ks[6], (num_classes, 50), 50),
        "fc2_b":   u(ks[7], (num_classes,), 50),
    }


def prepare_params(params):
    """One-time weight re-layout (hoisted off the per-call path): reorder conv weights
    to (kh, kw, cin, cout) rows, zero-pad every channel dim to 128 lanes, and fold the
    PyTorch NCHW flatten permutation into fc1's rows."""
    f32 = jnp.float32
    o1, cin = params["conv1_w"].shape[:2]
    o2, c2 = params["conv2_w"].shape[:2]
    f1 = params["fc1_w"].shape[0]
    nc = params["fc2_w"].shape[0]

    k1 = 25 * cin
    k1_pad = ((k1 + 7) // 8) * 8                                         # 25 -> 32
    w1 = jnp.transpose(params["conv1_w"], (2, 3, 1, 0)).astype(f32)      # (5,5,cin,o1)
    w1 = w1.reshape(k1, o1)                                              # rows (kh,kw,cin)
    w1 = jnp.pad(w1, ((0, k1_pad - k1), (0, LANES - o1)))                # (k1_pad, 128)

    w2 = jnp.transpose(params["conv2_w"], (2, 3, 1, 0)).astype(f32)      # (5,5,c2,o2)
    w2 = jnp.pad(w2, ((0, 0), (0, 0), (0, LANES - c2), (0, LANES - o2)))
    w2 = w2.reshape(25 * LANES, LANES)                                   # rows (kh,kw,cin)

    wf1 = params["fc1_w"].astype(f32).reshape(f1, o2, 4, 4)              # (f1,c,h,w)
    wf1 = jnp.transpose(wf1, (2, 3, 1, 0))                               # (h,w,c,f1)
    wf1 = jnp.pad(wf1, ((0, 0), (0, 0), (0, LANES - o2), (0, LANES - f1)))
    wf1 = wf1.reshape(16 * LANES, LANES)                                 # rows (h,w,cin)

    wf2 = jnp.pad(params["fc2_w"].astype(f32).T,
                  ((0, LANES - f1), (0, LANES - nc)))                    # (128,128)

    def pad_b(b):
        return jnp.pad(b.astype(f32), (0, LANES - b.shape[0])).reshape(1, LANES)

    return {
        "w1": w1, "b1": pad_b(params["conv1_b"]),
        "w2": w2, "b2": pad_b(params["conv2_b"]),
        "wf1": wf1, "bf1": pad_b(params["fc1_b"]),
        "wf2": wf2, "bf2": pad_b(params["fc2_b"]),
    }


# ------------------------------ forward wrapper ------------------------------

def cnn_mnist_forward(x_nchw, prep, *, num_classes=10):
    n, cin, h, w = x_nchw.shape
    assert (h, w) == (28, 28), "fc1=320 pins the spatial input to 28x28"

    # NCHW -> NHWC, then extract conv1 patches (layout plumbing, cols ordered (kh,kw,cin)).
    x = jnp.transpose(x_nchw, (0, 2, 3, 1)).astype(jnp.float32)          # (n,28,28,cin)
    patches = [x[:, kh:kh + 24, kw:kw + 24, :] for kh in range(5) for kw in range(5)]
    xp = jnp.concatenate(patches, axis=-1).reshape(n * 24 * 24, 25 * cin)
    k1_pad = prep["w1"].shape[0]
    xp = jnp.pad(xp, ((0, 0), (0, k1_pad - 25 * cin)))                   # (n*576, k1_pad)

    out = pl.pallas_call(
        _fused_cnn_kernel,
        out_shape=jax.ShapeDtypeStruct((n, LANES), jnp.float32),
        grid=(1,),
        in_specs=[
            pl.BlockSpec((n * 24 * 24, k1_pad), lambda i: (0, 0)),
            pl.BlockSpec((k1_pad, LANES), lambda i: (0, 0)),
            pl.BlockSpec((1, LANES), lambda i: (0, 0)),
            pl.BlockSpec((25 * LANES, LANES), lambda i: (0, 0)),
            pl.BlockSpec((1, LANES), lambda i: (0, 0)),
            pl.BlockSpec((16 * LANES, LANES), lambda i: (0, 0)),
            pl.BlockSpec((1, LANES), lambda i: (0, 0)),
            pl.BlockSpec((LANES, LANES), lambda i: (0, 0)),
            pl.BlockSpec((1, LANES), lambda i: (0, 0)),
        ],
        out_specs=pl.BlockSpec((n, LANES), lambda i: (0, 0)),
        scratch_shapes=[
            pltpu.VMEM((n, 12, 24, LANES), jnp.float32),      # conv1 H-pooled
            pltpu.VMEM((n, 12, 12, LANES), jnp.float32),      # pooled1 (conv2 input)
            pltpu.VMEM((n, 12, 8, 5 * LANES), jnp.float32),   # kw-packed conv2 input
            pltpu.VMEM((n, 4, 8, LANES), jnp.float32),        # conv2 H-pooled
            pltpu.VMEM((n, 4, 4, LANES), jnp.float32),        # pooled2
            pltpu.VMEM((n, 16 * LANES), jnp.float32),         # fc1 input slab
        ],
        compiler_params=pltpu.CompilerParams(
            dimension_semantics=("arbitrary",)),
        # TODO(synk): for large batches, split a leading batch grid axis marked
        # "parallel" so v7x's two TensorCores share the work; at N=2 one program wins.
    )(xp, prep["w1"], prep["b1"], prep["w2"], prep["b2"],
      prep["wf1"], prep["bf1"], prep["wf2"], prep["bf2"])

    return out[:, :num_classes]


# ------------------------------ pure-JAX reference ------------------------------

def reference_forward(x_nchw, params):
    dn = ("NCHW", "OIHW", "NCHW")
    hi = lax.Precision.HIGHEST
    y = lax.conv_general_dilated(x_nchw, params["conv1_w"], (1, 1), "VALID",
                                 dimension_numbers=dn, precision=hi)
    y = y + params["conv1_b"][None, :, None, None]
    y = lax.reduce_window(y, -jnp.inf, lax.max, (1, 1, 2, 2), (1, 1, 2, 2), "VALID")
    y = jnp.maximum(y, 0.0)
    y = lax.conv_general_dilated(y, params["conv2_w"], (1, 1), "VALID",
                                 dimension_numbers=dn, precision=hi)
    y = y + params["conv2_b"][None, :, None, None]
    y = lax.reduce_window(y, -jnp.inf, lax.max, (1, 1, 2, 2), (1, 1, 2, 2), "VALID")
    y = jnp.maximum(y, 0.0)
    y = y.reshape(y.shape[0], -1)                          # PyTorch NCHW flatten
    y = jnp.maximum(jnp.dot(y, params["fc1_w"].T, precision=hi) + params["fc1_b"], 0.0)
    y = jnp.dot(y, params["fc2_w"].T, precision=hi) + params["fc2_b"]
    return y


if __name__ == "__main__":
    num_channels, num_classes, batch = 1, 10, 2
    key = jax.random.PRNGKey(0)
    pkey, xkey = jax.random.split(key)
    params = init_params(pkey, num_channels, num_classes)
    x = jax.random.normal(xkey, (batch, num_channels, 28, 28), jnp.float32)

    prep = prepare_params(params)          # one-time re-layout, off the hot path
    fwd = jax.jit(functools.partial(cnn_mnist_forward, num_classes=num_classes))

    out = jax.block_until_ready(fwd(x, prep))
    assert out.shape == (batch, num_classes)
    assert bool(jnp.all(jnp.isfinite(out)))

    ref = jax.block_until_ready(jax.jit(reference_forward)(x, params))
    assert jnp.allclose(out, ref, rtol=1e-2, atol=1e-2), (
        "max abs err %.3e" % float(jnp.max(jnp.abs(out - ref))))

    print("KERNEL_OK")
</pallas_src>

<mosaic_0001>
module attributes {stable_mosaic.version = 11 : i64} {
  func.func @_fused_cnn_kernel(%arg0: i32, %arg1: memref<1152x32xf32, #tpu.memory_space<vmem>>, %arg2: memref<32x128xf32, #tpu.memory_space<vmem>>, %arg3: memref<1x128xf32, #tpu.memory_space<vmem>>, %arg4: memref<3200x128xf32, #tpu.memory_space<vmem>>, %arg5: memref<1x128xf32, #tpu.memory_space<vmem>>, %arg6: memref<2048x128xf32, #tpu.memory_space<vmem>>, %arg7: memref<1x128xf32, #tpu.memory_space<vmem>>, %arg8: memref<128x128xf32, #tpu.memory_space<vmem>>, %arg9: memref<1x128xf32, #tpu.memory_space<vmem>>, %arg10: memref<2x128xf32, #tpu.memory_space<vmem>>, %arg11: memref<2x12x24x128xf32, #tpu.memory_space<vmem>>, %arg12: memref<2x12x12x128xf32, #tpu.memory_space<vmem>>, %arg13: memref<2x12x8x640xf32, #tpu.memory_space<vmem>>, %arg14: memref<2x4x8x128xf32, #tpu.memory_space<vmem>>, %arg15: memref<2x4x4x128xf32, #tpu.memory_space<vmem>>, %arg16: memref<2x2048xf32, #tpu.memory_space<vmem>>) attributes {dimension_semantics = [#tpu.dimension_semantics<arbitrary>], iteration_bounds = array<i64: 1>, scalar_prefetch = 0 : i64, scratch_operands = 6 : i64, tpu.core_type = #tpu.core_type<tc>, window_params = [{pipeline_mode = #tpu.pipeline_mode<synchronous>, transform_indices = @transform_0, window_bounds = array<i64: 1152, 32>}, {pipeline_mode = #tpu.pipeline_mode<synchronous>, transform_indices = @transform_1, window_bounds = array<i64: 32, 128>}, {pipeline_mode = #tpu.pipeline_mode<synchronous>, transform_indices = @transform_2, window_bounds = array<i64: 1, 128>}, {pipeline_mode = #tpu.pipeline_mode<synchronous>, transform_indices = @transform_3, window_bounds = array<i64: 3200, 128>}, {pipeline_mode = #tpu.pipeline_mode<synchronous>, transform_indices = @transform_4, window_bounds = array<i64: 1, 128>}, {pipeline_mode = #tpu.pipeline_mode<synchronous>, transform_indices = @transform_5, window_bounds = array<i64: 2048, 128>}, {pipeline_mode = #tpu.pipeline_mode<synchronous>, transform_indices = @transform_6, window_bounds = array<i64: 1, 128>}, {pipeline_mode = #tpu.pipeline_mode<synchronous>, transform_indices = @transform_7, window_bounds = array<i64: 128, 128>}, {pipeline_mode = #tpu.pipeline_mode<synchronous>, transform_indices = @transform_8, window_bounds = array<i64: 1, 128>}, {pipeline_mode = #tpu.pipeline_mode<synchronous>, transform_indices = @transform_9, window_bounds = array<i64: 2, 128>}]} {
    %c0 = arith.constant 0 : index
    %c0_0 = arith.constant 0 : index
    %0 = vector.load %arg1[%c0, %c0_0] : memref<1152x32xf32, #tpu.memory_space<vmem>>, vector<1152x32xf32>
    %c0_1 = arith.constant 0 : index
    %c0_2 = arith.constant 0 : index
    %1 = vector.load %arg2[%c0_1, %c0_2] : memref<32x128xf32, #tpu.memory_space<vmem>>, vector<32x128xf32>
    %cst = arith.constant dense<0.000000e+00> : vector<1152x128xf32>
    %2 = tpu.matmul %0, %1, %cst {dimension_numbers = #tpu.dot_dimension_numbers<[1], [0], [0], [1], [0, 0, 1, 1], [], []>} : vector<1152x32xf32>, vector<32x128xf32>, vector<1152x128xf32> -> vector<1152x128xf32>
    %c0_3 = arith.constant 0 : index
    %c0_4 = arith.constant 0 : index
    %3 = vector.load %arg3[%c0_3, %c0_4] : memref<1x128xf32, #tpu.memory_space<vmem>>, vector<1x128xf32>
    %4 = vector.broadcast %3 : vector<1x128xf32> to vector<1152x128xf32>
    %5 = arith.addf %2, %4 : vector<1152x128xf32>
    %6 = vector.shape_cast %5 : vector<1152x128xf32> to vector<2x12x2x24x128xf32>
    %7 = vector.extract_strided_slice %6 {offsets = [0, 0, 0, 0, 0], sizes = [2, 12, 1, 24, 128], strides = [1, 1, 1, 1, 1]} : vector<2x12x2x24x128xf32> to vector<2x12x1x24x128xf32>
    %8 = vector.shape_cast %7 : vector<2x12x1x24x128xf32> to vector<2x12x24x128xf32>
    %9 = vector.extract_strided_slice %6 {offsets = [0, 0, 1, 0, 0], sizes = [2, 12, 1, 24, 128], strides = [1, 1, 1, 1, 1]} : vector<2x12x2x24x128xf32> to vector<2x12x1x24x128xf32>
    %10 = vector.shape_cast %9 : vector<2x12x1x24x128xf32> to vector<2x12x24x128xf32>
    %11 = arith.maximumf %8, %10 : vector<2x12x24x128xf32>
    %c0_5 = arith.constant 0 : index
    %c0_6 = arith.constant 0 : index
    %c0_7 = arith.constant 0 : index
    %c0_8 = arith.constant 0 : index
    %12 = vector.load %arg11[%c0_5, %c0_6, %c0_7, %c0_8] : memref<2x12x24x128xf32, #tpu.memory_space<vmem>>, vector<2x12x24x128xf32>
    tpu.vector_store %arg11[%c0_5, %c0_6, %c0_7, %c0_8], %11 {strides = array<i32>} : memref<2x12x24x128xf32, #tpu.memory_space<vmem>>, vector<2x12x24x128xf32>,
    %c0_9 = arith.constant 0 : index
    %c0_10 = arith.constant 0 : index
    %c0_11 = arith.constant 0 : index
    %c0_12 = arith.constant 0 : index
    %13 = tpu.strided_load %arg11[%c0_9, %c0_10, %c0_11, %c0_12] {strides = array<i32: 1, 1, 2, 1>} : memref<2x12x24x128xf32, #tpu.memory_space<vmem>>, vector<2x12x12x128xf32>
    %c0_13 = arith.constant 0 : index
    %c0_14 = arith.constant 0 : index
    %c1 = arith.constant 1 : index
    %c0_15 = arith.constant 0 : index
    %14 = tpu.strided_load %arg11[%c0_13, %c0_14, %c1, %c0_15] {strides = array<i32: 1, 1, 2, 1>} : memref<2x12x24x128xf32, #tpu.memory_space<vmem>>, vector<2x12x12x128xf32>
    %15 = arith.maximumf %13, %14 : vector<2x12x12x128xf32>
    %cst_16 = arith.constant 0.000000e+00 : f32
    %16 = vector.broadcast %cst_16 : f32 to vector<2x12x12x128xf32>
    %17 = arith.maximumf %15, %16 : vector<2x12x12x128xf32>
    %c0_17 = arith.constant 0 : index
    %c0_18 = arith.constant 0 : index
    %c0_19 = arith.constant 0 : index
    %c0_20 = arith.constant 0 : index
    %18 = vector.load %arg12[%c0_17, %c0_18, %c0_19, %c0_20] : memref<2x12x12x128xf32, #tpu.memory_space<vmem>>, vector<2x12x12x128xf32>
    tpu.vector_store %arg12[%c0_17, %c0_18, %c0_19, %c0_20], %17 {strides = array<i32>} : memref<2x12x12x128xf32, #tpu.memory_space<vmem>>, vector<2x12x12x128xf32>,
    %c0_21 = arith.constant 0 : index
    %c0_22 = arith.constant 0 : index
    %c0_23 = arith.constant 0 : index
    %c0_24 = arith.constant 0 : index
    %19 = vector.load %arg12[%c0_21, %c0_22, %c0_23, %c0_24] : memref<2x12x12x128xf32, #tpu.memory_space<vmem>>, vector<2x12x8x128xf32>
    %c0_25 = arith.constant 0 : index
    %c0_26 = arith.constant 0 : index
    %c0_27 = arith.constant 0 : index
    %c0_28 = arith.constant 0 : index
    %20 = vector.load %arg13[%c0_25, %c0_26, %c0_27, %c0_28] : memref<2x12x8x640xf32, #tpu.memory_space<vmem>>, vector<2x12x8x128xf32>
    tpu.vector_store %arg13[%c0_25, %c0_26, %c0_27, %c0_28], %19 {strides = array<i32>} : memref<2x12x8x640xf32, #tpu.memory_space<vmem>>, vector<2x12x8x128xf32>,
    %c0_29 = arith.constant 0 : index
    %c0_30 = arith.constant 0 : index
    %c1_31 = arith.constant 1 : index
    %c0_32 = arith.constant 0 : index
    %21 = vector.load %arg12[%c0_29, %c0_30, %c1_31, %c0_32] : memref<2x12x12x128xf32, #tpu.memory_space<vmem>>, vector<2x12x8x128xf32>
    %c0_33 = arith.constant 0 : index
    %c0_34 = arith.constant 0 : index
    %c0_35 = arith.constant 0 : index
    %c128 = arith.constant 128 : index
    %22 = vector.load %arg13[%c0_33, %c0_34, %c0_35, %c128] : memref<2x12x8x640xf32, #tpu.memory_space<vmem>>, vector<2x12x8x128xf32>
    tpu.vector_store %arg13[%c0_33, %c0_34, %c0_35, %c128], %21 {strides = array<i32>} : memref<2x12x8x640xf32, #tpu.memory_space<vmem>>, vector<2x12x8x128xf32>,
    %c0_36 = arith.constant 0 : index
    %c0_37 = arith.constant 0 : index
    %c2 = arith.constant 2 : index
    %c0_38 = arith.constant 0 : index
    %23 = vector.load %arg12[%c0_36, %c0_37, %c2, %c0_38] : memref<2x12x12x128xf32, #tpu.memory_space<vmem>>, vector<2x12x8x128xf32>
    %c0_39 = arith.constant 0 : index
    %c0_40 = arith.constant 0 : index
    %c0_41 = arith.constant 0 : index
    %c256 = arith.constant 256 : index
    %24 = vector.load %arg13[%c0_39, %c0_40, %c0_41, %c256] : memref<2x12x8x640xf32, #tpu.memory_space<vmem>>, vector<2x12x8x128xf32>
    tpu.vector_store %arg13[%c0_39, %c0_40, %c0_41, %c256], %23 {strides = array<i32>} : memref<2x12x8x640xf32, #tpu.memory_space<vmem>>, vector<2x12x8x128xf32>,
    %c0_42 = arith.constant 0 : index
    %c0_43 = arith.constant 0 : index
    %c3 = arith.constant 3 : index
    %c0_44 = arith.constant 0 : index
    %25 = vector.load %arg12[%c0_42, %c0_43, %c3, %c0_44] : memref<2x12x12x128xf32, #tpu.memory_space<vmem>>, vector<2x12x8x128xf32>
    %c0_45 = arith.constant 0 : index
    %c0_46 = arith.constant 0 : index
    %c0_47 = arith.constant 0 : index
    %c384 = arith.constant 384 : index
    %26 = vector.load %arg13[%c0_45, %c0_46, %c0_47, %c384] : memref<2x12x8x640xf32, #tpu.memory_space<vmem>>, vector<2x12x8x128xf32>
    tpu.vector_store %arg13[%c0_45, %c0_46, %c0_47, %c384], %25 {strides = array<i32>} : memref<2x12x8x640xf32, #tpu.memory_space<vmem>>, vector<2x12x8x128xf32>,
    %c0_48 = arith.constant 0 : index
    %c0_49 = arith.constant 0 : index
    %c4 = arith.constant 4 : index
    %c0_50 = arith.constant 0 : index
    %27 = vector.load %arg12[%c0_48, %c0_49, %c4, %c0_50] : memref<2x12x12x128xf32, #tpu.memory_space<vmem>>, vector<2x12x8x128xf32>
    %c0_51 = arith.constant 0 : index
    %c0_52 = arith.constant 0 : index
    %c0_53 = arith.constant 0 : index
    %c512 = arith.constant 512 : index
    %28 = vector.load %arg13[%c0_51, %c0_52, %c0_53, %c512] : memref<2x12x8x640xf32, #tpu.memory_space<vmem>>, vector<2x12x8x128xf32>
    tpu.vector_store %arg13[%c0_51, %c0_52, %c0_53, %c512], %27 {strides = array<i32>} : memref<2x12x8x640xf32, #tpu.memory_space<vmem>>, vector<2x12x8x128xf32>,
    %cst_54 = arith.constant 0.000000e+00 : f32
    %29 = vector.broadcast %cst_54 : f32 to vector<128x128xf32>
    %c0_55 = arith.constant 0 : index
    %c0_56 = arith.constant 0 : index
    %c0_57 = arith.constant 0 : index
    %c0_58 = arith.constant 0 : index
    %30 = vector.load %arg13[%c0_55, %c0_56, %c0_57, %c0_58] : memref<2x12x8x640xf32, #tpu.memory_space<vmem>>, vector<2x8x8x640xf32>
    %31 = vector.shape_cast %30 : vector<2x8x8x640xf32> to vector<128x640xf32>
    %c0_59 = arith.constant 0 : index
    %c0_60 = arith.constant 0 : index
    %32 = vector.load %arg4[%c0_59, %c0_60] : memref<3200x128xf32, #tpu.memory_space<vmem>>, vector<640x128xf32>
    %cst_61 = arith.constant dense<0.000000e+00> : vector<128x128xf32>
    %33 = tpu.matmul %31, %32, %cst_61 {dimension_numbers = #tpu.dot_dimension_numbers<[1], [0], [0], [1], [0, 0, 1, 1], [], []>} : vector<128x640xf32>, vector<640x128xf32>, vector<128x128xf32> -> vector<128x128xf32>
    %34 = arith.addf %29, %33 : vector<128x128xf32>
    %c0_62 = arith.constant 0 : index
    %c1_63 = arith.constant 1 : index
    %c0_64 = arith.constant 0 : index
    %c0_65 = arith.constant 0 : index
    %35 = vector.load %arg13[%c0_62, %c1_63, %c0_64, %c0_65] : memref<2x12x8x640xf32, #tpu.memory_space<vmem>>, vector<2x8x8x640xf32>
    %36 = vector.shape_cast %35 : vector<2x8x8x640xf32> to vector<128x640xf32>
    %c640 = arith.constant 640 : index
    %c0_66 = arith.constant 0 : index
    %37 = vector.load %arg4[%c640, %c0_66] : memref<3200x128xf32, #tpu.memory_space<vmem>>, vector<640x128xf32>
    %cst_67 = arith.constant dense<0.000000e+00> : vector<128x128xf32>
    %38 = tpu.matmul %36, %37, %cst_67 {dimension_numbers = #tpu.dot_dimension_numbers<[1], [0], [0], [1], [0, 0, 1, 1], [], []>} : vector<128x640xf32>, vector<640x128xf32>, vector<128x128xf32> -> vector<128x128xf32>
    %39 = arith.addf %34, %38 : vector<128x128xf32>
    %c0_68 = arith.constant 0 : index
    %c2_69 = arith.constant 2 : index
    %c0_70 = arith.constant 0 : index
    %c0_71 = arith.constant 0 : index
    %40 = vector.load %arg13[%c0_68, %c2_69, %c0_70, %c0_71] : memref<2x12x8x640xf32, #tpu.memory_space<vmem>>, vector<2x8x8x640xf32>
    %41 = vector.shape_cast %40 : vector<2x8x8x640xf32> to vector<128x640xf32>
    %c1280 = arith.constant 1280 : index
    %c0_72 = arith.constant 0 : index
    %42 = vector.load %arg4[%c1280, %c0_72] : memref<3200x128xf32, #tpu.memory_space<vmem>>, vector<640x128xf32>
    %cst_73 = arith.constant dense<0.000000e+00> : vector<128x128xf32>
    %43 = tpu.matmul %41, %42, %cst_73 {dimension_numbers = #tpu.dot_dimension_numbers<[1], [0], [0], [1], [0, 0, 1, 1], [], []>} : vector<128x640xf32>, vector<640x128xf32>, vector<128x128xf32> -> vector<128x128xf32>
    %44 = arith.addf %39, %43 : vector<128x128xf32>
    %c0_74 = arith.constant 0 : index
    %c3_75 = arith.constant 3 : index
    %c0_76 = arith.constant 0 : index
    %c0_77 = arith.constant 0 : index
    %45 = vector.load %arg13[%c0_74, %c3_75, %c0_76, %c0_77] : memref<2x12x8x640xf32, #tpu.memory_space<vmem>>, vector<2x8x8x640xf32>
    %46 = vector.shape_cast %45 : vector<2x8x8x640xf32> to vector<128x640xf32>
    %c1920 = arith.constant 1920 : index
    %c0_78 = arith.constant 0 : index
    %47 = vector.load %arg4[%c1920, %c0_78] : memref<3200x128xf32, #tpu.memory_space<vmem>>, vector<640x128xf32>
    %cst_79 = arith.constant dense<0.000000e+00> : vector<128x128xf32>
    %48 = tpu.matmul %46, %47, %cst_79 {dimension_numbers = #tpu.dot_dimension_numbers<[1], [0], [0], [1], [0, 0, 1, 1], [], []>} : vector<128x640xf32>, vector<640x128xf32>, vector<128x128xf32> -> vector<128x128xf32>
    %49 = arith.addf %44, %48 : vector<128x128xf32>
    %c0_80 = arith.constant 0 : index
    %c4_81 = arith.constant 4 : index
    %c0_82 = arith.constant 0 : index
    %c0_83 = arith.constant 0 : index
    %50 = vector.load %arg13[%c0_80, %c4_81, %c0_82, %c0_83] : memref<2x12x8x640xf32, #tpu.memory_space<vmem>>, vector<2x8x8x640xf32>
    %51 = vector.shape_cast %50 : vector<2x8x8x640xf32> to vector<128x640xf32>
    %c2560 = arith.constant 2560 : index
    %c0_84 = arith.constant 0 : index
    %52 = vector.load %arg4[%c2560, %c0_84] : memref<3200x128xf32, #tpu.memory_space<vmem>>, vector<640x128xf32>
    %cst_85 = arith.constant dense<0.000000e+00> : vector<128x128xf32>
    %53 = tpu.matmul %51, %52, %cst_85 {dimension_numbers = #tpu.dot_dimension_numbers<[1], [0], [0], [1], [0, 0, 1, 1], [], []>} : vector<128x640xf32>, vector<640x128xf32>, vector<128x128xf32> -> vector<128x128xf32>
    %54 = arith.addf %49, %53 : vector<128x128xf32>
    %c0_86 = arith.constant 0 : index
    %c0_87 = arith.constant 0 : index
    %55 = vector.load %arg5[%c0_86, %c0_87] : memref<1x128xf32, #tpu.memory_space<vmem>>, vector<1x128xf32>
    %56 = vector.broadcast %55 : vector<1x128xf32> to vector<128x128xf32>
    %57 = arith.addf %54, %56 : vector<128x128xf32>
    %58 = vector.shape_cast %57 : vector<128x128xf32> to vector<2x4x2x8x128xf32>
    %59 = vector.extract_strided_slice %58 {offsets = [0, 0, 0, 0, 0], sizes = [2, 4, 1, 8, 128], strides = [1, 1, 1, 1, 1]} : vector<2x4x2x8x128xf32> to vector<2x4x1x8x128xf32>
    %60 = vector.shape_cast %59 : vector<2x4x1x8x128xf32> to vector<2x4x8x128xf32>
    %61 = vector.extract_strided_slice %58 {offsets = [0, 0, 1, 0, 0], sizes = [2, 4, 1, 8, 128], strides = [1, 1, 1, 1, 1]} : vector<2x4x2x8x128xf32> to vector<2x4x1x8x128xf32>
    %62 = vector.shape_cast %61 : vector<2x4x1x8x128xf32> to vector<2x4x8x128xf32>
    %63 = arith.maximumf %60, %62 : vector<2x4x8x128xf32>
    %c0_88 = arith.constant 0 : index
    %c0_89 = arith.constant 0 : index
    %c0_90 = arith.constant 0 : index
    %c0_91 = arith.constant 0 : index
    %64 = vector.load %arg14[%c0_88, %c0_89, %c0_90, %c0_91] : memref<2x4x8x128xf32, #tpu.memory_space<vmem>>, vector<2x4x8x128xf32>
    tpu.vector_store %arg14[%c0_88, %c0_89, %c0_90, %c0_91], %63 {strides = array<i32>} : memref<2x4x8x128xf32, #tpu.memory_space<vmem>>, vector<2x4x8x128xf32>,
    %c0_92 = arith.constant 0 : index
    %c0_93 = arith.constant 0 : index
    %c0_94 = arith.constant 0 : index
    %c0_95 = arith.constant 0 : index
    %65 = tpu.strided_load %arg14[%c0_92, %c0_93, %c0_94, %c0_95] {strides = array<i32: 1, 1, 2, 1>} : memref<2x4x8x128xf32, #tpu.memory_space<vmem>>, vector<2x4x4x128xf32>
    %c0_96 = arith.constant 0 : index
    %c0_97 = arith.constant 0 : index
    %c1_98 = arith.constant 1 : index
    %c0_99 = arith.constant 0 : index
    %66 = tpu.strided_load %arg14[%c0_96, %c0_97, %c1_98, %c0_99] {strides = array<i32: 1, 1, 2, 1>} : memref<2x4x8x128xf32, #tpu.memory_space<vmem>>, vector<2x4x4x128xf32>
    %67 = arith.maximumf %65, %66 : vector<2x4x4x128xf32>
    %cst_100 = arith.constant 0.000000e+00 : f32
    %68 = vector.broadcast %cst_100 : f32 to vector<2x4x4x128xf32>
    %69 = arith.maximumf %67, %68 : vector<2x4x4x128xf32>
    %c0_101 = arith.constant 0 : index
    %c0_102 = arith.constant 0 : index
    %c0_103 = arith.constant 0 : index
    %c0_104 = arith.constant 0 : index
    %70 = vector.load %arg15[%c0_101, %c0_102, %c0_103, %c0_104] : memref<2x4x4x128xf32, #tpu.memory_space<vmem>>, vector<2x4x4x128xf32>
    tpu.vector_store %arg15[%c0_101, %c0_102, %c0_103, %c0_104], %69 {strides = array<i32>} : memref<2x4x4x128xf32, #tpu.memory_space<vmem>>, vector<2x4x4x128xf32>,
    %c0_105 = arith.constant 0 : index
    %c0_106 = arith.constant 0 : index
    %c0_107 = arith.constant 0 : index
    %c0_108 = arith.constant 0 : index
    %71 = vector.load %arg15[%c0_105, %c0_106, %c0_107, %c0_108] : memref<2x4x4x128xf32, #tpu.memory_space<vmem>>, vector<2x1x1x128xf32>
    %72 = vector.shape_cast %71 : vector<2x1x1x128xf32> to vector<2x128xf32>
    %c0_109 = arith.constant 0 : index
    %c0_110 = arith.constant 0 : index
    %73 = vector.load %arg16[%c0_109, %c0_110] : memref<2x2048xf32, #tpu.memory_space<vmem>>, vector<2x128xf32>
    tpu.vector_store %arg16[%c0_109, %c0_110], %72 {strides = array<i32>} : memref<2x2048xf32, #tpu.memory_space<vmem>>, vector<2x128xf32>,
    %c0_111 = arith.constant 0 : index
    %c0_112 = arith.constant 0 : index
    %c1_113 = arith.constant 1 : index
    %c0_114 = arith.constant 0 : index
    %74 = vector.load %arg15[%c0_111, %c0_112, %c1_113, %c0_114] : memref<2x4x4x128xf32, #tpu.memory_space<vmem>>, vector<2x1x1x128xf32>
    %75 = vector.shape_cast %74 : vector<2x1x1x128xf32> to vector<2x128xf32>
    %c0_115 = arith.constant 0 : index
    %c128_116 = arith.constant 128 : index
    %76 = vector.load %arg16[%c0_115, %c128_116] : memref<2x2048xf32, #tpu.memory_space<vmem>>, vector<2x128xf32>
    tpu.vector_store %arg16[%c0_115, %c128_116], %75 {strides = array<i32>} : memref<2x2048xf32, #tpu.memory_space<vmem>>, vector<2x128xf32>,
    %c0_117 = arith.constant 0 : index
    %c0_118 = arith.constant 0 : index
    %c2_119 = arith.constant 2 : index
    %c0_120 = arith.constant 0 : index
    %77 = vector.load %arg15[%c0_117, %c0_118, %c2_119, %c0_120] : memref<2x4x4x128xf32, #tpu.memory_space<vmem>>, vector<2x1x1x128xf32>
    %78 = vector.shape_cast %77 : vector<2x1x1x128xf32> to vector<2x128xf32>
    %c0_121 = arith.constant 0 : index
    %c256_122 = arith.constant 256 : index
    %79 = vector.load %arg16[%c0_121, %c256_122] : memref<2x2048xf32, #tpu.memory_space<vmem>>, vector<2x128xf32>
    tpu.vector_store %arg16[%c0_121, %c256_122], %78 {strides = array<i32>} : memref<2x2048xf32, #tpu.memory_space<vmem>>, vector<2x128xf32>,
    %c0_123 = arith.constant 0 : index
    %c0_124 = arith.constant 0 : index
    %c3_125 = arith.constant 3 : index
    %c0_126 = arith.constant 0 : index
    %80 = vector.load %arg15[%c0_123, %c0_124, %c3_125, %c0_126] : memref<2x4x4x128xf32, #tpu.memory_space<vmem>>, vector<2x1x1x128xf32>
    %81 = vector.shape_cast %80 : vector<2x1x1x128xf32> to vector<2x128xf32>
    %c0_127 = arith.constant 0 : index
    %c384_128 = arith.constant 384 : index
    %82 = vector.load %arg16[%c0_127, %c384_128] : memref<2x2048xf32, #tpu.memory_space<vmem>>, vector<2x128xf32>
    tpu.vector_store %arg16[%c0_127, %c384_128], %81 {strides = array<i32>} : memref<2x2048xf32, #tpu.memory_space<vmem>>, vector<2x128xf32>,
    %c0_129 = arith.constant 0 : index
    %c1_130 = arith.constant 1 : index
    %c0_131 = arith.constant 0 : index
    %c0_132 = arith.constant 0 : index
    %83 = vector.load %arg15[%c0_129, %c1_130, %c0_131, %c0_132] : memref<2x4x4x128xf32, #tpu.memory_space<vmem>>, vector<2x1x1x128xf32>
    %84 = vector.shape_cast %83 : vector<2x1x1x128xf32> to vector<2x128xf32>
    %c0_133 = arith.constant 0 : index
    %c512_134 = arith.constant 512 : index
    %85 = vector.load %arg16[%c0_133, %c512_134] : memref<2x2048xf32, #tpu.memory_space<vmem>>, vector<2x128xf32>
    tpu.vector_store %arg16[%c0_133, %c512_134], %84 {strides = array<i32>} : memref<2x2048xf32, #tpu.memory_space<vmem>>, vector<2x128xf32>,
    %c0_135 = arith.constant 0 : index
    %c1_136 = arith.constant 1 : index
    %c1_137 = arith.constant 1 : index
    %c0_138 = arith.constant 0 : index
    %86 = vector.load %arg15[%c0_135, %c1_136, %c1_137, %c0_138] : memref<2x4x4x128xf32, #tpu.memory_space<vmem>>, vector<2x1x1x128xf32>
    %87 = vector.shape_cast %86 : vector<2x1x1x128xf32> to vector<2x128xf32>
    %c0_139 = arith.constant 0 : index
    %c640_140 = arith.constant 640 : index
    %88 = vector.load %arg16[%c0_139, %c640_140] : memref<2x2048xf32, #tpu.memory_space<vmem>>, vector<2x128xf32>
    tpu.vector_store %arg16[%c0_139, %c640_140], %87 {strides = array<i32>} : memref<2x2048xf32, #tpu.memory_space<vmem>>, vector<2x128xf32>,
    %c0_141 = arith.constant 0 : index
    %c1_142 = arith.constant 1 : index
    %c2_143 = arith.constant 2 : index
    %c0_144 = arith.constant 0 : index
    %89 = vector.load %arg15[%c0_141, %c1_142, %c2_143, %c0_144] : memref<2x4x4x128xf32, #tpu.memory_space<vmem>>, vector<2x1x1x128xf32>
    %90 = vector.shape_cast %89 : vector<2x1x1x128xf32> to vector<2x128xf32>
    %c0_145 = arith.constant 0 : index
    %c768 = arith.constant 768 : index
    %91 = vector.load %arg16[%c0_145, %c768] : memref<2x2048xf32, #tpu.memory_space<vmem>>, vector<2x128xf32>
    tpu.vector_store %arg16[%c0_145, %c768], %90 {strides = array<i32>} : memref<2x2048xf32, #tpu.memory_space<vmem>>, vector<2x128xf32>,
    %c0_146 = arith.constant 0 : index
    %c1_147 = arith.constant 1 : index
    %c3_148 = arith.constant 3 : index
    %c0_149 = arith.constant 0 : index
    %92 = vector.load %arg15[%c0_146, %c1_147, %c3_148, %c0_149] : memref<2x4x4x128xf32, #tpu.memory_space<vmem>>, vector<2x1x1x128xf32>
    %93 = vector.shape_cast %92 : vector<2x1x1x128xf32> to vector<2x128xf32>
    %c0_150 = arith.constant 0 : index
    %c896 = arith.constant 896 : index
    %94 = vector.load %arg16[%c0_150, %c896] : memref<2x2048xf32, #tpu.memory_space<vmem>>, vector<2x128xf32>
    tpu.vector_store %arg16[%c0_150, %c896], %93 {strides = array<i32>} : memref<2x2048xf32, #tpu.memory_space<vmem>>, vector<2x128xf32>,
    %c0_151 = arith.constant 0 : index
    %c2_152 = arith.constant 2 : index
    %c0_153 = arith.constant 0 : index
    %c0_154 = arith.constant 0 : index
    %95 = vector.load %arg15[%c0_151, %c2_152, %c0_153, %c0_154] : memref<2x4x4x128xf32, #tpu.memory_space<vmem>>, vector<2x1x1x128xf32>
    %96 = vector.shape_cast %95 : vector<2x1x1x128xf32> to vector<2x128xf32>
    %c0_155 = arith.constant 0 : index
    %c1024 = arith.constant 1024 : index
    %97 = vector.load %arg16[%c0_155, %c1024] : memref<2x2048xf32, #tpu.memory_space<vmem>>, vector<2x128xf32>
    tpu.vector_store %arg16[%c0_155, %c1024], %96 {strides = array<i32>} : memref<2x2048xf32, #tpu.memory_space<vmem>>, vector<2x128xf32>,
    %c0_156 = arith.constant 0 : index
    %c2_157 = arith.constant 2 : index
    %c1_158 = arith.constant 1 : index
    %c0_159 = arith.constant 0 : index
    %98 = vector.load %arg15[%c0_156, %c2_157, %c1_158, %c0_159] : memref<2x4x4x128xf32, #tpu.memory_space<vmem>>, vector<2x1x1x128xf32>
    %99 = vector.shape_cast %98 : vector<2x1x1x128xf32> to vector<2x128xf32>
    %c0_160 = arith.constant 0 : index
    %c1152 = arith.constant 1152 : index
    %100 = vector.load %arg16[%c0_160, %c1152] : memref<2x2048xf32, #tpu.memory_space<vmem>>, vector<2x128xf32>
    tpu.vector_store %arg16[%c0_160, %c1152], %99 {strides = array<i32>} : memref<2x2048xf32, #tpu.memory_space<vmem>>, vector<2x128xf32>,
    %c0_161 = arith.constant 0 : index
    %c2_162 = arith.constant 2 : index
    %c2_163 = arith.constant 2 : index
    %c0_164 = arith.constant 0 : index
    %101 = vector.load %arg15[%c0_161, %c2_162, %c2_163, %c0_164] : memref<2x4x4x128xf32, #tpu.memory_space<vmem>>, vector<2x1x1x128xf32>
    %102 = vector.shape_cast %101 : vector<2x1x1x128xf32> to vector<2x128xf32>
    %c0_165 = arith.constant 0 : index
    %c1280_166 = arith.constant 1280 : index
    %103 = vector.load %arg16[%c0_165, %c1280_166] : memref<2x2048xf32, #tpu.memory_space<vmem>>, vector<2x128xf32>
    tpu.vector_store %arg16[%c0_165, %c1280_166], %102 {strides = array<i32>} : memref<2x2048xf32, #tpu.memory_space<vmem>>, vector<2x128xf32>,
    %c0_167 = arith.constant 0 : index
    %c2_168 = arith.constant 2 : index
    %c3_169 = arith.constant 3 : index
    %c0_170 = arith.constant 0 : index
    %104 = vector.load %arg15[%c0_167, %c2_168, %c3_169, %c0_170] : memref<2x4x4x128xf32, #tpu.memory_space<vmem>>, vector<2x1x1x128xf32>
    %105 = vector.shape_cast %104 : vector<2x1x1x128xf32> to vector<2x128xf32>
    %c0_171 = arith.constant 0 : index
    %c1408 = arith.constant 1408 : index
    %106 = vector.load %arg16[%c0_171, %c1408] : memref<2x2048xf32, #tpu.memory_space<vmem>>, vector<2x128xf32>
    tpu.vector_store %arg16[%c0_171, %c1408], %105 {strides = array<i32>} : memref<2x2048xf32, #tpu.memory_space<vmem>>, vector<2x128xf32>,
    %c0_172 = arith.constant 0 : index
    %c3_173 = arith.constant 3 : index
    %c0_174 = arith.constant 0 : index
    %c0_175 = arith.constant 0 : index
    %107 = vector.load %arg15[%c0_172, %c3_173, %c0_174, %c0_175] : memref<2x4x4x128xf32, #tpu.memory_space<vmem>>, vector<2x1x1x128xf32>
    %108 = vector.shape_cast %107 : vector<2x1x1x128xf32> to vector<2x128xf32>
    %c0_176 = arith.constant 0 : index
    %c1536 = arith.constant 1536 : index
    %109 = vector.load %arg16[%c0_176, %c1536] : memref<2x2048xf32, #tpu.memory_space<vmem>>, vector<2x128xf32>
    tpu.vector_store %arg16[%c0_176, %c1536], %108 {strides = array<i32>} : memref<2x2048xf32, #tpu.memory_space<vmem>>, vector<2x128xf32>,
    %c0_177 = arith.constant 0 : index
    %c3_178 = arith.constant 3 : index
    %c1_179 = arith.constant 1 : index
    %c0_180 = arith.constant 0 : index
    %110 = vector.load %arg15[%c0_177, %c3_178, %c1_179, %c0_180] : memref<2x4x4x128xf32, #tpu.memory_space<vmem>>, vector<2x1x1x128xf32>
    %111 = vector.shape_cast %110 : vector<2x1x1x128xf32> to vector<2x128xf32>
    %c0_181 = arith.constant 0 : index
    %c1664 = arith.constant 1664 : index
    %112 = vector.load %arg16[%c0_181, %c1664] : memref<2x2048xf32, #tpu.memory_space<vmem>>, vector<2x128xf32>
    tpu.vector_store %arg16[%c0_181, %c1664], %111 {strides = array<i32>} : memref<2x2048xf32, #tpu.memory_space<vmem>>, vector<2x128xf32>,
    %c0_182 = arith.constant 0 : index
    %c3_183 = arith.constant 3 : index
    %c2_184 = arith.constant 2 : index
    %c0_185 = arith.constant 0 : index
    %113 = vector.load %arg15[%c0_182, %c3_183, %c2_184, %c0_185] : memref<2x4x4x128xf32, #tpu.memory_space<vmem>>, vector<2x1x1x128xf32>
    %114 = vector.shape_cast %113 : vector<2x1x1x128xf32> to vector<2x128xf32>
    %c0_186 = arith.constant 0 : index
    %c1792 = arith.constant 1792 : index
    %115 = vector.load %arg16[%c0_186, %c1792] : memref<2x2048xf32, #tpu.memory_space<vmem>>, vector<2x128xf32>
    tpu.vector_store %arg16[%c0_186, %c1792], %114 {strides = array<i32>} : memref<2x2048xf32, #tpu.memory_space<vmem>>, vector<2x128xf32>,
    %c0_187 = arith.constant 0 : index
    %c3_188 = arith.constant 3 : index
    %c3_189 = arith.constant 3 : index
    %c0_190 = arith.constant 0 : index
    %116 = vector.load %arg15[%c0_187, %c3_188, %c3_189, %c0_190] : memref<2x4x4x128xf32, #tpu.memory_space<vmem>>, vector<2x1x1x128xf32>
    %117 = vector.shape_cast %116 : vector<2x1x1x128xf32> to vector<2x128xf32>
    %c0_191 = arith.constant 0 : index
    %c1920_192 = arith.constant 1920 : index
    %118 = vector.load %arg16[%c0_191, %c1920_192] : memref<2x2048xf32, #tpu.memory_space<vmem>>, vector<2x128xf32>
    tpu.vector_store %arg16[%c0_191, %c1920_192], %117 {strides = array<i32>} : memref<2x2048xf32, #tpu.memory_space<vmem>>, vector<2x128xf32>,
    %c0_193 = arith.constant 0 : index
    %c0_194 = arith.constant 0 : index
    %119 = vector.load %arg16[%c0_193, %c0_194] : memref<2x2048xf32, #tpu.memory_space<vmem>>, vector<2x2048xf32>
    %c0_195 = arith.constant 0 : index
    %c0_196 = arith.constant 0 : index
    %120 = vector.load %arg6[%c0_195, %c0_196] : memref<2048x128xf32, #tpu.memory_space<vmem>>, vector<2048x128xf32>
    %cst_197 = arith.constant dense<0.000000e+00> : vector<2x128xf32>
    %121 = tpu.matmul %119, %120, %cst_197 {dimension_numbers = #tpu.dot_dimension_numbers<[1], [0], [0], [1], [0, 0, 1, 1], [], []>} : vector<2x2048xf32>, vector<2048x128xf32>, vector<2x128xf32> -> vector<2x128xf32>
    %c0_198 = arith.constant 0 : index
    %c0_199 = arith.constant 0 : index
    %122 = vector.load %arg7[%c0_198, %c0_199] : memref<1x128xf32, #tpu.memory_space<vmem>>, vector<1x128xf32>
    %123 = vector.broadcast %122 : vector<1x128xf32> to vector<2x128xf32>
    %124 = arith.addf %121, %123 : vector<2x128xf32>
    %cst_200 = arith.constant 0.000000e+00 : f32
    %125 = vector.broadcast %cst_200 : f32 to vector<2x128xf32>
    %126 = arith.maximumf %124, %125 : vector<2x128xf32>
    %c0_201 = arith.constant 0 : index
    %c0_202 = arith.constant 0 : index
    %127 = vector.load %arg8[%c0_201, %c0_202] : memref<128x128xf32, #tpu.memory_space<vmem>>, vector<128x128xf32>
    %cst_203 = arith.constant dense<0.000000e+00> : vector<2x128xf32>
    %128 = tpu.matmul %126, %127, %cst_203 {dimension_numbers = #tpu.dot_dimension_numbers<[1], [0], [0], [1], [0, 0, 1, 1], [], []>} : vector<2x128xf32>, vector<128x128xf32>, vector<2x128xf32> -> vector<2x128xf32>
    %c0_204 = arith.constant 0 : index
    %c0_205 = arith.constant 0 : index
    %129 = vector.load %arg9[%c0_204, %c0_205] : memref<1x128xf32, #tpu.memory_space<vmem>>, vector<1x128xf32>
    %130 = vector.broadcast %129 : vector<1x128xf32> to vector<2x128xf32>
    %131 = arith.addf %128, %130 : vector<2x128xf32>
    %c0_206 = arith.constant 0 : index
    %c0_207 = arith.constant 0 : index
    %132 = vector.load %arg10[%c0_206, %c0_207] : memref<2x128xf32, #tpu.memory_space<vmem>>, vector<2x128xf32>
    tpu.vector_store %arg10[%c0_206, %c0_207], %131 {strides = array<i32>} : memref<2x128xf32, #tpu.memory_space<vmem>>, vector<2x128xf32>,
    return
  }
  func.func @transform_0(%arg0: i32) -> (i32, i32) {
    %c0_i32 = arith.constant 0 : i32
    %c0_i32_0 = arith.constant 0 : i32
    %c0_i32_1 = arith.constant 0 : i32
    return %c0_i32, %c0_i32_0 : i32, i32
  }
  func.func @transform_1(%arg0: i32) -> (i32, i32) {
    %c0_i32 = arith.constant 0 : i32
    %c0_i32_0 = arith.constant 0 : i32
    %c0_i32_1 = arith.constant 0 : i32
    return %c0_i32, %c0_i32_0 : i32, i32
  }
  func.func @transform_2(%arg0: i32) -> (i32, i32) {
    %c0_i32 = arith.constant 0 : i32
    %c0_i32_0 = arith.constant 0 : i32
    %c0_i32_1 = arith.constant 0 : i32
    return %c0_i32, %c0_i32_0 : i32, i32
  }
  func.func @transform_3(%arg0: i32) -> (i32, i32) {
    %c0_i32 = arith.constant 0 : i32
    %c0_i32_0 = arith.constant 0 : i32
    %c0_i32_1 = arith.constant 0 : i32
    return %c0_i32, %c0_i32_0 : i32, i32
  }
  func.func @transform_4(%arg0: i32) -> (i32, i32) {
    %c0_i32 = arith.constant 0 : i32
    %c0_i32_0 = arith.constant 0 : i32
    %c0_i32_1 = arith.constant 0 : i32
    return %c0_i32, %c0_i32_0 : i32, i32
  }
  func.func @transform_5(%arg0: i32) -> (i32, i32) {
    %c0_i32 = arith.constant 0 : i32
    %c0_i32_0 = arith.constant 0 : i32
    %c0_i32_1 = arith.constant 0 : i32
    return %c0_i32, %c0_i32_0 : i32, i32
  }
  func.func @transform_6(%arg0: i32) -> (i32, i32) {
    %c0_i32 = arith.constant 0 : i32
    %c0_i32_0 = arith.constant 0 : i32
    %c0_i32_1 = arith.constant 0 : i32
    return %c0_i32, %c0_i32_0 : i32, i32
  }
  func.func @transform_7(%arg0: i32) -> (i32, i32) {
    %c0_i32 = arith.constant 0 : i32
    %c0_i32_0 = arith.constant 0 : i32
    %c0_i32_1 = arith.constant 0 : i32
    return %c0_i32, %c0_i32_0 : i32, i32
  }
  func.func @transform_8(%arg0: i32) -> (i32, i32) {
    %c0_i32 = arith.constant 0 : i32
    %c0_i32_0 = arith.constant 0 : i32
    %c0_i32_1 = arith.constant 0 : i32
    return %c0_i32, %c0_i32_0 : i32, i32
  }
  func.func @transform_9(%arg0: i32) -> (i32, i32) {
    %c0_i32 = arith.constant 0 : i32
    %c0_i32_0 = arith.constant 0 : i32
    %c0_i32_1 = arith.constant 0 : i32
    return %c0_i32, %c0_i32_0 : i32, i32
  }
}

</mosaic_0001>

<bundles_post_ra>
// kernel: cnn_mnist_forward.1
= control target key start
LH: loop header
LB: loop body
LE: loop exit
PB: predicated region body
PF: predicated region fallthrough
CT: control target
= control target key end

     0   :  { %vm188_vm0 = vcmask 261120   ;;  %s13882_s0 = inlined_call_operand.vmem [shape: f32[1152,32], index: 0, kind: input, shape index: {}]   ;;  %s13883_s1 = inlined_call_operand.vmem [shape: f32[32,128], index: 1, kind: input, shape index: {}]   ;;  %s13884_s2 = inlined_call_operand.vmem [shape: f32[1,128], index: 2, kind: input, shape index: {}]   ;;  %s13885_s3 = inlined_call_operand.vmem [shape: f32[3200,128], index: 3, kind: input, shape index: {}]   ;;  %s13886_s4 = inlined_call_operand.vmem [shape: f32[1,128], index: 4, kind: input, shape index: {}]   ;;  %s13887_s5 = inlined_call_operand.vmem [shape: f32[2048,128], index: 5, kind: input, shape index: {}]   ;;  %s13888_s6 = inlined_call_operand.vmem [shape: f32[1,128], index: 6, kind: input, shape index: {}]   ;;  %s13889_s7 = inlined_call_operand.vmem [shape: f32[128,128], index: 7, kind: input, shape index: {}]   ;;  %s13890_s8 = inlined_call_operand.vmem [shape: f32[1,128], index: 8, kind: input, shape index: {}]   ;;  %s13891_s9 = inlined_call_operand.hbm [shape: f32[2,128], index: 9, kind: output, shape index: {}]  }
   0x1   :  { %v177_v0 = vld [vmem:[%s13883_s1] sm:$0xff]  ;;  %v178_v1 = vld [vmem:[%s13883_s1 + $0x8] sm:$0xff]  ;;  %v179_v2 = vld [vmem:[%s13883_s1 + $0x10] sm:$0xff] }
   0x2   :  { %v8835_v3 = vpack.c.bf16 %v178_v1, %v177_v0  ;;  %v180_v4 = vld [vmem:[%s13883_s1 + $0x18] sm:$0xff]  ;;  %v33_v5 = vld [vmem:[%s13882_s0] sm:$0xff]  ;;  %v34_v7 = vld [vmem:[%s13882_s0 + $0x8] sm:$0xff] }
   0x3   :  { %v8839_v6 = vpack.c.bf16 %v180_v4, %v179_v2  ;;  %8304 = vmatprep.mubr.msk.f32.mxu0 %vm188_vm0, %v33_v5  ;;  %v35_v8 = vld [vmem:[%s13882_s0 + $0x10] sm:$0xff]  ;;  %v36_v9 = vld [vmem:[%s13882_s0 + $0x18] sm:$0xff]  ;;  %v37_v10 = vld [vmem:[%s13882_s0 + $0x20] sm:$0xff] }
   0x4   :  { %8836 = vmatprep.subr.bf16.mxu0 %v8835_v3  ;;  %v38_v11 = vld [vmem:[%s13882_s0 + $0x28] sm:$0xff]  ;;  %v39_v12 = vld [vmem:[%s13882_s0 + $0x30] sm:$0xff]  ;;  %v40_v13 = vld [vmem:[%s13882_s0 + $0x38] sm:$0xff] }
   0x5   :  { %8838 = vmatpush3.bf16.msra.mxu0 %v8835_v3  ;;  %v41_v14 = vld [vmem:[%s13882_s0 + $0x40] sm:$0xff]  ;;  %v42_v15 = vld [vmem:[%s13882_s0 + $0x48] sm:$0xff]  ;;  %v43_v16 = vld [vmem:[%s13882_s0 + $0x50] sm:$0xff] }
   0x6   :  { %8840 = vmatprep.subr.bf16.mxu0 %v8839_v6 }
   0x9   :  { %8842 = vmatpush3.bf16.msra.mxu0 %v8839_v6 }
   0xc   :  { %8305 = vmatmul.mubr.msk.f32.vlgmr.msra.gmra.mrb[0].mxu0 %vm188_vm0, %v34_v7 }
   0xd   :  { %8307 = vmatprep.mubr.msk.f32.mxu0 %vm188_vm0, %v35_v8 }
  0x10   :  { %8308 = vmatmul.mubr.msk.f32.gmra.mrb[2].mxu0 %vm188_vm0, %v36_v9 }
  0x11   :  { %8310 = vmatprep.mubr.msk.f32.mxu0 %vm188_vm0, %v37_v10 }
  0x14   :  { %8311 = vmatmul.mubr.msk.f32.gmra.mrb[4].mxu0 %vm188_vm0, %v38_v11 }
  0x15   :  { %8313 = vmatprep.mubr.msk.f32.mxu0 %vm188_vm0, %v39_v12 }
  0x18   :  { %8314 = vmatmul.mubr.msk.f32.gmra.mrb[6].mxu0 %vm188_vm0, %v40_v13 }
  0x19   :  { %8316 = vmatprep.mubr.msk.f32.mxu0 %vm188_vm0, %v41_v14 }
  0x1a   :  { %14 = vsyncpa [#allocation9], 0  ;;  %v44_v17 = vld [vmem:[%s13882_s0 + $0x58] sm:$0xff]  ;;  %v45_v18 = vld [vmem:[%s13882_s0 + $0x60] sm:$0xff]  ;;  %vm5269_vm1 = vcmask 1041409   ;;  %vm5271_vm2 = vcmask 1043459  }
  0x1b   :  { %v46_v19 = vld [vmem:[%s13882_s0 + $0x68] sm:$0xff]  ;;  %v47_v20 = vld [vmem:[%s13882_s0 + $0x70] sm:$0xff]  ;;  %v48_v21 = vld [vmem:[%s13882_s0 + $0x78] sm:$0xff]  ;;  %vm5273_vm3 = vcmask 1045509   ;;  %vm5275_vm4 = vcmask 1047559   ;;  %vm9910_vm5 = vmmov 0  }
  0x1c   :  { %8317 = vmatmul.mubr.msk.f32.gmra.mrb[8].mxu0 %vm188_vm0, %v42_v15  ;;  %v49_v22 = vld [vmem:[%s13882_s0 + $0x80] sm:$0xff]  ;;  %v50_v23 = vld [vmem:[%s13882_s0 + $0x88] sm:$0xff]  ;;  %v51_v24 = vld [vmem:[%s13882_s0 + $0x90] sm:$0xff]  ;;  %s9912_s25 = smov [#allocation8]  }
  0x1d   :  { %8319 = vmatprep.mubr.msk.f32.mxu0 %vm188_vm0, %v43_v16  ;;  %v52_v25 = vld [vmem:[%s13882_s0 + $0x98] sm:$0xff]  ;;  %v53_v26 = vld [vmem:[%s13882_s0 + $0xa0] sm:$0xff]  ;;  %v54_v27 = vld [vmem:[%s13882_s0 + $0xa8] sm:$0xff]  ;;  %s6703_s26 = sshll.u32 %s9912_s25, 4  ;;  %s6704_s26 = int_to_ptr.vmem [resolvable:$true] %s6703_s26 }
  0x1e   :  { %v55_v28 = vld [vmem:[%s13882_s0 + $0xb0] sm:$0xff]  ;;  %v56_v29 = vld [vmem:[%s13882_s0 + $0xb8] sm:$0xff]  ;;  %v57_v30 = vld [vmem:[%s13882_s0 + $0xc0] sm:$0xff]  ;;  %s9884_s27 = scalar_lea.vmem %s6704_s26, 32  ;;  %p9889_p1 = scmp.lt.s32.totalorder %s6704_s26, %s6704_s26 }
  0x1f   :  { %v58_v31 = vld [vmem:[%s13882_s0 + $0xc8] sm:$0xff]  ;;  %v59_v32 = vld [vmem:[%s13882_s0 + $0xd0] sm:$0xff]  ;;  %v60_v33 = vld [vmem:[%s13882_s0 + $0xd8] sm:$0xff]  ;;  %p9885_p0 = scmp.ne.s32.totalorder %s6704_s26, %s9884_s27  ;;  %p9890_p2 = scmp.lt.s32.totalorder %s9884_s27, %s9884_s27 }
  0x20   :  { %8320 = vmatmul.mubr.msk.f32.gmra.mrb[10].mxu0 %vm188_vm0, %v44_v17  ;;  %v61_v34 = vld [vmem:[%s13882_s0 + $0xe0] sm:$0xff]  ;;  %v62_v35 = vld [vmem:[%s13882_s0 + $0xe8] sm:$0xff]  ;;  %v63_v36 = vld [vmem:[%s13882_s0 + $0xf0] sm:$0xff] }
  0x21   :  { %8322 = vmatprep.mubr.msk.f32.mxu0 %vm188_vm0, %v45_v18  ;;  %v64_v37 = vld [vmem:[%s13882_s0 + $0xf8] sm:$0xff]  ;;  %v65_v38 = vld [vmem:[%s13882_s0 + $0x100] sm:$0xff]  ;;  %v66_v39 = vld [vmem:[%s13882_s0 + $0x108] sm:$0xff]  ;;  %p9891_p3 = por %p9890_p2, %p9889_p1 }
  0x22   :  { %v67_v40 = vld [vmem:[%s13882_s0 + $0x110] sm:$0xff]  ;;  %v68_v41 = vld [vmem:[%s13882_s0 + $0x118] sm:$0xff]  ;;  %v69_v42 = vld [vmem:[%s13882_s0 + $0x120] sm:$0xff] }
  0x23   :  { %v70_v43 = vld [vmem:[%s13882_s0 + $0x128] sm:$0xff]  ;;  %v71_v44 = vld [vmem:[%s13882_s0 + $0x130] sm:$0xff]  ;;  %v72_v45 = vld [vmem:[%s13882_s0 + $0x138] sm:$0xff]  ;;  %p9892_p4 = pnand %p9891_p3, %p9885_p0 }
  0x24   :  { %8323 = vmatmul.mubr.msk.f32.gmra.mrb[12].mxu0 %vm188_vm0, %v46_v19  ;;  %v73_v46 = vld [vmem:[%s13882_s0 + $0x140] sm:$0xff]  ;;  %v74_v47 = vld [vmem:[%s13882_s0 + $0x148] sm:$0xff]  ;;  %v75_v48 = vld [vmem:[%s13882_s0 + $0x150] sm:$0xff] }
  0x25   :  { %8325 = vmatprep.mubr.msk.f32.mxu0 %vm188_vm0, %v47_v20  ;;  %v76_v49 = vld [vmem:[%s13882_s0 + $0x158] sm:$0xff]  ;;  %v77_v50 = vld [vmem:[%s13882_s0 + $0x160] sm:$0xff]  ;;  %v78_v51 = vld [vmem:[%s13882_s0 + $0x168] sm:$0xff] }
  0x26   :  { %v79_v52 = vld [vmem:[%s13882_s0 + $0x170] sm:$0xff]  ;;  %v80_v53 = vld [vmem:[%s13882_s0 + $0x178] sm:$0xff]  ;;  %v81_v54 = vld [vmem:[%s13882_s0 + $0x180] sm:$0xff] }
  0x27   :  { %v82_v55 = vld [vmem:[%s13882_s0 + $0x188] sm:$0xff]  ;;  %v83_v56 = vld [vmem:[%s13882_s0 + $0x190] sm:$0xff]  ;;  %v2382_v57 = vld [vmem:[%s13885_s3 + $0x300] sm:$0xff] }
  0x28   :  { %8326 = vmatmul.mubr.msk.f32.gmra.mrb[14].mxu0 %vm188_vm0, %v48_v21  ;;  %v2383_v58 = vld [vmem:[%s13885_s3 + $0x308] sm:$0xff]  ;;  %v2366_v60 = vld [vmem:[%s13885_s3 + $0x280] sm:$0xff]  ;;  %v84_v62 = vld [vmem:[%s13882_s0 + $0x198] sm:$0xff] }
  0x29   :  { %8328 = vmatprep.mubr.msk.f32.mxu0 %vm188_vm0, %v49_v22  ;;  %v8843_v59 = vpack.c.bf16 %v2383_v58, %v2382_v57  ;;  %v2367_v61 = vld [vmem:[%s13885_s3 + $0x288] sm:$0xff]  ;;  %v85_v0 = vld [vmem:[%s13882_s0 + $0x1a0] sm:$0xff]  ;;  %v2384_v1 = vld [vmem:[%s13885_s3 + $0x310] sm:$0xff] }
  0x2a   :  { %v8845_v63 = vpack.c.bf16 %v2367_v61, %v2366_v60  ;;  %v2385_v2 = vld [vmem:[%s13885_s3 + $0x318] sm:$0xff]  ;;  %v2368_v4 = vld [vmem:[%s13885_s3 + $0x290] sm:$0xff]  ;;  %v86_v6 = vld [vmem:[%s13882_s0 + $0x1a8] sm:$0xff] }
  0x2b   :  { %8844 = vmatprep.subr.bf16.mxu1 %v8843_v59  ;;  %v8847_v3 = vpack.c.bf16 %v2385_v2, %v2384_v1  ;;  %v2369_v5 = vld [vmem:[%s13885_s3 + $0x298] sm:$0xff]  ;;  %v87_v8 = vld [vmem:[%s13882_s0 + $0x1b0] sm:$0xff]  ;;  %v2386_v9 = vld [vmem:[%s13885_s3 + $0x320] sm:$0xff] }
  0x2c   :  { %8329 = vmatmul.mubr.msk.f32.gmra.mrb[16].mxu0 %vm188_vm0, %v50_v23  ;;  %8846 = vmatpush3.bf16.msra.mxu1 %v8845_v63  ;;  %v8849_v7 = vpack.c.bf16 %v2369_v5, %v2368_v4  ;;  %v2387_v10 = vld [vmem:[%s13885_s3 + $0x328] sm:$0xff]  ;;  %v2370_v12 = vld [vmem:[%s13885_s3 + $0x2a0] sm:$0xff]  ;;  %v88_v14 = vld [vmem:[%s13882_s0 + $0x1b8] sm:$0xff] }
  0x2d   :  { %8331 = vmatprep.mubr.msk.f32.mxu0 %vm188_vm0, %v51_v24  ;;  %8848 = vmatprep.subr.bf16.mxu1 %v8847_v3  ;;  %v8851_v11 = vpack.c.bf16 %v2387_v10, %v2386_v9  ;;  %v2371_v13 = vld [vmem:[%s13885_s3 + $0x2a8] sm:$0xff]  ;;  %v89_v16 = vld [vmem:[%s13882_s0 + $0x1c0] sm:$0xff]  ;;  %v2388_v17 = vld [vmem:[%s13885_s3 + $0x330] sm:$0xff] }
  0x2e   :  { %v8853_v15 = vpack.c.bf16 %v2371_v13, %v2370_v12  ;;  %v2389_v18 = vld [vmem:[%s13885_s3 + $0x338] sm:$0xff]  ;;  %v2372_v20 = vld [vmem:[%s13885_s3 + $0x2b0] sm:$0xff]  ;;  %v90_v22 = vld [vmem:[%s13882_s0 + $0x1c8] sm:$0xff] }
  0x2f   :  { %v8855_v19 = vpack.c.bf16 %v2389_v18, %v2388_v17  ;;  %v2373_v21 = vld [vmem:[%s13885_s3 + $0x2b8] sm:$0xff]  ;;  %v91_v24 = vld [vmem:[%s13882_s0 + $0x1d0] sm:$0xff]  ;;  %v3414_v57 = vld [vmem:[%s13885_s3 + $0x588] sm:$0xff] }
  0x30   :  { %8332 = vmatmul.mubr.msk.f32.gmra.mrb[18].mxu0 %vm188_vm0, %v52_v25  ;;  %8850 = vmatpush3.bf16.msra.mxu1 %v8849_v7  ;;  %v8857_v23 = vpack.c.bf16 %v2373_v21, %v2372_v20  ;;  %v2390_v25 = vld [vmem:[%s13885_s3 + $0x340] sm:$0xff]  ;;  %v99_v58 = vld [vmem:[%s13882_s0 + $0x210] sm:$0xff]  ;;  %v3398_v61 = vld [vmem:[%s13885_s3 + $0x508] sm:$0xff] }
  0x31   :  { %8334 = vmatprep.mubr.msk.f32.mxu0 %vm188_vm0, %v53_v26  ;;  %8852 = vmatprep.subr.bf16.mxu1 %v8851_v11  ;;  %v2391_v26 = vld [vmem:[%s13885_s3 + $0x348] sm:$0xff]  ;;  %v3397_v60 = vld [vmem:[%s13885_s3 + $0x500] sm:$0xff]  ;;  %v3415_v1 = vld [vmem:[%s13885_s3 + $0x590] sm:$0xff] }
  0x32   :  { %v9037_v63 = vpack.c.bf16 %v3398_v61, %v3397_v60  ;;  %v3416_v2 = vld [vmem:[%s13885_s3 + $0x598] sm:$0xff]  ;;  %v3399_v4 = vld [vmem:[%s13885_s3 + $0x510] sm:$0xff]  ;;  %v3417_v9 = vld [vmem:[%s13885_s3 + $0x5a0] sm:$0xff] }
  0x33   :  { %v9039_v3 = vpack.c.bf16 %v3416_v2, %v3415_v1  ;;  %v3400_v5 = vld [vmem:[%s13885_s3 + $0x518] sm:$0xff]  ;;  %v3418_v10 = vld [vmem:[%s13885_s3 + $0x5a8] sm:$0xff]  ;;  %v3401_v12 = vld [vmem:[%s13885_s3 + $0x520] sm:$0xff] }
  0x34   :  { %8335 = vmatmul.mubr.msk.f32.gmra.mrb[20].mxu0 %vm188_vm0, %v54_v27  ;;  %8854 = vmatpush3.bf16.msra.mxu1 %v8853_v15  ;;  %v8859_v27 = vpack.c.bf16 %v2391_v26, %v2390_v25  ;;  %v9041_v7 = vpack.c.bf16 %v3400_v5, %v3399_v4  ;;  %v9043_v11 = vpack.c.bf16 %v3418_v10, %v3417_v9  ;;  %v3402_v13 = vld [vmem:[%s13885_s3 + $0x528] sm:$0xff]  ;;  %v3419_v17 = vld [vmem:[%s13885_s3 + $0x5b0] sm:$0xff]  ;;  %v3420_v18 = vld [vmem:[%s13885_s3 + $0x5b8] sm:$0xff] }
  0x35   :  { %8337 = vmatprep.mubr.msk.f32.mxu0 %vm188_vm0, %v55_v28  ;;  %8856 = vmatprep.subr.bf16.mxu1 %v8855_v19  ;;  %v2374_v28 = vld [vmem:[%s13885_s3 + $0x2c0] sm:$0xff]  ;;  %v9045_v15 = vpack.c.bf16 %v3402_v13, %v3401_v12  ;;  %v9047_v19 = vpack.c.bf16 %v3420_v18, %v3419_v17  ;;  %v3403_v20 = vld [vmem:[%s13885_s3 + $0x530] sm:$0xff]  ;;  %v3404_v21 = vld [vmem:[%s13885_s3 + $0x538] sm:$0xff] }
  0x36   :  { %v3421_v25 = vld [vmem:[%s13885_s3 + $0x5c0] sm:$0xff]  ;;  %v3422_v26 = vld [vmem:[%s13885_s3 + $0x5c8] sm:$0xff]  ;;  %v119_v60 = vld [vmem:[%s13882_s0 + $0x2b0] sm:$0xff] }
  0x37   :  { %v120_v61 = vld [vmem:[%s13882_s0 + $0x2b8] sm:$0xff]  ;;  %v125_v2 = vld [vmem:[%s13882_s0 + $0x2e0] sm:$0xff]  ;;  %v127_v4 = vld [vmem:[%s13882_s0 + $0x2f0] sm:$0xff] }
  0x38   :  { %8338 = vmatmul.mubr.msk.f32.gmra.mrb[22].mxu0 %vm188_vm0, %v56_v29  ;;  %8858 = vmatpush3.bf16.msra.mxu1 %v8857_v23  ;;  %v2375_v29 = vld [vmem:[%s13885_s3 + $0x2c8] sm:$0xff]  ;;  %v9049_v23 = vpack.c.bf16 %v3404_v21, %v3403_v20  ;;  %v124_v1 = vld [vmem:[%s13882_s0 + $0x2d8] sm:$0xff]  ;;  %v133_v10 = vld [vmem:[%s13882_s0 + $0x320] sm:$0xff] }
  0x39   :  { %8340 = vmatprep.mubr.msk.f32.mxu0 %vm188_vm0, %v57_v30  ;;  %v92_v30 = vld [vmem:[%s13882_s0 + $0x1d8] sm:$0xff]  ;;  %8860 = vmatprep.subr.bf16.mxu1 %v8859_v27  ;;  %v9051_v27 = vpack.c.bf16 %v3422_v26, %v3421_v25  ;;  %v135_v12 = vld [vmem:[%s13882_s0 + $0x330] sm:$0xff]  ;;  %v141_v18 = vld [vmem:[%s13882_s0 + $0x360] sm:$0xff] }
  0x3a   :  { %v128_v5 = vld [vmem:[%s13882_s0 + $0x2f8] sm:$0xff]  ;;  %v10605_v21 = vld [vmem:[%s13884_s2] ss:$0 sm:$0xff] }
  0x3b   :  { %v132_v9 = vld [vmem:[%s13882_s0 + $0x318] sm:$0xff] }
  0x3c   :  { %8341 = vmatmul.mubr.msk.f32.gmra.mrb[24].mxu0 %vm188_vm0, %v58_v31  ;;  %v8861_v31 = vpack.c.bf16 %v2375_v29, %v2374_v28  ;;  %v3405_v28 = vld [vmem:[%s13885_s3 + $0x540] sm:$0xff]  ;;  %v3406_v29 = vld [vmem:[%s13885_s3 + $0x548] sm:$0xff]  ;;  %v136_v13 = vld [vmem:[%s13882_s0 + $0x338] sm:$0xff] }
  0x3d   :  { %8343 = vmatprep.mubr.msk.f32.mxu0 %vm188_vm0, %v59_v32  ;;  %v93_v32 = vld [vmem:[%s13882_s0 + $0x1e0] sm:$0xff]  ;;  %v140_v17 = vld [vmem:[%s13882_s0 + $0x358] sm:$0xff] }
  0x3e   :  { %8862 = vmatpush3.bf16.msra.mxu1 %v8861_v31  ;;  %v9053_v31 = vpack.c.bf16 %v3406_v29, %v3405_v28  ;;  %v144_v28 = vld [vmem:[%s13882_s0 + $0x378] sm:$0xff] }
  0x40   :  { %8344 = vmatmul.mubr.msk.f32.gmra.mrb[26].mxu0 %vm188_vm0, %v60_v33  ;;  %v2392_v33 = vld [vmem:[%s13885_s3 + $0x350] sm:$0xff] }
  0x41   :  { %8346 = vmatprep.mubr.msk.f32.mxu0 %vm188_vm0, %v61_v34  ;;  %v2393_v34 = vld [vmem:[%s13885_s3 + $0x358] sm:$0xff] }
  0x44   :  { %8347 = vmatmul.mubr.msk.f32.gmra.mrb[28].mxu0 %vm188_vm0, %v62_v35  ;;  %v8863_v35 = vpack.c.bf16 %v2393_v34, %v2392_v33  ;;  %v3423_v33 = vld [vmem:[%s13885_s3 + $0x5d0] sm:$0xff]  ;;  %v3424_v34 = vld [vmem:[%s13885_s3 + $0x5d8] sm:$0xff] }
  0x45   :  { %8349 = vmatprep.mubr.msk.f32.mxu0 %vm188_vm0, %v63_v36  ;;  %v2376_v36 = vld [vmem:[%s13885_s3 + $0x2d0] sm:$0xff] }
  0x46   :  { %8864 = vmatprep.subr.bf16.mxu1 %v8863_v35  ;;  %v9055_v35 = vpack.c.bf16 %v3424_v34, %v3423_v33 }
  0x48   :  { %8350 = vmatmul.mubr.msk.f32.gmra.mrb[30].mxu0 %vm188_vm0, %v64_v37  ;;  %v2377_v37 = vld [vmem:[%s13885_s3 + $0x2d8] sm:$0xff] }
  0x49   :  { %8352 = vmatprep.mubr.msk.f32.mxu0 %vm188_vm0, %v65_v38  ;;  %v94_v38 = vld [vmem:[%s13882_s0 + $0x1e8] sm:$0xff] }
  0x4c   :  { %8353 = vmatmul.mubr.msk.f32.gmra.mrb[32].mxu0 %vm188_vm0, %v66_v39  ;;  %v8865_v39 = vpack.c.bf16 %v2377_v37, %v2376_v36  ;;  %v3407_v36 = vld [vmem:[%s13885_s3 + $0x550] sm:$0xff]  ;;  %v3408_v37 = vld [vmem:[%s13885_s3 + $0x558] sm:$0xff] }
  0x4d   :  { %8355 = vmatprep.mubr.msk.f32.mxu0 %vm188_vm0, %v67_v40  ;;  %v95_v40 = vld [vmem:[%s13882_s0 + $0x1f0] sm:$0xff] }
  0x4e   :  { %8866 = vmatpush3.bf16.msra.mxu1 %v8865_v39  ;;  %v9057_v39 = vpack.c.bf16 %v3408_v37, %v3407_v36  ;;  %v146_v37 = vld [vmem:[%s13882_s0 + $0x388] sm:$0xff] }
  0x50   :  { %8356 = vmatmul.mubr.msk.f32.gmra.mrb[34].mxu0 %vm188_vm0, %v68_v41  ;;  %v2394_v41 = vld [vmem:[%s13885_s3 + $0x360] sm:$0xff] }
  0x51   :  { %8358 = vmatprep.mubr.msk.f32.mxu0 %vm188_vm0, %v69_v42  ;;  %v2395_v42 = vld [vmem:[%s13885_s3 + $0x368] sm:$0xff] }
  0x54   :  { %8359 = vmatmul.mubr.msk.f32.gmra.mrb[36].mxu0 %vm188_vm0, %v70_v43  ;;  %v8867_v43 = vpack.c.bf16 %v2395_v42, %v2394_v41  ;;  %v3425_v41 = vld [vmem:[%s13885_s3 + $0x5e0] sm:$0xff]  ;;  %v3426_v42 = vld [vmem:[%s13885_s3 + $0x5e8] sm:$0xff] }
  0x55   :  { %8361 = vmatprep.mubr.msk.f32.mxu0 %vm188_vm0, %v71_v44  ;;  %v2378_v44 = vld [vmem:[%s13885_s3 + $0x2e0] sm:$0xff] }
  0x56   :  { %8868 = vmatprep.subr.bf16.mxu1 %v8867_v43  ;;  %v9059_v43 = vpack.c.bf16 %v3426_v42, %v3425_v41 }
  0x58   :  { %8362 = vmatmul.mubr.msk.f32.gmra.mrb[38].mxu0 %vm188_vm0, %v72_v45  ;;  %v2379_v45 = vld [vmem:[%s13885_s3 + $0x2e8] sm:$0xff] }
  0x59   :  { %8364 = vmatprep.mubr.msk.f32.mxu0 %vm188_vm0, %v73_v46  ;;  %v96_v46 = vld [vmem:[%s13882_s0 + $0x1f8] sm:$0xff] }
  0x5c   :  { %8365 = vmatmul.mubr.msk.f32.gmra.mrb[40].mxu0 %vm188_vm0, %v74_v47  ;;  %v8869_v47 = vpack.c.bf16 %v2379_v45, %v2378_v44  ;;  %v3409_v44 = vld [vmem:[%s13885_s3 + $0x560] sm:$0xff]  ;;  %v3410_v45 = vld [vmem:[%s13885_s3 + $0x568] sm:$0xff] }
  0x5d   :  { %8367 = vmatprep.mubr.msk.f32.mxu0 %vm188_vm0, %v75_v48  ;;  %v97_v48 = vld [vmem:[%s13882_s0 + $0x200] sm:$0xff] }
  0x5e   :  { %8870 = vmatpush3.bf16.msra.mxu1 %v8869_v47  ;;  %v9061_v47 = vpack.c.bf16 %v3410_v45, %v3409_v44  ;;  %v149_v44 = vld [vmem:[%s13882_s0 + $0x3a0] sm:$0xff] }
  0x60   :  { %8368 = vmatmul.mubr.msk.f32.gmra.mrb[42].mxu0 %vm188_vm0, %v76_v49  ;;  %v2396_v49 = vld [vmem:[%s13885_s3 + $0x370] sm:$0xff] }
  0x61   :  { %8370 = vmatprep.mubr.msk.f32.mxu0 %vm188_vm0, %v77_v50  ;;  %v2397_v50 = vld [vmem:[%s13885_s3 + $0x378] sm:$0xff] }
  0x64   :  { %8371 = vmatmul.mubr.msk.f32.gmra.mrb[44].mxu0 %vm188_vm0, %v78_v51  ;;  %v8871_v51 = vpack.c.bf16 %v2397_v50, %v2396_v49  ;;  %v3427_v49 = vld [vmem:[%s13885_s3 + $0x5f0] sm:$0xff]  ;;  %v3428_v50 = vld [vmem:[%s13885_s3 + $0x5f8] sm:$0xff] }
  0x65   :  { %8373 = vmatprep.mubr.msk.f32.mxu0 %vm188_vm0, %v79_v52  ;;  %v2380_v52 = vld [vmem:[%s13885_s3 + $0x2f0] sm:$0xff] }
  0x66   :  { %8872 = vmatprep.subr.bf16.mxu1 %v8871_v51  ;;  %v9063_v51 = vpack.c.bf16 %v3428_v50, %v3427_v49  ;;  %v150_v49 = vld [vmem:[%s13882_s0 + $0x3a8] sm:$0xff] }
  0x68   :  { %8374 = vmatmul.mubr.msk.f32.gmra.mrb[46].mxu0 %vm188_vm0, %v80_v53  ;;  %v2381_v53 = vld [vmem:[%s13885_s3 + $0x2f8] sm:$0xff] }
  0x69   :  { %8376 = vmatprep.mubr.msk.f32.mxu0 %vm188_vm0, %v81_v54  ;;  %v98_v54 = vld [vmem:[%s13882_s0 + $0x208] sm:$0xff] }
  0x6c   :  { %8377 = vmatmul.mubr.msk.f32.gmra.mrb[48].mxu0 %vm188_vm0, %v82_v55  ;;  %v8873_v55 = vpack.c.bf16 %v2381_v53, %v2380_v52  ;;  %v3411_v52 = vld [vmem:[%s13885_s3 + $0x570] sm:$0xff]  ;;  %v3412_v53 = vld [vmem:[%s13885_s3 + $0x578] sm:$0xff] }
  0x6d   :  { %8379 = vmatprep.mubr.msk.f32.mxu0 %vm188_vm0, %v83_v56  ;;  %v3413_v56 = vld [vmem:[%s13885_s3 + $0x580] sm:$0xff] }
  0x6e   :  { %v9035_v59 = vpack.c.bf16 %v3414_v57, %v3413_v56  ;;  %8874 = vmatpush3.bf16.msra.mxu1 %v8873_v55  ;;  %v9065_v55 = vpack.c.bf16 %v3412_v53, %v3411_v52  ;;  %v115_v56 = vld [vmem:[%s13882_s0 + $0x290] sm:$0xff]  ;;  %v116_v57 = vld [vmem:[%s13882_s0 + $0x298] sm:$0xff] }
  0x70   :  { %8380 = vmatmul.mubr.msk.f32.gmra.mrb[50].mxu0 %vm188_vm0, %v84_v62  ;;  %9036 = vmatprep.subr.bf16.mxu0 %v9035_v59  ;;  %v100_v62 = vld [vmem:[%s13882_s0 + $0x218] sm:$0xff]  ;;  %v118_v59 = vld [vmem:[%s13882_s0 + $0x2a8] sm:$0xff] }
  0x71   :  { %8382 = vmatprep.mubr.msk.f32.mxu0 %vm188_vm0, %v85_v0  ;;  %v101_v0 = vld [vmem:[%s13882_s0 + $0x220] sm:$0xff]  ;;  %9038 = vmatpush3.bf16.msra.mxu0 %v9037_v63  ;;  %v122_v63 = vld [vmem:[%s13882_s0 + $0x2c8] sm:$0xff] }
  0x72   :  { %9040 = vmatprep.subr.bf16.mxu0 %v9039_v3  ;;  %v126_v3 = vld [vmem:[%s13882_s0 + $0x2e8] sm:$0xff] }
  0x74   :  { %8383 = vmatmul.mubr.msk.f32.gmra.mrb[52].mxu0 %vm188_vm0, %v86_v6  ;;  %v102_v6 = vld [vmem:[%s13882_s0 + $0x228] sm:$0xff] }
  0x75   :  { %8385 = vmatprep.mubr.msk.f32.mxu0 %vm188_vm0, %v87_v8  ;;  %v103_v8 = vld [vmem:[%s13882_s0 + $0x230] sm:$0xff]  ;;  %9042 = vmatpush3.bf16.msra.mxu0 %v9041_v7  ;;  %v130_v7 = vld [vmem:[%s13882_s0 + $0x308] sm:$0xff] }
  0x76   :  { %9044 = vmatprep.subr.bf16.mxu0 %v9043_v11  ;;  %v134_v11 = vld [vmem:[%s13882_s0 + $0x328] sm:$0xff] }
  0x78   :  { %8386 = vmatmul.mubr.msk.f32.gmra.mrb[54].mxu0 %vm188_vm0, %v88_v14  ;;  %v104_v14 = vld [vmem:[%s13882_s0 + $0x238] sm:$0xff] }
  0x79   :  { %8388 = vmatprep.mubr.msk.f32.mxu0 %vm188_vm0, %v89_v16  ;;  %v105_v16 = vld [vmem:[%s13882_s0 + $0x240] sm:$0xff]  ;;  %9046 = vmatpush3.bf16.msra.mxu0 %v9045_v15  ;;  %v138_v15 = vld [vmem:[%s13882_s0 + $0x348] sm:$0xff] }
  0x7a   :  { %9048 = vmatprep.subr.bf16.mxu0 %v9047_v19 }
  0x7c   :  { %8389 = vmatmul.mubr.msk.f32.gmra.mrb[56].mxu0 %vm188_vm0, %v90_v22  ;;  %v106_v22 = vld [vmem:[%s13882_s0 + $0x248] sm:$0xff] }
  0x7d   :  { %8391 = vmatprep.mubr.msk.f32.mxu0 %vm188_vm0, %v91_v24  ;;  %v107_v24 = vld [vmem:[%s13882_s0 + $0x250] sm:$0xff]  ;;  %9050 = vmatpush3.bf16.msra.mxu0 %v9049_v23 }
  0x7e   :  { %9052 = vmatprep.subr.bf16.mxu0 %v9051_v27  ;;  %v143_v23 = vld [vmem:[%s13882_s0 + $0x370] sm:$0xff] }
  0x80   :  { %8392 = vmatmul.mubr.msk.f32.gmra.mrb[58].mxu0 %vm188_vm0, %v92_v30  ;;  %v108_v30 = vld [vmem:[%s13882_s0 + $0x258] sm:$0xff] }
  0x81   :  { %8394 = vmatprep.mubr.msk.f32.mxu0 %vm188_vm0, %v93_v32  ;;  %v109_v32 = vld [vmem:[%s13882_s0 + $0x260] sm:$0xff]  ;;  %9054 = vmatpush3.bf16.msra.mxu0 %v9053_v31 }
  0x82   :  { %9056 = vmatprep.subr.bf16.mxu0 %v9055_v35 }
  0x84   :  { %8395 = vmatmul.mubr.msk.f32.gmra.mrb[60].mxu0 %vm188_vm0, %v94_v38  ;;  %v110_v38 = vld [vmem:[%s13882_s0 + $0x268] sm:$0xff] }
  0x85   :  { %8397 = vmatprep.mubr.msk.f32.mxu0 %vm188_vm0, %v95_v40  ;;  %v111_v40 = vld [vmem:[%s13882_s0 + $0x270] sm:$0xff]  ;;  %9058 = vmatpush3.bf16.msra.mxu0 %v9057_v39 }
  0x86   :  { %9060 = vmatprep.subr.bf16.mxu0 %v9059_v43  ;;  %v147_v39 = vld [vmem:[%s13882_s0 + $0x390] sm:$0xff]  ;;  %v148_v43 = vld [vmem:[%s13882_s0 + $0x398] sm:$0xff] }
  0x88   :  { %8398 = vmatmul.mubr.msk.f32.gmra.mrb[62].mxu0 %vm188_vm0, %v96_v46  ;;  %v112_v46 = vld [vmem:[%s13882_s0 + $0x278] sm:$0xff] }
  0x89   :  { %8400 = vmatprep.mubr.msk.f32.mxu0 %vm188_vm0, %v97_v48  ;;  %v113_v48 = vld [vmem:[%s13882_s0 + $0x280] sm:$0xff]  ;;  %9062 = vmatpush3.bf16.msra.mxu0 %v9061_v47 }
  0x8a   :  { %9064 = vmatprep.subr.bf16.mxu0 %v9063_v51  ;;  %v151_v51 = vld [vmem:[%s13882_s0 + $0x3b0] sm:$0xff] }
  0x8c   :  { %8401 = vmatmul.mubr.msk.f32.gmra.mrb[64].mxu0 %vm188_vm0, %v98_v54  ;;  %v114_v54 = vld [vmem:[%s13882_s0 + $0x288] sm:$0xff] }
  0x8d   :  { %8403 = vmatprep.mubr.msk.f32.mxu0 %vm188_vm0, %v99_v58  ;;  %9066 = vmatpush3.bf16.msra.mxu0 %v9065_v55  ;;  %v117_v58 = vld [vmem:[%s13882_s0 + $0x2a0] sm:$0xff] }
  0x90   :  { %8404 = vmatmul.mubr.msk.f32.gmra.mrb[66].mxu0 %vm188_vm0, %v100_v62  ;;  %v121_v62 = vld [vmem:[%s13882_s0 + $0x2c0] sm:$0xff] }
  0x91   :  { %8406 = vmatprep.mubr.msk.f32.mxu0 %vm188_vm0, %v101_v0  ;;  %v123_v0 = vld [vmem:[%s13882_s0 + $0x2d0] sm:$0xff] }
  0x94   :  { %8407 = vmatmul.mubr.msk.f32.gmra.mrb[68].mxu0 %vm188_vm0, %v102_v6  ;;  %v129_v6 = vld [vmem:[%s13882_s0 + $0x300] sm:$0xff] }
  0x95   :  { %8409 = vmatprep.mubr.msk.f32.mxu0 %vm188_vm0, %v103_v8  ;;  %v131_v8 = vld [vmem:[%s13882_s0 + $0x310] sm:$0xff] }
  0x98   :  { %8410 = vmatmul.mubr.msk.f32.gmra.mrb[70].mxu0 %vm188_vm0, %v104_v14  ;;  %v137_v14 = vld [vmem:[%s13882_s0 + $0x340] sm:$0xff] }
  0x99   :  { %8412 = vmatprep.mubr.msk.f32.mxu0 %vm188_vm0, %v105_v16  ;;  %v139_v16 = vld [vmem:[%s13882_s0 + $0x350] sm:$0xff] }
  0x9c   :  { %8413 = vmatmul.mubr.msk.f32.gmra.mrb[72].mxu0 %vm188_vm0, %v106_v22  ;;  %v142_v22 = vld [vmem:[%s13882_s0 + $0x368] sm:$0xff] }
  0x9d   :  { %8415 = vmatprep.mubr.msk.f32.mxu0 %vm188_vm0, %v107_v24 }
  0xa0   :  { %8416 = vmatmul.mubr.msk.f32.gmra.mrb[74].mxu0 %vm188_vm0, %v108_v30  ;;  %v145_v30 = vld [vmem:[%s13882_s0 + $0x380] sm:$0xff] }
  0xa1   :  { %8418 = vmatprep.mubr.msk.f32.mxu0 %vm188_vm0, %v109_v32 }
  0xa4   :  { %8419 = vmatmul.mubr.msk.f32.gmra.mrb[76].mxu0 %vm188_vm0, %v110_v38 }
  0xa5   :  { %8421 = vmatprep.mubr.msk.f32.mxu0 %vm188_vm0, %v111_v40 }
  0xa8   :  { %8422 = vmatmul.mubr.msk.f32.gmra.mrb[78].mxu0 %vm188_vm0, %v112_v46 }
  0xa9   :  { %8424 = vmatprep.mubr.msk.f32.mxu0 %vm188_vm0, %v113_v48 }
  0xac   :  { %8425 = vmatmul.mubr.msk.f32.gmra.mrb[80].mxu0 %vm188_vm0, %v114_v54 }
  0xad   :  { %8427 = vmatprep.mubr.msk.f32.mxu0 %vm188_vm0, %v115_v56 }
  0xb0   :  { %8428 = vmatmul.mubr.msk.f32.gmra.mrb[82].mxu0 %vm188_vm0, %v116_v57 }
  0xb1   :  { %8430 = vmatprep.mubr.msk.f32.mxu0 %vm188_vm0, %v117_v58 }
  0xb4   :  { %8431 = vmatmul.mubr.msk.f32.gmra.mrb[84].mxu0 %vm188_vm0, %v118_v59 }
  0xb5   :  { %8433 = vmatprep.mubr.msk.f32.mxu0 %vm188_vm0, %v119_v60 }
  0xb8   :  { %8434 = vmatmul.mubr.msk.f32.gmra.mrb[86].mxu0 %vm188_vm0, %v120_v61  ;;  %v152_v61 = vld [vmem:[%s13882_s0 + $0x3b8] sm:$0xff] }
  0xb9   :  { %8436 = vmatprep.mubr.msk.f32.mxu0 %vm188_vm0, %v121_v62 }
  0xbc   :  { %8437 = vmatmul.mubr.msk.f32.gmra.mrb[88].mxu0 %vm188_vm0, %v122_v63 }
  0xbd   :  { %8439 = vmatprep.mubr.msk.f32.mxu0 %vm188_vm0, %v123_v0 }
  0xc0   :  { %8440 = vmatmul.mubr.msk.f32.gmra.mrb[90].mxu0 %vm188_vm0, %v124_v1  ;;  %v153_v1 = vld [vmem:[%s13882_s0 + $0x3c0] sm:$0xff] }
  0xc1   :  { %8442 = vmatprep.mubr.msk.f32.mxu0 %vm188_vm0, %v125_v2 }
  0xc4   :  { %8443 = vmatmul.mubr.msk.f32.gmra.mrb[92].mxu0 %vm188_vm0, %v126_v3 }
  0xc5   :  { %8445 = vmatprep.mubr.msk.f32.mxu0 %vm188_vm0, %v127_v4 }
  0xc8   :  { %8446 = vmatmul.mubr.msk.f32.gmra.mrb[94].mxu0 %vm188_vm0, %v128_v5 }
  0xc9   :  { %8448 = vmatprep.mubr.msk.f32.mxu0 %vm188_vm0, %v129_v6 }
  0xcc   :  { %8449 = vmatmul.mubr.msk.f32.gmra.mrb[96].mxu0 %vm188_vm0, %v130_v7 }
  0xcd   :  { %8451 = vmatprep.mubr.msk.f32.mxu0 %vm188_vm0, %v131_v8  ;;  %v154_v8 = vld [vmem:[%s13882_s0 + $0x3c8] sm:$0xff] }
  0xd0   :  { %8452 = vmatmul.mubr.msk.f32.gmra.mrb[98].mxu0 %vm188_vm0, %v132_v9  ;;  %v155_v9 = vld [vmem:[%s13882_s0 + $0x3d0] sm:$0xff] }
  0xd1   :  { %8454 = vmatprep.mubr.msk.f32.mxu0 %vm188_vm0, %v133_v10 }
  0xd4   :  { %8455 = vmatmul.mubr.msk.f32.gmra.mrb[100].mxu0 %vm188_vm0, %v134_v11 }
  0xd5   :  { %8457 = vmatprep.mubr.msk.f32.mxu0 %vm188_vm0, %v135_v12 }
  0xd8   :  { %8458 = vmatmul.mubr.msk.f32.gmra.mrb[102].mxu0 %vm188_vm0, %v136_v13 }
  0xd9   :  { %8460 = vmatprep.mubr.msk.f32.mxu0 %vm188_vm0, %v137_v14  ;;  %v156_v14 = vld [vmem:[%s13882_s0 + $0x3d8] sm:$0xff] }
  0xdc   :  { %8461 = vmatmul.mubr.msk.f32.gmra.mrb[104].mxu0 %vm188_vm0, %v138_v15 }
  0xdd   :  { %8463 = vmatprep.mubr.msk.f32.mxu0 %vm188_vm0, %v139_v16  ;;  %v157_v16 = vld [vmem:[%s13882_s0 + $0x3e0] sm:$0xff] }
  0xdf   :  { %v8306_v19 = vpop.f32.mrb[0].mxu0 }
  0xe0   :  { %v687_v20 = vpop.f32.mrb[1].mxu0  ;;  %8464 = vmatmul.mubr.msk.f32.gmra.mrb[106].mxu0 %vm188_vm0, %v140_v17  ;;  %v693_v35 = vadd.f32 %v8306_v19, %v10605_v21 }
  0xe1   :  { %8466 = vmatprep.mubr.msk.f32.mxu0 %vm188_vm0, %v141_v18  ;;  %v688_v25 = vadd.f32 %v10605_v21, %v687_v20 }
  0xe3   :  { %v8309_v24 = vpop.f32.mrb[2].mxu0 }
  0xe4   :  { %v703_v26 = vadd.f32 %v8309_v24, %v10605_v21  ;;  %v697_v27 = vpop.f32.mrb[3].mxu0  ;;  %8467 = vmatmul.mubr.msk.f32.gmra.mrb[108].mxu0 %vm188_vm0, %v142_v22 }
  0xe5   :  { %8469 = vmatprep.mubr.msk.f32.mxu0 %vm188_vm0, %v143_v23  ;;  %v698_v32 = vadd.f32 %v10605_v21, %v697_v27  ;;  %v158_v27 = vld [vmem:[%s13882_s0 + $0x3e8] sm:$0xff] }
  0xe6   :  { %v1406_v29 = vmax.f32 %v688_v25, %v703_v26 }
  0xe7   :  { %v8312_v31 = vpop.f32.mrb[4].mxu0 }
  0xe8   :  { %1478 = vst [vmem:[#allocation2] sm:$0xff] %v1406_v29  ;;  %v713_v33 = vadd.f32 %v8312_v31, %v10605_v21  ;;  %v707_v34 = vpop.f32.mrb[5].mxu0  ;;  %8470 = vmatmul.mubr.msk.f32.gmra.mrb[110].mxu0 %vm188_vm0, %v144_v28  ;;  %v159_v31 = vld [vmem:[%s13882_s0 + $0x3f0] sm:$0xff] }
  0xe9   :  { %v708_v36 = vadd.f32 %v10605_v21, %v707_v34  ;;  %8472 = vmatprep.mubr.msk.f32.mxu0 %vm188_vm0, %v145_v30 }
  0xea   :  { %v1408_v38 = vmax.f32 %v698_v32, %v713_v33 }
  0xeb   :  { %v1407_v40 = vmax.f32 %v693_v35, %v708_v36  ;;  %v8315_v41 = vpop.f32.mrb[6].mxu0 }
  0xec   :  { %1480 = vst [vmem:[#allocation2 + $0x10] sm:$0xff] %v1408_v38  ;;  %v717_v42 = vpop.f32.mrb[7].mxu0  ;;  %8473 = vmatmul.mubr.msk.f32.gmra.mrb[112].mxu0 %vm188_vm0, %v146_v37  ;;  %v723_v59 = vadd.f32 %v8315_v41, %v10605_v21  ;;  %v160_v38 = vld [vmem:[%s13882_s0 + $0x3f8] sm:$0xff] }
  0xed   :  { %1479 = vst [vmem:[#allocation2 + $0x8] sm:$0xff] %v1407_v40  ;;  %8475 = vmatprep.mubr.msk.f32.mxu0 %vm188_vm0, %v147_v39  ;;  %v718_v46 = vadd.f32 %v10605_v21, %v717_v42  ;;  %v161_v39 = vld [vmem:[%s13882_s0 + $0x400] sm:$0xff] }
  0xef   :  { %v8318_v45 = vpop.f32.mrb[8].mxu0 }
  0xf0   :  { %v733_v47 = vadd.f32 %v8318_v45, %v10605_v21  ;;  %v727_v48 = vpop.f32.mrb[9].mxu0  ;;  %8476 = vmatmul.mubr.msk.f32.gmra.mrb[114].mxu0 %vm188_vm0, %v148_v43 }
  0xf1   :  { %8478 = vmatprep.mubr.msk.f32.mxu0 %vm188_vm0, %v149_v44  ;;  %v728_v54 = vadd.f32 %v10605_v21, %v727_v48  ;;  %v162_v44 = vld [vmem:[%s13882_s0 + $0x408] sm:$0xff] }
  0xf2   :  { %v1409_v50 = vmax.f32 %v718_v46, %v733_v47  ;;  %v163_v46 = vld [vmem:[%s13882_s0 + $0x410] sm:$0xff] }
  0xf3   :  { %v8321_v52 = vpop.f32.mrb[10].mxu0  ;;  %v1552_v53 = vld [vmem:[#allocation2 + $0x10] ss:$2 sm:$0xf] }
  0xf4   :  { %1481 = vst [vmem:[#allocation2 + $0x18] sm:$0xff] %v1409_v50  ;;  %v743_v55 = vadd.f32 %v8321_v52, %v10605_v21  ;;  %v737_v56 = vpop.f32.mrb[11].mxu0  ;;  %8479 = vmatmul.mubr.msk.f32.gmra.mrb[116].mxu0 %vm188_vm0, %v150_v49  ;;  %v1550_v57 = vld [vmem:[#allocation2] ss:$2 sm:$0xff]  ;;  %v1646_v58 = vld [vmem:[#allocation2 + $0x1] ss:$2 sm:$0xff] }
  0xf5   :  { %v738_v60 = vadd.f32 %v10605_v21, %v737_v56  ;;  %8481 = vmatprep.mubr.msk.f32.mxu0 %vm188_vm0, %v151_v51  ;;  %v1648_v62 = vld [vmem:[#allocation2 + $0x11] ss:$2 sm:$0xf]  ;;  %v1741_v63 = vmax.f32 %v1550_v57, %v1646_v58  ;;  %v164_v57 = vld [vmem:[%s13882_s0 + $0x418] sm:$0xff] }
  0xf6   :  { %v1411_v0 = vmax.f32 %v728_v54, %v743_v55  ;;  %v1742_v2 = vmax.f32 %v1552_v53, %v1648_v62 }
  0xf7   :  { %v1410_v3 = vmax.f32 %v723_v59, %v738_v60  ;;  %v8324_v4 = vpop.f32.mrb[12].mxu0  ;;  %v1789_v5 = vmax.f32 %v1741_v63, 0.0 }
  0xf8   :  { %1483 = vst [vmem:[#allocation2 + $0x28] sm:$0xff] %v1411_v0  ;;  %v747_v6 = vpop.f32.mrb[13].mxu0  ;;  %8482 = vmatmul.mubr.msk.f32.gmra.mrb[118].mxu0 %vm188_vm0, %v152_v61  ;;  %v1790_v7 = vmax.f32 %v1742_v2, 0.0  ;;  %v753_v25 = vadd.f32 %v8324_v4, %v10605_v21  ;;  %v165_v61 = vld [vmem:[%s13882_s0 + $0x420] sm:$0xff]  ;;  %v166_v4 = vld [vmem:[%s13882_s0 + $0x428] sm:$0xff] }
  0xf9   :  { %1482 = vst [vmem:[#allocation2 + $0x20] sm:$0xff] %v1410_v3  ;;  %8484 = vmatprep.mubr.msk.f32.mxu0 %vm188_vm0, %v153_v1  ;;  %1837 = vst [vmem:[#allocation3] sm:$0xff] %v1789_v5  ;;  %v748_v11 = vadd.f32 %v10605_v21, %v747_v6  ;;  %v167_v5 = vld [vmem:[%s13882_s0 + $0x430] sm:$0xff] }
  0xfa   :  { %1838 = vst [vmem:[#allocation3 + $0x8] sm:$0xf] %v1790_v7 }
  0xfb   :  { %v8327_v10 = vpop.f32.mrb[14].mxu0 }
  0xfc   :  { %v763_v12 = vadd.f32 %v8327_v10, %v10605_v21  ;;  %v757_v13 = vpop.f32.mrb[15].mxu0  ;;  %8485 = vmatmul.mubr.msk.f32.gmra.mrb[120].mxu0 %vm188_vm0, %v154_v8  ;;  %v168_v10 = vld [vmem:[%s13882_s0 + $0x438] sm:$0xff] }
  0xfd   :  { %8487 = vmatprep.mubr.msk.f32.mxu0 %vm188_vm0, %v155_v9  ;;  %v758_v19 = vadd.f32 %v10605_v21, %v757_v13 }
  0xfe   :  { %v1412_v15 = vmax.f32 %v748_v11, %v763_v12  ;;  %v169_v12 = vld [vmem:[%s13882_s0 + $0x440] sm:$0xff] }
  0xff   :  { %v8330_v17 = vpop.f32.mrb[16].mxu0  ;;  %v1556_v18 = vld [vmem:[#allocation2 + $0x28] ss:$2 sm:$0xf] }
 0x100   :  { %1484 = vst [vmem:[#allocation2 + $0x30] sm:$0xff] %v1412_v15  ;;  %v773_v20 = vadd.f32 %v8330_v17, %v10605_v21  ;;  %v767_v22 = vpop.f32.mrb[17].mxu0  ;;  %8488 = vmatmul.mubr.msk.f32.gmra.mrb[122].mxu0 %vm188_vm0, %v156_v14  ;;  %v1554_v23 = vld [vmem:[#allocation2 + $0x18] ss:$2 sm:$0xff]  ;;  %v1650_v24 = vld [vmem:[#allocation2 + $0x19] ss:$2 sm:$0xff] }
 0x101   :  { %v768_v26 = vadd.f32 %v10605_v21, %v767_v22  ;;  %8490 = vmatprep.mubr.msk.f32.mxu0 %vm188_vm0, %v157_v16  ;;  %v1652_v28 = vld [vmem:[#allocation2 + $0x29] ss:$2 sm:$0xf]  ;;  %v1743_v29 = vmax.f32 %v1554_v23, %v1650_v24 }
 0x102   :  { %v1414_v30 = vmax.f32 %v758_v19, %v773_v20  ;;  %v1744_v32 = vmax.f32 %v1556_v18, %v1652_v28  ;;  %v170_v24 = vld [vmem:[%s13882_s0 + $0x448] sm:$0xff]  ;;  %v171_v28 = vld [vmem:[%s13882_s0 + $0x450] sm:$0xff] }
 0x103   :  { %v1413_v33 = vmax.f32 %v753_v25, %v768_v26  ;;  %v8333_v34 = vpop.f32.mrb[18].mxu0  ;;  %v1791_v35 = vmax.f32 %v1743_v29, 0.0 }
 0x104   :  { %1486 = vst [vmem:[#allocation2 + $0x40] sm:$0xff] %v1414_v30  ;;  %v777_v36 = vpop.f32.mrb[19].mxu0  ;;  %8491 = vmatmul.mubr.msk.f32.gmra.mrb[124].mxu0 %vm188_vm0, %v158_v27  ;;  %v1792_v37 = vmax.f32 %v1744_v32, 0.0  ;;  %v783_v54 = vadd.f32 %v8333_v34, %v10605_v21 }
 0x105   :  { %1485 = vst [vmem:[#allocation2 + $0x38] sm:$0xff] %v1413_v33  ;;  %8493 = vmatprep.mubr.msk.f32.mxu0 %vm188_vm0, %v159_v31  ;;  %1839 = vst [vmem:[#allocation3 + $0x10] sm:$0xff] %v1791_v35  ;;  %v778_v41 = vadd.f32 %v10605_v21, %v777_v36  ;;  %v173_v36 = vld [vmem:[%s13882_s0 + $0x460] sm:$0xff] }
 0x106   :  { %1840 = vst [vmem:[#allocation3 + $0x18] sm:$0xf] %v1792_v37 }
 0x107   :  { %v8336_v40 = vpop.f32.mrb[20].mxu0 }
 0x108   :  { %v793_v42 = vadd.f32 %v8336_v40, %v10605_v21  ;;  %v787_v43 = vpop.f32.mrb[21].mxu0  ;;  %8494 = vmatmul.mubr.msk.f32.gmra.mrb[126].mxu0 %vm188_vm0, %v160_v38 }
 0x109   :  { %8496 = vmatprep.mubr.msk.f32.mxu0 %vm188_vm0, %v161_v39  ;;  %v788_v49 = vadd.f32 %v10605_v21, %v787_v43  ;;  %v175_v43 = vld [vmem:[%s13882_s0 + $0x470] sm:$0xff] }
 0x10a   :  { %v1415_v45 = vmax.f32 %v778_v41, %v793_v42  ;;  %v174_v41 = vld [vmem:[%s13882_s0 + $0x468] sm:$0xff] }
 0x10b   :  { %v8339_v47 = vpop.f32.mrb[22].mxu0  ;;  %v1560_v48 = vld [vmem:[#allocation2 + $0x40] ss:$2 sm:$0xf] }
 0x10c   :  { %1487 = vst [vmem:[#allocation2 + $0x48] sm:$0xff] %v1415_v45  ;;  %v803_v50 = vadd.f32 %v8339_v47, %v10605_v21  ;;  %v797_v51 = vpop.f32.mrb[23].mxu0  ;;  %8497 = vmatmul.mubr.msk.f32.gmra.mrb[128].mxu0 %vm188_vm0, %v162_v44  ;;  %v1558_v52 = vld [vmem:[#allocation2 + $0x30] ss:$2 sm:$0xff]  ;;  %v1654_v53 = vld [vmem:[#allocation2 + $0x31] ss:$2 sm:$0xff] }
 0x10d   :  { %v798_v55 = vadd.f32 %v10605_v21, %v797_v51  ;;  %v1934_v56 = vld [vmem:[#allocation3 + $0x11] sm:$0xff]  ;;  %8499 = vmatprep.mubr.msk.f32.mxu0 %vm188_vm0, %v163_v46  ;;  %v1656_v58 = vld [vmem:[#allocation2 + $0x41] ss:$2 sm:$0xf]  ;;  %v1745_v59 = vmax.f32 %v1558_v52, %v1654_v53 }
 0x10e   :  { %v1417_v60 = vmax.f32 %v788_v49, %v803_v50  ;;  %2510 = vmatprep.mubr.f32.mxu1 %v1934_v56  ;;  %v1746_v62 = vmax.f32 %v1560_v48, %v1656_v58 }
 0x10f   :  { %v1416_v63 = vmax.f32 %v783_v54, %v798_v55  ;;  %2511 = vmatmul.mubr.f32.vlgmr.msra.gmra.mrb[0].mxu1 %v1791_v35  ;;  %v8342_v0 = vpop.f32.mrb[24].mxu0  ;;  %v10726_v1 = vmax.f32 %v1745_v59, 0.0  ;;  %v172_v35 = vld [vmem:[%s13882_s0 + $0x458] sm:$0xff] }
 0x110   :  { %1489 = vst [vmem:[#allocation2 + $0x58] sm:$0xff] %v1417_v60  ;;  %v807_v2 = vpop.f32.mrb[25].mxu0  ;;  %8500 = vmatmul.mubr.msk.f32.gmra.mrb[130].mxu0 %vm188_vm0, %v164_v57  ;;  %v1794_v3 = vmax.f32 %v1746_v62, 0.0  ;;  %v813_v20 = vadd.f32 %v8342_v0, %v10605_v21  ;;  %v176_v55 = vld [vmem:[%s13882_s0 + $0x478] sm:$0xff] }
 0x111   :  { %1488 = vst [vmem:[#allocation2 + $0x50] sm:$0xff] %v1416_v63  ;;  %8502 = vmatprep.mubr.msk.f32.mxu0 %vm188_vm0, %v165_v61  ;;  %1841 = vst [vmem:[#allocation3 + $0x20] sm:$0xff] %v10726_v1  ;;  %v808_v7 = vadd.f32 %v10605_v21, %v807_v2 }
 0x112   :  { %1842 = vst [vmem:[#allocation3 + $0x28] sm:$0xf] %v1794_v3 }
 0x113   :  { %v8345_v6 = vpop.f32.mrb[26].mxu0 }
 0x114   :  { %v823_v8 = vadd.f32 %v8345_v6, %v10605_v21  ;;  %v817_v9 = vpop.f32.mrb[27].mxu0  ;;  %8503 = vmatmul.mubr.msk.f32.gmra.mrb[132].mxu0 %vm188_vm0, %v166_v4 }
 0x115   :  { %8505 = vmatprep.mubr.msk.f32.mxu0 %vm188_vm0, %v167_v5  ;;  %v818_v15 = vadd.f32 %v10605_v21, %v817_v9 }
 0x116   :  { %v1418_v11 = vmax.f32 %v808_v7, %v823_v8 }
 0x117   :  { %v8348_v13 = vpop.f32.mrb[28].mxu0  ;;  %v1564_v14 = vld [vmem:[#allocation2 + $0x58] ss:$2 sm:$0xf] }
 0x118   :  { %1490 = vst [vmem:[#allocation2 + $0x60] sm:$0xff] %v1418_v11  ;;  %v833_v16 = vadd.f32 %v8348_v13, %v10605_v21  ;;  %v827_v17 = vpop.f32.mrb[29].mxu0  ;;  %8506 = vmatmul.mubr.msk.f32.gmra.mrb[134].mxu0 %vm188_vm0, %v168_v10  ;;  %v1562_v18 = vld [vmem:[#allocation2 + $0x48] ss:$2 sm:$0xff]  ;;  %v1658_v19 = vld [vmem:[#allocation2 + $0x49] ss:$2 sm:$0xff] }
 0x119   :  { %v828_v22 = vadd.f32 %v10605_v21, %v827_v17  ;;  %v1935_v23 = vld [vmem:[#allocation3 + $0x21] sm:$0xff]  ;;  %8508 = vmatprep.mubr.msk.f32.mxu0 %vm188_vm0, %v169_v12  ;;  %v1660_v25 = vld [vmem:[#allocation2 + $0x59] ss:$2 sm:$0xf]  ;;  %v1747_v26 = vmax.f32 %v1562_v18, %v1658_v19 }
 0x11a   :  { %v1420_v27 = vmax.f32 %v818_v15, %v833_v16  ;;  %2515 = vmatprep.mubr.f32.mxu1 %v1935_v23  ;;  %v1748_v29 = vmax.f32 %v1564_v14, %v1660_v25 }
 0x11b   :  { %v1419_v30 = vmax.f32 %v813_v20, %v828_v22  ;;  %2516 = vmatmul.mubr.f32.gmra.mrb[2].mxu1 %v10726_v1  ;;  %v8351_v31 = vpop.f32.mrb[30].mxu0  ;;  %v10760_v32 = vmax.f32 %v1747_v26, 0.0 }
 0x11c   :  { %1492 = vst [vmem:[#allocation2 + $0x70] sm:$0xff] %v1420_v27  ;;  %v837_v33 = vpop.f32.mrb[31].mxu0  ;;  %8509 = vmatmul.mubr.msk.f32.gmra.mrb[136].mxu0 %vm188_vm0, %v170_v24  ;;  %v1796_v34 = vmax.f32 %v1748_v29, 0.0  ;;  %v843_v57 = vadd.f32 %v8351_v31, %v10605_v21 }
 0x11d   :  { %1491 = vst [vmem:[#allocation2 + $0x68] sm:$0xff] %v1419_v30  ;;  %8511 = vmatprep.mubr.msk.f32.mxu0 %vm188_vm0, %v171_v28  ;;  %1843 = vst [vmem:[#allocation3 + $0x30] sm:$0xff] %v10760_v32  ;;  %v838_v38 = vadd.f32 %v10605_v21, %v837_v33 }
 0x11e   :  { %1844 = vst [vmem:[#allocation3 + $0x38] sm:$0xf] %v1796_v34 }
 0x11f   :  { %v8354_v37 = vpop.f32.mrb[32].mxu0 }
 0x120   :  { %v853_v39 = vadd.f32 %v8354_v37, %v10605_v21  ;;  %v847_v40 = vpop.f32.mrb[33].mxu0  ;;  %8512 = vmatmul.mubr.msk.f32.gmra.mrb[138].mxu0 %vm188_vm0, %v172_v35 }
 0x121   :  { %8514 = vmatprep.mubr.msk.f32.mxu0 %vm188_vm0, %v173_v36  ;;  %v848_v51 = vadd.f32 %v10605_v21, %v847_v40 }
 0x122   :  { %v1421_v42 = vmax.f32 %v838_v38, %v853_v39 }
 0x123   :  { %v1568_v44 = vld [vmem:[#allocation2 + $0x70] ss:$2 sm:$0xf]  ;;  %v1664_v45 = vld [vmem:[#allocation2 + $0x71] ss:$2 sm:$0xf] }
 0x124   :  { %v1750_v46 = vmax.f32 %v1568_v44, %v1664_v45  ;;  %v1566_v47 = vld [vmem:[#allocation2 + $0x60] ss:$2 sm:$0xff]  ;;  %v1662_v48 = vld [vmem:[#allocation2 + $0x61] ss:$2 sm:$0xff]  ;;  %1493 = vst [vmem:[#allocation2 + $0x78] sm:$0xff] %v1421_v42  ;;  %v8357_v49 = vpop.f32.mrb[34].mxu0  ;;  %8515 = vmatmul.mubr.msk.f32.gmra.mrb[140].mxu0 %vm188_vm0, %v174_v41 }
 0x125   :  { %v1749_v50 = vmax.f32 %v1566_v47, %v1662_v48  ;;  %v863_v52 = vadd.f32 %v8357_v49, %v10605_v21  ;;  %v857_v53 = vpop.f32.mrb[35].mxu0  ;;  %v1936_v54 = vld [vmem:[#allocation3 + $0x31] sm:$0xff]  ;;  %8517 = vmatprep.mubr.msk.f32.mxu0 %vm188_vm0, %v175_v43 }
 0x126   :  { %v1798_v56 = vmax.f32 %v1750_v46, 0.0  ;;  %v858_v58 = vadd.f32 %v10605_v21, %v857_v53  ;;  %2520 = vmatprep.mubr.f32.mxu1 %v1936_v54 }
 0x127   :  { %v1797_v59 = vmax.f32 %v1749_v50, 0.0  ;;  %v1423_v60 = vmax.f32 %v848_v51, %v863_v52  ;;  %2521 = vmatmul.mubr.f32.gmra.mrb[4].mxu1 %v10760_v32  ;;  %v8360_v61 = vpop.f32.mrb[36].mxu0 }
 0x128   :  { %1846 = vst [vmem:[#allocation3 + $0x48] sm:$0xf] %v1798_v56  ;;  %v1422_v62 = vmax.f32 %v843_v57, %v858_v58  ;;  %v867_v63 = vpop.f32.mrb[37].mxu0  ;;  %8518 = vmatmul.mubr.msk.f32.gmra.mrb[142].mxu0 %vm188_vm0, %v176_v55  ;;  %v873_v14 = vadd.f32 %v8360_v61, %v10605_v21  ;;  %v2415_v55 = vld [vmem:[%s13885_s3 + $0x408] sm:$0xff]  ;;  %v2398_v56 = vld [vmem:[%s13885_s3 + $0x380] sm:$0xff]  ;;  %v2417_v61 = vld [vmem:[%s13885_s3 + $0x418] sm:$0xff] }
 0x129   :  { %1845 = vst [vmem:[#allocation3 + $0x40] sm:$0xff] %v1797_v59  ;;  %1495 = vst [vmem:[#allocation2 + $0x88] sm:$0xff] %v1423_v60  ;;  %3541 = vmatprep.mubr.f32.mxu0 %v1935_v23  ;;  %v868_v2 = vadd.f32 %v10605_v21, %v867_v63  ;;  %v2416_v60 = vld [vmem:[%s13885_s3 + $0x410] sm:$0xff] }
 0x12a   :  { %1494 = vst [vmem:[#allocation2 + $0x80] sm:$0xff] %v1422_v62 }
 0x12b   :  { %v8363_v0 = vpop.f32.mrb[38].mxu0 }
 0x12c   :  { %v883_v3 = vadd.f32 %v8363_v0, %v10605_v21  ;;  %v877_v4 = vpop.f32.mrb[39].mxu0  ;;  %3542 = vmatmul.mubr.f32.vlgmr.msra.gmra.mrb[144].mxu0 %v10726_v1 }
 0x12d   :  { %3546 = vmatprep.mubr.f32.mxu0 %v1936_v54  ;;  %v878_v9 = vadd.f32 %v10605_v21, %v877_v4  ;;  %v2414_v54 = vld [vmem:[%s13885_s3 + $0x400] sm:$0xff] }
 0x12e   :  { %v1424_v5 = vmax.f32 %v868_v2, %v883_v3  ;;  %v8875_v58 = vpack.c.bf16 %v2415_v55, %v2414_v54 }
 0x12f   :  { %v8366_v6 = vpop.f32.mrb[40].mxu0 }
 0x130   :  { %v1572_v7 = vld [vmem:[#allocation2 + $0x88] ss:$2 sm:$0xf]  ;;  %v1668_v8 = vld [vmem:[#allocation2 + $0x89] ss:$2 sm:$0xf]  ;;  %v893_v10 = vadd.f32 %v8366_v6, %v10605_v21  ;;  %3547 = vmatmul.mubr.f32.gmra.mrb[146].mxu0 %v10760_v32  ;;  %8876 = vmatprep.subr.bf16.mxu1 %v8875_v58 }
 0x131   :  { %1496 = vst [vmem:[#allocation2 + $0x90] sm:$0xff] %v1424_v5  ;;  %v1752_v11 = vmax.f32 %v1572_v7, %v1668_v8  ;;  %v1570_v12 = vld [vmem:[#allocation2 + $0x78] ss:$2 sm:$0xff]  ;;  %v1666_v13 = vld [vmem:[#allocation2 + $0x79] ss:$2 sm:$0xff]  ;;  %v887_v15 = vpop.f32.mrb[41].mxu0 }
 0x132   :  { %v1937_v16 = vld [vmem:[#allocation3 + $0x41] sm:$0xff]  ;;  %v1751_v1 = vmax.f32 %v1570_v12, %v1666_v13  ;;  %v1426_v17 = vmax.f32 %v878_v9, %v893_v10  ;;  %v888_v18 = vadd.f32 %v10605_v21, %v887_v15  ;;  %v8879_v10 = vpack.c.bf16 %v2417_v61, %v2416_v60  ;;  %v2401_v15 = vld [vmem:[%s13885_s3 + $0x398] sm:$0xff] }
 0x133   :  { %2525 = vmatprep.mubr.f32.mxu1 %v1937_v16  ;;  %3551 = vmatprep.mubr.f32.mxu0 %v1937_v16  ;;  %v1800_v19 = vmax.f32 %v1752_v11, 0.0  ;;  %v8369_v20 = vpop.f32.mrb[42].mxu0  ;;  %v2421_v58 = vld [vmem:[%s13885_s3 + $0x438] sm:$0xff] }
 0x134   :  { %2526 = vmatmul.mubr.f32.gmra.mrb[6].mxu1 %v1797_v59  ;;  %v1799_v22 = vmax.f32 %v1751_v1, 0.0  ;;  %1498 = vst [vmem:[#allocation2 + $0xa0] sm:$0xff] %v1426_v17  ;;  %v1425_v23 = vmax.f32 %v873_v14, %v888_v18  ;;  %v897_v24 = vpop.f32.mrb[43].mxu0  ;;  %3552 = vmatmul.mubr.f32.gmra.mrb[148].mxu0 %v1797_v59  ;;  %v903_v42 = vadd.f32 %v8369_v20, %v10605_v21  ;;  %v2399_v59 = vld [vmem:[%s13885_s3 + $0x388] sm:$0xff]  ;;  %v2400_v14 = vld [vmem:[%s13885_s3 + $0x390] sm:$0xff] }
 0x135   :  { %1848 = vst [vmem:[#allocation3 + $0x58] sm:$0xf] %v1800_v19  ;;  %v898_v26 = vadd.f32 %v10605_v21, %v897_v24  ;;  %v8877_v3 = vpack.c.bf16 %v2399_v59, %v2398_v56  ;;  %v8881_v20 = vpack.c.bf16 %v2401_v15, %v2400_v14  ;;  %v2404_v59 = vld [vmem:[%s13885_s3 + $0x3b0] sm:$0xff] }
 0x136   :  { %1847 = vst [vmem:[#allocation3 + $0x50] sm:$0xff] %v1799_v22  ;;  %1497 = vst [vmem:[#allocation2 + $0x98] sm:$0xff] %v1425_v23 }
 0x137   :  { %v8372_v25 = vpop.f32.mrb[44].mxu0  ;;  %8878 = vmatpush3.bf16.msra.mxu1 %v8877_v3 }
 0x138   :  { %v913_v27 = vadd.f32 %v8372_v25, %v10605_v21  ;;  %v907_v28 = vpop.f32.mrb[45].mxu0  ;;  %8880 = vmatprep.subr.bf16.mxu1 %v8879_v10 }
 0x139   :  { %v908_v36 = vadd.f32 %v10605_v21, %v907_v28  ;;  %v2419_v28 = vld [vmem:[%s13885_s3 + $0x428] sm:$0xff] }
 0x13a   :  { %v1427_v29 = vmax.f32 %v898_v26, %v913_v27  ;;  %v2418_v27 = vld [vmem:[%s13885_s3 + $0x420] sm:$0xff] }
 0x13b   :  { %v1576_v30 = vld [vmem:[#allocation2 + $0xa0] ss:$2 sm:$0xf]  ;;  %v1672_v31 = vld [vmem:[#allocation2 + $0xa1] ss:$2 sm:$0xf]  ;;  %8882 = vmatpush3.bf16.msra.mxu1 %v8881_v20 }
 0x13c   :  { %v1754_v32 = vmax.f32 %v1576_v30, %v1672_v31  ;;  %1499 = vst [vmem:[#allocation2 + $0xa8] sm:$0xff] %v1427_v29  ;;  %v8375_v33 = vpop.f32.mrb[46].mxu0  ;;  %v2402_v29 = vld [vmem:[%s13885_s3 + $0x3a0] sm:$0xff] }
 0x13d   :  { %v1574_v34 = vld [vmem:[#allocation2 + $0x90] ss:$2 sm:$0xff]  ;;  %v1670_v35 = vld [vmem:[#allocation2 + $0x91] ss:$2 sm:$0xff]  ;;  %v923_v37 = vadd.f32 %v8375_v33, %v10605_v21  ;;  %v917_v38 = vpop.f32.mrb[47].mxu0 }
 0x13e   :  { %v1938_v39 = vld [vmem:[#allocation3 + $0x51] sm:$0xff]  ;;  %v1802_v40 = vmax.f32 %v1754_v32, 0.0  ;;  %v1753_v41 = vmax.f32 %v1574_v34, %v1670_v35  ;;  %v918_v43 = vadd.f32 %v10605_v21, %v917_v38  ;;  %v8883_v32 = vpack.c.bf16 %v2419_v28, %v2418_v27  ;;  %v2403_v35 = vld [vmem:[%s13885_s3 + $0x3a8] sm:$0xff] }
 0x13f   :  { %2530 = vmatprep.mubr.f32.mxu1 %v1938_v39  ;;  %3556 = vmatprep.mubr.f32.mxu0 %v1938_v39  ;;  %v1429_v44 = vmax.f32 %v908_v36, %v923_v37  ;;  %v8378_v45 = vpop.f32.mrb[48].mxu0 }
 0x140   :  { %2531 = vmatmul.mubr.f32.gmra.mrb[8].mxu1 %v1799_v22  ;;  %3557 = vmatmul.mubr.f32.gmra.mrb[150].mxu0 %v1799_v22  ;;  %1850 = vst [vmem:[#allocation3 + $0x68] sm:$0xf] %v1802_v40  ;;  %v1801_v46 = vmax.f32 %v1753_v41, 0.0  ;;  %v1428_v47 = vmax.f32 %v903_v42, %v918_v43  ;;  %v927_v48 = vpop.f32.mrb[49].mxu0  ;;  %v933_v7 = vadd.f32 %v8378_v45, %v10605_v21 }
 0x141   :  { %1501 = vst [vmem:[#allocation2 + $0xb8] sm:$0xff] %v1429_v44  ;;  %v928_v50 = vadd.f32 %v10605_v21, %v927_v48  ;;  %8884 = vmatprep.subr.bf16.mxu1 %v8883_v32  ;;  %v8885_v42 = vpack.c.bf16 %v2403_v35, %v2402_v29  ;;  %v4028_v32 = vld [vmem:[%s13885_s3 + $0x818] sm:$0xff]  ;;  %v2408_v35 = vld [vmem:[%s13885_s3 + $0x3d0] sm:$0xff] }
 0x142   :  { %1849 = vst [vmem:[#allocation3 + $0x60] sm:$0xff] %v1801_v46  ;;  %1500 = vst [vmem:[#allocation2 + $0xb0] sm:$0xff] %v1428_v47 }
 0x143   :  { %v8381_v49 = vpop.f32.mrb[50].mxu0  ;;  %8886 = vmatpush3.bf16.msra.mxu1 %v8885_v42  ;;  %v4012_v42 = vld [vmem:[%s13885_s3 + $0x798] sm:$0xff] }
 0x144   :  { %v943_v51 = vadd.f32 %v8381_v49, %v10605_v21  ;;  %v937_v52 = vpop.f32.mrb[51].mxu0 }
 0x145   :  { %v938_v0 = vadd.f32 %v10605_v21, %v937_v52 }
 0x146   :  { %v1430_v53 = vmax.f32 %v928_v50, %v943_v51 }
 0x147   :  { %v8384_v57 = vpop.f32.mrb[52].mxu0 }
 0x148   :  { %v1580_v62 = vld [vmem:[#allocation2 + $0xb8] ss:$2 sm:$0xf]  ;;  %v1676_v63 = vld [vmem:[#allocation2 + $0xb9] ss:$2 sm:$0xf]  ;;  %v953_v2 = vadd.f32 %v8384_v57, %v10605_v21 }
 0x149   :  { %1502 = vst [vmem:[#allocation2 + $0xc0] sm:$0xff] %v1430_v53  ;;  %v1756_v4 = vmax.f32 %v1580_v62, %v1676_v63  ;;  %v1578_v5 = vld [vmem:[#allocation2 + $0xa8] ss:$2 sm:$0xff]  ;;  %v1674_v6 = vld [vmem:[#allocation2 + $0xa9] ss:$2 sm:$0xff]  ;;  %v947_v8 = vpop.f32.mrb[53].mxu0 }
 0x14a   :  { %v1939_v9 = vld [vmem:[#allocation3 + $0x61] sm:$0xff]  ;;  %v1755_v11 = vmax.f32 %v1578_v5, %v1674_v6  ;;  %v1432_v12 = vmax.f32 %v938_v0, %v953_v2  ;;  %v948_v13 = vadd.f32 %v10605_v21, %v947_v8  ;;  %v2420_v57 = vld [vmem:[%s13885_s3 + $0x430] sm:$0xff]  ;;  %v2405_v62 = vld [vmem:[%s13885_s3 + $0x3b8] sm:$0xff] }
 0x14b   :  { %2535 = vmatprep.mubr.f32.mxu1 %v1939_v9  ;;  %3561 = vmatprep.mubr.f32.mxu0 %v1939_v9  ;;  %v1804_v16 = vmax.f32 %v1756_v4, 0.0  ;;  %v8387_v1 = vpop.f32.mrb[54].mxu0  ;;  %v8887_v61 = vpack.c.bf16 %v2421_v58, %v2420_v57  ;;  %v2422_v63 = vld [vmem:[%s13885_s3 + $0x440] sm:$0xff]  ;;  %v2423_v0 = vld [vmem:[%s13885_s3 + $0x448] sm:$0xff]  ;;  %v8889_v6 = vpack.c.bf16 %v2405_v62, %v2404_v59 }
 0x14c   :  { %2536 = vmatmul.mubr.f32.gmra.mrb[10].mxu1 %v1801_v46  ;;  %3562 = vmatmul.mubr.f32.gmra.mrb[152].mxu0 %v1801_v46  ;;  %v1803_v17 = vmax.f32 %v1755_v11, 0.0  ;;  %1504 = vst [vmem:[#allocation2 + $0xd0] sm:$0xff] %v1432_v12  ;;  %v1431_v18 = vmax.f32 %v933_v7, %v948_v13  ;;  %v957_v19 = vpop.f32.mrb[55].mxu0  ;;  %v963_v44 = vadd.f32 %v8387_v1, %v10605_v21  ;;  %v2406_v1 = vld [vmem:[%s13885_s3 + $0x3c0] sm:$0xff] }
 0x14d   :  { %1852 = vst [vmem:[#allocation3 + $0x78] sm:$0xf] %v1804_v16  ;;  %v958_v23 = vadd.f32 %v10605_v21, %v957_v19  ;;  %8888 = vmatprep.subr.bf16.mxu1 %v8887_v61  ;;  %v8891_v13 = vpack.c.bf16 %v2423_v0, %v2422_v63 }
 0x14e   :  { %1851 = vst [vmem:[#allocation3 + $0x70] sm:$0xff] %v1803_v17  ;;  %1503 = vst [vmem:[#allocation2 + $0xc8] sm:$0xff] %v1431_v18  ;;  %v4025_v18 = vld [vmem:[%s13885_s3 + $0x800] sm:$0xff]  ;;  %8890 = vmatpush3.bf16.msra.mxu1 %v8889_v6 }
 0x14f   :  { %v8390_v22 = vpop.f32.mrb[56].mxu0  ;;  %8892 = vmatprep.subr.bf16.mxu1 %v8891_v13 }
 0x150   :  { %v973_v24 = vadd.f32 %v8390_v22, %v10605_v21  ;;  %v967_v25 = vpop.f32.mrb[57].mxu0  ;;  %v4026_v22 = vld [vmem:[%s13885_s3 + $0x808] sm:$0xff] }
 0x151   :  { %v968_v38 = vadd.f32 %v10605_v21, %v967_v25  ;;  %v9131_v29 = vpack.c.bf16 %v4026_v22, %v4025_v18  ;;  %v2428_v18 = vld [vmem:[%s13885_s3 + $0x470] sm:$0xff] }
 0x152   :  { %v1433_v26 = vmax.f32 %v958_v23, %v973_v24  ;;  %v4009_v23 = vld [vmem:[%s13885_s3 + $0x780] sm:$0xff]  ;;  %v4010_v24 = vld [vmem:[%s13885_s3 + $0x788] sm:$0xff] }
 0x153   :  { %v1584_v30 = vld [vmem:[#allocation2 + $0xd0] ss:$2 sm:$0xf]  ;;  %v1680_v31 = vld [vmem:[#allocation2 + $0xd1] ss:$2 sm:$0xf]  ;;  %9132 = vmatprep.subr.bf16.mxu0 %v9131_v29 }
 0x154   :  { %v1758_v33 = vmax.f32 %v1584_v30, %v1680_v31  ;;  %1505 = vst [vmem:[#allocation2 + $0xd8] sm:$0xff] %v1433_v26  ;;  %v8393_v34 = vpop.f32.mrb[58].mxu0  ;;  %v9133_v30 = vpack.c.bf16 %v4010_v24, %v4009_v23  ;;  %v4027_v31 = vld [vmem:[%s13885_s3 + $0x810] sm:$0xff] }
 0x155   :  { %v1582_v36 = vld [vmem:[#allocation2 + $0xc0] ss:$2 sm:$0xff]  ;;  %v1678_v37 = vld [vmem:[#allocation2 + $0xc1] ss:$2 sm:$0xff]  ;;  %v983_v39 = vadd.f32 %v8393_v34, %v10605_v21  ;;  %v977_v40 = vpop.f32.mrb[59].mxu0  ;;  %v1940_v41 = vld [vmem:[#allocation3 + $0x71] sm:$0xff] }
 0x156   :  { %v1757_v43 = vmax.f32 %v1582_v36, %v1678_v37  ;;  %v978_v45 = vadd.f32 %v10605_v21, %v977_v40  ;;  %2540 = vmatprep.mubr.f32.mxu1 %v1940_v41  ;;  %3566 = vmatprep.mubr.f32.mxu0 %v1940_v41  ;;  %v1806_v46 = vmax.f32 %v1758_v33, 0.0  ;;  %v2424_v33 = vld [vmem:[%s13885_s3 + $0x450] sm:$0xff]  ;;  %v2425_v34 = vld [vmem:[%s13885_s3 + $0x458] sm:$0xff]  ;;  %v9135_v36 = vpack.c.bf16 %v4028_v32, %v4027_v31  ;;  %v4017_v31 = vld [vmem:[%s13885_s3 + $0x7c0] sm:$0xff] }
 0x157   :  { %v1435_v47 = vmax.f32 %v968_v38, %v983_v39  ;;  %2541 = vmatmul.mubr.f32.gmra.mrb[12].mxu1 %v1803_v17  ;;  %3567 = vmatmul.mubr.f32.gmra.mrb[154].mxu0 %v1803_v17  ;;  %v8396_v48 = vpop.f32.mrb[60].mxu0  ;;  %v2407_v17 = vld [vmem:[%s13885_s3 + $0x3c8] sm:$0xff]  ;;  %v8895_v39 = vpack.c.bf16 %v2425_v34, %v2424_v33  ;;  %v2409_v40 = vld [vmem:[%s13885_s3 + $0x3d8] sm:$0xff]  ;;  %v4011_v41 = vld [vmem:[%s13885_s3 + $0x790] sm:$0xff] }
 0x158   :  { %v1434_v49 = vmax.f32 %v963_v44, %v978_v45  ;;  %v987_v50 = vpop.f32.mrb[61].mxu0  ;;  %v1805_v51 = vmax.f32 %v1757_v43, 0.0  ;;  %1854 = vst [vmem:[#allocation3 + $0x88] sm:$0xf] %v1806_v46  ;;  %v993_v9 = vadd.f32 %v8396_v48, %v10605_v21  ;;  %v8893_v28 = vpack.c.bf16 %v2407_v17, %v2406_v1  ;;  %9134 = vmatpush3.bf16.msra.mxu0 %v9133_v30  ;;  %v4030_v48 = vld [vmem:[%s13885_s3 + $0x828] sm:$0xff]  ;;  %v4015_v1 = vld [vmem:[%s13885_s3 + $0x7b0] sm:$0xff] }
 0x159   :  { %1507 = vst [vmem:[#allocation2 + $0xe8] sm:$0xff] %v1435_v47  ;;  %v988_v53 = vadd.f32 %v10605_v21, %v987_v50  ;;  %v8897_v45 = vpack.c.bf16 %v2409_v40, %v2408_v35  ;;  %9136 = vmatprep.subr.bf16.mxu0 %v9135_v36  ;;  %v9137_v46 = vpack.c.bf16 %v4012_v42, %v4011_v41  ;;  %v4029_v47 = vld [vmem:[%s13885_s3 + $0x820] sm:$0xff]  ;;  %v4016_v17 = vld [vmem:[%s13885_s3 + $0x7b8] sm:$0xff]  ;;  %v4018_v32 = vld [vmem:[%s13885_s3 + $0x7c8] sm:$0xff] }
 0x15a   :  { %1506 = vst [vmem:[#allocation2 + $0xe0] sm:$0xff] %v1434_v49  ;;  %1853 = vst [vmem:[#allocation3 + $0x80] sm:$0xff] %v1805_v51  ;;  %8894 = vmatpush3.bf16.msra.mxu1 %v8893_v28  ;;  %v9139_v50 = vpack.c.bf16 %v4030_v48, %v4029_v47  ;;  %v9145_v22 = vpack.c.bf16 %v4016_v17, %v4015_v1  ;;  %v10991_v33 = vld [vmem:[%s13884_s2] ss:$0 sm:$0xff]  ;;  %v4035_v41 = vld [vmem:[%s13885_s3 + $0x850] sm:$0xff] }
 0x15b   :  { %v8399_v52 = vpop.f32.mrb[62].mxu0  ;;  %8896 = vmatprep.subr.bf16.mxu1 %v8895_v39  ;;  %v2431_v39 = vld [vmem:[%s13885_s3 + $0x488] sm:$0xff]  ;;  %v4036_v42 = vld [vmem:[%s13885_s3 + $0x858] sm:$0xff] }
 0x15c   :  { %v1003_v54 = vadd.f32 %v8399_v52, %v10605_v21  ;;  %v997_v55 = vpop.f32.mrb[63].mxu0  ;;  %v4014_v52 = vld [vmem:[%s13885_s3 + $0x7a8] sm:$0xff]  ;;  %9138 = vmatpush3.bf16.msra.mxu0 %v9137_v46  ;;  %v4020_v46 = vld [vmem:[%s13885_s3 + $0x7d8] sm:$0xff] }
 0x15d   :  { %v998_v4 = vadd.f32 %v10605_v21, %v997_v55  ;;  %9140 = vmatprep.subr.bf16.mxu0 %v9139_v50 }
 0x15e   :  { %v1436_v56 = vmax.f32 %v988_v53, %v1003_v54  ;;  %8898 = vmatpush3.bf16.msra.mxu1 %v8897_v45  ;;  %v4019_v45 = vld [vmem:[%s13885_s3 + $0x7d0] sm:$0xff] }
 0x15f   :  { %v8402_v60 = vpop.f32.mrb[64].mxu0 }
 0x160   :  { %v1588_v2 = vld [vmem:[#allocation2 + $0xe8] ss:$2 sm:$0xf]  ;;  %v1684_v3 = vld [vmem:[#allocation2 + $0xe9] ss:$2 sm:$0xf]  ;;  %v1013_v5 = vadd.f32 %v8402_v60, %v10605_v21 }
 0x161   :  { %1508 = vst [vmem:[#allocation2 + $0xf0] sm:$0xff] %v1436_v56  ;;  %v1586_v7 = vld [vmem:[#allocation2 + $0xd8] ss:$2 sm:$0xff]  ;;  %v1682_v8 = vld [vmem:[#allocation2 + $0xd9] ss:$2 sm:$0xff]  ;;  %v1007_v10 = vpop.f32.mrb[65].mxu0  ;;  %v1760_v12 = vmax.f32 %v1588_v2, %v1684_v3 }
 0x162   :  { %v1941_v11 = vld [vmem:[#allocation3 + $0x81] sm:$0xff]  ;;  %v1438_v14 = vmax.f32 %v998_v4, %v1013_v5  ;;  %v1008_v15 = vadd.f32 %v10605_v21, %v1007_v10  ;;  %v1759_v16 = vmax.f32 %v1586_v7, %v1682_v8 }
 0x163   :  { %2545 = vmatprep.mubr.f32.mxu1 %v1941_v11  ;;  %3571 = vmatprep.mubr.f32.mxu0 %v1941_v11  ;;  %v8405_v19 = vpop.f32.mrb[66].mxu0  ;;  %v1808_v20 = vmax.f32 %v1760_v12, 0.0  ;;  %v2426_v3 = vld [vmem:[%s13885_s3 + $0x460] sm:$0xff]  ;;  %v2427_v4 = vld [vmem:[%s13885_s3 + $0x468] sm:$0xff]  ;;  %v4031_v11 = vld [vmem:[%s13885_s3 + $0x830] sm:$0xff] }
 0x164   :  { %2546 = vmatmul.mubr.f32.gmra.mrb[14].mxu1 %v1805_v51  ;;  %3572 = vmatmul.mubr.f32.gmra.mrb[156].mxu0 %v1805_v51  ;;  %1510 = vst [vmem:[#allocation2 + $0x100] sm:$0xff] %v1438_v14  ;;  %v1437_v25 = vmax.f32 %v993_v9, %v1008_v15  ;;  %v1017_v26 = vpop.f32.mrb[67].mxu0  ;;  %v1807_v27 = vmax.f32 %v1759_v16, 0.0  ;;  %v4013_v51 = vld [vmem:[%s13885_s3 + $0x7a0] sm:$0xff]  ;;  %v1023_v0 = vadd.f32 %v8405_v19, %v10605_v21  ;;  %v2411_v10 = vld [vmem:[%s13885_s3 + $0x3e8] sm:$0xff]  ;;  %v4032_v12 = vld [vmem:[%s13885_s3 + $0x838] sm:$0xff] }
 0x165   :  { %1856 = vst [vmem:[#allocation3 + $0x98] sm:$0xf] %v1808_v20  ;;  %v1018_v37 = vadd.f32 %v10605_v21, %v1017_v26  ;;  %v9141_v56 = vpack.c.bf16 %v4014_v52, %v4013_v51  ;;  %v2410_v5 = vld [vmem:[%s13885_s3 + $0x3e0] sm:$0xff]  ;;  %v9143_v16 = vpack.c.bf16 %v4032_v12, %v4031_v11  ;;  %v2429_v19 = vld [vmem:[%s13885_s3 + $0x478] sm:$0xff]  ;;  %v2412_v20 = vld [vmem:[%s13885_s3 + $0x3f0] sm:$0xff]  ;;  %v9153_v52 = vpack.c.bf16 %v4020_v46, %v4019_v45 }
 0x166   :  { %1509 = vst [vmem:[#allocation2 + $0xf8] sm:$0xff] %v1437_v25  ;;  %1855 = vst [vmem:[#allocation3 + $0x90] sm:$0xff] %v1807_v27  ;;  %v8901_v15 = vpack.c.bf16 %v2411_v10, %v2410_v5  ;;  %v8903_v24 = vpack.c.bf16 %v2429_v19, %v2428_v18  ;;  %v2413_v25 = vld [vmem:[%s13885_s3 + $0x3f8] sm:$0xff]  ;;  %v4033_v26 = vld [vmem:[%s13885_s3 + $0x840] sm:$0xff] }
 0x167   :  { %v8408_v38 = vpop.f32.mrb[68].mxu0  ;;  %9142 = vmatpush3.bf16.msra.mxu0 %v9141_v56  ;;  %v8905_v29 = vpack.c.bf16 %v2413_v25, %v2412_v20  ;;  %v4037_v56 = vld [vmem:[%s13885_s3 + $0x860] sm:$0xff]  ;;  %v4023_v11 = vld [vmem:[%s13885_s3 + $0x7f0] sm:$0xff]  ;;  %v4024_v12 = vld [vmem:[%s13885_s3 + $0x7f8] sm:$0xff] }
 0x168   :  { %v1033_v43 = vadd.f32 %v8408_v38, %v10605_v21  ;;  %v1027_v44 = vpop.f32.mrb[69].mxu0  ;;  %9144 = vmatprep.subr.bf16.mxu0 %v9143_v16  ;;  %v2430_v38 = vld [vmem:[%s13885_s3 + $0x480] sm:$0xff]  ;;  %v9161_v1 = vpack.c.bf16 %v4024_v12, %v4023_v11 }
 0x169   :  { %v1028_v60 = vadd.f32 %v10605_v21, %v1027_v44  ;;  %v11001_v40 = vpack.c.bf16 %v2431_v39, %v2430_v38  ;;  %v9151_v44 = vpack.c.bf16 %v4036_v42, %v4035_v41 }
 0x16a   :  { %v1439_v49 = vmax.f32 %v1018_v37, %v1033_v43  ;;  %v9149_v37 = vpack.c.bf16 %v4018_v32, %v4017_v31 }
 0x16b   :  { %v1592_v53 = vld [vmem:[#allocation2 + $0x100] ss:$2 sm:$0xf]  ;;  %v1688_v54 = vld [vmem:[#allocation2 + $0x101] ss:$2 sm:$0xf]  ;;  %9146 = vmatpush3.bf16.msra.mxu0 %v9145_v22 }
 0x16c   :  { %1511 = vst [vmem:[#allocation2 + $0x108] sm:$0xff] %v1439_v49  ;;  %v8411_v55 = vpop.f32.mrb[70].mxu0  ;;  %v1762_v57 = vmax.f32 %v1592_v53, %v1688_v54 }
 0x16d   :  { %v1590_v58 = vld [vmem:[#allocation2 + $0xf0] ss:$2 sm:$0xff]  ;;  %v1686_v59 = vld [vmem:[#allocation2 + $0xf1] ss:$2 sm:$0xff]  ;;  %v1043_v61 = vadd.f32 %v8411_v55, %v10605_v21  ;;  %v1037_v62 = vpop.f32.mrb[71].mxu0 }
 0x16e   :  { %v1942_v63 = vld [vmem:[#allocation3 + $0x91] sm:$0xff]  ;;  %v1038_v2 = vadd.f32 %v10605_v21, %v1037_v62  ;;  %v1761_v6 = vmax.f32 %v1590_v58, %v1686_v59  ;;  %v1810_v7 = vmax.f32 %v1762_v57, 0.0  ;;  %v8899_v21 = vpack.c.bf16 %v2427_v4, %v2426_v3  ;;  %v4021_v62 = vld [vmem:[%s13885_s3 + $0x7e0] sm:$0xff] }
 0x16f   :  { %3576 = vmatprep.mubr.f32.mxu0 %v1942_v63  ;;  %v1441_v8 = vmax.f32 %v1028_v60, %v1043_v61  ;;  %v10947_v9 = vpop.f32.mrb[72].mxu0  ;;  %v4038_v61 = vld [vmem:[%s13885_s3 + $0x868] sm:$0xff] }
 0x170   :  { %3577 = vmatmul.mubr.f32.gmra.mrb[158].mxu0 %v1807_v27  ;;  %v1440_v13 = vmax.f32 %v1023_v0, %v1038_v2  ;;  %v1047_v14 = vpop.f32.mrb[73].mxu0  ;;  %1858 = vst [vmem:[#allocation3 + $0xa8] sm:$0xf] %v1810_v7  ;;  %8900 = vmatprep.subr.bf16.mxu1 %v8899_v21  ;;  %v1809_v23 = vmax.f32 %v1761_v6, 0.0  ;;  %v4034_v27 = vld [vmem:[%s13885_s3 + $0x848] sm:$0xff]  ;;  %v1053_v58 = vadd.f32 %v10991_v33, %v10947_v9  ;;  %v4039_v9 = vld [vmem:[%s13885_s3 + $0x870] sm:$0xff] }
 0x171   :  { %1513 = vst [vmem:[#allocation2 + $0x118] sm:$0xff] %v1441_v8  ;;  %8902 = vmatpush3.bf16.msra.mxu1 %v8901_v15  ;;  %v9147_v30 = vpack.c.bf16 %v4034_v27, %v4033_v26  ;;  %v1048_v34 = vadd.f32 %v10991_v33, %v1047_v14  ;;  %v4022_v63 = vld [vmem:[%s13885_s3 + $0x7e8] sm:$0xff]  ;;  %v9155_v3 = vpack.c.bf16 %v4038_v61, %v4037_v56  ;;  %v4040_v21 = vld [vmem:[%s13885_s3 + $0x878] sm:$0xff] }
 0x172   :  { %1512 = vst [vmem:[#allocation2 + $0x110] sm:$0xff] %v1440_v13  ;;  %1857 = vst [vmem:[#allocation3 + $0xa0] sm:$0xff] %v1809_v23  ;;  %8904 = vmatprep.subr.bf16.mxu1 %v8903_v24  ;;  %v9157_v7 = vpack.c.bf16 %v4022_v63, %v4021_v62  ;;  %v9159_v10 = vpack.c.bf16 %v4040_v21, %v4039_v9 }
 0x173   :  { %v8417_v28 = vpop.f32.mrb[74].mxu0  ;;  %9148 = vmatprep.subr.bf16.mxu0 %v9147_v30 }
 0x174   :  { %v1063_v35 = vadd.f32 %v10991_v33, %v8417_v28  ;;  %v1057_v36 = vpop.f32.mrb[75].mxu0  ;;  %9150 = vmatpush3.bf16.msra.mxu0 %v9149_v37 }
 0x175   :  { %8906 = vmatpush3.bf16.msra.mxu1 %v8905_v29  ;;  %v1058_v50 = vadd.f32 %v10991_v33, %v1057_v36  ;;  %9152 = vmatprep.subr.bf16.mxu0 %v9151_v44 }
 0x176   :  { %v1442_v43 = vmax.f32 %v1048_v34, %v1063_v35  ;;  %8908 = vmatprep.subr.bf16.mxu1 %v11001_v40 }
 0x177   :  { %v8420_v47 = vpop.f32.mrb[76].mxu0 }
 0x178   :  { %v1596_v48 = vld [vmem:[#allocation2 + $0x118] ss:$2 sm:$0xf]  ;;  %v1692_v49 = vld [vmem:[#allocation2 + $0x119] ss:$2 sm:$0xf]  ;;  %v1073_v51 = vadd.f32 %v10991_v33, %v8420_v47  ;;  %9154 = vmatpush3.bf16.msra.mxu0 %v9153_v52 }
 0x179   :  { %1514 = vst [vmem:[#allocation2 + $0x120] sm:$0xff] %v1442_v43  ;;  %v1594_v53 = vld [vmem:[#allocation2 + $0x108] ss:$2 sm:$0xff]  ;;  %v1690_v54 = vld [vmem:[#allocation2 + $0x109] ss:$2 sm:$0xff]  ;;  %v1067_v55 = vpop.f32.mrb[77].mxu0  ;;  %v1764_v57 = vmax.f32 %v1596_v48, %v1692_v49  ;;  %9156 = vmatprep.subr.bf16.mxu0 %v9155_v3 }
 0x17a   :  { %v1444_v59 = vmax.f32 %v1058_v50, %v1073_v51  ;;  %v1068_v60 = vadd.f32 %v10991_v33, %v1067_v55  ;;  %v1763_v0 = vmax.f32 %v1594_v53, %v1690_v54 }
 0x17b   :  { %v8423_v2 = vpop.f32.mrb[78].mxu0  ;;  %v1812_v4 = vmax.f32 %v1764_v57, 0.0 }
 0x17c   :  { %1516 = vst [vmem:[#allocation2 + $0x130] sm:$0xff] %v1444_v59  ;;  %v1443_v5 = vmax.f32 %v1053_v58, %v1068_v60  ;;  %v1077_v6 = vpop.f32.mrb[79].mxu0  ;;  %v1811_v8 = vmax.f32 %v1763_v0, 0.0  ;;  %9158 = vmatpush3.bf16.msra.mxu0 %v9157_v7  ;;  %v1083_v28 = vadd.f32 %v10991_v33, %v8423_v2 }
 0x17d   :  { %1860 = vst [vmem:[#allocation3 + $0xb8] sm:$0xf] %v1812_v4  ;;  %v1078_v14 = vadd.f32 %v10991_v33, %v1077_v6  ;;  %9160 = vmatprep.subr.bf16.mxu0 %v9159_v10 }
 0x17e   :  { %1515 = vst [vmem:[#allocation2 + $0x128] sm:$0xff] %v1443_v5  ;;  %1859 = vst [vmem:[#allocation3 + $0xb0] sm:$0xff] %v1811_v8 }
 0x17f   :  { %v8426_v13 = vpop.f32.mrb[80].mxu0 }
 0x180   :  { %v1093_v15 = vadd.f32 %v10991_v33, %v8426_v13  ;;  %v1087_v16 = vpop.f32.mrb[81].mxu0  ;;  %9162 = vmatpush3.bf16.msra.mxu0 %v9161_v1 }
 0x181   :  { %v1088_v25 = vadd.f32 %v10991_v33, %v1087_v16 }
 0x182   :  { %v1445_v17 = vmax.f32 %v1078_v14, %v1093_v15 }
 0x183   :  { %v1600_v18 = vld [vmem:[#allocation2 + $0x130] ss:$2 sm:$0xf]  ;;  %v1696_v19 = vld [vmem:[#allocation2 + $0x131] ss:$2 sm:$0xf] }
 0x184   :  { %1517 = vst [vmem:[#allocation2 + $0x138] sm:$0xff] %v1445_v17  ;;  %v8429_v20 = vpop.f32.mrb[82].mxu0  ;;  %v1766_v22 = vmax.f32 %v1600_v18, %v1696_v19 }
 0x185   :  { %v1598_v23 = vld [vmem:[#allocation2 + $0x120] ss:$2 sm:$0xff]  ;;  %v1694_v24 = vld [vmem:[#allocation2 + $0x121] ss:$2 sm:$0xff]  ;;  %v1103_v26 = vadd.f32 %v10991_v33, %v8429_v20  ;;  %v1097_v27 = vpop.f32.mrb[83].mxu0 }
 0x186   :  { %v1098_v29 = vadd.f32 %v10991_v33, %v1097_v27  ;;  %v1765_v30 = vmax.f32 %v1598_v23, %v1694_v24  ;;  %v1814_v31 = vmax.f32 %v1766_v22, 0.0  ;;  %v4057_v23 = vld [vmem:[%s13885_s3 + $0x900] sm:$0xff]  ;;  %v4058_v24 = vld [vmem:[%s13885_s3 + $0x908] sm:$0xff] }
 0x187   :  { %v1447_v32 = vmax.f32 %v1088_v25, %v1103_v26  ;;  %v8432_v34 = vpop.f32.mrb[84].mxu0 }
 0x188   :  { %v1446_v35 = vmax.f32 %v1083_v28, %v1098_v29  ;;  %v1107_v36 = vpop.f32.mrb[85].mxu0  ;;  %v1813_v37 = vmax.f32 %v1765_v30, 0.0  ;;  %1862 = vst [vmem:[#allocation3 + $0xc8] sm:$0xf] %v1814_v31  ;;  %v1113_v53 = vadd.f32 %v10991_v33, %v8432_v34  ;;  %v9163_v28 = vpack.c.bf16 %v4058_v24, %v4057_v23 }
 0x189   :  { %1519 = vst [vmem:[#allocation2 + $0x148] sm:$0xff] %v1447_v32  ;;  %v1108_v39 = vadd.f32 %v10991_v33, %v1107_v36 }
 0x18a   :  { %1518 = vst [vmem:[#allocation2 + $0x140] sm:$0xff] %v1446_v35  ;;  %1861 = vst [vmem:[#allocation3 + $0xc0] sm:$0xff] %v1813_v37  ;;  %9164 = vmatprep.subr.bf16.mxu0 %v9163_v28 }
 0x18b   :  { %v8435_v38 = vpop.f32.mrb[86].mxu0 }
 0x18c   :  { %v1123_v41 = vadd.f32 %v10991_v33, %v8435_v38  ;;  %v1117_v42 = vpop.f32.mrb[87].mxu0 }
 0x18d   :  { %v1118_v47 = vadd.f32 %v10991_v33, %v1117_v42 }
 0x18e   :  { %v1448_v43 = vmax.f32 %v1108_v39, %v1123_v41 }
 0x18f   :  { %v8438_v44 = vpop.f32.mrb[88].mxu0 }
 0x190   :  { %v1604_v45 = vld [vmem:[#allocation2 + $0x148] ss:$2 sm:$0xf]  ;;  %v1700_v46 = vld [vmem:[#allocation2 + $0x149] ss:$2 sm:$0xf]  ;;  %v1133_v48 = vadd.f32 %v10991_v33, %v8438_v44 }
 0x191   :  { %1520 = vst [vmem:[#allocation2 + $0x150] sm:$0xff] %v1448_v43  ;;  %v1602_v49 = vld [vmem:[#allocation2 + $0x138] ss:$2 sm:$0xff]  ;;  %v1698_v50 = vld [vmem:[#allocation2 + $0x139] ss:$2 sm:$0xff]  ;;  %v1127_v51 = vpop.f32.mrb[89].mxu0  ;;  %v1768_v52 = vmax.f32 %v1604_v45, %v1700_v46 }
 0x192   :  { %v1450_v54 = vmax.f32 %v1118_v47, %v1133_v48  ;;  %v1128_v55 = vadd.f32 %v10991_v33, %v1127_v51  ;;  %v1767_v56 = vmax.f32 %v1602_v49, %v1698_v50 }
 0x193   :  { %v8441_v57 = vpop.f32.mrb[90].mxu0  ;;  %v1816_v58 = vmax.f32 %v1768_v52, 0.0 }
 0x194   :  { %1522 = vst [vmem:[#allocation2 + $0x160] sm:$0xff] %v1450_v54  ;;  %v1449_v59 = vmax.f32 %v1113_v53, %v1128_v55  ;;  %v1137_v60 = vpop.f32.mrb[91].mxu0  ;;  %v1815_v61 = vmax.f32 %v1767_v56, 0.0  ;;  %v1143_v13 = vadd.f32 %v10991_v33, %v8441_v57 }
 0x195   :  { %1864 = vst [vmem:[#allocation3 + $0xd8] sm:$0xf] %v1816_v58  ;;  %v1138_v63 = vadd.f32 %v10991_v33, %v1137_v60 }
 0x196   :  { %1521 = vst [vmem:[#allocation2 + $0x158] sm:$0xff] %v1449_v59  ;;  %1863 = vst [vmem:[#allocation3 + $0xd0] sm:$0xff] %v1815_v61 }
 0x197   :  { %v8444_v62 = vpop.f32.mrb[92].mxu0 }
 0x198   :  { %v1153_v0 = vadd.f32 %v10991_v33, %v8444_v62  ;;  %v1147_v2 = vpop.f32.mrb[93].mxu0 }
 0x199   :  { %v1148_v21 = vadd.f32 %v10991_v33, %v1147_v2 }
 0x19a   :  { %v1451_v3 = vmax.f32 %v1138_v63, %v1153_v0 }
 0x19b   :  { %v1608_v4 = vld [vmem:[#allocation2 + $0x160] ss:$2 sm:$0xf]  ;;  %v1704_v5 = vld [vmem:[#allocation2 + $0x161] ss:$2 sm:$0xf] }
 0x19c   :  { %1523 = vst [vmem:[#allocation2 + $0x168] sm:$0xff] %v1451_v3  ;;  %v8447_v6 = vpop.f32.mrb[94].mxu0  ;;  %v1770_v7 = vmax.f32 %v1608_v4, %v1704_v5 }
 0x19d   :  { %v1606_v8 = vld [vmem:[#allocation2 + $0x150] ss:$2 sm:$0xff]  ;;  %v1702_v9 = vld [vmem:[#allocation2 + $0x151] ss:$2 sm:$0xff]  ;;  %v1163_v10 = vadd.f32 %v10991_v33, %v8447_v6  ;;  %v1157_v11 = vpop.f32.mrb[95].mxu0 }
 0x19e   :  { %v1946_v12 = vld [vmem:[#allocation3 + $0xd1] sm:$0xff]  ;;  %v1158_v14 = vadd.f32 %v10991_v33, %v1157_v11  ;;  %v1769_v15 = vmax.f32 %v1606_v8, %v1702_v9  ;;  %v1818_v16 = vmax.f32 %v1770_v7, 0.0 }
 0x19f   :  { %2550 = vmatprep.mubr.f32.mxu1 %v1946_v12  ;;  %v1453_v1 = vmax.f32 %v1148_v21, %v1163_v10  ;;  %v8450_v17 = vpop.f32.mrb[96].mxu0 }
 0x1a0   :  { %2551 = vmatmul.mubr.f32.gmra.mrb[16].mxu1 %v1815_v61  ;;  %v1452_v18 = vmax.f32 %v1143_v13, %v1158_v14  ;;  %v1167_v19 = vpop.f32.mrb[97].mxu0  ;;  %v1817_v20 = vmax.f32 %v1769_v15, 0.0  ;;  %1866 = vst [vmem:[#allocation3 + $0xe8] sm:$0xf] %v1818_v16  ;;  %v1173_v39 = vadd.f32 %v10991_v33, %v8450_v17 }
 0x1a1   :  { %1525 = vst [vmem:[#allocation2 + $0x178] sm:$0xff] %v1453_v1  ;;  %v1168_v25 = vadd.f32 %v10991_v33, %v1167_v19 }
 0x1a2   :  { %1524 = vst [vmem:[#allocation2 + $0x170] sm:$0xff] %v1452_v18  ;;  %1865 = vst [vmem:[#allocation3 + $0xe0] sm:$0xff] %v1817_v20 }
 0x1a3   :  { %v8453_v22 = vpop.f32.mrb[98].mxu0 }
 0x1a4   :  { %v1183_v26 = vadd.f32 %v10991_v33, %v8453_v22  ;;  %v1177_v27 = vpop.f32.mrb[99].mxu0 }
 0x1a5   :  { %v1178_v34 = vadd.f32 %v10991_v33, %v1177_v27 }
 0x1a6   :  { %v1454_v29 = vmax.f32 %v1168_v25, %v1183_v26 }
 0x1a7   :  { %v8456_v30 = vpop.f32.mrb[100].mxu0 }
 0x1a8   :  { %v1612_v31 = vld [vmem:[#allocation2 + $0x178] ss:$2 sm:$0xf]  ;;  %v1708_v32 = vld [vmem:[#allocation2 + $0x179] ss:$2 sm:$0xf]  ;;  %v1193_v35 = vadd.f32 %v10991_v33, %v8456_v30 }
 0x1a9   :  { %1526 = vst [vmem:[#allocation2 + $0x180] sm:$0xff] %v1454_v29  ;;  %v1772_v36 = vmax.f32 %v1612_v31, %v1708_v32  ;;  %v1610_v37 = vld [vmem:[#allocation2 + $0x168] ss:$2 sm:$0xff]  ;;  %v1706_v38 = vld [vmem:[#allocation2 + $0x169] ss:$2 sm:$0xff]  ;;  %v1187_v41 = vpop.f32.mrb[101].mxu0 }
 0x1aa   :  { %v1947_v42 = vld [vmem:[#allocation3 + $0xe1] sm:$0xff]  ;;  %v1771_v43 = vmax.f32 %v1610_v37, %v1706_v38  ;;  %v1456_v44 = vmax.f32 %v1178_v34, %v1193_v35  ;;  %v1188_v45 = vadd.f32 %v10991_v33, %v1187_v41 }
 0x1ab   :  { %2555 = vmatprep.mubr.f32.mxu1 %v1947_v42  ;;  %3581 = vmatprep.mubr.f32.mxu0 %v1947_v42  ;;  %v8459_v46 = vpop.f32.mrb[102].mxu0  ;;  %v1820_v47 = vmax.f32 %v1772_v36, 0.0 }
 0x1ac   :  { %2556 = vmatmul.mubr.f32.gmra.mrb[18].mxu1 %v1817_v20  ;;  %3582 = vmatmul.mubr.f32.gmra.mrb[160].mxu0 %v1817_v20  ;;  %1528 = vst [vmem:[#allocation2 + $0x190] sm:$0xff] %v1456_v44  ;;  %v1455_v48 = vmax.f32 %v1173_v39, %v1188_v45  ;;  %v1197_v49 = vpop.f32.mrb[103].mxu0  ;;  %v11075_v50 = vmax.f32 %v1771_v43, 0.0  ;;  %v1203_v5 = vadd.f32 %v10991_v33, %v8459_v46 }
 0x1ad   :  { %1868 = vst [vmem:[#allocation3 + $0xf8] sm:$0xf] %v1820_v47  ;;  %v1198_v52 = vadd.f32 %v10991_v33, %v1197_v49 }
 0x1ae   :  { %1527 = vst [vmem:[#allocation2 + $0x188] sm:$0xff] %v1455_v48  ;;  %1867 = vst [vmem:[#allocation3 + $0xf0] sm:$0xff] %v11075_v50 }
 0x1af   :  { %v8462_v51 = vpop.f32.mrb[104].mxu0 }
 0x1b0   :  { %v1213_v53 = vadd.f32 %v10991_v33, %v8462_v51  ;;  %v1207_v54 = vpop.f32.mrb[105].mxu0 }
 0x1b1   :  { %v1208_v62 = vadd.f32 %v10991_v33, %v1207_v54 }
 0x1b2   :  { %v1457_v55 = vmax.f32 %v1198_v52, %v1213_v53 }
 0x1b3   :  { %v1616_v56 = vld [vmem:[#allocation2 + $0x190] ss:$2 sm:$0xf]  ;;  %v1712_v57 = vld [vmem:[#allocation2 + $0x191] ss:$2 sm:$0xf] }
 0x1b4   :  { %v1774_v58 = vmax.f32 %v1616_v56, %v1712_v57  ;;  %1529 = vst [vmem:[#allocation2 + $0x198] sm:$0xff] %v1457_v55  ;;  %v8465_v59 = vpop.f32.mrb[106].mxu0 }
 0x1b5   :  { %v1614_v60 = vld [vmem:[#allocation2 + $0x180] ss:$2 sm:$0xff]  ;;  %v1710_v61 = vld [vmem:[#allocation2 + $0x181] ss:$2 sm:$0xff]  ;;  %v1223_v63 = vadd.f32 %v10991_v33, %v8465_v59  ;;  %v1217_v0 = vpop.f32.mrb[107].mxu0  ;;  %v11082_v2 = vld [vmem:[#allocation3 + $0xf1] sm:$0xff] }
 0x1b6   :  { %v1822_v3 = vmax.f32 %v1774_v58, 0.0  ;;  %v1773_v4 = vmax.f32 %v1614_v60, %v1710_v61  ;;  %v1218_v6 = vadd.f32 %v10991_v33, %v1217_v0  ;;  %2560 = vmatprep.mubr.f32.mxu1 %v11082_v2  ;;  %3586 = vmatprep.mubr.f32.mxu0 %v11082_v2 }
 0x1b7   :  { %v1459_v7 = vmax.f32 %v1208_v62, %v1223_v63  ;;  %2561 = vmatmul.mubr.f32.gmra.mrb[20].mxu1 %v11075_v50  ;;  %3587 = vmatmul.mubr.f32.gmra.mrb[162].mxu0 %v11075_v50  ;;  %v8468_v8 = vpop.f32.mrb[108].mxu0 }
 0x1b8   :  { %1870 = vst [vmem:[#allocation3 + $0x108] sm:$0xf] %v1822_v3  ;;  %v11090_v9 = vmax.f32 %v1773_v4, 0.0  ;;  %v1458_v21 = vmax.f32 %v1203_v5, %v1218_v6  ;;  %v1227_v10 = vpop.f32.mrb[109].mxu0  ;;  %v1233_v24 = vadd.f32 %v10991_v33, %v8468_v8 }
 0x1b9   :  { %1531 = vst [vmem:[#allocation2 + $0x1a8] sm:$0xff] %v1459_v7  ;;  %v1228_v12 = vadd.f32 %v10991_v33, %v1227_v10 }
 0x1ba   :  { %1869 = vst [vmem:[#allocation3 + $0x100] sm:$0xff] %v11090_v9  ;;  %1530 = vst [vmem:[#allocation2 + $0x1a0] sm:$0xff] %v1458_v21 }
 0x1bb   :  { %v8471_v11 = vpop.f32.mrb[110].mxu0 }
 0x1bc   :  { %v1243_v13 = vadd.f32 %v10991_v33, %v8471_v11  ;;  %v1237_v14 = vpop.f32.mrb[111].mxu0 }
 0x1bd   :  { %v1238_v18 = vadd.f32 %v10991_v33, %v1237_v14 }
 0x1be   :  { %v1460_v15 = vmax.f32 %v1228_v12, %v1243_v13 }
 0x1bf   :  { %v8474_v16 = vpop.f32.mrb[112].mxu0 }
 0x1c0   :  { %v1620_v1 = vld [vmem:[#allocation2 + $0x1a8] ss:$2 sm:$0xf]  ;;  %v1716_v17 = vld [vmem:[#allocation2 + $0x1a9] ss:$2 sm:$0xf]  ;;  %v1253_v19 = vadd.f32 %v10991_v33, %v8474_v16 }
 0x1c1   :  { %1532 = vst [vmem:[#allocation2 + $0x1b0] sm:$0xff] %v1460_v15  ;;  %v1776_v20 = vmax.f32 %v1620_v1, %v1716_v17  ;;  %v1618_v22 = vld [vmem:[#allocation2 + $0x198] ss:$2 sm:$0xff]  ;;  %v1714_v23 = vld [vmem:[#allocation2 + $0x199] ss:$2 sm:$0xff]  ;;  %v1247_v25 = vpop.f32.mrb[113].mxu0 }
 0x1c2   :  { %v11098_v26 = vld [vmem:[#allocation3 + $0x101] sm:$0xff]  ;;  %v1775_v27 = vmax.f32 %v1618_v22, %v1714_v23  ;;  %v1462_v28 = vmax.f32 %v1238_v18, %v1253_v19  ;;  %v1248_v29 = vadd.f32 %v10991_v33, %v1247_v25 }
 0x1c3   :  { %2565 = vmatprep.mubr.f32.mxu1 %v11098_v26  ;;  %3591 = vmatprep.mubr.f32.mxu0 %v11098_v26  ;;  %v1824_v30 = vmax.f32 %v1776_v20, 0.0  ;;  %v8477_v31 = vpop.f32.mrb[114].mxu0 }
 0x1c4   :  { %2566 = vmatmul.mubr.f32.gmra.mrb[22].mxu1 %v11090_v9  ;;  %3592 = vmatmul.mubr.f32.gmra.mrb[164].mxu0 %v11090_v9  ;;  %v11105_v32 = vmax.f32 %v1775_v27, 0.0  ;;  %1534 = vst [vmem:[#allocation2 + $0x1c0] sm:$0xff] %v1462_v28  ;;  %v1461_v34 = vmax.f32 %v1233_v24, %v1248_v29  ;;  %v1257_v35 = vpop.f32.mrb[115].mxu0  ;;  %v1263_v55 = vadd.f32 %v10991_v33, %v8477_v31 }
 0x1c5   :  { %1872 = vst [vmem:[#allocation3 + $0x118] sm:$0xf] %v1824_v30  ;;  %v1258_v37 = vadd.f32 %v10991_v33, %v1257_v35 }
 0x1c6   :  { %1871 = vst [vmem:[#allocation3 + $0x110] sm:$0xff] %v11105_v32  ;;  %1533 = vst [vmem:[#allocation2 + $0x1b8] sm:$0xff] %v1461_v34 }
 0x1c7   :  { %v8480_v36 = vpop.f32.mrb[116].mxu0 }
 0x1c8   :  { %v1273_v38 = vadd.f32 %v10991_v33, %v8480_v36  ;;  %v1267_v39 = vpop.f32.mrb[117].mxu0 }
 0x1c9   :  { %v1268_v48 = vadd.f32 %v10991_v33, %v1267_v39 }
 0x1ca   :  { %v1463_v41 = vmax.f32 %v1258_v37, %v1273_v38 }
 0x1cb   :  { %v1624_v42 = vld [vmem:[#allocation2 + $0x1c0] ss:$2 sm:$0xf]  ;;  %v1720_v43 = vld [vmem:[#allocation2 + $0x1c1] ss:$2 sm:$0xf] }
 0x1cc   :  { %v1778_v44 = vmax.f32 %v1624_v42, %v1720_v43  ;;  %1535 = vst [vmem:[#allocation2 + $0x1c8] sm:$0xff] %v1463_v41  ;;  %v8483_v45 = vpop.f32.mrb[118].mxu0 }
 0x1cd   :  { %v1622_v46 = vld [vmem:[#allocation2 + $0x1b0] ss:$2 sm:$0xff]  ;;  %v1718_v47 = vld [vmem:[#allocation2 + $0x1b1] ss:$2 sm:$0xff]  ;;  %v1283_v49 = vadd.f32 %v10991_v33, %v8483_v45  ;;  %v1277_v51 = vpop.f32.mrb[119].mxu0 }
 0x1ce   :  { %v11112_v52 = vld [vmem:[#allocation3 + $0x111] sm:$0xff]  ;;  %v1826_v53 = vmax.f32 %v1778_v44, 0.0  ;;  %v1777_v54 = vmax.f32 %v1622_v46, %v1718_v47  ;;  %v1278_v56 = vadd.f32 %v10991_v33, %v1277_v51 }
 0x1cf   :  { %2570 = vmatprep.mubr.f32.mxu1 %v11112_v52  ;;  %3596 = vmatprep.mubr.f32.mxu0 %v11112_v52  ;;  %v1465_v57 = vmax.f32 %v1268_v48, %v1283_v49  ;;  %v8486_v58 = vpop.f32.mrb[120].mxu0 }
 0x1d0   :  { %2571 = vmatmul.mubr.f32.gmra.mrb[24].mxu1 %v11105_v32  ;;  %3597 = vmatmul.mubr.f32.gmra.mrb[166].mxu0 %v11105_v32  ;;  %1874 = vst [vmem:[#allocation3 + $0x128] sm:$0xf] %v1826_v53  ;;  %v11120_v59 = vmax.f32 %v1777_v54, 0.0  ;;  %v1464_v60 = vmax.f32 %v1263_v55, %v1278_v56  ;;  %v1287_v61 = vpop.f32.mrb[121].mxu0  ;;  %v1293_v13 = vadd.f32 %v10991_v33, %v8486_v58 }
 0x1d1   :  { %1537 = vst [vmem:[#allocation2 + $0x1d8] sm:$0xff] %v1465_v57  ;;  %v1288_v63 = vadd.f32 %v10991_v33, %v1287_v61 }
 0x1d2   :  { %1873 = vst [vmem:[#allocation3 + $0x120] sm:$0xff] %v11120_v59  ;;  %1536 = vst [vmem:[#allocation2 + $0x1d0] sm:$0xff] %v1464_v60 }
 0x1d3   :  { %v8489_v62 = vpop.f32.mrb[122].mxu0 }
 0x1d4   :  { %v1303_v0 = vadd.f32 %v10991_v33, %v8489_v62  ;;  %v1297_v3 = vpop.f32.mrb[123].mxu0 }
 0x1d5   :  { %v1298_v8 = vadd.f32 %v10991_v33, %v1297_v3 }
 0x1d6   :  { %v1466_v4 = vmax.f32 %v1288_v63, %v1303_v0 }
 0x1d7   :  { %v8492_v5 = vpop.f32.mrb[124].mxu0 }
 0x1d8   :  { %v1628_v6 = vld [vmem:[#allocation2 + $0x1d8] ss:$2 sm:$0xf]  ;;  %v1724_v7 = vld [vmem:[#allocation2 + $0x1d9] ss:$2 sm:$0xf]  ;;  %v1313_v21 = vadd.f32 %v10991_v33, %v8492_v5 }
 0x1d9   :  { %1538 = vst [vmem:[#allocation2 + $0x1e0] sm:$0xff] %v1466_v4  ;;  %v1780_v10 = vmax.f32 %v1628_v6, %v1724_v7  ;;  %v1626_v11 = vld [vmem:[#allocation2 + $0x1c8] ss:$2 sm:$0xff]  ;;  %v1722_v12 = vld [vmem:[#allocation2 + $0x1c9] ss:$2 sm:$0xff]  ;;  %v1307_v14 = vpop.f32.mrb[125].mxu0 }
 0x1da   :  { %v11128_v15 = vld [vmem:[#allocation3 + $0x121] sm:$0xff]  ;;  %v1779_v16 = vmax.f32 %v1626_v11, %v1722_v12  ;;  %v1468_v1 = vmax.f32 %v1298_v8, %v1313_v21  ;;  %v1308_v17 = vadd.f32 %v10991_v33, %v1307_v14 }
 0x1db   :  { %2575 = vmatprep.mubr.f32.mxu1 %v11128_v15  ;;  %3601 = vmatprep.mubr.f32.mxu0 %v11128_v15  ;;  %v1828_v18 = vmax.f32 %v1780_v10, 0.0  ;;  %v8495_v19 = vpop.f32.mrb[126].mxu0 }
 0x1dc   :  { %2576 = vmatmul.mubr.f32.gmra.mrb[26].mxu1 %v11120_v59  ;;  %3602 = vmatmul.mubr.f32.gmra.mrb[168].mxu0 %v11120_v59  ;;  %v11135_v20 = vmax.f32 %v1779_v16, 0.0  ;;  %1540 = vst [vmem:[#allocation2 + $0x1f0] sm:$0xff] %v1468_v1  ;;  %v1467_v22 = vmax.f32 %v1293_v13, %v1308_v17  ;;  %v1317_v23 = vpop.f32.mrb[127].mxu0  ;;  %v1323_v37 = vadd.f32 %v10991_v33, %v8495_v19  ;;  %v2432_v17 = vld [vmem:[%s13885_s3 + $0x490] sm:$0xff] }
 0x1dd   :  { %1876 = vst [vmem:[#allocation3 + $0x138] sm:$0xf] %v1828_v18  ;;  %v1318_v24 = vadd.f32 %v10991_v33, %v1317_v23  ;;  %v2433_v18 = vld [vmem:[%s13885_s3 + $0x498] sm:$0xff] }
 0x1de   :  { %1875 = vst [vmem:[#allocation3 + $0x130] sm:$0xff] %v11135_v20  ;;  %1539 = vst [vmem:[#allocation2 + $0x1e8] sm:$0xff] %v1467_v22  ;;  %v2030_v22 = vld [vmem:[#allocation3 + $0x13] sm:$0xff] }
 0x1df   :  { %v8498_v25 = vpop.f32.mrb[128].mxu0 }
 0x1e0   :  { %v1333_v27 = vadd.f32 %v10991_v33, %v8498_v25  ;;  %v1327_v28 = vpop.f32.mrb[129].mxu0 }
 0x1e1   :  { %v1328_v35 = vadd.f32 %v10991_v33, %v1327_v28 }
 0x1e2   :  { %v1469_v29 = vmax.f32 %v1318_v24, %v1333_v27  ;;  %v7071_v30 = vpop.f32.mrb[0].mxu1 }
 0x1e3   :  { %v1632_v31 = vld [vmem:[#allocation2 + $0x1f0] ss:$2 sm:$0xf]  ;;  %v1728_v34 = vld [vmem:[#allocation2 + $0x1f1] ss:$2 sm:$0xf] }
 0x1e4   :  { %v1782_v36 = vmax.f32 %v1632_v31, %v1728_v34  ;;  %1541 = vst [vmem:[#allocation2 + $0x1f8] sm:$0xff] %v1469_v29  ;;  %v7072_v38 = vpop.f32.mrb[1].mxu1  ;;  %v8501_v39 = vpop.f32.mrb[130].mxu0  ;;  %v8911_v29 = vpack.c.bf16 %v2433_v18, %v2432_v17  ;;  %v2434_v34 = vld [vmem:[%s13885_s3 + $0x4a0] sm:$0xff]  ;;  %v4059_v17 = vld [vmem:[%s13885_s3 + $0x910] sm:$0xff]  ;;  %v4060_v18 = vld [vmem:[%s13885_s3 + $0x918] sm:$0xff] }
 0x1e5   :  { %v1630_v41 = vld [vmem:[#allocation2 + $0x1e0] ss:$2 sm:$0xff]  ;;  %v1726_v42 = vld [vmem:[#allocation2 + $0x1e1] ss:$2 sm:$0xff]  ;;  %v11142_v43 = vadd.f32 %v7072_v38, %v7071_v30  ;;  %v1343_v44 = vadd.f32 %v10991_v33, %v8501_v39  ;;  %v1337_v45 = vpop.f32.mrb[131].mxu0  ;;  %v11145_v46 = vld [vmem:[#allocation3 + $0x131] sm:$0xff] }
 0x1e6   :  { %v1781_v47 = vmax.f32 %v1630_v41, %v1726_v42  ;;  %v1338_v48 = vadd.f32 %v10991_v33, %v1337_v45  ;;  %2580 = vmatprep.mubr.f32.mxu1 %v11145_v46  ;;  %3606 = vmatprep.mubr.f32.mxu0 %v11145_v46  ;;  %v1830_v49 = vmax.f32 %v1782_v36, 0.0  ;;  %v1982_v30 = vld [vmem:[#allocation3 + $0x12] sm:$0xff]  ;;  %v2031_v36 = vld [vmem:[#allocation3 + $0x23] sm:$0xff] }
 0x1e7   :  { %v1471_v51 = vmax.f32 %v1328_v35, %v1343_v44  ;;  %2581 = vmatmul.mubr.f32.gmra.mrb[28].mxu1 %v11135_v20  ;;  %3607 = vmatmul.mubr.f32.gmra.mrb[170].mxu0 %v11135_v20  ;;  %v8504_v53 = vpop.f32.mrb[132].mxu0  ;;  %v2435_v35 = vld [vmem:[%s13885_s3 + $0x4a8] sm:$0xff] }
 0x1e8   :  { %v1470_v54 = vmax.f32 %v1323_v37, %v1338_v48  ;;  %v11152_v55 = vmax.f32 %v1781_v47, 0.0  ;;  %1878 = vst [vmem:[#allocation3 + $0x148] sm:$0xf] %v1830_v49  ;;  %v1347_v56 = vpop.f32.mrb[133].mxu0  ;;  %v1353_v8 = vadd.f32 %v10991_v33, %v8504_v53  ;;  %v1983_v41 = vld [vmem:[#allocation3 + $0x22] sm:$0xff]  ;;  %v8915_v42 = vpack.c.bf16 %v2435_v35, %v2434_v34  ;;  %v11187_v47 = vld [vmem:[#allocation3 + $0x33] sm:$0xff] }
 0x1e9   :  { %1543 = vst [vmem:[#allocation2 + $0x208] sm:$0xff] %v1471_v51  ;;  %v1348_v57 = vadd.f32 %v10991_v33, %v1347_v56  ;;  %v2436_v48 = vld [vmem:[%s13885_s3 + $0x4b0] sm:$0xff]  ;;  %v2437_v49 = vld [vmem:[%s13885_s3 + $0x4b8] sm:$0xff]  ;;  %v9167_v35 = vpack.c.bf16 %v4060_v18, %v4059_v17 }
 0x1ea   :  { %1542 = vst [vmem:[#allocation2 + $0x200] sm:$0xff] %v1470_v54  ;;  %1877 = vst [vmem:[#allocation3 + $0x140] sm:$0xff] %v11152_v55  ;;  %v2440_v34 = vld [vmem:[%s13885_s3 + $0x4d0] sm:$0xff] }
 0x1eb   :  { %v8507_v58 = vpop.f32.mrb[134].mxu0 }
 0x1ec   :  { %v1363_v60 = vadd.f32 %v10991_v33, %v8507_v58  ;;  %v1357_v61 = vpop.f32.mrb[135].mxu0  ;;  %v11198_v58 = vld [vmem:[#allocation3 + $0x32] sm:$0xff] }
 0x1ed   :  { %v1358_v0 = vadd.f32 %v10991_v33, %v1357_v61 }
 0x1ee   :  { %v7074_v62 = vpop.f32.mrb[2].mxu1  ;;  %v1472_v63 = vmax.f32 %v1348_v57, %v1363_v60 }
 0x1ef   :  { %v7075_v3 = vpop.f32.mrb[3].mxu1  ;;  %v8510_v4 = vpop.f32.mrb[136].mxu0 }
 0x1f0   :  { %v1636_v5 = vld [vmem:[#allocation2 + $0x208] ss:$2 sm:$0xf]  ;;  %v1732_v6 = vld [vmem:[#allocation2 + $0x209] ss:$2 sm:$0xf]  ;;  %v11158_v7 = vadd.f32 %v7075_v3, %v7074_v62  ;;  %v1373_v21 = vadd.f32 %v10991_v33, %v8510_v4 }
 0x1f1   :  { %1544 = vst [vmem:[#allocation2 + $0x210] sm:$0xff] %v1472_v63  ;;  %v1634_v10 = vld [vmem:[#allocation2 + $0x1f8] ss:$2 sm:$0xff]  ;;  %v1730_v11 = vld [vmem:[#allocation2 + $0x1f9] ss:$2 sm:$0xff]  ;;  %v1367_v13 = vpop.f32.mrb[137].mxu0  ;;  %v1784_v14 = vmax.f32 %v1636_v5, %v1732_v6 }
 0x1f2   :  { %v11162_v12 = vld [vmem:[#allocation3 + $0x141] sm:$0xff]  ;;  %v1474_v16 = vmax.f32 %v1358_v0, %v1373_v21  ;;  %v1368_v1 = vadd.f32 %v10991_v33, %v1367_v13  ;;  %v1783_v19 = vmax.f32 %v1634_v10, %v1730_v11 }
 0x1f3   :  { %2585 = vmatprep.mubr.f32.mxu1 %v11162_v12  ;;  %3611 = vmatprep.mubr.f32.mxu0 %v11162_v12  ;;  %v8513_v23 = vpop.f32.mrb[138].mxu0  ;;  %v1832_v24 = vmax.f32 %v1784_v14, 0.0  ;;  %v11205_v5 = vld [vmem:[#allocation3 + $0x43] sm:$0xff] }
 0x1f4   :  { %2586 = vmatmul.mubr.f32.gmra.mrb[30].mxu1 %v11152_v55  ;;  %3612 = vmatmul.mubr.f32.gmra.mrb[172].mxu0 %v11152_v55  ;;  %1546 = vst [vmem:[#allocation2 + $0x220] sm:$0xff] %v1474_v16  ;;  %v1473_v25 = vmax.f32 %v1353_v8, %v1368_v1  ;;  %v1377_v27 = vpop.f32.mrb[139].mxu0  ;;  %v11175_v28 = vmax.f32 %v1783_v19, 0.0  ;;  %v1383_v54 = vadd.f32 %v10991_v33, %v8513_v23  ;;  %v2438_v21 = vld [vmem:[%s13885_s3 + $0x4c0] sm:$0xff]  ;;  %v4042_v11 = vld [vmem:[%s13885_s3 + $0x888] sm:$0xff] }
 0x1f5   :  { %2655 = vmatprep.mubr.f32.mxu1 %v2030_v22  ;;  %1880 = vst [vmem:[#allocation3 + $0x158] sm:$0xf] %v1832_v24  ;;  %v1378_v31 = vadd.f32 %v10991_v33, %v1377_v27  ;;  %v8919_v8 = vpack.c.bf16 %v2437_v49, %v2436_v48  ;;  %v4041_v10 = vld [vmem:[%s13885_s3 + $0x880] sm:$0xff]  ;;  %v2439_v1 = vld [vmem:[%s13885_s3 + $0x4c8] sm:$0xff]  ;;  %v11230_v22 = vld [vmem:[#allocation3 + $0x31] sm:$0xff] }
 0x1f6   :  { %1545 = vst [vmem:[#allocation2 + $0x218] sm:$0xff] %v1473_v25  ;;  %1879 = vst [vmem:[#allocation3 + $0x150] sm:$0xff] %v11175_v28  ;;  %v11237_v27 = vld [vmem:[#allocation3 + $0x42] sm:$0xff] }
 0x1f7   :  { %v8516_v37 = vpop.f32.mrb[140].mxu0 }
 0x1f8   :  { %2656 = vmatmul.mubr.f32.vlgmr.msra.gmra.mrb[32].mxu1 %v1982_v30  ;;  %v1393_v38 = vadd.f32 %v10991_v33, %v8516_v37  ;;  %v1387_v39 = vpop.f32.mrb[141].mxu0  ;;  %v9165_v30 = vpack.c.bf16 %v4042_v11, %v4041_v10  ;;  %v4044_v37 = vld [vmem:[%s13885_s3 + $0x898] sm:$0xff] }
 0x1f9   :  { %8910 = vmatpush3.bf16.msra.mxu1 %v11001_v40  ;;  %2660 = vmatprep.mubr.f32.mxu1 %v2031_v36  ;;  %v1388_v53 = vadd.f32 %v10991_v33, %v1387_v39  ;;  %v4043_v36 = vld [vmem:[%s13885_s3 + $0x890] sm:$0xff]  ;;  %v4064_v10 = vld [vmem:[%s13885_s3 + $0x938] sm:$0xff] }
 0x1fa   :  { %8912 = vmatprep.subr.bf16.mxu1 %v8911_v29  ;;  %v7077_v44 = vpop.f32.mrb[4].mxu1  ;;  %v1475_v45 = vmax.f32 %v1378_v31, %v1393_v38  ;;  %v8923_v31 = vpack.c.bf16 %v2439_v1, %v2438_v21  ;;  %v11252_v38 = vld [vmem:[#allocation3 + $0x30] sm:$0xff] }
 0x1fb   :  { %v1640_v40 = vld [vmem:[#allocation2 + $0x220] ss:$2 sm:$0xf]  ;;  %v1736_v51 = vld [vmem:[#allocation2 + $0x221] ss:$2 sm:$0xf] }
 0x1fc   :  { %2661 = vmatmul.mubr.f32.gmra.mrb[34].mxu1 %v1983_v41  ;;  %v7078_v56 = vpop.f32.mrb[5].mxu1  ;;  %1547 = vst [vmem:[#allocation2 + $0x228] sm:$0xff] %v1475_v45  ;;  %v8519_v57 = vpop.f32.mrb[142].mxu0  ;;  %v1786_v60 = vmax.f32 %v1640_v40, %v1736_v51  ;;  %v2441_v41 = vld [vmem:[%s13885_s3 + $0x4d8] sm:$0xff]  ;;  %v11265_v45 = vld [vmem:[#allocation3 + $0x41] sm:$0xff]  ;;  %v4063_v21 = vld [vmem:[%s13885_s3 + $0x930] sm:$0xff] }
 0x1fd   :  { %2665 = vmatprep.mubr.f32.mxu1 %v11187_v47  ;;  %8914 = vmatpush3.bf16.msra.mxu1 %v8911_v29  ;;  %v1638_v61 = vld [vmem:[#allocation2 + $0x210] ss:$2 sm:$0xff]  ;;  %v1734_v62 = vld [vmem:[#allocation2 + $0x211] ss:$2 sm:$0xff]  ;;  %v11200_v63 = vadd.f32 %v7078_v56, %v7077_v44  ;;  %v1403_v0 = vadd.f32 %v10991_v33, %v8519_v57  ;;  %v1397_v4 = vpop.f32.mrb[143].mxu0  ;;  %v4062_v44 = vld [vmem:[%s13885_s3 + $0x928] sm:$0xff]  ;;  %v8927_v56 = vpack.c.bf16 %v2441_v41, %v2440_v34 }
 0x1fe   :  { %v11203_v3 = vld [vmem:[#allocation3 + $0x151] sm:$0xff]  ;;  %8916 = vmatprep.subr.bf16.mxu1 %v8915_v42  ;;  %v1398_v6 = vadd.f32 %v10991_v33, %v1397_v4  ;;  %v1785_v13 = vmax.f32 %v1638_v61, %v1734_v62  ;;  %v1834_v14 = vmax.f32 %v1786_v60, 0.0  ;;  %v11272_v51 = vld [vmem:[#allocation3 + $0x63] sm:$0xff] }
 0x1ff   :  { %3616 = vmatprep.mubr.f32.mxu0 %v11203_v3  ;;  %v1477_v16 = vmax.f32 %v1388_v53, %v1403_v0  ;;  %v7455_v33 = vpop.f32.mrb[144].mxu0  ;;  %v11239_v29 = vld [vmem:[#allocation3 + $0x53] sm:$0xff]  ;;  %v9169_v53 = vpack.c.bf16 %v4044_v37, %v4043_v36  ;;  %v2442_v57 = vld [vmem:[%s13885_s3 + $0x4e0] sm:$0xff]  ;;  %v4046_v62 = vld [vmem:[%s13885_s3 + $0x8a8] sm:$0xff] }
 0x200   :  { %2666 = vmatmul.mubr.f32.gmra.mrb[36].mxu1 %v11198_v58  ;;  %3617 = vmatmul.mubr.f32.gmra.mrb[174].mxu0 %v11175_v28  ;;  %v1476_v19 = vmax.f32 %v1383_v54, %v1398_v6  ;;  %v7456_v23 = vpop.f32.mrb[145].mxu0  ;;  %v11233_v24 = vmax.f32 %v1785_v13, 0.0  ;;  %1882 = vst [vmem:[#allocation3 + $0x168] sm:$0xf] %v1834_v14  ;;  %v11270_v40 = vld [vmem:[#allocation3 + $0x52] sm:$0xff]  ;;  %v4045_v61 = vld [vmem:[%s13885_s3 + $0x8a0] sm:$0xff] }
 0x201   :  { %2670 = vmatprep.mubr.f32.mxu1 %v11205_v5  ;;  %4153 = vmatprep.mubr.f32.mxu0 %v11230_v22  ;;  %1549 = vst [vmem:[#allocation2 + $0x238] sm:$0xff] %v1477_v16  ;;  %v11235_v25 = vadd.f32 %v7456_v23, %v7455_v33  ;;  %v11284_v4 = vld [vmem:[#allocation3 + $0x40] sm:$0xff]  ;;  %v11299_v13 = vld [vmem:[#allocation3 + $0x51] sm:$0xff]  ;;  %v9173_v1 = vpack.c.bf16 %v4046_v62, %v4045_v61  ;;  %v4066_v37 = vld [vmem:[%s13885_s3 + $0x948] sm:$0xff] }
 0x202   :  { %8918 = vmatpush3.bf16.msra.mxu1 %v8915_v42  ;;  %1548 = vst [vmem:[#allocation2 + $0x230] sm:$0xff] %v1476_v19  ;;  %1881 = vst [vmem:[#allocation3 + $0x160] sm:$0xff] %v11233_v24  ;;  %v4061_v42 = vld [vmem:[%s13885_s3 + $0x920] sm:$0xff]  ;;  %v11304_v33 = vld [vmem:[#allocation3 + $0x73] sm:$0xff]  ;;  %v9175_v23 = vpack.c.bf16 %v4064_v10, %v4063_v21 }
 0x203   :  { %13902 = vst [vmem:[#allocation11_spill] sm:$0xff] %v11235_v25  ;;  %8920 = vmatprep.subr.bf16.mxu1 %v8919_v8  ;;  %v7458_v39 = vpop.f32.mrb[146].mxu0  ;;  %v9171_v60 = vpack.c.bf16 %v4062_v44, %v4061_v42  ;;  %v11302_v16 = vld [vmem:[#allocation3 + $0x62] sm:$0xff]  ;;  %v2444_v19 = vld [vmem:[%s13885_s3 + $0x4f0] sm:$0xff] }
 0x204   :  { %2671 = vmatmul.mubr.f32.gmra.mrb[38].mxu1 %v11237_v27  ;;  %4154 = vmatmul.mubr.f32.vlgmr.msra.gmra.mrb[176].mxu0 %v11252_v38  ;;  %v7459_v48 = vpop.f32.mrb[147].mxu0  ;;  %v11318_v34 = vld [vmem:[#allocation3 + $0x50] sm:$0xff]  ;;  %v4065_v36 = vld [vmem:[%s13885_s3 + $0x940] sm:$0xff]  ;;  %v2222_v61 = vld [vmem:[%s13885_s3 + $0x88] sm:$0xff] }
 0x205   :  { %2675 = vmatprep.mubr.f32.mxu1 %v11239_v29  ;;  %4158 = vmatprep.mubr.f32.mxu0 %v11265_v45  ;;  %v11268_v49 = vadd.f32 %v7459_v48, %v7458_v39  ;;  %v11331_v39 = vld [vmem:[#allocation3 + $0x61] sm:$0xff]  ;;  %v11334_v41 = vld [vmem:[#allocation3 + $0x72] sm:$0xff] }
 0x206   :  { %8922 = vmatpush3.bf16.msra.mxu1 %v8919_v8  ;;  %9166 = vmatpush3.bf16.msra.mxu0 %v9165_v30  ;;  %v2443_v8 = vld [vmem:[%s13885_s3 + $0x4e8] sm:$0xff]  ;;  %v4047_v30 = vld [vmem:[%s13885_s3 + $0x8b0] sm:$0xff] }
 0x207   :  { %13903 = vst [vmem:[#allocation12_spill] sm:$0xff] %v11268_v49  ;;  %v7080_v54 = vpop.f32.mrb[6].mxu1  ;;  %8924 = vmatprep.subr.bf16.mxu1 %v8923_v31  ;;  %9168 = vmatprep.subr.bf16.mxu0 %v9167_v35  ;;  %v7461_v6 = vpop.f32.mrb[148].mxu0  ;;  %v8931_v18 = vpack.c.bf16 %v2443_v8, %v2442_v57  ;;  %v2445_v35 = vld [vmem:[%s13885_s3 + $0x4f8] sm:$0xff]  ;;  %v11336_v42 = vld [vmem:[#allocation3 + $0x83] sm:$0xff]  ;;  %v4067_v62 = vld [vmem:[%s13885_s3 + $0x950] sm:$0xff] }
 0x208   :  { %v7081_v0 = vpop.f32.mrb[7].mxu1  ;;  %2676 = vmatmul.mubr.f32.gmra.mrb[40].mxu1 %v11270_v40  ;;  %4159 = vmatmul.mubr.f32.gmra.mrb[178].mxu0 %v11284_v4  ;;  %v7462_v14 = vpop.f32.mrb[149].mxu0  ;;  %v8935_v48 = vpack.c.bf16 %v2445_v35, %v2444_v19  ;;  %v4050_v57 = vld [vmem:[%s13885_s3 + $0x8c8] sm:$0xff]  ;;  %v11373_v35 = vld [vmem:[#allocation3 + $0x70] sm:$0xff] }
 0x209   :  { %v11296_v11 = vadd.f32 %v7081_v0, %v7080_v54  ;;  %2680 = vmatprep.mubr.f32.mxu1 %v11272_v51  ;;  %4163 = vmatprep.mubr.f32.mxu0 %v11299_v13  ;;  %v11306_v17 = vadd.f32 %v7462_v14, %v7461_v6  ;;  %v4049_v54 = vld [vmem:[%s13885_s3 + $0x8c0] sm:$0xff]  ;;  %v4068_v0 = vld [vmem:[%s13885_s3 + $0x958] sm:$0xff] }
 0x20a   :  { %8926 = vmatpush3.bf16.msra.mxu1 %v8923_v31  ;;  %9170 = vmatpush3.bf16.msra.mxu0 %v9169_v53  ;;  %v4048_v31 = vld [vmem:[%s13885_s3 + $0x8b8] sm:$0xff]  ;;  %v9179_v53 = vpack.c.bf16 %v4066_v37, %v4065_v36  ;;  %v9181_v8 = vpack.c.bf16 %v4050_v57, %v4049_v54  ;;  %v11364_v14 = vld [vmem:[#allocation3 + $0x82] sm:$0xff]  ;;  %v9183_v19 = vpack.c.bf16 %v4068_v0, %v4067_v62 }
 0x20b   :  { %13904 = vst [vmem:[#allocation13_spill] sm:$0xff] %v11306_v17  ;;  %8928 = vmatprep.subr.bf16.mxu1 %v8927_v56  ;;  %9172 = vmatprep.subr.bf16.mxu0 %v9171_v60  ;;  %v9177_v44 = vpack.c.bf16 %v4048_v31, %v4047_v30  ;;  %v2221_v60 = vld [vmem:[%s13885_s3 + $0x80] sm:$0xff]  ;;  %v11361_v6 = vld [vmem:[#allocation3 + $0x71] sm:$0xff] }
 0x20c   :  { %2681 = vmatmul.mubr.f32.gmra.mrb[42].mxu1 %v11302_v16  ;;  %4164 = vmatmul.mubr.f32.gmra.mrb[180].mxu0 %v11318_v34  ;;  %v4052_v30 = vld [vmem:[%s13885_s3 + $0x8d8] sm:$0xff]  ;;  %v4069_v37 = vld [vmem:[%s13885_s3 + $0x960] sm:$0xff] }
 0x20d   :  { %2685 = vmatprep.mubr.f32.mxu1 %v11304_v33  ;;  %4168 = vmatprep.mubr.f32.mxu0 %v11331_v39  ;;  %v2042_v36 = vld [vmem:[#allocation3 + $0xd3] sm:$0xff]  ;;  %v9783_v57 = vld [vmem:[#allocation3 + $0x81] sm:$0xff] }
 0x20e   :  { %8930 = vmatpush3.bf16.msra.mxu1 %v8927_v56  ;;  %9174 = vmatpush3.bf16.msra.mxu0 %v9173_v1  ;;  %v11348_v56 = vld [vmem:[#allocation3 + $0x60] sm:$0xff]  ;;  %v8939_v1 = vpack.c.bf16 %v2222_v61, %v2221_v60  ;;  %v1994_v61 = vld [vmem:[#allocation3 + $0xd2] sm:$0xff] }
 0x20f   :  { %8932 = vmatprep.subr.bf16.mxu1 %v8931_v18  ;;  %9176 = vmatprep.subr.bf16.mxu0 %v9175_v23  ;;  %v4051_v23 = vld [vmem:[%s13885_s3 + $0x8d0] sm:$0xff]  ;;  %v4053_v0 = vld [vmem:[%s13885_s3 + $0x8e0] sm:$0xff] }
 0x210   :  { %2686 = vmatmul.mubr.f32.gmra.mrb[44].mxu1 %v11334_v41  ;;  %4169 = vmatmul.mubr.f32.gmra.mrb[182].mxu0 %v11348_v56  ;;  %v9185_v60 = vpack.c.bf16 %v4052_v30, %v4051_v23  ;;  %v11398_v30 = vld [vmem:[#allocation3 + $0xe2] sm:$0xff] }
 0x211   :  { %2690 = vmatprep.mubr.f32.mxu1 %v11336_v42  ;;  %4173 = vmatprep.mubr.f32.mxu0 %v11361_v6  ;;  %v11507_v49 = vld [vmem:[#allocation3 + $0x44] sm:$0xff] }
 0x212   :  { %8934 = vmatpush3.bf16.msra.mxu1 %v8931_v18  ;;  %9178 = vmatpush3.bf16.msra.mxu0 %v9177_v44  ;;  %v4070_v44 = vld [vmem:[%s13885_s3 + $0x968] sm:$0xff] }
 0x213   :  { %v7083_v21 = vpop.f32.mrb[8].mxu1  ;;  %v7464_v10 = vpop.f32.mrb[150].mxu0  ;;  %8936 = vmatprep.subr.bf16.mxu1 %v8935_v48  ;;  %9180 = vmatprep.subr.bf16.mxu0 %v9179_v53  ;;  %v9187_v62 = vpack.c.bf16 %v4070_v44, %v4069_v37  ;;  %v4056_v37 = vld [vmem:[%s13885_s3 + $0x8f8] sm:$0xff]  ;;  %v9786_v44 = vld [vmem:[#allocation3 + $0x90] sm:$0xff] }
 0x214   :  { %v7084_v31 = vpop.f32.mrb[9].mxu1  ;;  %2691 = vmatmul.mubr.f32.gmra.mrb[46].mxu1 %v11364_v14  ;;  %v7465_v18 = vpop.f32.mrb[151].mxu0  ;;  %4174 = vmatmul.mubr.f32.gmra.mrb[184].mxu0 %v11373_v35 }
 0x215   :  { %v11382_v53 = vadd.f32 %v7084_v31, %v7083_v21  ;;  %v11384_v54 = vadd.f32 %v7465_v18, %v7464_v10  ;;  %2695 = vmatprep.mubr.f32.mxu1 %v2042_v36  ;;  %4178 = vmatprep.mubr.f32.mxu0 %v9783_v57  ;;  %v4054_v21 = vld [vmem:[%s13885_s3 + $0x8e8] sm:$0xff]  ;;  %v9784_v10 = vld [vmem:[#allocation3 + $0x80] sm:$0xff]  ;;  %v4055_v36 = vld [vmem:[%s13885_s3 + $0x8f0] sm:$0xff] }
 0x216   :  { %8938 = vmatpush3.bf16.msra.mxu1 %v8935_v48  ;;  %9182 = vmatpush3.bf16.msra.mxu0 %v9181_v8  ;;  %v2043_v31 = vld [vmem:[#allocation3 + $0xe3] sm:$0xff]  ;;  %v4071_v48 = vld [vmem:[%s13885_s3 + $0x970] sm:$0xff]  ;;  %v4072_v8 = vld [vmem:[%s13885_s3 + $0x978] sm:$0xff]  ;;  %v9189_v23 = vpack.c.bf16 %v4054_v21, %v4053_v0 }
 0x217   :  { %13905 = vst [vmem:[#allocation14_spill] sm:$0xff] %v11384_v54  ;;  %8940 = vmatprep.subr.bf16.mxu1 %v8939_v1  ;;  %9184 = vmatprep.subr.bf16.mxu0 %v9183_v19  ;;  %v9785_v1 = vld [vmem:[#allocation3 + $0x91] sm:$0xff]  ;;  %v1943_v19 = vld [vmem:[#allocation3 + $0xa1] sm:$0xff]  ;;  %v9191_v18 = vpack.c.bf16 %v4072_v8, %v4071_v48 }
 0x218   :  { %2696 = vmatmul.mubr.f32.gmra.mrb[48].mxu1 %v1994_v61  ;;  %4179 = vmatmul.mubr.f32.gmra.mrb[186].mxu0 %v9784_v10  ;;  %v11407_v57 = vld [vmem:[#allocation3 + $0xf3] sm:$0xff]  ;;  %v4670_v61 = vld [vmem:[%s13885_s3 + $0xb88] sm:$0xff] }
 0x219   :  { %2700 = vmatprep.mubr.f32.mxu1 %v2043_v31  ;;  %4183 = vmatprep.mubr.f32.mxu0 %v9785_v1  ;;  %v11416_v10 = vld [vmem:[#allocation3 + $0xf2] sm:$0xff]  ;;  %v9787_v1 = vld [vmem:[#allocation3 + $0xa0] sm:$0xff] }
 0x21a   :  { %9186 = vmatpush3.bf16.msra.mxu0 %v9185_v60  ;;  %v4669_v60 = vld [vmem:[%s13885_s3 + $0xb80] sm:$0xff] }
 0x21b   :  { %9188 = vmatprep.subr.bf16.mxu0 %v9187_v62  ;;  %v9193_v62 = vpack.c.bf16 %v4056_v37, %v4055_v36  ;;  %v9259_v31 = vpack.c.bf16 %v4670_v61, %v4669_v60  ;;  %v11443_v37 = vld [vmem:[#allocation3 + $0x122] sm:$0xff]  ;;  %v11447_v61 = vld [vmem:[#allocation3 + $0x133] sm:$0xff] }
 0x21c   :  { %2701 = vmatmul.mubr.f32.gmra.mrb[50].mxu1 %v11398_v30  ;;  %4184 = vmatmul.mubr.f32.gmra.mrb[188].mxu0 %v9786_v44  ;;  %v11419_v44 = vld [vmem:[#allocation3 + $0x103] sm:$0xff] }
 0x21d   :  { %2705 = vmatprep.mubr.f32.mxu1 %v11407_v57  ;;  %4188 = vmatprep.mubr.f32.mxu0 %v1943_v19  ;;  %v11427_v19 = vld [vmem:[#allocation3 + $0x102] sm:$0xff] }
 0x21e   :  { %9190 = vmatpush3.bf16.msra.mxu0 %v9189_v23  ;;  %v11431_v23 = vld [vmem:[#allocation3 + $0x113] sm:$0xff] }
 0x21f   :  { %v7086_v0 = vpop.f32.mrb[10].mxu1  ;;  %v7467_v21 = vpop.f32.mrb[152].mxu0  ;;  %9192 = vmatprep.subr.bf16.mxu0 %v9191_v18  ;;  %v11435_v18 = vld [vmem:[#allocation3 + $0x112] sm:$0xff] }
 0x220   :  { %v7087_v48 = vpop.f32.mrb[11].mxu1  ;;  %2706 = vmatmul.mubr.f32.gmra.mrb[52].mxu1 %v11416_v10  ;;  %v7468_v8 = vpop.f32.mrb[153].mxu0  ;;  %4189 = vmatmul.mubr.f32.gmra.mrb[190].mxu0 %v9787_v1  ;;  %v2207_v1 = vld [vmem:[%s13885_s3 + $0x10] sm:$0xff] }
 0x221   :  { %v11421_v54 = vadd.f32 %v7087_v48, %v7086_v0  ;;  %v11423_v17 = vadd.f32 %v7468_v8, %v7467_v21  ;;  %2710 = vmatprep.mubr.f32.mxu1 %v11419_v44  ;;  %4193 = vmatprep.mubr.f32.mxu0 %v11082_v2  ;;  %v11439_v2 = vld [vmem:[#allocation3 + $0x123] sm:$0xff] }
 0x222   :  { %9194 = vmatpush3.bf16.msra.mxu0 %v9193_v62  ;;  %v11459_v0 = vld [vmem:[#allocation3 + $0x143] sm:$0xff] }
 0x223   :  { %13906 = vst [vmem:[#allocation15_spill] sm:$0xff] %v11421_v54  ;;  %13907 = vst [vmem:[#allocation16_spill] sm:$0xff] %v11423_v17  ;;  %9260 = vmatprep.subr.bf16.mxu0 %v9259_v31  ;;  %v11469_v21 = vld [vmem:[#allocation3 + $0x142] sm:$0xff]  ;;  %v2224_v31 = vld [vmem:[%s13885_s3 + $0x98] sm:$0xff] }
 0x224   :  { %2711 = vmatmul.mubr.f32.gmra.mrb[54].mxu1 %v11427_v19  ;;  %4194 = vmatmul.mubr.f32.gmra.mrb[192].mxu0 %v11075_v50 }
 0x225   :  { %2715 = vmatprep.mubr.f32.mxu1 %v11431_v23  ;;  %4198 = vmatprep.mubr.f32.mxu0 %v11098_v26 }
 0x228   :  { %2716 = vmatmul.mubr.f32.gmra.mrb[56].mxu1 %v11435_v18  ;;  %4199 = vmatmul.mubr.f32.gmra.mrb[194].mxu0 %v11090_v9 }
 0x229   :  { %2720 = vmatprep.mubr.f32.mxu1 %v11439_v2  ;;  %4203 = vmatprep.mubr.f32.mxu0 %v11112_v52  ;;  %v11455_v52 = vld [vmem:[#allocation3 + $0x132] sm:$0xff] }
 0x22a   :  { %v7089_v36 = vpop.f32.mrb[12].mxu1  ;;  %v7470_v50 = vpop.f32.mrb[154].mxu0 }
 0x22b   :  { %v7090_v60 = vpop.f32.mrb[13].mxu1  ;;  %v7471_v26 = vpop.f32.mrb[155].mxu0 }
 0x22c   :  { %2721 = vmatmul.mubr.f32.gmra.mrb[58].mxu1 %v11443_v37  ;;  %4204 = vmatmul.mubr.f32.gmra.mrb[196].mxu0 %v11105_v32  ;;  %v11449_v62 = vadd.f32 %v7090_v60, %v7089_v36  ;;  %v11451_v9 = vadd.f32 %v7471_v26, %v7470_v50  ;;  %v2205_v32 = vld [vmem:[%s13885_s3] sm:$0xff]  ;;  %v2208_v36 = vld [vmem:[%s13885_s3 + $0x18] sm:$0xff] }
 0x22d   :  { %2725 = vmatprep.mubr.f32.mxu1 %v11447_v61  ;;  %4208 = vmatprep.mubr.f32.mxu0 %v11128_v15  ;;  %v2206_v15 = vld [vmem:[%s13885_s3 + $0x8] sm:$0xff]  ;;  %v8945_v17 = vpack.c.bf16 %v2208_v36, %v2207_v1 }
 0x22e   :  { %13908 = vst [vmem:[#allocation17_spill] sm:$0xff] %v11449_v62  ;;  %13909 = vst [vmem:[#allocation18_spill] sm:$0xff] %v11451_v9  ;;  %v8941_v48 = vpack.c.bf16 %v2206_v15, %v2205_v32  ;;  %v11489_v26 = vld [vmem:[#allocation3 + $0x24] sm:$0xff] }
 0x22f   :  { %v11583_v62 = vld [vmem:[#allocation3 + $0xe4] sm:$0xff] }
 0x230   :  { %2726 = vmatmul.mubr.f32.gmra.mrb[60].mxu1 %v11455_v52  ;;  %4209 = vmatmul.mubr.f32.gmra.mrb[198].mxu0 %v11120_v59  ;;  %v2223_v59 = vld [vmem:[%s13885_s3 + $0x90] sm:$0xff]  ;;  %13917 = vst [vmem:[#allocation26_spill] sm:$0xff] %v11583_v62 }
 0x231   :  { %2730 = vmatprep.mubr.f32.mxu1 %v11459_v0  ;;  %4213 = vmatprep.mubr.f32.mxu0 %v11145_v46  ;;  %v11479_v46 = vld [vmem:[#allocation3 + $0x14] sm:$0xff]  ;;  %v8943_v8 = vpack.c.bf16 %v2224_v31, %v2223_v59 }
 0x232   :  { %v11499_v59 = vld [vmem:[#allocation3 + $0x34] sm:$0xff] }
 0x234   :  { %2731 = vmatmul.mubr.f32.gmra.mrb[62].mxu1 %v11469_v21  ;;  %4214 = vmatmul.mubr.f32.gmra.mrb[200].mxu0 %v11135_v20  ;;  %v2225_v20 = vld [vmem:[%s13885_s3 + $0xa0] sm:$0xff] }
 0x235   :  { %8552 = vmatprep.mubr.f32.mxu1 %v11479_v46  ;;  %4218 = vmatprep.mubr.f32.mxu0 %v11162_v12  ;;  %v2226_v12 = vld [vmem:[%s13885_s3 + $0xa8] sm:$0xff] }
 0x236   :  { %v8947_v25 = vpack.c.bf16 %v2226_v12, %v2225_v20  ;;  %v2211_v20 = vld [vmem:[%s13885_s3 + $0x30] sm:$0xff]  ;;  %v2212_v12 = vld [vmem:[%s13885_s3 + $0x38] sm:$0xff] }
 0x237   :  { %v7092_v50 = vpop.f32.mrb[14].mxu1  ;;  %v7473_v60 = vpop.f32.mrb[156].mxu0 }
 0x238   :  { %v7093_v32 = vpop.f32.mrb[15].mxu1  ;;  %8553 = vmatmul.mubr.f32.vlgmr.msra.gmra.mrb[64].mxu1 %v11489_v26  ;;  %v7474_v15 = vpop.f32.mrb[157].mxu0  ;;  %4219 = vmatmul.mubr.f32.gmra.mrb[202].mxu0 %v11152_v55  ;;  %v2209_v55 = vld [vmem:[%s13885_s3 + $0x20] sm:$0xff] }
 0x239   :  { %v11501_v31 = vadd.f32 %v7093_v32, %v7092_v50  ;;  %8942 = vmatpush3.bf16.msra.mxu1 %v8941_v48  ;;  %v11503_v9 = vadd.f32 %v7474_v15, %v7473_v60  ;;  %8555 = vmatprep.mubr.f32.mxu1 %v11499_v59  ;;  %v2210_v50 = vld [vmem:[%s13885_s3 + $0x28] sm:$0xff]  ;;  %v2227_v60 = vld [vmem:[%s13885_s3 + $0xb0] sm:$0xff]  ;;  %v4653_v15 = vld [vmem:[%s13885_s3 + $0xb00] sm:$0xff] }
 0x23a   :  { %8944 = vmatprep.subr.bf16.mxu1 %v8943_v8  ;;  %4223 = vmatprep.mubr.f32.mxu0 %v11203_v3  ;;  %v1955_v48 = vld [vmem:[#allocation3 + $0x161] sm:$0xff]  ;;  %v2228_v3 = vld [vmem:[%s13885_s3 + $0xb8] sm:$0xff]  ;;  %v8949_v1 = vpack.c.bf16 %v2210_v50, %v2209_v55  ;;  %v8953_v50 = vpack.c.bf16 %v2212_v12, %v2211_v20 }
 0x23b   :  { %13910 = vst [vmem:[#allocation19_spill] sm:$0xff] %v11501_v31  ;;  %13911 = vst [vmem:[#allocation20_spill] sm:$0xff] %v11503_v9  ;;  %v11523_v8 = vld [vmem:[#allocation3 + $0x54] sm:$0xff]  ;;  %v8951_v36 = vpack.c.bf16 %v2228_v3, %v2227_v60  ;;  %v11532_v32 = vld [vmem:[#allocation3 + $0x64] sm:$0xff] }
 0x23c   :  { %8556 = vmatmul.mubr.f32.gmra.mrb[66].mxu1 %v11507_v49  ;;  %4224 = vmatmul.mubr.f32.gmra.mrb[204].mxu0 %v11175_v28  ;;  %13912 = vst [vmem:[#allocation21_spill] sm:$0xff] %v11523_v8  ;;  %13913 = vst [vmem:[#allocation22_spill] sm:$0xff] %v11532_v32  ;;  %v2229_v28 = vld [vmem:[%s13885_s3 + $0xc0] sm:$0xff]  ;;  %v4654_v55 = vld [vmem:[%s13885_s3 + $0xb08] sm:$0xff] }
 0x23d   :  { %8946 = vmatpush3.bf16.msra.mxu1 %v8945_v17  ;;  %8558 = vmatprep.mubr.f32.mxu1 %v11523_v8  ;;  %v11542_v17 = vld [vmem:[#allocation3 + $0x74] sm:$0xff]  ;;  %v2214_v60 = vld [vmem:[%s13885_s3 + $0x48] sm:$0xff]  ;;  %v9792_v8 = vld [vmem:[#allocation3 + $0x20] sm:$0xff] }
 0x23e   :  { %8948 = vmatprep.subr.bf16.mxu1 %v8947_v25  ;;  %4228 = vmatprep.mubr.f32.mxu0 %v1955_v48  ;;  %v2230_v25 = vld [vmem:[%s13885_s3 + $0xc8] sm:$0xff]  ;;  %13914 = vst [vmem:[#allocation23_spill] sm:$0xff] %v11542_v17  ;;  %v11565_v12 = vld [vmem:[#allocation3 + $0xd4] sm:$0xff] }
 0x23f   :  { %v8955_v48 = vpack.c.bf16 %v2230_v25, %v2229_v28  ;;  %v2085_v9 = vld [vmem:[#allocation3 + $0x84] sm:$0xff]  ;;  %13915 = vst [vmem:[#allocation24_spill] sm:$0xff] %v11565_v12  ;;  %v4671_v28 = vld [vmem:[%s13885_s3 + $0xb90] sm:$0xff]  ;;  %v4672_v25 = vld [vmem:[%s13885_s3 + $0xb98] sm:$0xff] }
 0x240   :  { %8559 = vmatmul.mubr.f32.gmra.mrb[68].mxu1 %v11532_v32  ;;  %4229 = vmatmul.mubr.f32.gmra.mrb[206].mxu0 %v11233_v24  ;;  %v2213_v24 = vld [vmem:[%s13885_s3 + $0x40] sm:$0xff] }
 0x241   :  { %8950 = vmatpush3.bf16.msra.mxu1 %v8949_v1  ;;  %8561 = vmatprep.mubr.f32.mxu1 %v11542_v17  ;;  %v2231_v1 = vld [vmem:[%s13885_s3 + $0xd0] sm:$0xff] }
 0x242   :  { %4298 = vmatprep.mubr.f32.mxu0 %v11187_v47  ;;  %8952 = vmatprep.subr.bf16.mxu1 %v8951_v36  ;;  %v2232_v47 = vld [vmem:[%s13885_s3 + $0xd8] sm:$0xff]  ;;  %v9261_v36 = vpack.c.bf16 %v4654_v55, %v4653_v15  ;;  %v8957_v15 = vpack.c.bf16 %v2214_v60, %v2213_v24  ;;  %v4655_v60 = vld [vmem:[%s13885_s3 + $0xb10] sm:$0xff] }
 0x243   :  { %v7476_v3 = vpop.f32.mrb[158].mxu0  ;;  %v2216_v55 = vld [vmem:[%s13885_s3 + $0x58] sm:$0xff] }
 0x244   :  { %8562 = vmatmul.mubr.f32.gmra.mrb[70].mxu1 %v2085_v9  ;;  %v7477_v20 = vpop.f32.mrb[159].mxu0  ;;  %4299 = vmatmul.mubr.f32.vlgmr.msra.gmra.mrb[208].mxu0 %v11198_v58  ;;  %v8959_v58 = vpack.c.bf16 %v2232_v47, %v2231_v1  ;;  %v2215_v9 = vld [vmem:[%s13885_s3 + $0x50] sm:$0xff] }
 0x245   :  { %8954 = vmatpush3.bf16.msra.mxu1 %v8953_v50  ;;  %v11573_v31 = vadd.f32 %v7477_v20, %v7476_v3  ;;  %8564 = vmatprep.mubr.f32.mxu1 %v11565_v12  ;;  %v2233_v50 = vld [vmem:[%s13885_s3 + $0xe0] sm:$0xff]  ;;  %v11593_v24 = vld [vmem:[#allocation3 + $0xf4] sm:$0xff]  ;;  %v8961_v1 = vpack.c.bf16 %v2216_v55, %v2215_v9  ;;  %v2218_v20 = vld [vmem:[%s13885_s3 + $0x68] sm:$0xff] }
 0x246   :  { %4303 = vmatprep.mubr.f32.mxu0 %v11205_v5  ;;  %8956 = vmatprep.subr.bf16.mxu1 %v8955_v48  ;;  %v2234_v5 = vld [vmem:[%s13885_s3 + $0xe8] sm:$0xff]  ;;  %v9263_v48 = vpack.c.bf16 %v4672_v25, %v4671_v28  ;;  %13918 = vst [vmem:[#allocation27_spill] sm:$0xff] %v11593_v24  ;;  %v4656_v3 = vld [vmem:[%s13885_s3 + $0xb18] sm:$0xff]  ;;  %v2235_v25 = vld [vmem:[%s13885_s3 + $0xf0] sm:$0xff] }
 0x247   :  { %13916 = vst [vmem:[#allocation25_spill] sm:$0xff] %v11573_v31  ;;  %9262 = vmatpush3.bf16.msra.mxu0 %v9261_v36  ;;  %v8963_v47 = vpack.c.bf16 %v2234_v5, %v2233_v50  ;;  %v2217_v36 = vld [vmem:[%s13885_s3 + $0x60] sm:$0xff]  ;;  %v11619_v9 = vld [vmem:[#allocation3 + $0x114] sm:$0xff]  ;;  %v4674_v50 = vld [vmem:[%s13885_s3 + $0xba8] sm:$0xff] }
 0x248   :  { %8565 = vmatmul.mubr.f32.gmra.mrb[72].mxu1 %v11583_v62  ;;  %4304 = vmatmul.mubr.f32.gmra.mrb[210].mxu0 %v11237_v27  ;;  %v11609_v28 = vld [vmem:[#allocation3 + $0x104] sm:$0xff]  ;;  %13920 = vst [vmem:[#allocation29_spill] sm:$0xff] %v11619_v9  ;;  %v8965_v5 = vpack.c.bf16 %v2218_v20, %v2217_v36  ;;  %v11645_v20 = vld [vmem:[#allocation3 + $0x134] sm:$0xff] }
 0x249   :  { %8958 = vmatpush3.bf16.msra.mxu1 %v8957_v15  ;;  %8567 = vmatprep.mubr.f32.mxu1 %v11593_v24  ;;  %13919 = vst [vmem:[#allocation28_spill] sm:$0xff] %v11609_v28  ;;  %v2236_v15 = vld [vmem:[%s13885_s3 + $0xf8] sm:$0xff]  ;;  %v4673_v55 = vld [vmem:[%s13885_s3 + $0xba0] sm:$0xff]  ;;  %v2254_v36 = vld [vmem:[%s13885_s3 + $0x188] sm:$0xff] }
 0x24a   :  { %4308 = vmatprep.mubr.f32.mxu0 %v11239_v29  ;;  %8960 = vmatprep.subr.bf16.mxu1 %v8959_v58  ;;  %v9265_v58 = vpack.c.bf16 %v4656_v3, %v4655_v60  ;;  %v2219_v60 = vld [vmem:[%s13885_s3 + $0x70] sm:$0xff]  ;;  %v2220_v3 = vld [vmem:[%s13885_s3 + $0x78] sm:$0xff]  ;;  %v11635_v31 = vld [vmem:[#allocation3 + $0x124] sm:$0xff]  ;;  %13922 = vst [vmem:[#allocation31_spill] sm:$0xff] %v11645_v20 }
 0x24b   :  { %9264 = vmatprep.subr.bf16.mxu0 %v9263_v48  ;;  %v8967_v48 = vpack.c.bf16 %v2236_v15, %v2235_v25  ;;  %13921 = vst [vmem:[#allocation30_spill] sm:$0xff] %v11635_v31  ;;  %v4657_v25 = vld [vmem:[%s13885_s3 + $0xb20] sm:$0xff]  ;;  %v4658_v15 = vld [vmem:[%s13885_s3 + $0xb28] sm:$0xff]  ;;  %v2259_v12 = vld [vmem:[%s13885_s3 + $0x1b0] sm:$0xff] }
 0x24c   :  { %8568 = vmatmul.mubr.f32.gmra.mrb[74].mxu1 %v11609_v28  ;;  %4309 = vmatmul.mubr.f32.gmra.mrb[212].mxu0 %v11270_v40  ;;  %v2241_v24 = vld [vmem:[%s13885_s3 + $0x120] sm:$0xff] }
 0x24d   :  { %8962 = vmatpush3.bf16.msra.mxu1 %v8961_v1  ;;  %8570 = vmatprep.mubr.f32.mxu1 %v11619_v9  ;;  %v2253_v1 = vld [vmem:[%s13885_s3 + $0x180] sm:$0xff]  ;;  %v8969_v9 = vpack.c.bf16 %v2220_v3, %v2219_v60  ;;  %v2256_v60 = vld [vmem:[%s13885_s3 + $0x198] sm:$0xff] }
 0x24e   :  { %4313 = vmatprep.mubr.f32.mxu0 %v11272_v51  ;;  %8964 = vmatprep.subr.bf16.mxu1 %v8963_v47  ;;  %v9267_v47 = vpack.c.bf16 %v4674_v50, %v4673_v55  ;;  %v2237_v55 = vld [vmem:[%s13885_s3 + $0x100] sm:$0xff]  ;;  %v2238_v50 = vld [vmem:[%s13885_s3 + $0x108] sm:$0xff] }
 0x24f   :  { %9266 = vmatpush3.bf16.msra.mxu0 %v9265_v58  ;;  %v8971_v58 = vpack.c.bf16 %v2254_v36, %v2253_v1  ;;  %v1933_v3 = vld [vmem:[#allocation3 + $0x1] sm:$0xff]  ;;  %v4675_v1 = vld [vmem:[%s13885_s3 + $0xbb0] sm:$0xff]  ;;  %v4676_v36 = vld [vmem:[%s13885_s3 + $0xbb8] sm:$0xff] }
 0x250   :  { %8571 = vmatmul.mubr.f32.gmra.mrb[76].mxu1 %v11635_v31  ;;  %4314 = vmatmul.mubr.f32.gmra.mrb[214].mxu0 %v11302_v16  ;;  %v2097_v31 = vld [vmem:[#allocation3 + $0x144] sm:$0xff] }
 0x251   :  { %8966 = vmatpush3.bf16.msra.mxu1 %v8965_v5  ;;  %8573 = vmatprep.mubr.f32.mxu1 %v11645_v20  ;;  %v2255_v5 = vld [vmem:[%s13885_s3 + $0x190] sm:$0xff]  ;;  %v8973_v20 = vpack.c.bf16 %v2238_v50, %v2237_v55  ;;  %v9788_v50 = vld [vmem:[#allocation3] sm:$0xff] }
 0x252   :  { %4318 = vmatprep.mubr.f32.mxu0 %v11304_v33  ;;  %8968 = vmatprep.subr.bf16.mxu1 %v8967_v48  ;;  %v9269_v48 = vpack.c.bf16 %v4658_v15, %v4657_v25  ;;  %v2240_v25 = vld [vmem:[%s13885_s3 + $0x118] sm:$0xff]  ;;  %v2257_v15 = vld [vmem:[%s13885_s3 + $0x1a0] sm:$0xff]  ;;  %v4659_v55 = vld [vmem:[%s13885_s3 + $0xb30] sm:$0xff] }
 0x253   :  { %9268 = vmatprep.subr.bf16.mxu0 %v9267_v47  ;;  %v8975_v47 = vpack.c.bf16 %v2256_v60, %v2255_v5  ;;  %v2258_v5 = vld [vmem:[%s13885_s3 + $0x1a8] sm:$0xff]  ;;  %v4677_v60 = vld [vmem:[%s13885_s3 + $0xbc0] sm:$0xff] }
 0x254   :  { %8574 = vmatmul.mubr.f32.gmra.mrb[78].mxu1 %v2097_v31  ;;  %4319 = vmatmul.mubr.f32.gmra.mrb[216].mxu0 %v11334_v41  ;;  %v2239_v31 = vld [vmem:[%s13885_s3 + $0x110] sm:$0xff] }
 0x255   :  { %8970 = vmatpush3.bf16.msra.mxu1 %v8969_v9  ;;  %2945 = vmatprep.mubr.f32.mxu1 %v1933_v3  ;;  %v9271_v9 = vpack.c.bf16 %v4676_v36, %v4675_v1  ;;  %v9789_v3 = vld [vmem:[#allocation3 + $0x11] sm:$0xff]  ;;  %v8977_v28 = vpack.c.bf16 %v2240_v25, %v2239_v31  ;;  %v4662_v31 = vld [vmem:[%s13885_s3 + $0xb48] sm:$0xff] }
 0x256   :  { %4323 = vmatprep.mubr.f32.mxu0 %v11336_v42  ;;  %8972 = vmatprep.subr.bf16.mxu1 %v8971_v58  ;;  %v4660_v58 = vld [vmem:[%s13885_s3 + $0xb38] sm:$0xff]  ;;  %v9790_v25 = vld [vmem:[#allocation3 + $0x10] sm:$0xff] }
 0x257   :  { %9270 = vmatpush3.bf16.msra.mxu0 %v9269_v48  ;;  %v4678_v48 = vld [vmem:[%s13885_s3 + $0xbc8] sm:$0xff]  ;;  %v11700_v1 = vld [vmem:[#allocation3 + $0x93] sm:$0xff]  ;;  %v9273_v62 = vpack.c.bf16 %v4660_v58, %v4659_v55 }
 0x258   :  { %2946 = vmatmul.mubr.f32.vlgmr.msra.gmra.mrb[80].mxu1 %v9788_v50  ;;  %4324 = vmatmul.mubr.f32.gmra.mrb[218].mxu0 %v11364_v14  ;;  %v11702_v36 = vld [vmem:[#allocation3 + $0x92] sm:$0xff]  ;;  %v11705_v50 = vld [vmem:[#allocation3 + $0xa3] sm:$0xff]  ;;  %v9275_v17 = vpack.c.bf16 %v4678_v48, %v4677_v60 }
 0x259   :  { %8974 = vmatpush3.bf16.msra.mxu1 %v8973_v20  ;;  %2950 = vmatprep.mubr.f32.mxu1 %v9789_v3  ;;  %v2242_v20 = vld [vmem:[%s13885_s3 + $0x128] sm:$0xff]  ;;  %v8979_v3 = vpack.c.bf16 %v2258_v5, %v2257_v15  ;;  %v2260_v15 = vld [vmem:[%s13885_s3 + $0x1b8] sm:$0xff]  ;;  %v2243_v48 = vld [vmem:[%s13885_s3 + $0x130] sm:$0xff] }
 0x25a   :  { %4328 = vmatprep.mubr.f32.mxu0 %v11700_v1  ;;  %8976 = vmatprep.subr.bf16.mxu1 %v8975_v47  ;;  %v4661_v47 = vld [vmem:[%s13885_s3 + $0xb40] sm:$0xff]  ;;  %v4680_v55 = vld [vmem:[%s13885_s3 + $0xbd8] sm:$0xff]  ;;  %v8981_v60 = vpack.c.bf16 %v2242_v20, %v2241_v24  ;;  %v8983_v32 = vpack.c.bf16 %v2260_v15, %v2259_v12  ;;  %v4663_v24 = vld [vmem:[%s13885_s3 + $0xb50] sm:$0xff] }
 0x25b   :  { %9272 = vmatprep.subr.bf16.mxu0 %v9271_v9  ;;  %v4679_v9 = vld [vmem:[%s13885_s3 + $0xbd0] sm:$0xff]  ;;  %v9791_v58 = vld [vmem:[#allocation3 + $0x21] sm:$0xff]  ;;  %v9277_v54 = vpack.c.bf16 %v4662_v31, %v4661_v47  ;;  %v4664_v20 = vld [vmem:[%s13885_s3 + $0xb58] sm:$0xff] }
 0x25c   :  { %2951 = vmatmul.mubr.f32.gmra.mrb[82].mxu1 %v9790_v25  ;;  %4329 = vmatmul.mubr.f32.gmra.mrb[220].mxu0 %v11702_v36  ;;  %v11733_v5 = vld [vmem:[#allocation3 + $0xa2] sm:$0xff]  ;;  %v2244_v25 = vld [vmem:[%s13885_s3 + $0x138] sm:$0xff]  ;;  %v9281_v31 = vpack.c.bf16 %v4664_v20, %v4663_v24 }
 0x25d   :  { %2955 = vmatprep.mubr.f32.mxu1 %v9791_v58  ;;  %4333 = vmatprep.mubr.f32.mxu0 %v11705_v50  ;;  %v9279_v58 = vpack.c.bf16 %v4680_v55, %v4679_v9  ;;  %v4682_v12 = vld [vmem:[%s13885_s3 + $0xbe8] sm:$0xff]  ;;  %v2263_v55 = vld [vmem:[%s13885_s3 + $0x1d0] sm:$0xff]  ;;  %v2248_v24 = vld [vmem:[%s13885_s3 + $0x158] sm:$0xff] }
 0x25e   :  { %8978 = vmatpush3.bf16.msra.mxu1 %v8977_v28  ;;  %9274 = vmatpush3.bf16.msra.mxu0 %v9273_v62  ;;  %v2261_v28 = vld [vmem:[%s13885_s3 + $0x1c0] sm:$0xff]  ;;  %v2262_v62 = vld [vmem:[%s13885_s3 + $0x1c8] sm:$0xff] }
 0x25f   :  { %8980 = vmatprep.subr.bf16.mxu1 %v8979_v3  ;;  %9276 = vmatprep.subr.bf16.mxu0 %v9275_v17  ;;  %v4681_v17 = vld [vmem:[%s13885_s3 + $0xbe0] sm:$0xff]  ;;  %v2246_v47 = vld [vmem:[%s13885_s3 + $0x148] sm:$0xff]  ;;  %v8987_v15 = vpack.c.bf16 %v2262_v62, %v2261_v28  ;;  %v2247_v28 = vld [vmem:[%s13885_s3 + $0x150] sm:$0xff] }
 0x260   :  { %2956 = vmatmul.mubr.f32.gmra.mrb[84].mxu1 %v9792_v8  ;;  %4334 = vmatmul.mubr.f32.gmra.mrb[222].mxu0 %v11733_v5  ;;  %v8985_v8 = vpack.c.bf16 %v2244_v25, %v2243_v48  ;;  %v2245_v3 = vld [vmem:[%s13885_s3 + $0x140] sm:$0xff]  ;;  %v9283_v9 = vpack.c.bf16 %v4682_v12, %v4681_v17  ;;  %v4684_v48 = vld [vmem:[%s13885_s3 + $0xbf8] sm:$0xff]  ;;  %v2266_v12 = vld [vmem:[%s13885_s3 + $0x1e8] sm:$0xff] }
 0x261   :  { %2960 = vmatprep.mubr.f32.mxu1 %v11230_v22  ;;  %4338 = vmatprep.mubr.f32.mxu0 %v11407_v57  ;;  %v4665_v22 = vld [vmem:[%s13885_s3 + $0xb60] sm:$0xff]  ;;  %v4668_v62 = vld [vmem:[%s13885_s3 + $0xb78] sm:$0xff] }
 0x262   :  { %8982 = vmatpush3.bf16.msra.mxu1 %v8981_v60  ;;  %9278 = vmatpush3.bf16.msra.mxu0 %v9277_v54  ;;  %v4666_v54 = vld [vmem:[%s13885_s3 + $0xb68] sm:$0xff]  ;;  %v4683_v60 = vld [vmem:[%s13885_s3 + $0xbf0] sm:$0xff]  ;;  %v2265_v17 = vld [vmem:[%s13885_s3 + $0x1e0] sm:$0xff] }
 0x263   :  { %8984 = vmatprep.subr.bf16.mxu1 %v8983_v32  ;;  %9280 = vmatprep.subr.bf16.mxu0 %v9279_v58  ;;  %v2264_v32 = vld [vmem:[%s13885_s3 + $0x1d8] sm:$0xff]  ;;  %v9285_v25 = vpack.c.bf16 %v4666_v54, %v4665_v22  ;;  %v9287_v20 = vpack.c.bf16 %v4684_v48, %v4683_v60 }
 0x264   :  { %2961 = vmatmul.mubr.f32.gmra.mrb[86].mxu1 %v11252_v38  ;;  %4339 = vmatmul.mubr.f32.gmra.mrb[224].mxu0 %v11416_v10  ;;  %v8989_v38 = vpack.c.bf16 %v2246_v47, %v2245_v3  ;;  %v8991_v58 = vpack.c.bf16 %v2264_v32, %v2263_v55  ;;  %v2249_v47 = vld [vmem:[%s13885_s3 + $0x160] sm:$0xff]  ;;  %v2252_v54 = vld [vmem:[%s13885_s3 + $0x178] sm:$0xff]  ;;  %v2270_v55 = vld [vmem:[%s13885_s3 + $0x208] sm:$0xff] }
 0x265   :  { %2965 = vmatprep.mubr.f32.mxu1 %v11265_v45  ;;  %4343 = vmatprep.mubr.f32.mxu0 %v11419_v44  ;;  %v4667_v45 = vld [vmem:[%s13885_s3 + $0xb70] sm:$0xff] }
 0x266   :  { %8986 = vmatpush3.bf16.msra.mxu1 %v8985_v8  ;;  %9282 = vmatpush3.bf16.msra.mxu0 %v9281_v31  ;;  %v8993_v8 = vpack.c.bf16 %v2248_v24, %v2247_v28  ;;  %v9289_v3 = vpack.c.bf16 %v4668_v62, %v4667_v45  ;;  %v2250_v31 = vld [vmem:[%s13885_s3 + $0x168] sm:$0xff]  ;;  %v9793_v28 = vld [vmem:[#allocation3 + $0xc0] sm:$0xff] }
 0x267   :  { %8988 = vmatprep.subr.bf16.mxu1 %v8987_v15  ;;  %9284 = vmatprep.subr.bf16.mxu0 %v9283_v9  ;;  %v2268_v15 = vld [vmem:[%s13885_s3 + $0x1f8] sm:$0xff]  ;;  %v8997_v9 = vpack.c.bf16 %v2250_v31, %v2249_v47  ;;  %v11858_v24 = vld [vmem:[#allocation3 + $0x163] sm:$0xff] }
 0x268   :  { %2966 = vmatmul.mubr.f32.gmra.mrb[88].mxu1 %v11284_v4  ;;  %4344 = vmatmul.mubr.f32.gmra.mrb[226].mxu0 %v11427_v19  ;;  %v8995_v4 = vpack.c.bf16 %v2266_v12, %v2265_v17  ;;  %v9796_v45 = vld [vmem:[#allocation3 + $0xe1] sm:$0xff] }
 0x269   :  { %2970 = vmatprep.mubr.f32.mxu1 %v11299_v13  ;;  %4348 = vmatprep.mubr.f32.mxu0 %v11431_v23  ;;  %v2267_v13 = vld [vmem:[%s13885_s3 + $0x1f0] sm:$0xff]  ;;  %v11862_v62 = vld [vmem:[#allocation3 + $0x162] sm:$0xff] }
 0x26a   :  { %8990 = vmatpush3.bf16.msra.mxu1 %v8989_v38  ;;  %9286 = vmatpush3.bf16.msra.mxu0 %v9285_v25  ;;  %v8999_v22 = vpack.c.bf16 %v2268_v15, %v2267_v13  ;;  %v1945_v38 = vld [vmem:[#allocation3 + $0xc1] sm:$0xff]  ;;  %v9798_v13 = vld [vmem:[#allocation3 + $0xf1] sm:$0xff] }
 0x26b   :  { %8992 = vmatprep.subr.bf16.mxu1 %v8991_v58  ;;  %9288 = vmatprep.subr.bf16.mxu0 %v9287_v20  ;;  %v9794_v58 = vld [vmem:[#allocation3 + $0xd1] sm:$0xff]  ;;  %v11869_v15 = vld [vmem:[#allocation3 + $0x43] sm:$0xff] }
 0x26c   :  { %2971 = vmatmul.mubr.f32.gmra.mrb[90].mxu1 %v11318_v34  ;;  %4349 = vmatmul.mubr.f32.gmra.mrb[228].mxu0 %v11435_v18  ;;  %v2251_v34 = vld [vmem:[%s13885_s3 + $0x170] sm:$0xff] }
 0x26d   :  { %2975 = vmatprep.mubr.f32.mxu1 %v11331_v39  ;;  %4353 = vmatprep.mubr.f32.mxu0 %v11439_v2  ;;  %v2269_v39 = vld [vmem:[%s13885_s3 + $0x200] sm:$0xff]  ;;  %v9001_v32 = vpack.c.bf16 %v2252_v54, %v2251_v34  ;;  %v9795_v20 = vld [vmem:[#allocation3 + $0xd0] sm:$0xff] }
 0x26e   :  { %8994 = vmatpush3.bf16.msra.mxu1 %v8993_v8  ;;  %9290 = vmatpush3.bf16.msra.mxu0 %v9289_v3  ;;  %v11844_v48 = vpack.c.bf16 %v2270_v55, %v2269_v39  ;;  %v9797_v3 = vld [vmem:[#allocation3 + $0xe0] sm:$0xff]  ;;  %v9803_v54 = vld [vmem:[#allocation3 + $0x111] sm:$0xff] }
 0x26f   :  { %8996 = vmatprep.subr.bf16.mxu1 %v8995_v4  ;;  %v9802_v34 = vld [vmem:[#allocation3 + $0x100] sm:$0xff] }
 0x270   :  { %2976 = vmatmul.mubr.f32.gmra.mrb[92].mxu1 %v11348_v56  ;;  %4354 = vmatmul.mubr.f32.gmra.mrb[230].mxu0 %v11443_v37 }
 0x271   :  { %2980 = vmatprep.mubr.f32.mxu1 %v11361_v6  ;;  %4358 = vmatprep.mubr.f32.mxu0 %v11447_v61  ;;  %v11851_v6 = vld [vmem:[#allocation3 + $0x153] sm:$0xff] }
 0x272   :  { %8998 = vmatpush3.bf16.msra.mxu1 %v8997_v9  ;;  %v9800_v9 = vld [vmem:[#allocation3 + $0xf0] sm:$0xff] }
 0x273   :  { %v7095_v60 = vpop.f32.mrb[16].mxu1  ;;  %9000 = vmatprep.subr.bf16.mxu1 %v8999_v22  ;;  %v9801_v22 = vld [vmem:[#allocation3 + $0x101] sm:$0xff] }
 0x274   :  { %v7096_v56 = vpop.f32.mrb[17].mxu1  ;;  %2981 = vmatmul.mubr.f32.gmra.mrb[94].mxu1 %v11373_v35  ;;  %4359 = vmatmul.mubr.f32.gmra.mrb[232].mxu0 %v11455_v52  ;;  %v11856_v35 = vld [vmem:[#allocation3 + $0x152] sm:$0xff] }
 0x275   :  { %v11848_v25 = vadd.f32 %v7096_v56, %v7095_v60  ;;  %2985 = vmatprep.mubr.f32.mxu1 %v1945_v38  ;;  %4363 = vmatprep.mubr.f32.mxu0 %v11459_v0  ;;  %v9804_v60 = vld [vmem:[#allocation3 + $0x110] sm:$0xff] }
 0x276   :  { %9002 = vmatpush3.bf16.msra.mxu1 %v9001_v32 }
 0x277   :  { %9004 = vmatprep.subr.bf16.mxu1 %v11844_v48 }
 0x278   :  { %2986 = vmatmul.mubr.f32.gmra.mrb[96].mxu1 %v9793_v28  ;;  %4364 = vmatmul.mubr.f32.gmra.mrb[234].mxu0 %v11469_v21  ;;  %v2272_v28 = vld [vmem:[%s13885_s3 + $0x218] sm:$0xff] }
 0x279   :  { %2990 = vmatprep.mubr.f32.mxu1 %v9794_v58  ;;  %4368 = vmatprep.mubr.f32.mxu0 %v11851_v6  ;;  %v9808_v58 = vld [vmem:[#allocation3 + $0x130] sm:$0xff] }
 0x27c   :  { %2991 = vmatmul.mubr.f32.gmra.mrb[98].mxu1 %v9795_v20  ;;  %4369 = vmatmul.mubr.f32.gmra.mrb[236].mxu0 %v11856_v35 }
 0x27d   :  { %2995 = vmatprep.mubr.f32.mxu1 %v9796_v45  ;;  %4373 = vmatprep.mubr.f32.mxu0 %v11858_v24 }
 0x27f   :  { %v7098_v17 = vpop.f32.mrb[18].mxu1  ;;  %v7479_v12 = vpop.f32.mrb[160].mxu0 }
 0x280   :  { %v7099_v8 = vpop.f32.mrb[19].mxu1  ;;  %2996 = vmatmul.mubr.f32.gmra.mrb[100].mxu1 %v9797_v3  ;;  %v7480_v4 = vpop.f32.mrb[161].mxu0  ;;  %4374 = vmatmul.mubr.f32.gmra.mrb[238].mxu0 %v11862_v62 }
 0x281   :  { %v11865_v47 = vadd.f32 %v7099_v8, %v7098_v17  ;;  %v11867_v31 = vadd.f32 %v7480_v4, %v7479_v12  ;;  %3000 = vmatprep.mubr.f32.mxu1 %v9798_v13  ;;  %4910 = vmatprep.mubr.f32.mxu0 %v11869_v15  ;;  %v2273_v8 = vld [vmem:[%s13885_s3 + $0x220] sm:$0xff]  ;;  %v9809_v4 = vld [vmem:[#allocation3 + $0x13] sm:$0xff] }
 0x282   :  { %v9810_v13 = vld [vmem:[#allocation3 + $0x12] sm:$0xff] }
 0x284   :  { %3001 = vmatmul.mubr.f32.gmra.mrb[102].mxu1 %v9800_v9  ;;  %4911 = vmatmul.mubr.f32.vlgmr.msra.gmra.mrb[240].mxu0 %v11237_v27  ;;  %v2040_v9 = vld [vmem:[#allocation3 + $0xb3] sm:$0xff] }
 0x285   :  { %3005 = vmatprep.mubr.f32.mxu1 %v9801_v22  ;;  %4915 = vmatprep.mubr.f32.mxu0 %v11239_v29  ;;  %v9805_v29 = vld [vmem:[#allocation3 + $0x121] sm:$0xff]  ;;  %v2275_v22 = vld [vmem:[%s13885_s3 + $0x230] sm:$0xff] }
 0x288   :  { %3006 = vmatmul.mubr.f32.gmra.mrb[104].mxu1 %v9802_v34  ;;  %4916 = vmatmul.mubr.f32.gmra.mrb[242].mxu0 %v11270_v40  ;;  %v9806_v40 = vld [vmem:[#allocation3 + $0x120] sm:$0xff] }
 0x289   :  { %3010 = vmatprep.mubr.f32.mxu1 %v9803_v54  ;;  %4920 = vmatprep.mubr.f32.mxu0 %v11272_v51  ;;  %v9807_v51 = vld [vmem:[#allocation3 + $0x131] sm:$0xff]  ;;  %v11912_v34 = vld [vmem:[#allocation3 + $0x23] sm:$0xff] }
 0x28a   :  { %v7101_v39 = vpop.f32.mrb[20].mxu1  ;;  %v7482_v55 = vpop.f32.mrb[162].mxu0 }
 0x28b   :  { %v7102_v32 = vpop.f32.mrb[21].mxu1  ;;  %v7483_v56 = vpop.f32.mrb[163].mxu0 }
 0x28c   :  { %3011 = vmatmul.mubr.f32.gmra.mrb[106].mxu1 %v9804_v60  ;;  %4921 = vmatmul.mubr.f32.gmra.mrb[244].mxu0 %v11302_v16  ;;  %v11877_v27 = vadd.f32 %v7102_v32, %v7101_v39  ;;  %v11879_v38 = vadd.f32 %v7483_v56, %v7482_v55  ;;  %v2271_v16 = vld [vmem:[%s13885_s3 + $0x210] sm:$0xff]  ;;  %v11915_v39 = vld [vmem:[#allocation3 + $0x22] sm:$0xff] }
 0x28d   :  { %3015 = vmatprep.mubr.f32.mxu1 %v9805_v29  ;;  %4925 = vmatprep.mubr.f32.mxu0 %v11304_v33  ;;  %v2029_v33 = vld [vmem:[#allocation3 + $0x3] sm:$0xff]  ;;  %v11924_v32 = vld [vmem:[#allocation3 + $0x33] sm:$0xff] }
 0x28e   :  { %v2278_v55 = vld [vmem:[%s13885_s3 + $0x248] sm:$0xff] }
 0x290   :  { %3016 = vmatmul.mubr.f32.gmra.mrb[108].mxu1 %v9806_v40  ;;  %4926 = vmatmul.mubr.f32.gmra.mrb[246].mxu0 %v11334_v41  ;;  %v9007_v41 = vpack.c.bf16 %v2272_v28, %v2271_v16  ;;  %v2279_v28 = vld [vmem:[%s13885_s3 + $0x250] sm:$0xff] }
 0x291   :  { %3020 = vmatprep.mubr.f32.mxu1 %v9807_v51  ;;  %4930 = vmatprep.mubr.f32.mxu0 %v11336_v42  ;;  %v1981_v42 = vld [vmem:[#allocation3 + $0x2] sm:$0xff]  ;;  %v11928_v51 = vld [vmem:[#allocation3 + $0x32] sm:$0xff] }
 0x294   :  { %3021 = vmatmul.mubr.f32.gmra.mrb[110].mxu1 %v9808_v58  ;;  %4931 = vmatmul.mubr.f32.gmra.mrb[248].mxu0 %v11364_v14  ;;  %v2274_v14 = vld [vmem:[%s13885_s3 + $0x228] sm:$0xff]  ;;  %v2280_v58 = vld [vmem:[%s13885_s3 + $0x258] sm:$0xff] }
 0x295   :  { %3090 = vmatprep.mubr.f32.mxu1 %v2029_v33  ;;  %4935 = vmatprep.mubr.f32.mxu0 %v11700_v1 }
 0x297   :  { %v7104_v20 = vpop.f32.mrb[22].mxu1  ;;  %v7485_v45 = vpop.f32.mrb[164].mxu0 }
 0x298   :  { %v7105_v17 = vpop.f32.mrb[23].mxu1  ;;  %3091 = vmatmul.mubr.f32.vlgmr.msra.gmra.mrb[112].mxu1 %v1981_v42  ;;  %v7486_v12 = vpop.f32.mrb[165].mxu0  ;;  %4936 = vmatmul.mubr.f32.gmra.mrb[250].mxu0 %v11702_v36  ;;  %v9011_v36 = vpack.c.bf16 %v2274_v14, %v2273_v8  ;;  %v2281_v42 = vld [vmem:[%s13885_s3 + $0x260] sm:$0xff]  ;;  %v11958_v14 = vld [vmem:[#allocation3 + $0x52] sm:$0xff] }
 0x299   :  { %v11899_v3 = vadd.f32 %v7105_v17, %v7104_v20  ;;  %9006 = vmatpush3.bf16.msra.mxu1 %v11844_v48  ;;  %v11902_v1 = vadd.f32 %v7486_v12, %v7485_v45  ;;  %3095 = vmatprep.mubr.f32.mxu1 %v9809_v4  ;;  %v2276_v48 = vld [vmem:[%s13885_s3 + $0x238] sm:$0xff]  ;;  %v9023_v20 = vpack.c.bf16 %v2280_v58, %v2279_v28  ;;  %v11944_v45 = vld [vmem:[#allocation3 + $0x42] sm:$0xff]  ;;  %v2283_v4 = vld [vmem:[%s13885_s3 + $0x270] sm:$0xff] }
 0x29a   :  { %4940 = vmatprep.mubr.f32.mxu0 %v11705_v50  ;;  %9008 = vmatprep.subr.bf16.mxu1 %v9007_v41  ;;  %v1992_v50 = vld [vmem:[#allocation3 + $0xb2] sm:$0xff]  ;;  %v9015_v54 = vpack.c.bf16 %v2276_v48, %v2275_v22  ;;  %v2282_v17 = vld [vmem:[%s13885_s3 + $0x268] sm:$0xff] }
 0x29b   :  { %v11954_v12 = vld [vmem:[#allocation3 + $0x53] sm:$0xff]  ;;  %v9027_v8 = vpack.c.bf16 %v2282_v17, %v2281_v42  ;;  %v2041_v58 = vld [vmem:[#allocation3 + $0xc3] sm:$0xff] }
 0x29c   :  { %3096 = vmatmul.mubr.f32.gmra.mrb[114].mxu1 %v9810_v13  ;;  %4941 = vmatmul.mubr.f32.gmra.mrb[252].mxu0 %v11733_v5  ;;  %v2277_v5 = vld [vmem:[%s13885_s3 + $0x240] sm:$0xff]  ;;  %v11990_v28 = vld [vmem:[#allocation3 + $0x72] sm:$0xff] }
 0x29d   :  { %3100 = vmatprep.mubr.f32.mxu1 %v11912_v34  ;;  %4945 = vmatprep.mubr.f32.mxu0 %v2040_v9  ;;  %v9019_v29 = vpack.c.bf16 %v2278_v55, %v2277_v5  ;;  %v11968_v13 = vld [vmem:[#allocation3 + $0x63] sm:$0xff] }
 0x29e   :  { %9010 = vmatpush3.bf16.msra.mxu1 %v9007_v41  ;;  %v3445_v55 = vld [vmem:[%s13885_s3 + $0x680] sm:$0xff] }
 0x29f   :  { %9012 = vmatprep.subr.bf16.mxu1 %v9011_v36 }
 0x2a0   :  { %3101 = vmatmul.mubr.f32.gmra.mrb[116].mxu1 %v11915_v39  ;;  %4946 = vmatmul.mubr.f32.gmra.mrb[254].mxu0 %v1992_v50 }
 0x2a1   :  { %3105 = vmatprep.mubr.f32.mxu1 %v11924_v32  ;;  %4950 = vmatprep.mubr.f32.mxu0 %v11419_v44 }
 0x2a2   :  { %9014 = vmatpush3.bf16.msra.mxu1 %v9011_v36  ;;  %v2284_v36 = vld [vmem:[%s13885_s3 + $0x278] sm:$0xff] }
 0x2a3   :  { %v7107_v60 = vpop.f32.mrb[24].mxu1  ;;  %v7488_v56 = vpop.f32.mrb[166].mxu0  ;;  %9016 = vmatprep.subr.bf16.mxu1 %v9015_v54  ;;  %v9031_v48 = vpack.c.bf16 %v2284_v36, %v2283_v4  ;;  %v9823_v4 = vld [vmem:[#allocation3 + $0xd2] sm:$0xff] }
 0x2a4   :  { %v7108_v40 = vpop.f32.mrb[25].mxu1  ;;  %3106 = vmatmul.mubr.f32.gmra.mrb[118].mxu1 %v11928_v51  ;;  %v7489_v16 = vpop.f32.mrb[167].mxu0  ;;  %4951 = vmatmul.mubr.f32.gmra.mrb[0].mxu0 %v11427_v19 }
 0x2a5   :  { %v11938_v33 = vadd.f32 %v7108_v40, %v7107_v60  ;;  %v11940_v41 = vadd.f32 %v7489_v16, %v7488_v56  ;;  %3110 = vmatprep.mubr.f32.mxu1 %v11869_v15  ;;  %4955 = vmatprep.mubr.f32.mxu0 %v11431_v23  ;;  %v3446_v60 = vld [vmem:[%s13885_s3 + $0x688] sm:$0xff]  ;;  %v11986_v40 = vld [vmem:[#allocation3 + $0x73] sm:$0xff] }
 0x2a6   :  { %9018 = vmatpush3.bf16.msra.mxu1 %v9015_v54  ;;  %v11972_v54 = vld [vmem:[#allocation3 + $0x62] sm:$0xff]  ;;  %v9067_v16 = vpack.c.bf16 %v3446_v60, %v3445_v55 }
 0x2a7   :  { %13923 = vst [vmem:[#allocation32_spill] sm:$0xff] %v11940_v41  ;;  %9020 = vmatprep.subr.bf16.mxu1 %v9019_v29 }
 0x2a8   :  { %3111 = vmatmul.mubr.f32.gmra.mrb[120].mxu1 %v11944_v45  ;;  %4956 = vmatmul.mubr.f32.gmra.mrb[2].mxu0 %v11435_v18 }
 0x2a9   :  { %3115 = vmatprep.mubr.f32.mxu1 %v11954_v12  ;;  %4960 = vmatprep.mubr.f32.mxu0 %v11439_v2 }
 0x2aa   :  { %9022 = vmatpush3.bf16.msra.mxu1 %v9019_v29 }
 0x2ab   :  { %9024 = vmatprep.subr.bf16.mxu1 %v9023_v20 }
 0x2ac   :  { %3116 = vmatmul.mubr.f32.gmra.mrb[122].mxu1 %v11958_v14  ;;  %4961 = vmatmul.mubr.f32.gmra.mrb[4].mxu0 %v11443_v37 }
 0x2ad   :  { %3120 = vmatprep.mubr.f32.mxu1 %v11968_v13  ;;  %4965 = vmatprep.mubr.f32.mxu0 %v11447_v61 }
 0x2ae   :  { %9026 = vmatpush3.bf16.msra.mxu1 %v9023_v20  ;;  %v1993_v20 = vld [vmem:[#allocation3 + $0xc2] sm:$0xff] }
 0x2af   :  { %v7110_v9 = vpop.f32.mrb[26].mxu1  ;;  %v7491_v22 = vpop.f32.mrb[168].mxu0  ;;  %9028 = vmatprep.subr.bf16.mxu1 %v9027_v8 }
 0x2b0   :  { %v7111_v50 = vpop.f32.mrb[27].mxu1  ;;  %3121 = vmatmul.mubr.f32.gmra.mrb[124].mxu1 %v11972_v54  ;;  %v7492_v5 = vpop.f32.mrb[169].mxu0  ;;  %4966 = vmatmul.mubr.f32.gmra.mrb[6].mxu0 %v11455_v52 }
 0x2b1   :  { %v11982_v56 = vadd.f32 %v7111_v50, %v7110_v9  ;;  %v11984_v29 = vadd.f32 %v7492_v5, %v7491_v22  ;;  %3125 = vmatprep.mubr.f32.mxu1 %v11986_v40  ;;  %4970 = vmatprep.mubr.f32.mxu0 %v11459_v0  ;;  %v9822_v0 = vld [vmem:[#allocation3 + $0xd3] sm:$0xff]  ;;  %v12002_v22 = vld [vmem:[#allocation3 + $0xe3] sm:$0xff] }
 0x2b2   :  { %9030 = vmatpush3.bf16.msra.mxu1 %v9027_v8 }
 0x2b3   :  { %13924 = vst [vmem:[#allocation33_spill] sm:$0xff] %v11984_v29  ;;  %9032 = vmatprep.subr.bf16.mxu1 %v9031_v48 }
 0x2b4   :  { %3126 = vmatmul.mubr.f32.gmra.mrb[126].mxu1 %v11990_v28  ;;  %4971 = vmatmul.mubr.f32.gmra.mrb[8].mxu0 %v11469_v21 }
 0x2b5   :  { %3130 = vmatprep.mubr.f32.mxu1 %v2041_v58  ;;  %4975 = vmatprep.mubr.f32.mxu0 %v11851_v6 }
 0x2b6   :  { %9034 = vmatpush3.bf16.msra.mxu1 %v9031_v48 }
 0x2b7   :  { %9068 = vmatprep.subr.bf16.mxu1 %v9067_v16 }
 0x2b8   :  { %3131 = vmatmul.mubr.f32.gmra.mrb[128].mxu1 %v1993_v20  ;;  %4976 = vmatmul.mubr.f32.gmra.mrb[10].mxu0 %v11856_v35 }
 0x2b9   :  { %3135 = vmatprep.mubr.f32.mxu1 %v9822_v0  ;;  %4980 = vmatprep.mubr.f32.mxu0 %v11858_v24  ;;  %v2077_v0 = vld [vmem:[#allocation3 + $0x4] sm:$0xff] }
 0x2ba   :  { %v7113_v42 = vpop.f32.mrb[28].mxu1  ;;  %v7494_v17 = vpop.f32.mrb[170].mxu0 }
 0x2bb   :  { %v7114_v8 = vpop.f32.mrb[29].mxu1  ;;  %v7495_v21 = vpop.f32.mrb[171].mxu0 }
 0x2bc   :  { %3136 = vmatmul.mubr.f32.gmra.mrb[130].mxu1 %v9823_v4  ;;  %4981 = vmatmul.mubr.f32.gmra.mrb[12].mxu0 %v11862_v62  ;;  %v11998_v36 = vadd.f32 %v7114_v8, %v7113_v42  ;;  %v12000_v9 = vadd.f32 %v7495_v21, %v7494_v17  ;;  %v3431_v21 = vld [vmem:[%s13885_s3 + $0x610] sm:$0xff] }
 0x2bd   :  { %3140 = vmatprep.mubr.f32.mxu1 %v12002_v22 }
 0x2be   :  { %13925 = vst [vmem:[#allocation34_spill] sm:$0xff] %v12000_v9 }
 0x2c0   :  { %3141 = vmatmul.mubr.f32.gmra.mrb[132].mxu1 %v11398_v30 }
 0x2c1   :  { %3145 = vmatprep.mubr.f32.mxu1 %v11407_v57 }
 0x2c4   :  { %3146 = vmatmul.mubr.f32.gmra.mrb[134].mxu1 %v11416_v10 }
 0x2c5   :  { %3150 = vmatprep.mubr.f32.mxu1 %v11419_v44 }
 0x2c7   :  { %v7116_v24 = vpop.f32.mrb[30].mxu1  ;;  %v7497_v48 = vpop.f32.mrb[172].mxu0 }
 0x2c8   :  { %v7117_v50 = vpop.f32.mrb[31].mxu1  ;;  %3151 = vmatmul.mubr.f32.gmra.mrb[136].mxu1 %v11427_v19  ;;  %v7498_v62 = vpop.f32.mrb[173].mxu0 }
 0x2c9   :  { %v12010_v5 = vadd.f32 %v7117_v50, %v7116_v24  ;;  %v12012_v55 = vadd.f32 %v7498_v62, %v7497_v48  ;;  %3155 = vmatprep.mubr.f32.mxu1 %v11431_v23  ;;  %v3429_v23 = vld [vmem:[%s13885_s3 + $0x600] sm:$0xff]  ;;  %v3432_v24 = vld [vmem:[%s13885_s3 + $0x618] sm:$0xff] }
 0x2ca   :  { %v3449_v62 = vld [vmem:[%s13885_s3 + $0x6a0] sm:$0xff] }
 0x2cb   :  { %13926 = vst [vmem:[#allocation35_spill] sm:$0xff] %v12012_v55  ;;  %v7151_v60 = vpop.f32.mrb[32].mxu1 }
 0x2cc   :  { %v7152_v30 = vpop.f32.mrb[33].mxu1  ;;  %3156 = vmatmul.mubr.f32.gmra.mrb[138].mxu1 %v11435_v18  ;;  %v3430_v18 = vld [vmem:[%s13885_s3 + $0x608] sm:$0xff] }
 0x2cd   :  { %v7153_v57 = vadd.f32 %v7152_v30, %v7151_v60  ;;  %3160 = vmatprep.mubr.f32.mxu1 %v11439_v2  ;;  %v3450_v60 = vld [vmem:[%s13885_s3 + $0x6a8] sm:$0xff] }
 0x2cf   :  { %v12018_v10 = vadd.f32 %v7153_v57, %v11142_v43  ;;  %v7154_v44 = vpop.f32.mrb[34].mxu1 }
 0x2d0   :  { %v7155_v16 = vpop.f32.mrb[35].mxu1  ;;  %3161 = vmatmul.mubr.f32.gmra.mrb[140].mxu1 %v11443_v37  ;;  %v3447_v37 = vld [vmem:[%s13885_s3 + $0x690] sm:$0xff] }
 0x2d1   :  { %v7156_v19 = vadd.f32 %v7155_v16, %v7154_v44  ;;  %3165 = vmatprep.mubr.f32.mxu1 %v11447_v61  ;;  %v3448_v61 = vld [vmem:[%s13885_s3 + $0x698] sm:$0xff] }
 0x2d2   :  { %v9071_v4 = vpack.c.bf16 %v3448_v61, %v3447_v37  ;;  %v3452_v37 = vld [vmem:[%s13885_s3 + $0x6b8] sm:$0xff] }
 0x2d3   :  { %v12029_v2 = vadd.f32 %v7156_v19, %v11158_v7  ;;  %v7157_v43 = vpop.f32.mrb[36].mxu1  ;;  %v7500_v58 = vpop.f32.mrb[174].mxu0  ;;  %v9069_v7 = vpack.c.bf16 %v3430_v18, %v3429_v23  ;;  %v9075_v19 = vpack.c.bf16 %v3450_v60, %v3449_v62  ;;  %v3433_v23 = vld [vmem:[%s13885_s3 + $0x620] sm:$0xff]  ;;  %v3434_v18 = vld [vmem:[%s13885_s3 + $0x628] sm:$0xff]  ;;  %v13928_v62 = vld [vmem:[#allocation21_spill] sm:$0xff] }
 0x2d4   :  { %v7158_v20 = vpop.f32.mrb[37].mxu1  ;;  %3166 = vmatmul.mubr.f32.gmra.mrb[142].mxu1 %v11455_v52  ;;  %v7501_v42 = vpop.f32.mrb[175].mxu0 }
 0x2d5   :  { %v7159_v17 = vadd.f32 %v7158_v20, %v7157_v43  ;;  %8608 = vmatprep.mubr.f32.mxu1 %v2077_v0  ;;  %v12038_v8 = vadd.f32 %v7501_v42, %v7500_v58 }
 0x2d7   :  { %13927 = vst [vmem:[#allocation36_spill] sm:$0xff] %v12038_v8  ;;  %v12047_v48 = vadd.f32 %v7159_v17, %v11200_v63  ;;  %v7160_v52 = vpop.f32.mrb[38].mxu1  ;;  %v7647_v50 = vpop.f32.mrb[176].mxu0  ;;  %v9073_v63 = vpack.c.bf16 %v3432_v24, %v3431_v21  ;;  %v3463_v8 = vld [vmem:[%s13885_s3 + $0x710] sm:$0xff] }
 0x2d8   :  { %v7161_v30 = vpop.f32.mrb[39].mxu1  ;;  %8609 = vmatmul.mubr.f32.vlgmr.msra.gmra.mrb[64].mxu1 %v11479_v46  ;;  %v7648_v57 = vpop.f32.mrb[177].mxu0 }
 0x2d9   :  { %v7162_v44 = vadd.f32 %v7161_v30, %v7160_v52  ;;  %9070 = vmatpush3.bf16.msra.mxu1 %v9069_v7  ;;  %v12056_v16 = vadd.f32 %v7648_v57, %v7647_v50  ;;  %8611 = vmatprep.mubr.f32.mxu1 %v11489_v26  ;;  %v3451_v26 = vld [vmem:[%s13885_s3 + $0x6b0] sm:$0xff]  ;;  %v3454_v52 = vld [vmem:[%s13885_s3 + $0x6c8] sm:$0xff] }
 0x2da   :  { %9072 = vmatprep.subr.bf16.mxu1 %v9071_v4  ;;  %v9079_v17 = vpack.c.bf16 %v3452_v37, %v3451_v26  ;;  %v3435_v7 = vld [vmem:[%s13885_s3 + $0x630] sm:$0xff]  ;;  %v3436_v4 = vld [vmem:[%s13885_s3 + $0x638] sm:$0xff] }
 0x2db   :  { %v12066_v46 = vadd.f32 %v7162_v44, %v11296_v11  ;;  %v7163_v43 = vpop.f32.mrb[40].mxu1  ;;  %v7650_v58 = vpop.f32.mrb[178].mxu0  ;;  %v9077_v11 = vpack.c.bf16 %v3434_v18, %v3433_v23  ;;  %v9081_v44 = vpack.c.bf16 %v3436_v4, %v3435_v7  ;;  %v3438_v23 = vld [vmem:[%s13885_s3 + $0x648] sm:$0xff]  ;;  %v3455_v37 = vld [vmem:[%s13885_s3 + $0x6d0] sm:$0xff] }
 0x2dc   :  { %v7164_v61 = vpop.f32.mrb[41].mxu1  ;;  %8612 = vmatmul.mubr.f32.gmra.mrb[66].mxu1 %v11499_v59  ;;  %v7651_v20 = vpop.f32.mrb[179].mxu0  ;;  %v13930_v18 = vld [vmem:[#allocation15_spill] sm:$0xff] }
 0x2dd   :  { %v7165_v0 = vadd.f32 %v7164_v61, %v7163_v43  ;;  %9074 = vmatpush3.bf16.msra.mxu1 %v9073_v63  ;;  %v12075_v42 = vadd.f32 %v7651_v20, %v7650_v58  ;;  %8614 = vmatprep.mubr.f32.mxu1 %v11507_v49  ;;  %v3453_v49 = vld [vmem:[%s13885_s3 + $0x6c0] sm:$0xff]  ;;  %v3456_v61 = vld [vmem:[%s13885_s3 + $0x6d8] sm:$0xff] }
 0x2de   :  { %9076 = vmatprep.subr.bf16.mxu1 %v9075_v19  ;;  %v9083_v63 = vpack.c.bf16 %v3454_v52, %v3453_v49  ;;  %v3437_v19 = vld [vmem:[%s13885_s3 + $0x640] sm:$0xff]  ;;  %v3439_v49 = vld [vmem:[%s13885_s3 + $0x650] sm:$0xff]  ;;  %v3440_v52 = vld [vmem:[%s13885_s3 + $0x658] sm:$0xff] }
 0x2df   :  { %v12085_v59 = vadd.f32 %v7165_v0, %v11382_v53  ;;  %v7166_v21 = vpop.f32.mrb[42].mxu1  ;;  %v7653_v24 = vpop.f32.mrb[180].mxu0  ;;  %v13929_v53 = vld [vmem:[#allocation22_spill] sm:$0xff]  ;;  %v13931_v0 = vld [vmem:[#allocation23_spill] sm:$0xff] }
 0x2e0   :  { %v7167_v50 = vpop.f32.mrb[43].mxu1  ;;  %8615 = vmatmul.mubr.f32.gmra.mrb[68].mxu1 %v13928_v62  ;;  %v7654_v60 = vpop.f32.mrb[181].mxu0 }
 0x2e1   :  { %v7168_v30 = vadd.f32 %v7167_v50, %v7166_v21  ;;  %9078 = vmatpush3.bf16.msra.mxu1 %v9077_v11  ;;  %v12094_v57 = vadd.f32 %v7654_v60, %v7653_v24  ;;  %8617 = vmatprep.mubr.f32.mxu1 %v13929_v53  ;;  %v9085_v21 = vpack.c.bf16 %v3438_v23, %v3437_v19  ;;  %v13932_v50 = vld [vmem:[#allocation17_spill] sm:$0xff]  ;;  %v3457_v53 = vld [vmem:[%s13885_s3 + $0x6e0] sm:$0xff]  ;;  %v13933_v19 = vld [vmem:[#allocation24_spill] sm:$0xff] }
 0x2e2   :  { %9080 = vmatprep.subr.bf16.mxu1 %v9079_v17  ;;  %v2089_v17 = vld [vmem:[#allocation3 + $0xc4] sm:$0xff]  ;;  %v9087_v24 = vpack.c.bf16 %v3456_v61, %v3455_v37  ;;  %v9089_v37 = vpack.c.bf16 %v3440_v52, %v3439_v49 }
 0x2e3   :  { %v12104_v43 = vadd.f32 %v7168_v30, %v13930_v18  ;;  %v7169_v58 = vpop.f32.mrb[44].mxu1  ;;  %v7656_v26 = vpop.f32.mrb[182].mxu0  ;;  %v13936_v52 = vld [vmem:[#allocation27_spill] sm:$0xff] }
 0x2e4   :  { %v7170_v20 = vpop.f32.mrb[45].mxu1  ;;  %8618 = vmatmul.mubr.f32.gmra.mrb[70].mxu1 %v13931_v0  ;;  %v7657_v11 = vpop.f32.mrb[183].mxu0  ;;  %v3442_v0 = vld [vmem:[%s13885_s3 + $0x668] sm:$0xff] }
 0x2e5   :  { %v7171_v7 = vadd.f32 %v7170_v20, %v7169_v58  ;;  %9082 = vmatpush3.bf16.msra.mxu1 %v9081_v44  ;;  %v12113_v4 = vadd.f32 %v7657_v11, %v7656_v26  ;;  %8620 = vmatprep.mubr.f32.mxu1 %v2089_v17  ;;  %v3458_v44 = vld [vmem:[%s13885_s3 + $0x6e8] sm:$0xff]  ;;  %v13934_v26 = vld [vmem:[#allocation26_spill] sm:$0xff] }
 0x2e6   :  { %9084 = vmatprep.subr.bf16.mxu1 %v9083_v63  ;;  %v9091_v61 = vpack.c.bf16 %v3458_v44, %v3457_v53  ;;  %v3441_v20 = vld [vmem:[%s13885_s3 + $0x660] sm:$0xff]  ;;  %v13937_v44 = vld [vmem:[#allocation28_spill] sm:$0xff] }
 0x2e7   :  { %v12122_v62 = vadd.f32 %v7171_v7, %v13932_v50  ;;  %v7172_v60 = vpop.f32.mrb[46].mxu1  ;;  %v7659_v30 = vpop.f32.mrb[184].mxu0  ;;  %v13935_v11 = vld [vmem:[#allocation19_spill] sm:$0xff]  ;;  %v3459_v50 = vld [vmem:[%s13885_s3 + $0x6f0] sm:$0xff] }
 0x2e8   :  { %v7173_v63 = vpop.f32.mrb[47].mxu1  ;;  %8621 = vmatmul.mubr.f32.gmra.mrb[72].mxu1 %v13933_v19  ;;  %v7660_v23 = vpop.f32.mrb[185].mxu0 }
 0x2e9   :  { %v7174_v18 = vadd.f32 %v7173_v63, %v7172_v60  ;;  %9086 = vmatpush3.bf16.msra.mxu1 %v9085_v21  ;;  %v12131_v58 = vadd.f32 %v7660_v23, %v7659_v30  ;;  %8623 = vmatprep.mubr.f32.mxu1 %v13934_v26  ;;  %v9093_v63 = vpack.c.bf16 %v3442_v0, %v3441_v20  ;;  %v3443_v23 = vld [vmem:[%s13885_s3 + $0x670] sm:$0xff] }
 0x2ea   :  { %9088 = vmatprep.subr.bf16.mxu1 %v9087_v24  ;;  %v3460_v24 = vld [vmem:[%s13885_s3 + $0x6f8] sm:$0xff] }
 0x2eb   :  { %v12141_v17 = vadd.f32 %v7174_v18, %v13935_v11  ;;  %v7175_v7 = vpop.f32.mrb[48].mxu1  ;;  %v7662_v21 = vpop.f32.mrb[186].mxu0  ;;  %v9095_v19 = vpack.c.bf16 %v3460_v24, %v3459_v50  ;;  %v3444_v18 = vld [vmem:[%s13885_s3 + $0x678] sm:$0xff] }
 0x2ec   :  { %v7176_v49 = vpop.f32.mrb[49].mxu1  ;;  %8624 = vmatmul.mubr.f32.gmra.mrb[74].mxu1 %v13936_v52  ;;  %v7663_v60 = vpop.f32.mrb[187].mxu0  ;;  %v13938_v0 = vld [vmem:[#allocation29_spill] sm:$0xff] }
 0x2ed   :  { %v7177_v30 = vadd.f32 %v7176_v49, %v7175_v7  ;;  %9090 = vmatpush3.bf16.msra.mxu1 %v9089_v37  ;;  %v12150_v53 = vadd.f32 %v7663_v60, %v7662_v21  ;;  %8626 = vmatprep.mubr.f32.mxu1 %v13937_v44  ;;  %v3461_v7 = vld [vmem:[%s13885_s3 + $0x700] sm:$0xff]  ;;  %v9097_v49 = vpack.c.bf16 %v3444_v18, %v3443_v23 }
 0x2ee   :  { %9092 = vmatprep.subr.bf16.mxu1 %v9091_v61  ;;  %v3462_v61 = vld [vmem:[%s13885_s3 + $0x708] sm:$0xff] }
 0x2ef   :  { %v12160_v26 = vadd.f32 %v7177_v30, %v11848_v25  ;;  %v7178_v11 = vpop.f32.mrb[50].mxu1  ;;  %v7665_v37 = vpop.f32.mrb[188].mxu0  ;;  %v13939_v25 = vld [vmem:[#allocation30_spill] sm:$0xff]  ;;  %v9099_v52 = vpack.c.bf16 %v3462_v61, %v3461_v7 }
 0x2f0   :  { %v7179_v20 = vpop.f32.mrb[51].mxu1  ;;  %8627 = vmatmul.mubr.f32.gmra.mrb[76].mxu1 %v13938_v0  ;;  %v7666_v21 = vpop.f32.mrb[189].mxu0  ;;  %v3465_v0 = vld [vmem:[%s13885_s3 + $0x720] sm:$0xff] }
 0x2f1   :  { %v7180_v50 = vadd.f32 %v7179_v20, %v7178_v11  ;;  %9094 = vmatpush3.bf16.msra.mxu1 %v9093_v63  ;;  %v12169_v24 = vadd.f32 %v7666_v21, %v7665_v37  ;;  %8629 = vmatprep.mubr.f32.mxu1 %v13939_v25  ;;  %v3464_v63 = vld [vmem:[%s13885_s3 + $0x718] sm:$0xff]  ;;  %v13940_v37 = vld [vmem:[#allocation31_spill] sm:$0xff] }
 0x2f2   :  { %9096 = vmatprep.subr.bf16.mxu1 %v9095_v19  ;;  %v3466_v21 = vld [vmem:[%s13885_s3 + $0x728] sm:$0xff] }
 0x2f3   :  { %v12173_v60 = vadd.f32 %v7180_v50, %v11865_v47  ;;  %v7181_v30 = vpop.f32.mrb[52].mxu1  ;;  %v7668_v44 = vpop.f32.mrb[190].mxu0  ;;  %v9103_v47 = vpack.c.bf16 %v3464_v63, %v3463_v8  ;;  %v3467_v63 = vld [vmem:[%s13885_s3 + $0x730] sm:$0xff] }
 0x2f4   :  { %v7182_v11 = vpop.f32.mrb[53].mxu1  ;;  %8630 = vmatmul.mubr.f32.gmra.mrb[78].mxu1 %v13940_v37  ;;  %v7669_v20 = vpop.f32.mrb[191].mxu0 }
 0x2f5   :  { %v7183_v23 = vadd.f32 %v7182_v11, %v7181_v30  ;;  %9098 = vmatpush3.bf16.msra.mxu1 %v9097_v49  ;;  %v12182_v19 = vadd.f32 %v7669_v20, %v7668_v44  ;;  %3686 = vmatprep.mubr.f32.mxu1 %v11912_v34 }
 0x2f6   :  { %9100 = vmatprep.subr.bf16.mxu1 %v9099_v52 }
 0x2f7   :  { %v12186_v18 = vadd.f32 %v7183_v23, %v11877_v27  ;;  %v7184_v7 = vpop.f32.mrb[54].mxu1  ;;  %v7671_v61 = vpop.f32.mrb[192].mxu0  ;;  %v9107_v27 = vpack.c.bf16 %v3466_v21, %v3465_v0 }
 0x2f8   :  { %v7185_v50 = vpop.f32.mrb[55].mxu1  ;;  %3687 = vmatmul.mubr.f32.vlgmr.msra.gmra.mrb[144].mxu1 %v11915_v39  ;;  %v7672_v25 = vpop.f32.mrb[193].mxu0  ;;  %v3468_v39 = vld [vmem:[%s13885_s3 + $0x738] sm:$0xff] }
 0x2f9   :  { %v7186_v34 = vadd.f32 %v7185_v50, %v7184_v7  ;;  %9102 = vmatpush3.bf16.msra.mxu1 %v9099_v52  ;;  %v12195_v8 = vadd.f32 %v7672_v25, %v7671_v61  ;;  %3691 = vmatprep.mubr.f32.mxu1 %v11924_v32  ;;  %v3469_v61 = vld [vmem:[%s13885_s3 + $0x740] sm:$0xff] }
 0x2fa   :  { %9104 = vmatprep.subr.bf16.mxu1 %v9103_v47 }
 0x2fb   :  { %v12199_v49 = vadd.f32 %v7186_v34, %v11899_v3  ;;  %v7187_v30 = vpop.f32.mrb[56].mxu1  ;;  %v7674_v44 = vpop.f32.mrb[194].mxu0  ;;  %v9111_v3 = vpack.c.bf16 %v3468_v39, %v3467_v63 }
 0x2fc   :  { %v7188_v52 = vpop.f32.mrb[57].mxu1  ;;  %3692 = vmatmul.mubr.f32.gmra.mrb[146].mxu1 %v11928_v51  ;;  %v7675_v11 = vpop.f32.mrb[195].mxu0  ;;  %v3470_v51 = vld [vmem:[%s13885_s3 + $0x748] sm:$0xff] }
 0x2fd   :  { %v7189_v32 = vadd.f32 %v7188_v52, %v7187_v30  ;;  %v12208_v37 = vadd.f32 %v7675_v11, %v7674_v44  ;;  %3696 = vmatprep.mubr.f32.mxu1 %v11869_v15  ;;  %9106 = vmatpush3.bf16.msra.mxu1 %v9103_v47  ;;  %v3471_v30 = vld [vmem:[%s13885_s3 + $0x750] sm:$0xff] }
 0x2fe   :  { %9108 = vmatprep.subr.bf16.mxu1 %v9107_v27 }
 0x2ff   :  { %v12212_v20 = vadd.f32 %v7189_v32, %v11938_v33  ;;  %v7190_v23 = vpop.f32.mrb[58].mxu1  ;;  %v7677_v7 = vpop.f32.mrb[196].mxu0  ;;  %v9115_v33 = vpack.c.bf16 %v3470_v51, %v3469_v61  ;;  %v3473_v32 = vld [vmem:[%s13885_s3 + $0x760] sm:$0xff] }
 0x300   :  { %v7191_v0 = vpop.f32.mrb[59].mxu1  ;;  %3697 = vmatmul.mubr.f32.gmra.mrb[148].mxu1 %v11944_v45  ;;  %v7678_v15 = vpop.f32.mrb[197].mxu0  ;;  %v3472_v45 = vld [vmem:[%s13885_s3 + $0x758] sm:$0xff] }
 0x301   :  { %v7192_v47 = vadd.f32 %v7191_v0, %v7190_v23  ;;  %v12221_v21 = vadd.f32 %v7678_v15, %v7677_v7  ;;  %3701 = vmatprep.mubr.f32.mxu1 %v11954_v12  ;;  %9110 = vmatpush3.bf16.msra.mxu1 %v9107_v27  ;;  %v3475_v0 = vld [vmem:[%s13885_s3 + $0x770] sm:$0xff] }
 0x302   :  { %9112 = vmatprep.subr.bf16.mxu1 %v9111_v3 }
 0x303   :  { %v12225_v50 = vadd.f32 %v7192_v47, %v11982_v56  ;;  %v7193_v25 = vpop.f32.mrb[60].mxu1  ;;  %v7680_v34 = vpop.f32.mrb[198].mxu0  ;;  %v9119_v56 = vpack.c.bf16 %v3472_v45, %v3471_v30  ;;  %v9826_v30 = vld [vmem:[#allocation3 + $0x82] sm:$0xff]  ;;  %v9827_v45 = vld [vmem:[#allocation3 + $0x93] sm:$0xff] }
 0x304   :  { %v7194_v44 = vpop.f32.mrb[61].mxu1  ;;  %3702 = vmatmul.mubr.f32.gmra.mrb[150].mxu1 %v11958_v14  ;;  %v7681_v12 = vpop.f32.mrb[199].mxu0  ;;  %v3474_v14 = vld [vmem:[%s13885_s3 + $0x768] sm:$0xff] }
 0x305   :  { %v7195_v27 = vadd.f32 %v7194_v44, %v7193_v25  ;;  %v12234_v63 = vadd.f32 %v7681_v12, %v7680_v34  ;;  %3706 = vmatprep.mubr.f32.mxu1 %v11968_v13  ;;  %9114 = vmatpush3.bf16.msra.mxu1 %v9111_v3  ;;  %v4073_v25 = vld [vmem:[%s13885_s3 + $0x980] sm:$0xff]  ;;  %v4074_v34 = vld [vmem:[%s13885_s3 + $0x988] sm:$0xff] }
 0x306   :  { %9116 = vmatprep.subr.bf16.mxu1 %v9115_v33  ;;  %v12270_v12 = vpack.c.bf16 %v4074_v34, %v4073_v25  ;;  %v1642_v34 = vld [vmem:[#allocation2 + $0x228] ss:$2 sm:$0xff] }
 0x307   :  { %v12238_v39 = vadd.f32 %v7195_v27, %v11998_v36  ;;  %v7196_v52 = vpop.f32.mrb[62].mxu1  ;;  %v7683_v11 = vpop.f32.mrb[200].mxu0  ;;  %v9123_v36 = vpack.c.bf16 %v3474_v14, %v3473_v32  ;;  %v9829_v14 = vld [vmem:[#allocation3 + $0xe2] sm:$0xff] }
 0x308   :  { %v7197_v23 = vpop.f32.mrb[63].mxu1  ;;  %3707 = vmatmul.mubr.f32.gmra.mrb[152].mxu1 %v11972_v54  ;;  %v7684_v13 = vpop.f32.mrb[201].mxu0  ;;  %v3476_v54 = vld [vmem:[%s13885_s3 + $0x778] sm:$0xff] }
 0x309   :  { %v7198_v3 = vadd.f32 %v7197_v23, %v7196_v52  ;;  %v12247_v7 = vadd.f32 %v7684_v13, %v7683_v11  ;;  %3711 = vmatprep.mubr.f32.mxu1 %v11986_v40  ;;  %9118 = vmatpush3.bf16.msra.mxu1 %v9115_v33  ;;  %v9825_v40 = vld [vmem:[#allocation3 + $0x83] sm:$0xff] }
 0x30a   :  { %9120 = vmatprep.subr.bf16.mxu1 %v9119_v56 }
 0x30b   :  { %v12251_v61 = vadd.f32 %v7198_v3, %v12010_v5  ;;  %v7686_v51 = vpop.f32.mrb[202].mxu0  ;;  %v9127_v5 = vpack.c.bf16 %v3476_v54, %v3475_v0  ;;  %v9830_v3 = vld [vmem:[#allocation3 + $0xf3] sm:$0xff] }
 0x30c   :  { %3712 = vmatmul.mubr.f32.gmra.mrb[154].mxu1 %v11990_v28  ;;  %v7687_v15 = vpop.f32.mrb[203].mxu0  ;;  %v9831_v0 = vld [vmem:[#allocation3 + $0xf2] sm:$0xff] }
 0x30d   :  { %v12260_v47 = vadd.f32 %v7687_v15, %v7686_v51  ;;  %3716 = vmatprep.mubr.f32.mxu1 %v9825_v40  ;;  %9122 = vmatpush3.bf16.msra.mxu1 %v9119_v56  ;;  %v9828_v56 = vld [vmem:[#allocation3 + $0x92] sm:$0xff]  ;;  %v9832_v15 = vld [vmem:[#allocation3 + $0x103] sm:$0xff] }
 0x30e   :  { %9124 = vmatprep.subr.bf16.mxu1 %v9123_v36  ;;  %v1644_v40 = vld [vmem:[#allocation2 + $0x238] ss:$2 sm:$0xf] }
 0x30f   :  { %v7689_v33 = vpop.f32.mrb[204].mxu0 }
 0x310   :  { %3717 = vmatmul.mubr.f32.gmra.mrb[156].mxu1 %v9826_v30  ;;  %v7690_v28 = vpop.f32.mrb[205].mxu0  ;;  %v1738_v30 = vld [vmem:[#allocation2 + $0x229] ss:$2 sm:$0xff] }
 0x311   :  { %3721 = vmatprep.mubr.f32.mxu1 %v9827_v45  ;;  %v12268_v44 = vadd.f32 %v7690_v28, %v7689_v33  ;;  %9126 = vmatpush3.bf16.msra.mxu1 %v9123_v36  ;;  %v9833_v28 = vld [vmem:[#allocation3 + $0x102] sm:$0xff] }
 0x312   :  { %9128 = vmatprep.subr.bf16.mxu1 %v9127_v5 }
 0x313   :  { %v7692_v27 = vpop.f32.mrb[206].mxu0 }
 0x314   :  { %3722 = vmatmul.mubr.f32.gmra.mrb[158].mxu1 %v9828_v56  ;;  %v7693_v52 = vpop.f32.mrb[207].mxu0 }
 0x315   :  { %3726 = vmatprep.mubr.f32.mxu1 %v12002_v22  ;;  %v12273_v11 = vadd.f32 %v7693_v52, %v7692_v27  ;;  %9130 = vmatpush3.bf16.msra.mxu1 %v9127_v5  ;;  %v1740_v5 = vld [vmem:[#allocation2 + $0x239] ss:$2 sm:$0xf] }
 0x316   :  { %9196 = vmatprep.subr.bf16.mxu1 %v12270_v12  ;;  %v9834_v27 = vld [vmem:[#allocation3 + $0x113] sm:$0xff] }
 0x317   :  { %v7727_v32 = vpop.f32.mrb[208].mxu0 }
 0x318   :  { %3727 = vmatmul.mubr.f32.gmra.mrb[160].mxu1 %v9829_v14  ;;  %v7728_v23 = vpop.f32.mrb[209].mxu0  ;;  %v1788_v14 = vmax.f32 %v1644_v40, %v1740_v5  ;;  %v9838_v5 = vld [vmem:[#allocation3 + $0x133] sm:$0xff] }
 0x319   :  { %v7729_v13 = vadd.f32 %v7728_v23, %v7727_v32  ;;  %3731 = vmatprep.mubr.f32.mxu1 %v9830_v3  ;;  %v1787_v32 = vmax.f32 %v1642_v34, %v1738_v30  ;;  %v9835_v23 = vld [vmem:[#allocation3 + $0x112] sm:$0xff]  ;;  %v9836_v3 = vld [vmem:[#allocation3 + $0x123] sm:$0xff] }
 0x31b   :  { %v12277_v36 = vadd.f32 %v7729_v13, %v12056_v16  ;;  %v7730_v51 = vpop.f32.mrb[210].mxu0 }
 0x31c   :  { %3732 = vmatmul.mubr.f32.gmra.mrb[162].mxu1 %v9831_v0  ;;  %v7731_v54 = vpop.f32.mrb[211].mxu0  ;;  %v1836_v0 = vmax.f32 %v1788_v14, 0.0 }
 0x31d   :  { %v7732_v22 = vadd.f32 %v7731_v54, %v7730_v51  ;;  %3736 = vmatprep.mubr.f32.mxu1 %v9832_v15  ;;  %v12285_v51 = vmax.f32 %v1787_v32, 0.0 }
 0x31e   :  { %1884 = vst [vmem:[#allocation3 + $0x178] sm:$0xf] %v1836_v0  ;;  %v9841_v0 = vld [vmem:[#allocation3 + $0x142] sm:$0xff] }
 0x31f   :  { %v12280_v33 = vadd.f32 %v7732_v22, %v12075_v42  ;;  %v7733_v25 = vpop.f32.mrb[212].mxu0  ;;  %1883 = vst [vmem:[#allocation3 + $0x170] sm:$0xff] %v12285_v51 }
 0x320   :  { %3737 = vmatmul.mubr.f32.gmra.mrb[164].mxu1 %v9833_v28  ;;  %v7734_v45 = vpop.f32.mrb[213].mxu0 }
 0x321   :  { %v7735_v16 = vadd.f32 %v7734_v45, %v7733_v25  ;;  %3741 = vmatprep.mubr.f32.mxu1 %v9834_v27  ;;  %v9839_v45 = vld [vmem:[#allocation3 + $0x132] sm:$0xff] }
 0x323   :  { %v12283_v56 = vadd.f32 %v7735_v16, %v12094_v57  ;;  %v7736_v52 = vpop.f32.mrb[214].mxu0  ;;  %v9837_v57 = vld [vmem:[#allocation3 + $0x122] sm:$0xff] }
 0x324   :  { %3742 = vmatmul.mubr.f32.gmra.mrb[166].mxu1 %v9835_v23  ;;  %v7737_v13 = vpop.f32.mrb[215].mxu0 }
 0x325   :  { %v7738_v42 = vadd.f32 %v7737_v13, %v7736_v52  ;;  %3746 = vmatprep.mubr.f32.mxu1 %v9836_v3  ;;  %v9840_v52 = vld [vmem:[#allocation3 + $0x143] sm:$0xff] }
 0x326   :  { %v2052_v32 = vld [vmem:[#allocation3 + $0x173] sm:$0xff] }
 0x327   :  { %v12288_v54 = vadd.f32 %v7738_v42, %v12113_v4  ;;  %v7739_v22 = vpop.f32.mrb[216].mxu0  ;;  %v2004_v14 = vld [vmem:[#allocation3 + $0x172] sm:$0xff]  ;;  %4985 = vmatprep.mubr.f32.mxu0 %v2052_v32 }
 0x328   :  { %3747 = vmatmul.mubr.f32.gmra.mrb[168].mxu1 %v9837_v57  ;;  %v7740_v15 = vpop.f32.mrb[217].mxu0  ;;  %4986 = vmatmul.mubr.f32.gmra.mrb[14].mxu0 %v2004_v14  ;;  %v4077_v14 = vld [vmem:[%s13885_s3 + $0x9a0] sm:$0xff] }
 0x329   :  { %v7741_v40 = vadd.f32 %v7740_v15, %v7739_v22  ;;  %3751 = vmatprep.mubr.f32.mxu1 %v9838_v5 }
 0x32b   :  { %v12292_v25 = vadd.f32 %v7741_v40, %v12131_v58  ;;  %v7263_v34 = vpop.f32.mrb[80].mxu1  ;;  %v7742_v30 = vpop.f32.mrb[218].mxu0 }
 0x32c   :  { %v7264_v28 = vpop.f32.mrb[81].mxu1  ;;  %3752 = vmatmul.mubr.f32.gmra.mrb[170].mxu1 %v9839_v45  ;;  %v7743_v4 = vpop.f32.mrb[219].mxu0 }
 0x32d   :  { %v7265_v16 = vadd.f32 %v7264_v28, %v7263_v34  ;;  %v7744_v27 = vadd.f32 %v7743_v4, %v7742_v30  ;;  %3756 = vmatprep.mubr.f32.mxu1 %v9840_v52  ;;  %v4075_v34 = vld [vmem:[%s13885_s3 + $0x990] sm:$0xff]  ;;  %v4076_v30 = vld [vmem:[%s13885_s3 + $0x998] sm:$0xff]  ;;  %v9842_v4 = vld [vmem:[#allocation3 + $0x24] sm:$0xff] }
 0x32f   :  { %v12295_v23 = vadd.f32 %v7265_v16, %v12018_v10  ;;  %v12298_v13 = vadd.f32 %v7744_v27, %v12150_v53  ;;  %v7266_v58 = vpop.f32.mrb[82].mxu1  ;;  %v7745_v42 = vpop.f32.mrb[220].mxu0 }
 0x330   :  { %v7267_v3 = vpop.f32.mrb[83].mxu1  ;;  %3757 = vmatmul.mubr.f32.gmra.mrb[172].mxu1 %v9841_v0  ;;  %v7746_v22 = vpop.f32.mrb[221].mxu0 }
 0x331   :  { %v7268_v57 = vadd.f32 %v7267_v3, %v7266_v58  ;;  %v7747_v15 = vadd.f32 %v7746_v22, %v7745_v42  ;;  %3761 = vmatprep.mubr.f32.mxu1 %v11851_v6  ;;  %v12326_v42 = vld [vmem:[#allocation3 + $0x34] sm:$0xff] }
 0x333   :  { %v12302_v40 = vadd.f32 %v7268_v57, %v12029_v2  ;;  %v12305_v10 = vadd.f32 %v7747_v15, %v12169_v24  ;;  %v7269_v53 = vpop.f32.mrb[84].mxu1  ;;  %v7748_v5 = vpop.f32.mrb[222].mxu0  ;;  %v9199_v24 = vpack.c.bf16 %v4076_v30, %v4075_v34  ;;  %v4079_v34 = vld [vmem:[%s13885_s3 + $0x9b0] sm:$0xff] }
 0x334   :  { %v7270_v28 = vpop.f32.mrb[85].mxu1  ;;  %3762 = vmatmul.mubr.f32.gmra.mrb[174].mxu1 %v11856_v35  ;;  %v7749_v6 = vpop.f32.mrb[223].mxu0  ;;  %v4078_v35 = vld [vmem:[%s13885_s3 + $0x9a8] sm:$0xff] }
 0x335   :  { %v7271_v45 = vadd.f32 %v7270_v28, %v7269_v53  ;;  %v7750_v2 = vadd.f32 %v7749_v6, %v7748_v5  ;;  %8664 = vmatprep.mubr.f32.mxu1 %v9842_v4  ;;  %v9203_v22 = vpack.c.bf16 %v4078_v35, %v4077_v14  ;;  %v12345_v28 = vld [vmem:[#allocation3 + $0x54] sm:$0xff]  ;;  %v4081_v35 = vld [vmem:[%s13885_s3 + $0x9c0] sm:$0xff] }
 0x337   :  { %v12315_v16 = vadd.f32 %v7271_v45, %v12047_v48  ;;  %v12318_v27 = vadd.f32 %v7750_v2, %v12182_v19  ;;  %v7272_v52 = vpop.f32.mrb[86].mxu1  ;;  %v7751_v32 = vpop.f32.mrb[224].mxu0  ;;  %v12330_v19 = vld [vmem:[#allocation3 + $0x44] sm:$0xff] }
 0x338   :  { %v7273_v58 = vpop.f32.mrb[87].mxu1  ;;  %8665 = vmatmul.mubr.f32.vlgmr.msra.gmra.mrb[64].mxu1 %v12326_v42  ;;  %v7752_v48 = vpop.f32.mrb[225].mxu0 }
 0x339   :  { %v7274_v3 = vadd.f32 %v7273_v58, %v7272_v52  ;;  %v7753_v0 = vadd.f32 %v7752_v48, %v7751_v32  ;;  %9198 = vmatpush3.bf16.msra.mxu1 %v12270_v12  ;;  %8667 = vmatprep.mubr.f32.mxu1 %v12330_v19  ;;  %v4080_v12 = vld [vmem:[%s13885_s3 + $0x9b8] sm:$0xff] }
 0x33a   :  { %9200 = vmatprep.subr.bf16.mxu1 %v9199_v24  ;;  %v9207_v2 = vpack.c.bf16 %v4080_v12, %v4079_v34  ;;  %v12363_v48 = vld [vmem:[#allocation3 + $0x74] sm:$0xff] }
 0x33b   :  { %v12334_v57 = vadd.f32 %v7274_v3, %v12066_v46  ;;  %v12337_v15 = vadd.f32 %v7753_v0, %v12195_v8  ;;  %v7275_v53 = vpop.f32.mrb[88].mxu1  ;;  %v7754_v5 = vpop.f32.mrb[226].mxu0  ;;  %v12348_v8 = vld [vmem:[#allocation3 + $0x64] sm:$0xff] }
 0x33c   :  { %v7276_v30 = vpop.f32.mrb[89].mxu1  ;;  %8668 = vmatmul.mubr.f32.gmra.mrb[66].mxu1 %v12345_v28  ;;  %v7755_v46 = vpop.f32.mrb[227].mxu0 }
 0x33d   :  { %v7277_v6 = vadd.f32 %v7276_v30, %v7275_v53  ;;  %v7756_v45 = vadd.f32 %v7755_v46, %v7754_v5  ;;  %9202 = vmatpush3.bf16.msra.mxu1 %v9199_v24  ;;  %8670 = vmatprep.mubr.f32.mxu1 %v12348_v8  ;;  %v4082_v24 = vld [vmem:[%s13885_s3 + $0x9c8] sm:$0xff]  ;;  %v12375_v46 = vld [vmem:[#allocation3 + $0x94] sm:$0xff] }
 0x33e   :  { %9204 = vmatprep.subr.bf16.mxu1 %v9203_v22  ;;  %v9211_v53 = vpack.c.bf16 %v4082_v24, %v4081_v35 }
 0x33f   :  { %v12352_v4 = vadd.f32 %v7277_v6, %v12085_v59  ;;  %v12355_v52 = vadd.f32 %v7756_v45, %v12208_v37  ;;  %v7278_v32 = vpop.f32.mrb[90].mxu1  ;;  %v7757_v14 = vpop.f32.mrb[228].mxu0  ;;  %v12366_v37 = vld [vmem:[#allocation3 + $0x84] sm:$0xff]  ;;  %v4084_v6 = vld [vmem:[%s13885_s3 + $0x9d8] sm:$0xff] }
 0x340   :  { %v7279_v58 = vpop.f32.mrb[91].mxu1  ;;  %8671 = vmatmul.mubr.f32.gmra.mrb[68].mxu1 %v12363_v48  ;;  %v7758_v59 = vpop.f32.mrb[229].mxu0 }
 0x341   :  { %v7280_v3 = vadd.f32 %v7279_v58, %v7278_v32  ;;  %v7759_v0 = vadd.f32 %v7758_v59, %v7757_v14  ;;  %9206 = vmatpush3.bf16.msra.mxu1 %v9203_v22  ;;  %8673 = vmatprep.mubr.f32.mxu1 %v12366_v37  ;;  %v4083_v22 = vld [vmem:[%s13885_s3 + $0x9d0] sm:$0xff] }
 0x342   :  { %9208 = vmatprep.subr.bf16.mxu1 %v9207_v2  ;;  %v9215_v35 = vpack.c.bf16 %v4084_v6, %v4083_v22 }
 0x343   :  { %v12370_v5 = vadd.f32 %v7280_v3, %v12104_v43  ;;  %v12373_v34 = vadd.f32 %v7759_v0, %v12221_v21  ;;  %v7281_v12 = vpop.f32.mrb[92].mxu1  ;;  %v7760_v30 = vpop.f32.mrb[230].mxu0  ;;  %v9849_v21 = vld [vmem:[#allocation3 + $0xe4] sm:$0xff] }
 0x344   :  { %v7282_v45 = vpop.f32.mrb[93].mxu1  ;;  %8674 = vmatmul.mubr.f32.gmra.mrb[70].mxu1 %v12375_v46  ;;  %v7761_v43 = vpop.f32.mrb[231].mxu0  ;;  %v4085_v0 = vld [vmem:[%s13885_s3 + $0x9e0] sm:$0xff] }
 0x345   :  { %13941 = vst [vmem:[#allocation21_spill] sm:$0xff] %v12373_v34  ;;  %v7283_v32 = vadd.f32 %v7282_v45, %v7281_v12  ;;  %v7762_v14 = vadd.f32 %v7761_v43, %v7760_v30  ;;  %9210 = vmatpush3.bf16.msra.mxu1 %v9207_v2  ;;  %8676 = vmatprep.mubr.f32.mxu1 %v9849_v21  ;;  %v4086_v2 = vld [vmem:[%s13885_s3 + $0x9e8] sm:$0xff]  ;;  %v12396_v30 = vld [vmem:[#allocation3 + $0xf4] sm:$0xff] }
 0x346   :  { %9212 = vmatprep.subr.bf16.mxu1 %v9211_v53  ;;  %v9219_v45 = vpack.c.bf16 %v4086_v2, %v4085_v0  ;;  %v1944_v34 = vld [vmem:[#allocation3 + $0xb1] sm:$0xff] }
 0x347   :  { %v12385_v24 = vadd.f32 %v7283_v32, %v12122_v62  ;;  %v12388_v58 = vadd.f32 %v7762_v14, %v12234_v63  ;;  %v7284_v59 = vpop.f32.mrb[94].mxu1  ;;  %v7763_v3 = vpop.f32.mrb[232].mxu0  ;;  %v12399_v63 = vld [vmem:[#allocation3 + $0x104] sm:$0xff] }
 0x348   :  { %v7285_v12 = vpop.f32.mrb[95].mxu1  ;;  %8677 = vmatmul.mubr.f32.gmra.mrb[72].mxu1 %v12396_v30  ;;  %v7764_v62 = vpop.f32.mrb[233].mxu0 }
 0x349   :  { %13942 = vst [vmem:[#allocation22_spill] sm:$0xff] %v12388_v58  ;;  %v7286_v22 = vadd.f32 %v7285_v12, %v7284_v59  ;;  %v7765_v6 = vadd.f32 %v7764_v62, %v7763_v3  ;;  %9214 = vmatpush3.bf16.msra.mxu1 %v9211_v53  ;;  %8679 = vmatprep.mubr.f32.mxu1 %v12399_v63  ;;  %v4087_v59 = vld [vmem:[%s13885_s3 + $0x9f0] sm:$0xff]  ;;  %v4088_v53 = vld [vmem:[%s13885_s3 + $0x9f8] sm:$0xff] }
 0x34a   :  { %9216 = vmatprep.subr.bf16.mxu1 %v9215_v35  ;;  %v12414_v12 = vld [vmem:[#allocation3 + $0x114] sm:$0xff]  ;;  %v9223_v62 = vpack.c.bf16 %v4088_v53, %v4087_v59 }
 0x34b   :  { %v12403_v43 = vadd.f32 %v7286_v22, %v12141_v17  ;;  %v12406_v32 = vadd.f32 %v7765_v6, %v12247_v7  ;;  %v7287_v14 = vpop.f32.mrb[96].mxu1  ;;  %v7766_v21 = vpop.f32.mrb[234].mxu0  ;;  %v12417_v7 = vld [vmem:[#allocation3 + $0x124] sm:$0xff]  ;;  %v4624_v58 = vld [vmem:[%s13885_s3 + $0xa18] sm:$0xff] }
 0x34c   :  { %v7288_v3 = vpop.f32.mrb[97].mxu1  ;;  %8680 = vmatmul.mubr.f32.gmra.mrb[74].mxu1 %v12414_v12  ;;  %v7767_v17 = vpop.f32.mrb[235].mxu0 }
 0x34d   :  { %13943 = vst [vmem:[#allocation15_spill] sm:$0xff] %v12406_v32  ;;  %v7289_v0 = vadd.f32 %v7288_v3, %v7287_v14  ;;  %v7768_v2 = vadd.f32 %v7767_v17, %v7766_v21  ;;  %9218 = vmatpush3.bf16.msra.mxu1 %v9215_v35  ;;  %8682 = vmatprep.mubr.f32.mxu1 %v12417_v7  ;;  %v4637_v14 = vld [vmem:[%s13885_s3 + $0xa80] sm:$0xff]  ;;  %v4638_v35 = vld [vmem:[%s13885_s3 + $0xa88] sm:$0xff]  ;;  %v12432_v3 = vld [vmem:[#allocation3 + $0x134] sm:$0xff] }
 0x34e   :  { %9220 = vmatprep.subr.bf16.mxu1 %v9219_v45  ;;  %v9227_v17 = vpack.c.bf16 %v4638_v35, %v4637_v14  ;;  %v4639_v14 = vld [vmem:[%s13885_s3 + $0xa90] sm:$0xff]  ;;  %v4640_v35 = vld [vmem:[%s13885_s3 + $0xa98] sm:$0xff] }
 0x34f   :  { %v12421_v22 = vadd.f32 %v7289_v0, %v12160_v26  ;;  %v12424_v6 = vadd.f32 %v7768_v2, %v12260_v47  ;;  %v7290_v55 = vpop.f32.mrb[98].mxu1  ;;  %v7769_v32 = vpop.f32.mrb[236].mxu0  ;;  %v12435_v47 = vld [vmem:[#allocation3 + $0x144] sm:$0xff] }
 0x350   :  { %v7291_v21 = vpop.f32.mrb[99].mxu1  ;;  %8683 = vmatmul.mubr.f32.gmra.mrb[76].mxu1 %v12432_v3  ;;  %v7770_v26 = vpop.f32.mrb[237].mxu0  ;;  %v4621_v0 = vld [vmem:[%s13885_s3 + $0xa00] sm:$0xff]  ;;  %v4622_v2 = vld [vmem:[%s13885_s3 + $0xa08] sm:$0xff] }
 0x351   :  { %13944 = vst [vmem:[#allocation23_spill] sm:$0xff] %v12424_v6  ;;  %v7292_v59 = vadd.f32 %v7291_v21, %v7290_v55  ;;  %9222 = vmatpush3.bf16.msra.mxu1 %v9219_v45  ;;  %8685 = vmatprep.mubr.f32.mxu1 %v12435_v47  ;;  %v7771_v53 = vadd.f32 %v7770_v26, %v7769_v32  ;;  %v12447_v45 = vld [vmem:[#allocation3 + $0x154] sm:$0xff] }
 0x352   :  { %9224 = vmatprep.subr.bf16.mxu1 %v9223_v62 }
 0x353   :  { %v12445_v6 = vadd.f32 %v7292_v59, %v12173_v60  ;;  %v7293_v55 = vpop.f32.mrb[100].mxu1  ;;  %v12450_v21 = vadd.f32 %v7771_v53, %v12268_v44  ;;  %v7772_v32 = vpop.f32.mrb[238].mxu0  ;;  %v9229_v44 = vpack.c.bf16 %v4622_v2, %v4621_v0  ;;  %v9231_v53 = vpack.c.bf16 %v4640_v35, %v4639_v14  ;;  %v4642_v0 = vld [vmem:[%s13885_s3 + $0xaa8] sm:$0xff]  ;;  %v4625_v35 = vld [vmem:[%s13885_s3 + $0xa20] sm:$0xff] }
 0x354   :  { %v7294_v26 = vpop.f32.mrb[101].mxu1  ;;  %8686 = vmatmul.mubr.f32.gmra.mrb[78].mxu1 %v12447_v45  ;;  %v7773_v60 = vpop.f32.mrb[239].mxu0 }
 0x355   :  { %13945 = vst [vmem:[#allocation17_spill] sm:$0xff] %v12450_v21  ;;  %v7295_v59 = vadd.f32 %v7294_v26, %v7293_v55  ;;  %9226 = vmatpush3.bf16.msra.mxu1 %v9223_v62  ;;  %8720 = vmatprep.mubr.f32.mxu1 %v12326_v42  ;;  %v7774_v9 = vadd.f32 %v7773_v60, %v7772_v32  ;;  %v4623_v21 = vld [vmem:[%s13885_s3 + $0xa10] sm:$0xff]  ;;  %v4626_v26 = vld [vmem:[%s13885_s3 + $0xa28] sm:$0xff] }
 0x356   :  { %9228 = vmatprep.subr.bf16.mxu1 %v9227_v17  ;;  %v4641_v17 = vld [vmem:[%s13885_s3 + $0xaa0] sm:$0xff] }
 0x357   :  { %v12467_v29 = vadd.f32 %v7295_v59, %v12186_v18  ;;  %v12470_v55 = vadd.f32 %v7774_v9, %v12273_v11  ;;  %v7296_v62 = vpop.f32.mrb[102].mxu1  ;;  %v7919_v42 = vpop.f32.mrb[240].mxu0  ;;  %v9233_v9 = vpack.c.bf16 %v4624_v58, %v4623_v21  ;;  %v9235_v11 = vpack.c.bf16 %v4642_v0, %v4641_v17  ;;  %v4644_v58 = vld [vmem:[%s13885_s3 + $0xab8] sm:$0xff] }
 0x358   :  { %v7297_v2 = vpop.f32.mrb[103].mxu1  ;;  %8721 = vmatmul.mubr.f32.vlgmr.msra.gmra.mrb[64].mxu1 %v12330_v19  ;;  %v7920_v32 = vpop.f32.mrb[241].mxu0 }
 0x359   :  { %13946 = vst [vmem:[#allocation24_spill] sm:$0xff] %v12470_v55  ;;  %v7298_v14 = vadd.f32 %v7297_v2, %v7296_v62  ;;  %9230 = vmatpush3.bf16.msra.mxu1 %v9229_v44  ;;  %v12479_v18 = vadd.f32 %v7920_v32, %v7919_v42  ;;  %8723 = vmatprep.mubr.f32.mxu1 %v12345_v28  ;;  %v4643_v62 = vld [vmem:[%s13885_s3 + $0xab0] sm:$0xff]  ;;  %v4628_v32 = vld [vmem:[%s13885_s3 + $0xa38] sm:$0xff] }
 0x35a   :  { %9232 = vmatprep.subr.bf16.mxu1 %v9231_v53  ;;  %v9239_v0 = vpack.c.bf16 %v4644_v58, %v4643_v62  ;;  %v4627_v2 = vld [vmem:[%s13885_s3 + $0xa30] sm:$0xff] }
 0x35b   :  { %13947 = vst [vmem:[#allocation26_spill] sm:$0xff] %v12479_v18  ;;  %v12489_v60 = vadd.f32 %v7298_v14, %v12199_v49  ;;  %v7299_v59 = vpop.f32.mrb[104].mxu1  ;;  %v7922_v44 = vpop.f32.mrb[242].mxu0  ;;  %v9237_v49 = vpack.c.bf16 %v4626_v26, %v4625_v35  ;;  %v4687_v55 = vld [vmem:[%s13885_s3 + $0xc10] sm:$0xff] }
 0x35c   :  { %v7300_v21 = vpop.f32.mrb[105].mxu1  ;;  %8724 = vmatmul.mubr.f32.gmra.mrb[66].mxu1 %v12348_v8  ;;  %v7923_v53 = vpop.f32.mrb[243].mxu0 }
 0x35d   :  { %v7301_v42 = vadd.f32 %v7300_v21, %v7299_v59  ;;  %9234 = vmatpush3.bf16.msra.mxu1 %v9233_v9  ;;  %v12498_v17 = vadd.f32 %v7923_v53, %v7922_v44  ;;  %8726 = vmatprep.mubr.f32.mxu1 %v12363_v48  ;;  %v4645_v44 = vld [vmem:[%s13885_s3 + $0xac0] sm:$0xff] }
 0x35e   :  { %9236 = vmatprep.subr.bf16.mxu1 %v9235_v11  ;;  %v4646_v11 = vld [vmem:[%s13885_s3 + $0xac8] sm:$0xff]  ;;  %v4629_v53 = vld [vmem:[%s13885_s3 + $0xa40] sm:$0xff] }
 0x35f   :  { %13948 = vst [vmem:[#allocation19_spill] sm:$0xff] %v12498_v17  ;;  %v12508_v14 = vadd.f32 %v7301_v42, %v12212_v20  ;;  %v7302_v59 = vpop.f32.mrb[106].mxu1  ;;  %v7925_v9 = vpop.f32.mrb[244].mxu0  ;;  %v9241_v20 = vpack.c.bf16 %v4628_v32, %v4627_v2  ;;  %v9243_v21 = vpack.c.bf16 %v4646_v11, %v4645_v44  ;;  %v4630_v42 = vld [vmem:[%s13885_s3 + $0xa48] sm:$0xff]  ;;  %v4648_v2 = vld [vmem:[%s13885_s3 + $0xad8] sm:$0xff] }
 0x360   :  { %v7303_v35 = vpop.f32.mrb[107].mxu1  ;;  %8727 = vmatmul.mubr.f32.gmra.mrb[68].mxu1 %v12366_v37  ;;  %v7926_v26 = vpop.f32.mrb[245].mxu0 }
 0x361   :  { %v7304_v62 = vadd.f32 %v7303_v35, %v7302_v59  ;;  %9238 = vmatpush3.bf16.msra.mxu1 %v9237_v49  ;;  %v12517_v58 = vadd.f32 %v7926_v26, %v7925_v9  ;;  %8729 = vmatprep.mubr.f32.mxu1 %v12375_v46  ;;  %v12529_v9 = vld [vmem:[#allocation3 + $0xa4] sm:$0xff]  ;;  %v9245_v35 = vpack.c.bf16 %v4630_v42, %v4629_v53 }
 0x362   :  { %9240 = vmatprep.subr.bf16.mxu1 %v9239_v0  ;;  %v4647_v0 = vld [vmem:[%s13885_s3 + $0xad0] sm:$0xff] }
 0x363   :  { %13949 = vst [vmem:[#allocation27_spill] sm:$0xff] %v12517_v58  ;;  %v12527_v17 = vadd.f32 %v7304_v62, %v12225_v50  ;;  %v7305_v59 = vpop.f32.mrb[108].mxu1  ;;  %v7928_v49 = vpop.f32.mrb[246].mxu0  ;;  %v9247_v26 = vpack.c.bf16 %v4648_v2, %v4647_v0  ;;  %v4631_v62 = vld [vmem:[%s13885_s3 + $0xa50] sm:$0xff]  ;;  %v4632_v58 = vld [vmem:[%s13885_s3 + $0xa58] sm:$0xff] }
 0x364   :  { %v7306_v32 = vpop.f32.mrb[109].mxu1  ;;  %8730 = vmatmul.mubr.f32.gmra.mrb[70].mxu1 %v12529_v9  ;;  %v7929_v44 = vpop.f32.mrb[247].mxu0 }
 0x365   :  { %v7307_v11 = vadd.f32 %v7306_v32, %v7305_v59  ;;  %9242 = vmatpush3.bf16.msra.mxu1 %v9241_v20  ;;  %v12538_v50 = vadd.f32 %v7929_v44, %v7928_v49  ;;  %8732 = vmatprep.mubr.f32.mxu1 %v12396_v30  ;;  %v4649_v30 = vld [vmem:[%s13885_s3 + $0xae0] sm:$0xff]  ;;  %v4634_v44 = vld [vmem:[%s13885_s3 + $0xa68] sm:$0xff] }
 0x366   :  { %9244 = vmatprep.subr.bf16.mxu1 %v9243_v21  ;;  %v4650_v21 = vld [vmem:[%s13885_s3 + $0xae8] sm:$0xff]  ;;  %v4633_v32 = vld [vmem:[%s13885_s3 + $0xa60] sm:$0xff] }
 0x367   :  { %13950 = vst [vmem:[#allocation28_spill] sm:$0xff] %v12538_v50  ;;  %v12548_v18 = vadd.f32 %v7307_v11, %v12238_v39  ;;  %v7308_v59 = vpop.f32.mrb[110].mxu1  ;;  %v7931_v20 = vpop.f32.mrb[248].mxu0  ;;  %v9249_v39 = vpack.c.bf16 %v4632_v58, %v4631_v62  ;;  %v9251_v2 = vpack.c.bf16 %v4650_v21, %v4649_v30  ;;  %v4652_v58 = vld [vmem:[%s13885_s3 + $0xaf8] sm:$0xff]  ;;  %v12601_v50 = vld [vmem:[#allocation3 + $0x164] sm:$0xff] }
 0x368   :  { %v7309_v53 = vpop.f32.mrb[111].mxu1  ;;  %8733 = vmatmul.mubr.f32.gmra.mrb[72].mxu1 %v12399_v63  ;;  %v7932_v42 = vpop.f32.mrb[249].mxu0 }
 0x369   :  { %v7310_v49 = vadd.f32 %v7309_v53, %v7308_v59  ;;  %9246 = vmatpush3.bf16.msra.mxu1 %v9245_v35  ;;  %v12557_v0 = vadd.f32 %v7932_v42, %v7931_v20  ;;  %8735 = vmatprep.mubr.f32.mxu1 %v12414_v12  ;;  %v4651_v20 = vld [vmem:[%s13885_s3 + $0xaf0] sm:$0xff] }
 0x36a   :  { %9248 = vmatprep.subr.bf16.mxu1 %v9247_v26  ;;  %v9255_v53 = vpack.c.bf16 %v4652_v58, %v4651_v20  ;;  %v4635_v42 = vld [vmem:[%s13885_s3 + $0xa70] sm:$0xff] }
 0x36b   :  { %13951 = vst [vmem:[#allocation29_spill] sm:$0xff] %v12557_v0  ;;  %v12567_v11 = vadd.f32 %v7310_v49, %v12251_v61  ;;  %v7343_v59 = vpop.f32.mrb[112].mxu1  ;;  %v7934_v35 = vpop.f32.mrb[250].mxu0  ;;  %v9253_v61 = vpack.c.bf16 %v4634_v44, %v4633_v32  ;;  %v4636_v49 = vld [vmem:[%s13885_s3 + $0xa78] sm:$0xff] }
 0x36c   :  { %v7344_v26 = vpop.f32.mrb[113].mxu1  ;;  %8736 = vmatmul.mubr.f32.gmra.mrb[74].mxu1 %v12417_v7  ;;  %v7935_v62 = vpop.f32.mrb[251].mxu0 }
 0x36d   :  { %v7345_v30 = vadd.f32 %v7344_v26, %v7343_v59  ;;  %9250 = vmatpush3.bf16.msra.mxu1 %v9249_v39  ;;  %v12576_v21 = vadd.f32 %v7935_v62, %v7934_v35  ;;  %8738 = vmatprep.mubr.f32.mxu1 %v12432_v3  ;;  %v4685_v35 = vld [vmem:[%s13885_s3 + $0xc00] sm:$0xff] }
 0x36e   :  { %9252 = vmatprep.subr.bf16.mxu1 %v9251_v2  ;;  %v4686_v2 = vld [vmem:[%s13885_s3 + $0xc08] sm:$0xff] }
 0x36f   :  { %13952 = vst [vmem:[#allocation30_spill] sm:$0xff] %v12576_v21  ;;  %v12586_v0 = vadd.f32 %v12295_v23, %v7345_v30  ;;  %v7346_v59 = vpop.f32.mrb[114].mxu1  ;;  %v7937_v39 = vpop.f32.mrb[252].mxu0  ;;  %v9257_v23 = vpack.c.bf16 %v4636_v49, %v4635_v42  ;;  %v9291_v26 = vpack.c.bf16 %v4686_v2, %v4685_v35  ;;  %v9856_v49 = vld [vmem:[#allocation3 + $0x41] sm:$0xff] }
 0x370   :  { %v7347_v32 = vpop.f32.mrb[115].mxu1  ;;  %8739 = vmatmul.mubr.f32.gmra.mrb[76].mxu1 %v12435_v47  ;;  %v7938_v44 = vpop.f32.mrb[253].mxu0 }
 0x371   :  { %v7348_v20 = vadd.f32 %v7347_v32, %v7346_v59  ;;  %9254 = vmatpush3.bf16.msra.mxu1 %v9253_v61  ;;  %v12595_v58 = vadd.f32 %v7938_v44, %v7937_v39  ;;  %8741 = vmatprep.mubr.f32.mxu1 %v12447_v45  ;;  %v4688_v61 = vld [vmem:[%s13885_s3 + $0xc18] sm:$0xff]  ;;  %v4689_v44 = vld [vmem:[%s13885_s3 + $0xc20] sm:$0xff] }
 0x372   :  { %9256 = vmatprep.subr.bf16.mxu1 %v9255_v53  ;;  %v9295_v39 = vpack.c.bf16 %v4688_v61, %v4687_v55 }
 0x373   :  { %13953 = vst [vmem:[#allocation31_spill] sm:$0xff] %v12595_v58  ;;  %v12599_v62 = vadd.f32 %v12302_v40, %v7348_v20  ;;  %v7349_v30 = vpop.f32.mrb[116].mxu1  ;;  %v7940_v21 = vpop.f32.mrb[254].mxu0  ;;  %v4690_v20 = vld [vmem:[%s13885_s3 + $0xc28] sm:$0xff]  ;;  %v9869_v58 = vld [vmem:[#allocation3 + $0xa0] sm:$0xff] }
 0x374   :  { %v7350_v59 = vpop.f32.mrb[117].mxu1  ;;  %8742 = vmatmul.mubr.f32.gmra.mrb[78].mxu1 %v12601_v50  ;;  %v7941_v53 = vpop.f32.mrb[255].mxu0  ;;  %v9299_v55 = vpack.c.bf16 %v4690_v20, %v4689_v44  ;;  %v9860_v44 = vld [vmem:[#allocation3 + $0x61] sm:$0xff] }
 0x375   :  { %v7351_v42 = vadd.f32 %v7350_v59, %v7349_v30  ;;  %9258 = vmatpush3.bf16.msra.mxu1 %v9257_v23  ;;  %v12610_v40 = vadd.f32 %v7941_v53, %v7940_v21  ;;  %4765 = vmatprep.mubr.f32.mxu1 %v9856_v49  ;;  %v9857_v21 = vld [vmem:[#allocation3 + $0x40] sm:$0xff] }
 0x376   :  { %9292 = vmatprep.subr.bf16.mxu1 %v9291_v26 }
 0x377   :  { %13954 = vst [vmem:[#allocation37_spill] sm:$0xff] %v12610_v40  ;;  %v12613_v35 = vadd.f32 %v12315_v16, %v7351_v42  ;;  %v7352_v2 = vpop.f32.mrb[118].mxu1  ;;  %v7943_v32 = vpop.f32.mrb[0].mxu0  ;;  %v9858_v16 = vld [vmem:[#allocation3 + $0x51] sm:$0xff] }
 0x378   :  { %v7353_v23 = vpop.f32.mrb[119].mxu1  ;;  %4766 = vmatmul.mubr.f32.vlgmr.msra.gmra.mrb[176].mxu1 %v9857_v21  ;;  %v7944_v30 = vpop.f32.mrb[1].mxu0  ;;  %v4691_v40 = vld [vmem:[%s13885_s3 + $0xc30] sm:$0xff] }
 0x379   :  { %v7354_v59 = vadd.f32 %v7353_v23, %v7352_v2  ;;  %v12621_v53 = vadd.f32 %v7944_v30, %v7943_v32  ;;  %9294 = vmatpush3.bf16.msra.mxu1 %v9291_v26  ;;  %4770 = vmatprep.mubr.f32.mxu1 %v9858_v16  ;;  %v4692_v2 = vld [vmem:[%s13885_s3 + $0xc38] sm:$0xff]  ;;  %v9859_v23 = vld [vmem:[#allocation3 + $0x50] sm:$0xff] }
 0x37a   :  { %9296 = vmatprep.subr.bf16.mxu1 %v9295_v39 }
 0x37b   :  { %13955 = vst [vmem:[#allocation38_spill] sm:$0xff] %v12621_v53  ;;  %v12624_v61 = vadd.f32 %v12334_v57, %v7354_v59  ;;  %v7355_v42 = vpop.f32.mrb[120].mxu1  ;;  %v7946_v49 = vpop.f32.mrb[2].mxu0  ;;  %v9303_v57 = vpack.c.bf16 %v4692_v2, %v4691_v40  ;;  %v4693_v53 = vld [vmem:[%s13885_s3 + $0xc40] sm:$0xff]  ;;  %v9862_v40 = vld [vmem:[#allocation3 + $0x71] sm:$0xff] }
 0x37c   :  { %v7356_v32 = vpop.f32.mrb[121].mxu1  ;;  %4771 = vmatmul.mubr.f32.gmra.mrb[178].mxu1 %v9859_v23  ;;  %v7947_v26 = vpop.f32.mrb[3].mxu0 }
 0x37d   :  { %v7357_v21 = vadd.f32 %v7356_v32, %v7355_v42  ;;  %v12632_v30 = vadd.f32 %v7947_v26, %v7946_v49  ;;  %4775 = vmatprep.mubr.f32.mxu1 %v9860_v44  ;;  %9298 = vmatpush3.bf16.msra.mxu1 %v9295_v39  ;;  %v4694_v42 = vld [vmem:[%s13885_s3 + $0xc48] sm:$0xff]  ;;  %v9861_v32 = vld [vmem:[#allocation3 + $0x60] sm:$0xff] }
 0x37e   :  { %9300 = vmatprep.subr.bf16.mxu1 %v9299_v55 }
 0x37f   :  { %13956 = vst [vmem:[#allocation39_spill] sm:$0xff] %v12632_v30  ;;  %v12635_v20 = vadd.f32 %v12352_v4, %v7357_v21  ;;  %v7358_v59 = vpop.f32.mrb[122].mxu1  ;;  %v7949_v16 = vpop.f32.mrb[4].mxu0  ;;  %v9307_v4 = vpack.c.bf16 %v4694_v42, %v4693_v53  ;;  %v4695_v30 = vld [vmem:[%s13885_s3 + $0xc50] sm:$0xff]  ;;  %v9864_v53 = vld [vmem:[#allocation3 + $0x81] sm:$0xff] }
 0x380   :  { %v7359_v49 = vpop.f32.mrb[123].mxu1  ;;  %4776 = vmatmul.mubr.f32.gmra.mrb[180].mxu1 %v9861_v32  ;;  %v7950_v23 = vpop.f32.mrb[5].mxu0 }
 0x381   :  { %v7360_v39 = vadd.f32 %v7359_v49, %v7358_v59  ;;  %v12643_v26 = vadd.f32 %v7950_v23, %v7949_v16  ;;  %4780 = vmatprep.mubr.f32.mxu1 %v9862_v40  ;;  %9302 = vmatpush3.bf16.msra.mxu1 %v9299_v55  ;;  %v4696_v59 = vld [vmem:[%s13885_s3 + $0xc58] sm:$0xff]  ;;  %v9863_v49 = vld [vmem:[#allocation3 + $0x70] sm:$0xff] }
 0x382   :  { %9304 = vmatprep.subr.bf16.mxu1 %v9303_v57 }
 0x383   :  { %13957 = vst [vmem:[#allocation40_spill] sm:$0xff] %v12643_v26  ;;  %v12646_v2 = vadd.f32 %v12370_v5, %v7360_v39  ;;  %v7361_v21 = vpop.f32.mrb[124].mxu1  ;;  %v7952_v44 = vpop.f32.mrb[6].mxu0  ;;  %v9311_v5 = vpack.c.bf16 %v4696_v59, %v4695_v30  ;;  %v4697_v26 = vld [vmem:[%s13885_s3 + $0xc60] sm:$0xff]  ;;  %v9866_v30 = vld [vmem:[#allocation3 + $0x91] sm:$0xff] }
 0x384   :  { %v7362_v16 = vpop.f32.mrb[125].mxu1  ;;  %4781 = vmatmul.mubr.f32.gmra.mrb[182].mxu1 %v9863_v49  ;;  %v7953_v32 = vpop.f32.mrb[7].mxu0 }
 0x385   :  { %v7363_v55 = vadd.f32 %v7362_v16, %v7361_v21  ;;  %v12654_v23 = vadd.f32 %v7953_v32, %v7952_v44  ;;  %4785 = vmatprep.mubr.f32.mxu1 %v9864_v53  ;;  %9306 = vmatpush3.bf16.msra.mxu1 %v9303_v57  ;;  %v4698_v21 = vld [vmem:[%s13885_s3 + $0xc68] sm:$0xff]  ;;  %v9865_v16 = vld [vmem:[#allocation3 + $0x80] sm:$0xff]  ;;  %v4699_v53 = vld [vmem:[%s13885_s3 + $0xc70] sm:$0xff] }
 0x386   :  { %9308 = vmatprep.subr.bf16.mxu1 %v9307_v4 }
 0x387   :  { %13958 = vst [vmem:[#allocation41_spill] sm:$0xff] %v12654_v23  ;;  %v12657_v42 = vadd.f32 %v12385_v24, %v7363_v55  ;;  %v7364_v39 = vpop.f32.mrb[126].mxu1  ;;  %v7955_v40 = vpop.f32.mrb[8].mxu0  ;;  %v9315_v24 = vpack.c.bf16 %v4698_v21, %v4697_v26 }
 0x388   :  { %v7365_v44 = vpop.f32.mrb[127].mxu1  ;;  %4786 = vmatmul.mubr.f32.gmra.mrb[184].mxu1 %v9865_v16  ;;  %v7956_v49 = vpop.f32.mrb[9].mxu0  ;;  %v4700_v16 = vld [vmem:[%s13885_s3 + $0xc78] sm:$0xff] }
 0x389   :  { %v7366_v57 = vadd.f32 %v7365_v44, %v7364_v39  ;;  %v12665_v32 = vadd.f32 %v7956_v49, %v7955_v40  ;;  %4790 = vmatprep.mubr.f32.mxu1 %v9866_v30  ;;  %9310 = vmatpush3.bf16.msra.mxu1 %v9307_v4  ;;  %v9867_v44 = vld [vmem:[#allocation3 + $0x90] sm:$0xff]  ;;  %v9868_v30 = vld [vmem:[#allocation3 + $0xa1] sm:$0xff]  ;;  %v9319_v26 = vpack.c.bf16 %v4700_v16, %v4699_v53 }
 0x38a   :  { %9312 = vmatprep.subr.bf16.mxu1 %v9311_v5  ;;  %v1896_v16 = vld [vmem:[#allocation3 + $0xb0] sm:$0xff] }
 0x38b   :  { %13959 = vst [vmem:[#allocation42_spill] sm:$0xff] %v12665_v32  ;;  %v12668_v59 = vadd.f32 %v12403_v43, %v7366_v57  ;;  %v7367_v55 = vpop.f32.mrb[128].mxu1  ;;  %v7958_v39 = vpop.f32.mrb[10].mxu0 }
 0x38c   :  { %v7368_v40 = vpop.f32.mrb[129].mxu1  ;;  %4791 = vmatmul.mubr.f32.gmra.mrb[186].mxu1 %v9867_v44  ;;  %v7959_v49 = vpop.f32.mrb[11].mxu0 }
 0x38d   :  { %v7369_v4 = vadd.f32 %v7368_v40, %v7367_v55  ;;  %4795 = vmatprep.mubr.f32.mxu1 %v9868_v30  ;;  %9314 = vmatpush3.bf16.msra.mxu1 %v9311_v5  ;;  %v12676_v43 = vadd.f32 %v7959_v49, %v7958_v39  ;;  %v9870_v40 = vld [vmem:[#allocation3 + $0x101] sm:$0xff]  ;;  %v9873_v30 = vld [vmem:[#allocation3 + $0x110] sm:$0xff] }
 0x38e   :  { %9316 = vmatprep.subr.bf16.mxu1 %v9315_v24 }
 0x38f   :  { %v12679_v21 = vadd.f32 %v12421_v22, %v7369_v4  ;;  %v7370_v57 = vpop.f32.mrb[130].mxu1  ;;  %v7961_v32 = vpop.f32.mrb[12].mxu0 }
 0x390   :  { %v7371_v23 = vpop.f32.mrb[131].mxu1  ;;  %4796 = vmatmul.mubr.f32.gmra.mrb[188].mxu1 %v9869_v58  ;;  %v7962_v41 = vpop.f32.mrb[13].mxu0 }
 0x391   :  { %v7372_v44 = vadd.f32 %v7371_v23, %v7370_v57  ;;  %4800 = vmatprep.mubr.f32.mxu1 %v1944_v34  ;;  %9318 = vmatpush3.bf16.msra.mxu1 %v9315_v24  ;;  %v12681_v55 = vadd.f32 %v7962_v41, %v7961_v32  ;;  %v9871_v24 = vld [vmem:[#allocation3 + $0x100] sm:$0xff]  ;;  %v9872_v32 = vld [vmem:[#allocation3 + $0x111] sm:$0xff] }
 0x392   :  { %9320 = vmatprep.subr.bf16.mxu1 %v9319_v26 }
 0x393   :  { %v12684_v5 = vadd.f32 %v12445_v6, %v7372_v44  ;;  %v7373_v53 = vpop.f32.mrb[132].mxu1  ;;  %v9874_v44 = vld [vmem:[#allocation3 + $0x121] sm:$0xff] }
 0x394   :  { %v7374_v22 = vpop.f32.mrb[133].mxu1  ;;  %4801 = vmatmul.mubr.f32.gmra.mrb[190].mxu1 %v1896_v16  ;;  %v9875_v16 = vld [vmem:[#allocation3 + $0x120] sm:$0xff] }
 0x395   :  { %v7375_v39 = vadd.f32 %v7374_v22, %v7373_v53  ;;  %4805 = vmatprep.mubr.f32.mxu1 %v9870_v40  ;;  %9322 = vmatpush3.bf16.msra.mxu1 %v9319_v26 }
 0x397   :  { %v12687_v58 = vadd.f32 %v12467_v29, %v7375_v39  ;;  %v7376_v23 = vpop.f32.mrb[134].mxu1  ;;  %v9876_v39 = vld [vmem:[#allocation3 + $0x131] sm:$0xff] }
 0x398   :  { %v7377_v34 = vpop.f32.mrb[135].mxu1  ;;  %4806 = vmatmul.mubr.f32.gmra.mrb[192].mxu1 %v9871_v24 }
 0x399   :  { %v7378_v41 = vadd.f32 %v7377_v34, %v7376_v23  ;;  %4810 = vmatprep.mubr.f32.mxu1 %v9872_v32  ;;  %v9877_v34 = vld [vmem:[#allocation3 + $0x130] sm:$0xff] }
 0x39b   :  { %v12690_v6 = vadd.f32 %v12489_v60, %v7378_v41  ;;  %v7379_v49 = vpop.f32.mrb[136].mxu1  ;;  %v9878_v41 = vld [vmem:[#allocation3 + $0x141] sm:$0xff] }
 0x39c   :  { %v7380_v4 = vpop.f32.mrb[137].mxu1  ;;  %4811 = vmatmul.mubr.f32.gmra.mrb[194].mxu1 %v9873_v30 }
 0x39d   :  { %v7381_v57 = vadd.f32 %v7380_v4, %v7379_v49  ;;  %4815 = vmatprep.mubr.f32.mxu1 %v9874_v44  ;;  %v9879_v4 = vld [vmem:[#allocation3 + $0x140] sm:$0xff]  ;;  %v9881_v44 = vld [vmem:[#allocation3 + $0x150] sm:$0xff] }
 0x39f   :  { %v12693_v29 = vadd.f32 %v12508_v14, %v7381_v57  ;;  %v7382_v26 = vpop.f32.mrb[138].mxu1  ;;  %v9880_v57 = vld [vmem:[#allocation3 + $0x151] sm:$0xff] }
 0x3a0   :  { %v7383_v53 = vpop.f32.mrb[139].mxu1  ;;  %4816 = vmatmul.mubr.f32.gmra.mrb[196].mxu1 %v9875_v16  ;;  %v1956_v16 = vld [vmem:[#allocation3 + $0x171] sm:$0xff] }
 0x3a1   :  { %v7384_v22 = vadd.f32 %v7383_v53, %v7382_v26  ;;  %4820 = vmatprep.mubr.f32.mxu1 %v9876_v39  ;;  %v9882_v26 = vld [vmem:[#allocation3 + $0x161] sm:$0xff] }
 0x3a2   :  { %v9883_v53 = vld [vmem:[#allocation3 + $0x160] sm:$0xff] }
 0x3a3   :  { %v12696_v60 = vadd.f32 %v12527_v17, %v7384_v22  ;;  %v7385_v40 = vpop.f32.mrb[140].mxu1  ;;  %v2100_v22 = vld [vmem:[#allocation3 + $0x174] sm:$0xff] }
 0x3a4   :  { %v7386_v23 = vpop.f32.mrb[141].mxu1  ;;  %4821 = vmatmul.mubr.f32.gmra.mrb[198].mxu1 %v9877_v34 }
 0x3a5   :  { %v7387_v24 = vadd.f32 %v7386_v23, %v7385_v40  ;;  %4825 = vmatprep.mubr.f32.mxu1 %v9878_v41  ;;  %v13962_v23 = vld [vmem:[#allocation13_spill] sm:$0xff] }
 0x3a7   :  { %v12699_v14 = vadd.f32 %v12548_v18, %v7387_v24  ;;  %v7388_v32 = vpop.f32.mrb[142].mxu1  ;;  %v2088_v18 = vld [vmem:[#allocation3 + $0xb4] sm:$0xff] }
 0x3a8   :  { %v7389_v49 = vpop.f32.mrb[143].mxu1  ;;  %4826 = vmatmul.mubr.f32.gmra.mrb[200].mxu1 %v9879_v4 }
 0x3a9   :  { %v7390_v30 = vadd.f32 %v7389_v49, %v7388_v32  ;;  %4830 = vmatprep.mubr.f32.mxu1 %v9880_v57  ;;  %v13963_v32 = vld [vmem:[#allocation14_spill] sm:$0xff] }
 0x3ab   :  { %v12702_v17 = vadd.f32 %v12567_v11, %v7390_v30 }
 0x3ac   :  { %4831 = vmatmul.mubr.f32.gmra.mrb[202].mxu1 %v9881_v44  ;;  %v13964_v44 = vld [vmem:[#allocation16_spill] sm:$0xff] }
 0x3ad   :  { %4835 = vmatprep.mubr.f32.mxu1 %v9882_v26 }
 0x3b0   :  { %4836 = vmatmul.mubr.f32.gmra.mrb[204].mxu1 %v9883_v53 }
 0x3b1   :  { %4840 = vmatprep.mubr.f32.mxu1 %v1956_v16 }
 0x3b4   :  { %4841 = vmatmul.mubr.f32.gmra.mrb[206].mxu1 %v12285_v51 }
 0x3b5   :  { %8776 = vmatprep.mubr.f32.mxu1 %v12330_v19 }
 0x3b8   :  { %8777 = vmatmul.mubr.f32.vlgmr.msra.gmra.mrb[64].mxu1 %v12345_v28 }
 0x3b9   :  { %8779 = vmatprep.mubr.f32.mxu1 %v12348_v8  ;;  %v13960_v8 = vld [vmem:[#allocation11_spill] sm:$0xff] }
 0x3bc   :  { %8780 = vmatmul.mubr.f32.gmra.mrb[66].mxu1 %v12363_v48 }
 0x3bd   :  { %8782 = vmatprep.mubr.f32.mxu1 %v12366_v37 }
 0x3c0   :  { %8783 = vmatmul.mubr.f32.gmra.mrb[68].mxu1 %v12375_v46 }
 0x3c1   :  { %8785 = vmatprep.mubr.f32.mxu1 %v12529_v9 }
 0x3c4   :  { %8786 = vmatmul.mubr.f32.gmra.mrb[70].mxu1 %v2088_v18 }
 0x3c5   :  { %8788 = vmatprep.mubr.f32.mxu1 %v12399_v63 }
 0x3c8   :  { %8789 = vmatmul.mubr.f32.gmra.mrb[72].mxu1 %v12414_v12  ;;  %v13961_v12 = vld [vmem:[#allocation12_spill] sm:$0xff] }
 0x3c9   :  { %8791 = vmatprep.mubr.f32.mxu1 %v12417_v7 }
 0x3cb   :  { %v7535_v51 = vpop.f32.mrb[144].mxu1 }
 0x3cc   :  { %v7536_v19 = vpop.f32.mrb[145].mxu1  ;;  %8792 = vmatmul.mubr.f32.gmra.mrb[74].mxu1 %v12432_v3 }
 0x3cd   :  { %v7537_v28 = vadd.f32 %v7536_v19, %v7535_v51  ;;  %8794 = vmatprep.mubr.f32.mxu1 %v12435_v47  ;;  %v13965_v51 = vld [vmem:[#allocation18_spill] sm:$0xff] }
 0x3cf   :  { %v3689_v48 = vadd.f32 %v7537_v28, %v13960_v8  ;;  %v7538_v37 = vpop.f32.mrb[146].mxu1 }
 0x3d0   :  { %v7539_v46 = vpop.f32.mrb[147].mxu1  ;;  %8795 = vmatmul.mubr.f32.gmra.mrb[76].mxu1 %v12447_v45 }
 0x3d1   :  { %v9611_v9 = vadd.f32 %v12586_v0, %v3689_v48  ;;  %v7540_v63 = vadd.f32 %v7539_v46, %v7538_v37  ;;  %8797 = vmatprep.mubr.f32.mxu1 %v12601_v50  ;;  %v13966_v37 = vld [vmem:[#allocation20_spill] sm:$0xff] }
 0x3d3   :  { %v3694_v7 = vadd.f32 %v7540_v63, %v13961_v12  ;;  %v7541_v11 = vpop.f32.mrb[148].mxu1  ;;  %v12723_v3 = vadd.f32 %v9611_v9, %v12277_v36 }
 0x3d4   :  { %v7542_v39 = vpop.f32.mrb[149].mxu1  ;;  %8798 = vmatmul.mubr.f32.gmra.mrb[78].mxu1 %v2100_v22 }
 0x3d5   :  { %v9605_v47 = vadd.f32 %v12599_v62, %v3694_v7  ;;  %v7543_v40 = vadd.f32 %v7542_v39, %v7541_v11  ;;  %v13967_v7 = vld [vmem:[#allocation25_spill] sm:$0xff] }
 0x3d7   :  { %v3699_v34 = vadd.f32 %v7543_v40, %v13962_v23  ;;  %v7544_v45 = vpop.f32.mrb[150].mxu1  ;;  %v12728_v0 = vadd.f32 %v9605_v47, %v12280_v33 }
 0x3d8   :  { %v7545_v24 = vpop.f32.mrb[151].mxu1 }
 0x3d9   :  { %v9623_v50 = vadd.f32 %v12613_v35, %v3699_v34  ;;  %v7546_v41 = vadd.f32 %v7545_v24, %v7544_v45 }
 0x3db   :  { %v3704_v49 = vadd.f32 %v7546_v41, %v13963_v32  ;;  %v7547_v4 = vpop.f32.mrb[152].mxu1  ;;  %v12733_v36 = vadd.f32 %v9623_v50, %v12283_v56 }
 0x3dc   :  { %v7548_v30 = vpop.f32.mrb[153].mxu1 }
 0x3dd   :  { %v9617_v62 = vadd.f32 %v12624_v61, %v3704_v49  ;;  %v7549_v57 = vadd.f32 %v7548_v30, %v7547_v4 }
 0x3df   :  { %v3709_v26 = vadd.f32 %v7549_v57, %v13964_v44  ;;  %v7550_v53 = vpop.f32.mrb[154].mxu1  ;;  %v12738_v33 = vadd.f32 %v9617_v62, %v12288_v54  ;;  %v13968_v62 = vld [vmem:[#allocation32_spill] sm:$0xff]  ;;  %v13969_v44 = vld [vmem:[#allocation21_spill] sm:$0xff] }
 0x3e0   :  { %v7551_v16 = vpop.f32.mrb[155].mxu1 }
 0x3e1   :  { %v9635_v35 = vadd.f32 %v12635_v20, %v3709_v26  ;;  %v7552_v18 = vadd.f32 %v7551_v16, %v7550_v53  ;;  %v13970_v16 = vld [vmem:[#allocation33_spill] sm:$0xff] }
 0x3e3   :  { %v3714_v19 = vadd.f32 %v7552_v18, %v13965_v51  ;;  %v7553_v28 = vpop.f32.mrb[156].mxu1  ;;  %v12743_v56 = vadd.f32 %v9635_v35, %v12292_v25  ;;  %v13971_v18 = vld [vmem:[#allocation22_spill] sm:$0xff] }
 0x3e4   :  { %v7554_v8 = vpop.f32.mrb[157].mxu1 }
 0x3e5   :  { %v9629_v61 = vadd.f32 %v12646_v2, %v3714_v19  ;;  %v7555_v48 = vadd.f32 %v7554_v8, %v7553_v28  ;;  %v13972_v28 = vld [vmem:[#allocation34_spill] sm:$0xff] }
 0x3e7   :  { %v3719_v46 = vadd.f32 %v7555_v48, %v13966_v37  ;;  %v7556_v9 = vpop.f32.mrb[158].mxu1  ;;  %v12748_v54 = vadd.f32 %v9629_v61, %v12298_v13  ;;  %v13973_v37 = vld [vmem:[#allocation15_spill] sm:$0xff] }
 0x3e8   :  { %v7557_v63 = vpop.f32.mrb[159].mxu1 }
 0x3e9   :  { %v9647_v20 = vadd.f32 %v12657_v42, %v3719_v46  ;;  %v7558_v12 = vadd.f32 %v7557_v63, %v7556_v9 }
 0x3eb   :  { %v3724_v11 = vadd.f32 %v7558_v12, %v13967_v7  ;;  %v7559_v22 = vpop.f32.mrb[160].mxu1  ;;  %v12753_v25 = vadd.f32 %v9647_v20, %v12305_v10  ;;  %v13974_v7 = vld [vmem:[#allocation35_spill] sm:$0xff] }
 0x3ec   :  { %v7560_v39 = vpop.f32.mrb[161].mxu1 }
 0x3ed   :  { %v9641_v2 = vadd.f32 %v12668_v59, %v3724_v11  ;;  %v7561_v47 = vadd.f32 %v7560_v39, %v7559_v22  ;;  %v13975_v39 = vld [vmem:[#allocation23_spill] sm:$0xff] }
 0x3ef   :  { %v3729_v40 = vadd.f32 %v7561_v47, %v11867_v31  ;;  %v7562_v23 = vpop.f32.mrb[162].mxu1  ;;  %v12758_v13 = vadd.f32 %v9641_v2, %v12318_v27 }
 0x3f0   :  { %v7563_v34 = vpop.f32.mrb[163].mxu1 }
 0x3f1   :  { %v9659_v42 = vadd.f32 %v12679_v21, %v3729_v40  ;;  %v7564_v45 = vadd.f32 %v7563_v34, %v7562_v23  ;;  %v13976_v23 = vld [vmem:[#allocation36_spill] sm:$0xff] }
 0x3f3   :  { %v3734_v24 = vadd.f32 %v7564_v45, %v11879_v38  ;;  %v7565_v50 = vpop.f32.mrb[164].mxu1  ;;  %v12763_v10 = vadd.f32 %v9659_v42, %v12337_v15  ;;  %v5707_v42 = vld [vmem:[%s13887_s5 + $0x80] sm:$0xff] }
 0x3f4   :  { %v7566_v41 = vpop.f32.mrb[165].mxu1  ;;  %v5691_v45 = vld [vmem:[%s13887_s5] sm:$0xff] }
 0x3f5   :  { %v9653_v59 = vadd.f32 %v12684_v5, %v3734_v24  ;;  %v7567_v32 = vadd.f32 %v7566_v41, %v7565_v50  ;;  %v13977_v24 = vld [vmem:[#allocation17_spill] sm:$0xff] }
 0x3f7   :  { %v3739_v31 = vadd.f32 %v7567_v32, %v11902_v1  ;;  %v7568_v49 = vpop.f32.mrb[166].mxu1  ;;  %v12768_v27 = vadd.f32 %v9653_v59, %v12355_v52 }
 0x3f8   :  { %v7569_v4 = vpop.f32.mrb[167].mxu1 }
 0x3f9   :  { %v9671_v21 = vadd.f32 %v12687_v58, %v3739_v31  ;;  %v7570_v30 = vadd.f32 %v7569_v4, %v7568_v49  ;;  %v13978_v31 = vld [vmem:[#allocation24_spill] sm:$0xff] }
 0x3fa   :  { %v5709_v4 = vld [vmem:[%s13887_s5 + $0x90] sm:$0xff] }
 0x3fb   :  { %v3744_v38 = vadd.f32 %v7570_v30, %v13968_v62  ;;  %v7571_v57 = vpop.f32.mrb[168].mxu1  ;;  %v12773_v15 = vadd.f32 %v9671_v21, %v13969_v44  ;;  %v7964_v48 = vpop.f32.mrb[14].mxu0  ;;  %v5710_v21 = vld [vmem:[%s13887_s5 + $0x98] sm:$0xff]  ;;  %v5693_v30 = vld [vmem:[%s13887_s5 + $0x10] sm:$0xff]  ;;  %v5712_v44 = vld [vmem:[%s13887_s5 + $0xa8] sm:$0xff] }
 0x3fc   :  { %v7572_v26 = vpop.f32.mrb[169].mxu1  ;;  %v9327_v62 = vpack.c.bf16 %v5710_v21, %v5709_v4  ;;  %v5701_v4 = vld [vmem:[%s13887_s5 + $0x50] sm:$0xff]  ;;  %v5702_v21 = vld [vmem:[%s13887_s5 + $0x58] sm:$0xff] }
 0x3fd   :  { %v9665_v5 = vadd.f32 %v12690_v6, %v3744_v38  ;;  %v7573_v53 = vadd.f32 %v7572_v26, %v7571_v57  ;;  %v7965_v6 = vpop.f32.mrb[15].mxu0  ;;  %v5711_v57 = vld [vmem:[%s13887_s5 + $0xa0] sm:$0xff] }
 0x3fe   :  { %v12786_v12 = vadd.f32 %v7965_v6, %v7964_v48  ;;  %v5695_v26 = vld [vmem:[%s13887_s5 + $0x20] sm:$0xff]  ;;  %v5742_v6 = vld [vmem:[%s13887_s5 + $0x198] sm:$0xff] }
 0x3ff   :  { %v3749_v1 = vadd.f32 %v7573_v53, %v13970_v16  ;;  %v7574_v35 = vpop.f32.mrb[170].mxu1  ;;  %v12778_v52 = vadd.f32 %v9665_v5, %v13971_v18  ;;  %v9331_v5 = vpack.c.bf16 %v5712_v44, %v5711_v57  ;;  %v5696_v53 = vld [vmem:[%s13887_s5 + $0x28] sm:$0xff]  ;;  %v9345_v57 = vpack.c.bf16 %v5702_v21, %v5701_v4 }
 0x400   :  { %v7575_v51 = vpop.f32.mrb[171].mxu1  ;;  %v9333_v16 = vpack.c.bf16 %v5696_v53, %v5695_v26  ;;  %v5720_v53 = vld [vmem:[%s13887_s5 + $0xe8] sm:$0xff] }
 0x401   :  { %v9683_v58 = vadd.f32 %v12693_v29, %v3749_v1  ;;  %v7576_v19 = vadd.f32 %v7575_v51, %v7574_v35  ;;  %v5739_v1 = vld [vmem:[%s13887_s5 + $0x180] sm:$0xff]  ;;  %v5740_v35 = vld [vmem:[%s13887_s5 + $0x188] sm:$0xff] }
 0x402   :  { %v9355_v18 = vpack.c.bf16 %v5740_v35, %v5739_v1  ;;  %v5723_v51 = vld [vmem:[%s13887_s5 + $0x100] sm:$0xff]  ;;  %v5704_v35 = vld [vmem:[%s13887_s5 + $0x68] sm:$0xff] }
 0x403   :  { %v3754_v8 = vadd.f32 %v7576_v19, %v13972_v28  ;;  %v7577_v61 = vpop.f32.mrb[172].mxu1  ;;  %v12783_v46 = vadd.f32 %v9683_v58, %v13973_v37  ;;  %v5724_v58 = vld [vmem:[%s13887_s5 + $0x108] sm:$0xff]  ;;  %v5713_v28 = vld [vmem:[%s13887_s5 + $0xb0] sm:$0xff]  ;;  %v5698_v37 = vld [vmem:[%s13887_s5 + $0x38] sm:$0xff] }
 0x404   :  { %v7578_v9 = vpop.f32.mrb[173].mxu1  ;;  %v9357_v19 = vpack.c.bf16 %v5724_v58, %v5723_v51  ;;  %9356 = vmatprep.subr.bf16.mxu1 %v9355_v18  ;;  %v5747_v18 = vld [vmem:[%s13887_s5 + $0x1c0] sm:$0xff]  ;;  %v5748_v51 = vld [vmem:[%s13887_s5 + $0x1c8] sm:$0xff] }
 0x405   :  { %v9677_v63 = vadd.f32 %v12696_v60, %v3754_v8  ;;  %v7579_v20 = vadd.f32 %v7578_v9, %v7577_v61  ;;  %v5708_v60 = vld [vmem:[%s13887_s5 + $0x88] sm:$0xff]  ;;  %v5714_v8 = vld [vmem:[%s13887_s5 + $0xb8] sm:$0xff]  ;;  %v5697_v61 = vld [vmem:[%s13887_s5 + $0x30] sm:$0xff]  ;;  %v9371_v58 = vpack.c.bf16 %v5748_v51, %v5747_v18 }
 0x406   :  { %v9323_v41 = vpack.c.bf16 %v5708_v60, %v5707_v42  ;;  %9358 = vmatpush3.bf16.msra.mxu1 %v9357_v19  ;;  %v9335_v48 = vpack.c.bf16 %v5714_v8, %v5713_v28  ;;  %v5741_v9 = vld [vmem:[%s13887_s5 + $0x190] sm:$0xff]  ;;  %v5715_v42 = vld [vmem:[%s13887_s5 + $0xc0] sm:$0xff]  ;;  %v5716_v60 = vld [vmem:[%s13887_s5 + $0xc8] sm:$0xff] }
 0x407   :  { %v3759_v11 = vadd.f32 %v7579_v20, %v13974_v7  ;;  %v7580_v22 = vpop.f32.mrb[174].mxu1  ;;  %v12790_v29 = vadd.f32 %v9677_v63, %v13975_v39  ;;  %v9337_v63 = vpack.c.bf16 %v5698_v37, %v5697_v61  ;;  %v9359_v20 = vpack.c.bf16 %v5742_v6, %v5741_v9  ;;  %v5725_v7 = vld [vmem:[%s13887_s5 + $0x110] sm:$0xff]  ;;  %v5743_v39 = vld [vmem:[%s13887_s5 + $0x1a0] sm:$0xff]  ;;  %v5732_v28 = vld [vmem:[%s13887_s5 + $0x148] sm:$0xff] }
 0x408   :  { %v7581_v2 = vpop.f32.mrb[175].mxu1  ;;  %9324 = vmatprep.subr.bf16.mxu0 %v9323_v41  ;;  %v5700_v41 = vld [vmem:[%s13887_s5 + $0x48] sm:$0xff]  ;;  %v5731_v19 = vld [vmem:[%s13887_s5 + $0x140] sm:$0xff]  ;;  %v5749_v8 = vld [vmem:[%s13887_s5 + $0x1d0] sm:$0xff] }
 0x409   :  { %v9695_v47 = vadd.f32 %v12699_v14, %v3759_v11  ;;  %v7582_v40 = vadd.f32 %v7581_v2, %v7580_v22  ;;  %v5692_v14 = vld [vmem:[%s13887_s5 + $0x8] sm:$0xff]  ;;  %v5726_v11 = vld [vmem:[%s13887_s5 + $0x118] sm:$0xff]  ;;  %9360 = vmatprep.subr.bf16.mxu1 %v9359_v20  ;;  %v9373_v61 = vpack.c.bf16 %v5732_v28, %v5731_v19  ;;  %v5733_v37 = vld [vmem:[%s13887_s5 + $0x150] sm:$0xff] }
 0x40a   :  { %v9325_v32 = vpack.c.bf16 %v5692_v14, %v5691_v45  ;;  %v9361_v22 = vpack.c.bf16 %v5726_v11, %v5725_v7  ;;  %v5744_v2 = vld [vmem:[%s13887_s5 + $0x1a8] sm:$0xff]  ;;  %v5699_v45 = vld [vmem:[%s13887_s5 + $0x40] sm:$0xff]  ;;  %v5717_v14 = vld [vmem:[%s13887_s5 + $0xd0] sm:$0xff] }
 0x40b   :  { %v3764_v34 = vadd.f32 %v7582_v40, %v13976_v23  ;;  %v12804_v50 = vadd.f32 %v9695_v47, %v13977_v24  ;;  %v9363_v47 = vpack.c.bf16 %v5744_v2, %v5743_v39  ;;  %v5727_v40 = vld [vmem:[%s13887_s5 + $0x120] sm:$0xff]  ;;  %v5728_v23 = vld [vmem:[%s13887_s5 + $0x128] sm:$0xff]  ;;  %v9339_v24 = vpack.c.bf16 %v5716_v60, %v5715_v42  ;;  %v5734_v9 = vld [vmem:[%s13887_s5 + $0x158] sm:$0xff] }
 0x40c   :  { %9326 = vmatpush3.bf16.msra.mxu0 %v9325_v32  ;;  %9362 = vmatpush3.bf16.msra.mxu1 %v9361_v22  ;;  %v9341_v32 = vpack.c.bf16 %v5700_v41, %v5699_v45  ;;  %v5721_v20 = vld [vmem:[%s13887_s5 + $0xf0] sm:$0xff]  ;;  %v5722_v7 = vld [vmem:[%s13887_s5 + $0xf8] sm:$0xff]  ;;  %v5751_v2 = vld [vmem:[%s13887_s5 + $0x1e0] sm:$0xff] }
 0x40d   :  { %v9689_v59 = vadd.f32 %v12702_v17, %v3764_v34  ;;  %v5694_v17 = vld [vmem:[%s13887_s5 + $0x18] sm:$0xff]  ;;  %9328 = vmatprep.subr.bf16.mxu0 %v9327_v62  ;;  %v9365_v34 = vpack.c.bf16 %v5728_v23, %v5727_v40  ;;  %9364 = vmatprep.subr.bf16.mxu1 %v9363_v47  ;;  %v5705_v11 = vld [vmem:[%s13887_s5 + $0x70] sm:$0xff]  ;;  %v9351_v22 = vpack.c.bf16 %v5722_v7, %v5721_v20  ;;  %v5752_v47 = vld [vmem:[%s13887_s5 + $0x1e8] sm:$0xff] }
 0x40e   :  { %v9329_v38 = vpack.c.bf16 %v5694_v17, %v5693_v30  ;;  %v5745_v30 = vld [vmem:[%s13887_s5 + $0x1b0] sm:$0xff]  ;;  %v5746_v62 = vld [vmem:[%s13887_s5 + $0x1b8] sm:$0xff]  ;;  %v9377_v40 = vpack.c.bf16 %v5734_v9, %v5733_v37  ;;  %v5735_v42 = vld [vmem:[%s13887_s5 + $0x160] sm:$0xff] }
 0x40f   :  { %v12811_v49 = vadd.f32 %v9689_v59, %v13978_v31  ;;  %v5718_v59 = vld [vmem:[%s13887_s5 + $0xd8] sm:$0xff]  ;;  %v5729_v17 = vld [vmem:[%s13887_s5 + $0x130] sm:$0xff]  ;;  %v9367_v44 = vpack.c.bf16 %v5746_v62, %v5745_v30  ;;  %v5736_v60 = vld [vmem:[%s13887_s5 + $0x168] sm:$0xff] }
 0x410   :  { %9330 = vmatpush3.bf16.msra.mxu0 %v9329_v38  ;;  %9366 = vmatpush3.bf16.msra.mxu1 %v9365_v34  ;;  %v9343_v31 = vpack.c.bf16 %v5718_v59, %v5717_v14  ;;  %v5730_v38 = vld [vmem:[%s13887_s5 + $0x138] sm:$0xff]  ;;  %v9379_v34 = vpack.c.bf16 %v5752_v47, %v5751_v2  ;;  %v5753_v45 = vld [vmem:[%s13887_s5 + $0x1f0] sm:$0xff]  ;;  %v9381_v41 = vpack.c.bf16 %v5736_v60, %v5735_v42  ;;  %v5771_v30 = vld [vmem:[%s13887_s5 + $0x280] sm:$0xff] }
 0x411   :  { %9332 = vmatprep.subr.bf16.mxu0 %v9331_v5  ;;  %v9369_v26 = vpack.c.bf16 %v5730_v38, %v5729_v17  ;;  %v5719_v5 = vld [vmem:[%s13887_s5 + $0xe0] sm:$0xff]  ;;  %9368 = vmatprep.subr.bf16.mxu1 %v9367_v44  ;;  %v5706_v39 = vld [vmem:[%s13887_s5 + $0x78] sm:$0xff]  ;;  %v5772_v62 = vld [vmem:[%s13887_s5 + $0x288] sm:$0xff] }
 0x412   :  { %v9347_v1 = vpack.c.bf16 %v5720_v53, %v5719_v5  ;;  %v9353_v23 = vpack.c.bf16 %v5706_v39, %v5705_v11  ;;  %v9387_v38 = vpack.c.bf16 %v5772_v62, %v5771_v30  ;;  %v5803_v5 = vld [vmem:[%s13887_s5 + $0x380] sm:$0xff]  ;;  %v5804_v53 = vld [vmem:[%s13887_s5 + $0x388] sm:$0xff]  ;;  %v13983_v47 = vld [vmem:[#allocation29_spill] sm:$0xff] }
 0x413   :  { %v13980_v51 = vld [vmem:[#allocation19_spill] sm:$0xff]  ;;  %v13984_v60 = vld [vmem:[#allocation30_spill] sm:$0xff]  ;;  %v13986_v30 = vld [vmem:[#allocation37_spill] sm:$0xff] }
 0x414   :  { %9334 = vmatpush3.bf16.msra.mxu0 %v9333_v16  ;;  %v5703_v16 = vld [vmem:[%s13887_s5 + $0x60] sm:$0xff]  ;;  %9370 = vmatpush3.bf16.msra.mxu1 %v9369_v26 }
 0x415   :  { %9336 = vmatprep.subr.bf16.mxu0 %v9335_v48  ;;  %v5750_v48 = vld [vmem:[%s13887_s5 + $0x1d8] sm:$0xff]  ;;  %v9349_v6 = vpack.c.bf16 %v5704_v35, %v5703_v16  ;;  %9372 = vmatprep.subr.bf16.mxu1 %v9371_v58 }
 0x418   :  { %9338 = vmatpush3.bf16.msra.mxu0 %v9337_v63  ;;  %v9375_v63 = vpack.c.bf16 %v5750_v48, %v5749_v8  ;;  %9374 = vmatpush3.bf16.msra.mxu1 %v9373_v61  ;;  %v13981_v48 = vld [vmem:[#allocation27_spill] sm:$0xff] }
 0x419   :  { %9340 = vmatprep.subr.bf16.mxu0 %v9339_v24  ;;  %v5754_v24 = vld [vmem:[%s13887_s5 + $0x1f8] sm:$0xff] }
 0x41a   :  { %9376 = vmatprep.subr.bf16.mxu1 %v9375_v63  ;;  %v9383_v59 = vpack.c.bf16 %v5754_v24, %v5753_v45 }
 0x41c   :  { %9342 = vmatpush3.bf16.msra.mxu0 %v9341_v32  ;;  %9378 = vmatpush3.bf16.msra.mxu1 %v9377_v40  ;;  %v5737_v32 = vld [vmem:[%s13887_s5 + $0x170] sm:$0xff] }
 0x41d   :  { %9344 = vmatprep.subr.bf16.mxu0 %v9343_v31  ;;  %9380 = vmatprep.subr.bf16.mxu1 %v9379_v34  ;;  %v5738_v31 = vld [vmem:[%s13887_s5 + $0x178] sm:$0xff] }
 0x41e   :  { %v9385_v17 = vpack.c.bf16 %v5738_v31, %v5737_v32 }
 0x420   :  { %9346 = vmatpush3.bf16.msra.mxu0 %v9345_v57  ;;  %9382 = vmatpush3.bf16.msra.mxu1 %v9381_v41  ;;  %v13979_v57 = vld [vmem:[#allocation26_spill] sm:$0xff] }
 0x421   :  { %9348 = vmatprep.subr.bf16.mxu0 %v9347_v1  ;;  %9384 = vmatprep.subr.bf16.mxu1 %v9383_v59  ;;  %v9419_v1 = vpack.c.bf16 %v5804_v53, %v5803_v5  ;;  %v13985_v59 = vld [vmem:[#allocation31_spill] sm:$0xff] }
 0x424   :  { %9350 = vmatpush3.bf16.msra.mxu0 %v9349_v6  ;;  %9386 = vmatpush3.bf16.msra.mxu1 %v9385_v17 }
 0x425   :  { %9352 = vmatprep.subr.bf16.mxu0 %v9351_v22  ;;  %9420 = vmatprep.subr.bf16.mxu1 %v9419_v1  ;;  %v13988_v1 = vld [vmem:[#allocation39_spill] sm:$0xff] }
 0x428   :  { %9354 = vmatpush3.bf16.msra.mxu0 %v9353_v23 }
 0x429   :  { %9388 = vmatprep.subr.bf16.mxu0 %v9387_v38 }
 0x44b   :  { %v7839_v14 = vpop.f32.mrb[176].mxu1 }
 0x44c   :  { %v7840_v4 = vpop.f32.mrb[177].mxu1 }
 0x44d   :  { %v7841_v21 = vadd.f32 %v7840_v4, %v7839_v14 }
 0x44f   :  { %v4913_v44 = vadd.f32 %v13979_v57, %v7841_v21  ;;  %v7842_v26 = vpop.f32.mrb[178].mxu1 }
 0x450   :  { %v7843_v16 = vpop.f32.mrb[179].mxu1 }
 0x451   :  { %v7844_v35 = vadd.f32 %v7843_v16, %v7842_v26  ;;  %v13007_v18 = vadd.f32 %v12723_v3, %v4913_v44  ;;  %v13982_v3 = vld [vmem:[#allocation28_spill] sm:$0xff]  ;;  %v13987_v44 = vld [vmem:[#allocation38_spill] sm:$0xff] }
 0x453   :  { %v4918_v58 = vadd.f32 %v13980_v51, %v7844_v35  ;;  %v7845_v19 = vpop.f32.mrb[180].mxu1 }
 0x454   :  { %v7846_v28 = vpop.f32.mrb[181].mxu1 }
 0x455   :  { %v7847_v8 = vadd.f32 %v7846_v28, %v7845_v19  ;;  %v13011_v61 = vadd.f32 %v12728_v0, %v4918_v58  ;;  %v13989_v28 = vld [vmem:[#allocation40_spill] sm:$0xff] }
 0x457   :  { %v4923_v37 = vadd.f32 %v13981_v48, %v7847_v8  ;;  %v7848_v9 = vpop.f32.mrb[182].mxu1 }
 0x458   :  { %v7849_v6 = vpop.f32.mrb[183].mxu1 }
 0x459   :  { %v7850_v63 = vadd.f32 %v7849_v6, %v7848_v9  ;;  %v13015_v20 = vadd.f32 %v12733_v36, %v4923_v37  ;;  %v13990_v6 = vld [vmem:[#allocation41_spill] sm:$0xff] }
 0x45b   :  { %v4928_v7 = vadd.f32 %v13982_v3, %v7850_v63  ;;  %v7851_v11 = vpop.f32.mrb[184].mxu1 }
 0x45c   :  { %v7852_v22 = vpop.f32.mrb[185].mxu1 }
 0x45d   :  { %v7853_v39 = vadd.f32 %v7852_v22, %v7851_v11  ;;  %v13019_v2 = vadd.f32 %v12738_v33, %v4928_v7  ;;  %v13991_v22 = vld [vmem:[#allocation42_spill] sm:$0xff] }
 0x45f   :  { %v4933_v40 = vadd.f32 %v13983_v47, %v7853_v39  ;;  %v7854_v0 = vpop.f32.mrb[186].mxu1 }
 0x460   :  { %v7855_v23 = vpop.f32.mrb[187].mxu1 }
 0x461   :  { %v7856_v34 = vadd.f32 %v7855_v23, %v7854_v0  ;;  %v13023_v42 = vadd.f32 %v12743_v56, %v4933_v40 }
 0x463   :  { %v4938_v45 = vadd.f32 %v13984_v60, %v7856_v34  ;;  %v7857_v36 = vpop.f32.mrb[188].mxu1 }
 0x464   :  { %v7858_v24 = vpop.f32.mrb[189].mxu1 }
 0x465   :  { %v7859_v41 = vadd.f32 %v7858_v24, %v7857_v36  ;;  %v13027_v14 = vadd.f32 %v12748_v54, %v4938_v45 }
 0x467   :  { %v4943_v32 = vadd.f32 %v13985_v59, %v7859_v41  ;;  %v7860_v33 = vpop.f32.mrb[190].mxu1 }
 0x468   :  { %v7861_v31 = vpop.f32.mrb[191].mxu1 }
 0x469   :  { %v7862_v4 = vadd.f32 %v7861_v31, %v7860_v33  ;;  %v13031_v21 = vadd.f32 %v12753_v25, %v4943_v32 }
 0x46b   :  { %v4948_v62 = vadd.f32 %v13986_v30, %v7862_v4  ;;  %v7863_v56 = vpop.f32.mrb[192].mxu1 }
 0x46c   :  { %v7864_v17 = vpop.f32.mrb[193].mxu1 }
 0x46d   :  { %v7865_v38 = vadd.f32 %v7864_v17, %v7863_v56  ;;  %v9643_v57 = vadd.f32 %v12758_v13, %v4948_v62 }
 0x46f   :  { %v4953_v26 = vadd.f32 %v13987_v44, %v7865_v38  ;;  %v7866_v5 = vpop.f32.mrb[194].mxu1 }
 0x470   :  { %v7867_v54 = vpop.f32.mrb[195].mxu1 }
 0x471   :  { %v7868_v53 = vadd.f32 %v7867_v54, %v7866_v5  ;;  %v13037_v16 = vadd.f32 %v12763_v10, %v4953_v26 }
 0x473   :  { %v4958_v35 = vadd.f32 %v13988_v1, %v7868_v53  ;;  %v7869_v51 = vpop.f32.mrb[196].mxu1 }
 0x474   :  { %v7870_v25 = vpop.f32.mrb[197].mxu1 }
 0x475   :  { %v7871_v58 = vadd.f32 %v7870_v25, %v7869_v51  ;;  %v13041_v19 = vadd.f32 %v12768_v27, %v4958_v35 }
 0x477   :  { %v4963_v8 = vadd.f32 %v13989_v28, %v7871_v58  ;;  %v7872_v48 = vpop.f32.mrb[198].mxu1 }
 0x478   :  { %v7873_v13 = vpop.f32.mrb[199].mxu1 }
 0x479   :  { %v7874_v37 = vadd.f32 %v7873_v13, %v7872_v48  ;;  %v13045_v9 = vadd.f32 %v12773_v15, %v4963_v8 }
 0x47b   :  { %v4968_v63 = vadd.f32 %v13990_v6, %v7874_v37  ;;  %v7875_v10 = vpop.f32.mrb[200].mxu1 }
 0x47c   :  { %v7876_v3 = vpop.f32.mrb[201].mxu1 }
 0x47d   :  { %v7877_v7 = vadd.f32 %v7876_v3, %v7875_v10  ;;  %v13049_v11 = vadd.f32 %v12778_v52, %v4968_v63 }
 0x47f   :  { %v4973_v39 = vadd.f32 %v13991_v22, %v7877_v7  ;;  %v7878_v27 = vpop.f32.mrb[202].mxu1 }
 0x480   :  { %v7879_v47 = vpop.f32.mrb[203].mxu1 }
 0x481   :  { %v7880_v40 = vadd.f32 %v7879_v47, %v7878_v27  ;;  %v13053_v0 = vadd.f32 %v12783_v46, %v4973_v39 }
 0x483   :  { %v4978_v23 = vadd.f32 %v12676_v43, %v7880_v40  ;;  %v7881_v15 = vpop.f32.mrb[204].mxu1  ;;  %v13067_v43 = vld [vmem:[%s13886_s4] ss:$0 sm:$0xff] }
 0x484   :  { %v7882_v34 = vpop.f32.mrb[205].mxu1 }
 0x485   :  { %v7883_v60 = vadd.f32 %v7882_v34, %v7881_v15  ;;  %v13057_v45 = vadd.f32 %v12790_v29, %v4978_v23 }
 0x487   :  { %v4983_v36 = vadd.f32 %v12681_v55, %v7883_v60  ;;  %v7884_v52 = vpop.f32.mrb[206].mxu1 }
 0x488   :  { %v7885_v24 = vpop.f32.mrb[207].mxu1 }
 0x489   :  { %v7886_v41 = vadd.f32 %v7885_v24, %v7884_v52  ;;  %v13061_v59 = vadd.f32 %v12804_v50, %v4983_v36 }
 0x48b   :  { %v4988_v32 = vadd.f32 %v12786_v12, %v7886_v41  ;;  %v8778_v46 = vpop.f32.mrb[64].mxu1 }
 0x48c   :  { %v9608_v33 = vadd.f32 %v13011_v61, %v8778_v46  ;;  %v5057_v29 = vpop.f32.mrb[65].mxu1 }
 0x48d   :  { %v9614_v31 = vadd.f32 %v13007_v18, %v5057_v29  ;;  %v13072_v55 = vadd.f32 %v12811_v49, %v4988_v32 }
 0x48e   :  { %v5160_v4 = vadd.f32 %v9608_v33, %v13067_v43 }
 0x48f   :  { %v5159_v50 = vadd.f32 %v9614_v31, %v13067_v43  ;;  %v8781_v30 = vpop.f32.mrb[66].mxu1 }
 0x490   :  { %v9620_v12 = vadd.f32 %v13019_v2, %v8781_v30  ;;  %v5067_v62 = vpop.f32.mrb[67].mxu1 }
 0x491   :  { %v5175_v56 = vmax.f32 %v5159_v50, %v5160_v4  ;;  %v9626_v17 = vadd.f32 %v13015_v20, %v5067_v62 }
 0x492   :  { %v5162_v38 = vadd.f32 %v9620_v12, %v13067_v43 }
 0x493   :  { %5183 = vst [vmem:[#allocation5] sm:$0xff] %v5175_v56  ;;  %v5161_v61 = vadd.f32 %v9626_v17, %v13067_v43  ;;  %v8784_v18 = vpop.f32.mrb[68].mxu1 }
 0x494   :  { %v9632_v49 = vadd.f32 %v13027_v14, %v8784_v18  ;;  %v5077_v44 = vpop.f32.mrb[69].mxu1 }
 0x495   :  { %v5176_v26 = vmax.f32 %v5161_v61, %v5162_v38  ;;  %v9638_v5 = vadd.f32 %v13023_v42, %v5077_v44 }
 0x496   :  { %v5164_v54 = vadd.f32 %v9632_v49, %v13067_v43 }
 0x497   :  { %5184 = vst [vmem:[#allocation5 + $0x8] sm:$0xff] %v5176_v26  ;;  %v5163_v2 = vadd.f32 %v9638_v5, %v13067_v43  ;;  %v8787_v53 = vpop.f32.mrb[70].mxu1 }
 0x498   :  { %v9644_v1 = vadd.f32 %v9643_v57, %v8787_v53  ;;  %v5087_v20 = vpop.f32.mrb[71].mxu1 }
 0x499   :  { %v5177_v35 = vmax.f32 %v5163_v2, %v5164_v54  ;;  %v9650_v51 = vadd.f32 %v13031_v21, %v5087_v20  ;;  %v9908_v54 = vmov 1983009808  }
 0x49a   :  { %v5191_v25 = vld [vmem:[#allocation5] ss:$2 sm:$0xf]  ;;  %v5207_v58 = vld [vmem:[#allocation5 + $0x1] ss:$2 sm:$0xf]  ;;  %v5166_v28 = vadd.f32 %v9644_v1, %v13067_v43  ;;  %v5960_v2 = vunpack.c.l.s4 %v9908_v54 }
 0x49b   :  { %v5222_v14 = vmax.f32 %v5191_v25, %v5207_v58  ;;  %5185 = vst [vmem:[#allocation5 + $0x10] sm:$0xff] %v5177_v35  ;;  %v5165_v8 = vadd.f32 %v9650_v51, %v13067_v43  ;;  %v8790_v42 = vpop.f32.mrb[72].mxu1  ;;  %v13111_v35 = vld [vmem:[%s13887_s5 + $0x208] sm:$0xff] }
 0x49c   :  { %v9656_v48 = vadd.f32 %v13041_v19, %v8790_v42  ;;  %v5097_v13 = vpop.f32.mrb[73].mxu1  ;;  %v5961_v25 = vunpack.c.0.s8 %v5960_v2 }
 0x49d   :  { %v5230_v37 = vmax.f32 %v5222_v14, 0.0  ;;  %v5178_v6 = vmax.f32 %v5165_v8, %v5166_v28  ;;  %v9662_v57 = vadd.f32 %v13037_v16, %v5097_v13  ;;  %v13116_v28 = vld [vmem:[%s13887_s5 + $0x300] sm:$0xff]  ;;  %v13121_v14 = vld [vmem:[%s13887_s5 + $0x308] sm:$0xff]  ;;  %v13126_v8 = vld [vmem:[%s13887_s5 + $0x290] sm:$0xff] }
 0x49e   :  { %v5193_v63 = vld [vmem:[#allocation5 + $0x8] ss:$2 sm:$0xf]  ;;  %v5209_v10 = vld [vmem:[#allocation5 + $0x9] ss:$2 sm:$0xf]  ;;  %v5168_v21 = vadd.f32 %v9656_v48, %v13067_v43 }
 0x49f   :  { %5238 = vst [vmem:[#allocation6] sm:$0xf] %v5230_v37  ;;  %v5223_v3 = vmax.f32 %v5193_v63, %v5209_v10  ;;  %5186 = vst [vmem:[#allocation5 + $0x18] sm:$0xff] %v5178_v6  ;;  %v5167_v7 = vadd.f32 %v9662_v57, %v13067_v43  ;;  %v8793_v22 = vpop.f32.mrb[74].mxu1  ;;  %v13131_v57 = vld [vmem:[%s13887_s5 + $0x298] sm:$0xff]  ;;  %v13136_v63 = vld [vmem:[%s13887_s5 + $0x210] sm:$0xff] }
 0x4a0   :  { %v9668_v39 = vadd.f32 %v13049_v11, %v8793_v22  ;;  %v5107_v27 = vpop.f32.mrb[75].mxu1 }
 0x4a1   :  { %v5231_v47 = vmax.f32 %v5223_v3, 0.0  ;;  %v5179_v19 = vmax.f32 %v5167_v7, %v5168_v21  ;;  %v9674_v40 = vadd.f32 %v13045_v9, %v5107_v27  ;;  %v13141_v7 = vld [vmem:[%s13887_s5 + $0x218] sm:$0xff] }
 0x4a2   :  { %v5195_v23 = vld [vmem:[#allocation5 + $0x10] ss:$2 sm:$0xf]  ;;  %v5211_v15 = vld [vmem:[#allocation5 + $0x11] ss:$2 sm:$0xf]  ;;  %v5170_v16 = vadd.f32 %v9668_v39, %v13067_v43 }
 0x4a3   :  { %5239 = vst [vmem:[#allocation6 + $0x4] sm:$0xf] %v5231_v47  ;;  %v5224_v34 = vmax.f32 %v5195_v23, %v5211_v15  ;;  %5187 = vst [vmem:[#allocation5 + $0x20] sm:$0xff] %v5179_v19  ;;  %v5169_v60 = vadd.f32 %v9674_v40, %v13067_v43  ;;  %v8796_v36 = vpop.f32.mrb[76].mxu1 }
 0x4a4   :  { %v9680_v52 = vadd.f32 %v13057_v45, %v8796_v36  ;;  %v5117_v24 = vpop.f32.mrb[77].mxu1  ;;  %v9391_v36 = vpack.c.bf16 %v13131_v57, %v13126_v8  ;;  %v5777_v57 = vld [vmem:[%s13887_s5 + $0x2b0] sm:$0xff] }
 0x4a5   :  { %v5232_v41 = vmax.f32 %v5224_v34, 0.0  ;;  %v5180_v11 = vmax.f32 %v5169_v60, %v5170_v16  ;;  %v9686_v32 = vadd.f32 %v13053_v0, %v5117_v24  ;;  %v9421_v60 = vpack.c.bf16 %v13121_v14, %v13116_v28 }
 0x4a6   :  { %v5197_v46 = vld [vmem:[#allocation5 + $0x18] ss:$2 sm:$0xf]  ;;  %v5213_v33 = vld [vmem:[#allocation5 + $0x19] ss:$2 sm:$0xf]  ;;  %v5172_v9 = vadd.f32 %v9680_v52, %v13067_v43 }
 0x4a7   :  { %5240 = vst [vmem:[#allocation6 + $0x8] sm:$0xf] %v5232_v41  ;;  %v5225_v29 = vmax.f32 %v5197_v46, %v5213_v33  ;;  %5188 = vst [vmem:[#allocation5 + $0x28] sm:$0xff] %v5180_v11  ;;  %v5171_v31 = vadd.f32 %v9686_v32, %v13067_v43  ;;  %v8799_v4 = vpop.f32.mrb[78].mxu1  ;;  %v9393_v46 = vpack.c.bf16 %v13141_v7, %v13136_v63  ;;  %v5762_v63 = vld [vmem:[%s13887_s5 + $0x238] sm:$0xff] }
 0x4a8   :  { %v9692_v50 = vadd.f32 %v13072_v55, %v8799_v4  ;;  %v5127_v30 = vpop.f32.mrb[79].mxu1  ;;  %v6857_v37 = vld.sshfl [vmem:[#allocation6] sm:$0x1 pattern:$0x76325410] }
 0x4a9   :  { %v5233_v12 = vmax.f32 %v5225_v29, 0.0  ;;  %v5181_v45 = vmax.f32 %v5171_v31, %v5172_v9  ;;  %v9698_v62 = vadd.f32 %v13061_v59, %v5127_v30  ;;  %v5962_v59 = vlaneseq  ;;  %v6859_v21 = vld.sshfl [vmem:[#allocation6 + $0x1] sm:$0x1 pattern:$0x76325410] }
 0x4aa   :  { %v5199_v56 = vld [vmem:[#allocation5 + $0x20] ss:$2 sm:$0xf]  ;;  %v5215_v17 = vld [vmem:[#allocation5 + $0x21] ss:$2 sm:$0xf]  ;;  %v5174_v0 = vadd.f32 %v9692_v50, %v13067_v43 }
 0x4ab   :  { %5241 = vst [vmem:[#allocation6 + $0xc] sm:$0xf] %v5233_v12  ;;  %v5226_v38 = vmax.f32 %v5199_v56, %v5215_v17  ;;  %5189 = vst [vmem:[#allocation5 + $0x30] sm:$0xff] %v5181_v45  ;;  %v5173_v61 = vadd.f32 %v9698_v62, %v13067_v43  ;;  %v13106_v43 = vld [vmem:[%s13887_s5 + $0x200] sm:$0xff]  ;;  %v5963_v58 = vshrl.u32 %v5962_v59, 7 }
 0x4ac   :  { %v6861_v27 = vld.sshfl [vmem:[#allocation6 + $0x2] sm:$0x1 pattern:$0x76325410]  ;;  %v9389_v40 = vpack.c.bf16 %v13111_v35, %v13106_v43 }
 0x4ad   :  { %v5234_v18 = vmax.f32 %v5226_v38, 0.0  ;;  %v5182_v49 = vmax.f32 %v5173_v61, %v5174_v0  ;;  %v13143_v19 = vsub.s32 %v5961_v25, %v5963_v58  ;;  %v6863_v16 = vld.sshfl [vmem:[#allocation6 + $0x3] sm:$0x1 pattern:$0x76325410] }
 0x4ae   :  { %v5201_v44 = vld [vmem:[#allocation5 + $0x28] ss:$2 sm:$0xf]  ;;  %v5217_v26 = vld [vmem:[#allocation5 + $0x29] ss:$2 sm:$0xf] }
 0x4af   :  { %5242 = vst [vmem:[#allocation6 + $0x10] sm:$0xf] %v5234_v18  ;;  %v5227_v55 = vmax.f32 %v5201_v44, %v5217_v26  ;;  %5190 = vst [vmem:[#allocation5 + $0x38] sm:$0xff] %v5182_v49 }
 0x4b0   :  { %v6865_v11 = vld.sshfl [vmem:[#allocation6 + $0x4] sm:$0x1 pattern:$0x76325410] }
 0x4b1   :  { %v5235_v5 = vmax.f32 %v5227_v55, 0.0  ;;  %v6867_v61 = vld.sshfl [vmem:[#allocation6 + $0x5] sm:$0x1 pattern:$0x76325410] }
 0x4b2   :  { %v5203_v53 = vld [vmem:[#allocation5 + $0x30] ss:$2 sm:$0xf]  ;;  %v5219_v1 = vld [vmem:[#allocation5 + $0x31] ss:$2 sm:$0xf] }
 0x4b3   :  { %5243 = vst [vmem:[#allocation6 + $0x14] sm:$0xf] %v5235_v5  ;;  %v5228_v20 = vmax.f32 %v5203_v53, %v5219_v1  ;;  %v6869_v5 = vld.sshfl [vmem:[#allocation6 + $0x6] sm:$0x1 pattern:$0x76325410] }
 0x4b4   :  { %v6871_v54 = vld.sshfl [vmem:[#allocation6 + $0x7] sm:$0x1 pattern:$0x76325410] }
 0x4b5   :  { %v5236_v51 = vmax.f32 %v5228_v20, 0.0 }
 0x4b6   :  { %v5205_v42 = vld [vmem:[#allocation5 + $0x38] ss:$2 sm:$0xf]  ;;  %v5221_v48 = vld [vmem:[#allocation5 + $0x39] ss:$2 sm:$0xf] }
 0x4b7   :  { %5244 = vst [vmem:[#allocation6 + $0x18] sm:$0xf] %v5236_v51  ;;  %v5229_v13 = vmax.f32 %v5205_v42, %v5221_v48  ;;  %v6858_v6 = vld.sshfl [vmem:[#allocation6 + $0x10] sm:$0x1 pattern:$0x76325410] }
 0x4b8   :  { %v5268_v10 = vrot.slane %v6858_v6, 7  ;;  %v6860_v3 = vld.sshfl [vmem:[#allocation6 + $0x11] sm:$0x1 pattern:$0x76325410] }
 0x4b9   :  { %v5237_v22 = vmax.f32 %v5229_v13, 0.0  ;;  %v5299_v39 = vrot.slane %v6860_v3, 7  ;;  %v6862_v47 = vld.sshfl [vmem:[#allocation6 + $0x12] sm:$0x1 pattern:$0x76325410] }
 0x4ba   :  { %v5270_v23 = vsel %vm5269_vm1, %v5268_v10, %v6857_v37  ;;  %v5326_v15 = vrot.slane %v6862_v47, 7  ;;  %v6864_v34 = vld.sshfl [vmem:[#allocation6 + $0x13] sm:$0x1 pattern:$0x76325410] }
 0x4bb   :  { %5245 = vst [vmem:[#allocation6 + $0x1c] sm:$0xf] %v5237_v22  ;;  %v5272_v52 = vsel %vm5271_vm2, %v5268_v10, %v5270_v23  ;;  %v5300_v24 = vsel %vm5269_vm1, %v5299_v39, %v6859_v21  ;;  %v5353_v41 = vrot.slane %v6864_v34, 7 }
 0x4bc   :  { %v6866_v32 = vld.sshfl [vmem:[#allocation6 + $0x14] sm:$0x1 pattern:$0x76325410]  ;;  %v5274_v33 = vsel %vm5273_vm3, %v5268_v10, %v5272_v52  ;;  %v5301_v9 = vsel %vm5271_vm2, %v5299_v39, %v5300_v24  ;;  %v5327_v29 = vsel %vm5269_vm1, %v5326_v15, %v6861_v27 }
 0x4bd   :  { %v5381_v31 = vrot.slane %v6866_v32, 7  ;;  %v6868_v4 = vld.sshfl [vmem:[#allocation6 + $0x15] sm:$0x1 pattern:$0x76325410]  ;;  %v5276_v50 = vsel %vm5275_vm4, %v5268_v10, %v5274_v33  ;;  %v5302_v30 = vsel %vm5273_vm3, %v5299_v39, %v5301_v9  ;;  %v5328_v12 = vsel %vm5271_vm2, %v5326_v15, %v5327_v29  ;;  %v13195_v29 = vld [vmem:[%s13887_s5 + $0x398] sm:$0xff] }
 0x4be   :  { %v5354_v45 = vsel %vm5269_vm1, %v5353_v41, %v6863_v16  ;;  %v6870_v62 = vld.sshfl [vmem:[#allocation6 + $0x16] sm:$0x1 pattern:$0x76325410]  ;;  %5278 = vst [vmem:[#allocation7] sm:$0x3] %v5276_v50  ;;  %v5303_v56 = vsel %vm5275_vm4, %v5299_v39, %v5302_v30  ;;  %v5329_v17 = vsel %vm5273_vm3, %v5326_v15, %v5328_v12 }
 0x4bf   :  { %v5355_v0 = vsel %vm5271_vm2, %v5353_v41, %v5354_v45  ;;  %v5382_v38 = vsel %vm5269_vm1, %v5381_v31, %v6865_v11  ;;  %v6872_v18 = vld.sshfl [vmem:[#allocation6 + $0x17] sm:$0x1 pattern:$0x76325410]  ;;  %5305 = vst [vmem:[#allocation7 + $0x2] sm:$0x3] %v5303_v56  ;;  %v5330_v49 = vsel %vm5275_vm4, %v5326_v15, %v5329_v17 }
 0x4c0   :  { %v5356_v44 = vsel %vm5273_vm3, %v5353_v41, %v5355_v0  ;;  %v5383_v26 = vsel %vm5271_vm2, %v5381_v31, %v5382_v38  ;;  %v5408_v55 = vrot.slane %v6868_v4, 7  ;;  %v6874_v2 = vld.sshfl [vmem:[#allocation6 + $0x18] sm:$0x1 pattern:$0x76325410]  ;;  %v5435_v1 = vrot.slane %v6870_v62, 7 }
 0x4c1   :  { %5332 = vst [vmem:[#allocation7 + $0x4] sm:$0x3] %v5330_v49  ;;  %v5357_v59 = vsel %vm5275_vm4, %v5353_v41, %v5356_v44  ;;  %v5384_v53 = vsel %vm5273_vm3, %v5381_v31, %v5383_v26  ;;  %v5462_v20 = vrot.slane %v6872_v18, 7  ;;  %v5490_v48 = vrot.slane %v6874_v2, 7  ;;  %v13190_v9 = vld [vmem:[%s13887_s5 + $0x390] sm:$0xff] }
 0x4c2   :  { %v6873_v51 = vld.sshfl [vmem:[#allocation6 + $0x8] sm:$0x1 pattern:$0x76325410]  ;;  %5359 = vst [vmem:[#allocation7 + $0x6] sm:$0x3] %v5357_v59  ;;  %v5385_v58 = vsel %vm5275_vm4, %v5381_v31, %v5384_v53  ;;  %v5409_v42 = vsel %vm5269_vm1, %v5408_v55, %v6867_v61  ;;  %v5436_v10 = vsel %vm5269_vm1, %v5435_v1, %v6869_v5  ;;  %v9423_v44 = vpack.c.bf16 %v13195_v29, %v13190_v9 }
 0x4c3   :  { %v6876_v25 = vld.sshfl [vmem:[#allocation6 + $0x19] sm:$0x1 pattern:$0x76325410]  ;;  %5387 = vst [vmem:[#allocation7 + $0x8] sm:$0x3] %v5385_v58  ;;  %v5410_v6 = vsel %vm5271_vm2, %v5408_v55, %v5409_v42  ;;  %v5463_v21 = vsel %vm5269_vm1, %v5462_v20, %v6871_v54  ;;  %v5437_v27 = vsel %vm5271_vm2, %v5435_v1, %v5436_v10  ;;  %v5491_v23 = vsel %vm5269_vm1, %v5490_v48, %v6873_v51 }
 0x4c4   :  { %v5517_v13 = vrot.slane %v6876_v25, 7  ;;  %v6878_v37 = vld.sshfl [vmem:[#allocation6 + $0x1a] sm:$0x1 pattern:$0x76325410]  ;;  %v5411_v39 = vsel %vm5273_vm3, %v5408_v55, %v5410_v6  ;;  %v5464_v47 = vsel %vm5271_vm2, %v5462_v20, %v5463_v21  ;;  %v5438_v52 = vsel %vm5273_vm3, %v5435_v1, %v5437_v27  ;;  %v5809_v29 = vld [vmem:[%s13887_s5 + $0x3b0] sm:$0xff] }
 0x4c5   :  { %v6875_v3 = vld.sshfl [vmem:[#allocation6 + $0x9] sm:$0x1 pattern:$0x76325410]  ;;  %v5544_v22 = vrot.slane %v6878_v37, 7  ;;  %v5412_v34 = vsel %vm5275_vm4, %v5408_v55, %v5411_v39  ;;  %v5465_v24 = vsel %vm5273_vm3, %v5462_v20, %v5464_v47  ;;  %v5492_v41 = vsel %vm5271_vm2, %v5490_v48, %v5491_v23 }
 0x4c6   :  { %v6877_v15 = vld.sshfl [vmem:[#allocation6 + $0xa] sm:$0x1 pattern:$0x76325410]  ;;  %5414 = vst [vmem:[#allocation7 + $0xa] sm:$0x3] %v5412_v34  ;;  %v5439_v32 = vsel %vm5275_vm4, %v5435_v1, %v5438_v52  ;;  %v5466_v33 = vsel %vm5275_vm4, %v5462_v20, %v5465_v24  ;;  %v5493_v31 = vsel %vm5273_vm3, %v5490_v48, %v5492_v41  ;;  %v5518_v4 = vsel %vm5269_vm1, %v5517_v13, %v6875_v3 }
 0x4c7   :  { %v6880_v16 = vld.sshfl [vmem:[#allocation6 + $0x1b] sm:$0x1 pattern:$0x76325410]  ;;  %5441 = vst [vmem:[#allocation7 + $0xc] sm:$0x3] %v5439_v32  ;;  %v5494_v30 = vsel %vm5275_vm4, %v5490_v48, %v5493_v31  ;;  %v5519_v12 = vsel %vm5271_vm2, %v5517_v13, %v5518_v4  ;;  %v5545_v45 = vsel %vm5269_vm1, %v5544_v22, %v6877_v15 }
 0x4c8   :  { %v6882_v11 = vld.sshfl [vmem:[#allocation6 + $0x1c] sm:$0x1 pattern:$0x76325410]  ;;  %5468 = vst [vmem:[#allocation7 + $0xe] sm:$0x3] %v5466_v33  ;;  %v5520_v17 = vsel %vm5273_vm3, %v5517_v13, %v5519_v12  ;;  %v5546_v0 = vsel %vm5271_vm2, %v5544_v22, %v5545_v45 }
 0x4c9   :  { %v6879_v50 = vld.sshfl [vmem:[#allocation6 + $0xb] sm:$0x1 pattern:$0x76325410]  ;;  %v5571_v62 = vrot.slane %v6880_v16, 7  ;;  %v5599_v61 = vrot.slane %v6882_v11, 7  ;;  %v5521_v26 = vsel %vm5275_vm4, %v5517_v13, %v5520_v17  ;;  %v5547_v55 = vsel %vm5273_vm3, %v5544_v22, %v5546_v0 }
 0x4ca   :  { %v6884_v56 = vld.sshfl [vmem:[#allocation6 + $0x1d] sm:$0x1 pattern:$0x76325410]  ;;  %5496 = vst [vmem:[#allocation7 + $0x10] sm:$0x3] %v5494_v30  ;;  %v5548_v53 = vsel %vm5275_vm4, %v5544_v22, %v5547_v55 }
 0x4cb   :  { %v6881_v38 = vld.sshfl [vmem:[#allocation6 + $0xc] sm:$0x1 pattern:$0x76325410]  ;;  %v5626_v18 = vrot.slane %v6884_v56, 7  ;;  %v5687_v49 = vld [vmem:[#allocation7] sm:$0xff]  ;;  %v5572_v5 = vsel %vm5269_vm1, %v5571_v62, %v6879_v50 }
 0x4cc   :  { %v6886_v54 = vld.sshfl [vmem:[#allocation6 + $0x1e] sm:$0x1 pattern:$0x76325410]  ;;  %v5965_v2 = vrot.slane %v5687_v49, %v13143_v19  ;;  %v5958_v59 = vcombine.high %v5687_v49, %v5687_v49  ;;  %5523 = vst [vmem:[#allocation7 + $0x12] sm:$0x3] %v5521_v26  ;;  %v5573_v1 = vsel %vm5271_vm2, %v5571_v62, %v5572_v5  ;;  %v5600_v25 = vsel %vm5269_vm1, %v5599_v61, %v6881_v38 }
 0x4cd   :  { %v6883_v20 = vld.sshfl [vmem:[#allocation6 + $0xd] sm:$0x1 pattern:$0x76325410]  ;;  %5550 = vst [vmem:[#allocation7 + $0x14] sm:$0x3] %v5548_v53  ;;  %v5574_v51 = vsel %vm5273_vm3, %v5571_v62, %v5573_v1  ;;  %v5601_v10 = vsel %vm5271_vm2, %v5599_v61, %v5600_v25 }
 0x4ce   :  { %v5627_v58 = vsel %vm5269_vm1, %v5626_v18, %v6883_v20  ;;  %v5653_v42 = vrot.slane %v6886_v54, 7  ;;  %v6888_v48 = vld.sshfl [vmem:[#allocation6 + $0x1f] sm:$0x1 pattern:$0x76325410]  ;;  %v5973_v13 = vcombine.high %v5965_v2, %v5965_v2  ;;  %v5972_v37 = vrot.slane %v5958_v59, %v13143_v19  ;;  %v5775_v3 = vld [vmem:[%s13887_s5 + $0x2a0] sm:$0xff] }
 0x4cf   :  { %v5575_v6 = vsel %vm5275_vm4, %v5571_v62, %v5574_v51  ;;  %v6885_v21 = vld.sshfl [vmem:[#allocation6 + $0xe] sm:$0x1 pattern:$0x76325410]  ;;  %v5602_v39 = vsel %vm5273_vm3, %v5599_v61, %v5601_v10  ;;  %v5628_v27 = vsel %vm5271_vm2, %v5626_v18, %v5627_v58  ;;  %v5680_v23 = vrot.slane %v6888_v48, 7  ;;  %v5789_v32 = vld [vmem:[%s13887_s5 + $0x310] sm:$0xff] }
 0x4d0   :  { %v5776_v22 = vld [vmem:[%s13887_s5 + $0x2a8] sm:$0xff]  ;;  %5577 = vst [vmem:[#allocation7 + $0x16] sm:$0x3] %v5575_v6  ;;  %v5654_v47 = vsel %vm5269_vm1, %v5653_v42, %v6885_v21  ;;  %6106 = vmatprep.mubr.f32.mxu0 %v5973_v13  ;;  %v5974_v15 = vcombine.high %v5972_v37, %v5972_v37  ;;  %v5603_v34 = vsel %vm5275_vm4, %v5599_v61, %v5602_v39  ;;  %v5790_v33 = vld [vmem:[%s13887_s5 + $0x318] sm:$0xff]  ;;  %v5807_v12 = vld [vmem:[%s13887_s5 + $0x3a0] sm:$0xff] }
 0x4d1   :  { %v5688_v16 = vld [vmem:[#allocation7 + $0x8] sm:$0xff]  ;;  %v5629_v52 = vsel %vm5273_vm3, %v5626_v18, %v5628_v27  ;;  %v5655_v24 = vsel %vm5271_vm2, %v5653_v42, %v5654_v47  ;;  %6107 = vmatmul.mubr.f32.vlgmr.msra.gmra.mrb[16].mxu0 %v5965_v2  ;;  %5605 = vst [vmem:[#allocation7 + $0x18] sm:$0x3] %v5603_v34  ;;  %v9395_v30 = vpack.c.bf16 %v5776_v22, %v5775_v3  ;;  %v5810_v49 = vld [vmem:[%s13887_s5 + $0x3b8] sm:$0xff]  ;;  %v5761_v26 = vld [vmem:[%s13887_s5 + $0x230] sm:$0xff] }
 0x4d2   :  { %v13231_v41 = vrot.slane %v5688_v16, %v13143_v19  ;;  %v5975_v11 = vcombine.high %v5688_v16, %v5688_v16  ;;  %v5630_v31 = vsel %vm5275_vm4, %v5626_v18, %v5629_v52  ;;  %v5656_v4 = vsel %vm5273_vm3, %v5653_v42, %v5655_v24  ;;  %v6887_v50 = vld.sshfl [vmem:[#allocation6 + $0xf] sm:$0x1 pattern:$0x76325410]  ;;  %9390 = vmatpush3.bf16.msra.mxu0 %v9389_v40  ;;  %v5759_v40 = vld [vmem:[%s13887_s5 + $0x220] sm:$0xff]  ;;  %v5793_v54 = vld [vmem:[%s13887_s5 + $0x330] sm:$0xff] }
 0x4d3   :  { %6176 = vmatprep.mubr.f32.mxu1 %v5974_v15  ;;  %v5808_v45 = vld [vmem:[%s13887_s5 + $0x3a8] sm:$0xff]  ;;  %5632 = vst [vmem:[#allocation7 + $0x1a] sm:$0x3] %v5630_v31  ;;  %v5657_v62 = vsel %vm5275_vm4, %v5653_v42, %v5656_v4  ;;  %v5681_v56 = vsel %vm5269_vm1, %v5680_v23, %v6887_v50  ;;  %9392 = vmatprep.subr.bf16.mxu0 %v9391_v36  ;;  %v5778_v36 = vld [vmem:[%s13887_s5 + $0x2b8] sm:$0xff]  ;;  %v5811_v53 = vld [vmem:[%s13887_s5 + $0x3c0] sm:$0xff] }
 0x4d4   :  { %6177 = vmatmul.mubr.f32.vlgmr.msra.gmra.mrb[208].mxu1 %v5972_v37  ;;  %v5990_v43 = vcombine.high %v13231_v41, %v13231_v41  ;;  %v13258_v35 = vrot.slane %v5975_v11, %v13143_v19  ;;  %v5760_v17 = vld [vmem:[%s13887_s5 + $0x228] sm:$0xff]  ;;  %5659 = vst [vmem:[#allocation7 + $0x1c] sm:$0x3] %v5657_v62  ;;  %v5682_v0 = vsel %vm5271_vm2, %v5680_v23, %v5681_v56  ;;  %v5794_v2 = vld [vmem:[%s13887_s5 + $0x338] sm:$0xff]  ;;  %v5763_v51 = vld [vmem:[%s13887_s5 + $0x240] sm:$0xff] }
 0x4d5   :  { %9422 = vmatpush3.bf16.msra.mxu1 %v9421_v60  ;;  %v9425_v8 = vpack.c.bf16 %v5790_v33, %v5789_v32  ;;  %v5683_v38 = vsel %vm5273_vm3, %v5680_v23, %v5682_v0  ;;  %v9427_v14 = vpack.c.bf16 %v5808_v45, %v5807_v12  ;;  %v5791_v60 = vld [vmem:[%s13887_s5 + $0x320] sm:$0xff]  ;;  %v5792_v61 = vld [vmem:[%s13887_s5 + $0x328] sm:$0xff]  ;;  %v9397_v9 = vpack.c.bf16 %v5760_v17, %v5759_v40  ;;  %v5781_v42 = vld [vmem:[%s13887_s5 + $0x2d0] sm:$0xff] }
 0x4d6   :  { %6246 = vmatprep.mubr.f32.mxu0 %v5990_v43  ;;  %9424 = vmatprep.subr.bf16.mxu1 %v9423_v44  ;;  %v5991_v28 = vcombine.high %v13258_v35, %v13258_v35  ;;  %v5684_v18 = vsel %vm5275_vm4, %v5680_v23, %v5683_v38  ;;  %v9399_v44 = vpack.c.bf16 %v5778_v36, %v5777_v57  ;;  %v5780_v55 = vld [vmem:[%s13887_s5 + $0x2c8] sm:$0xff]  ;;  %v5782_v48 = vld [vmem:[%s13887_s5 + $0x2d8] sm:$0xff]  ;;  %v5795_v37 = vld [vmem:[%s13887_s5 + $0x340] sm:$0xff] }
 0x4d7   :  { %9394 = vmatpush3.bf16.msra.mxu0 %v9393_v46  ;;  %5686 = vst [vmem:[#allocation7 + $0x1e] sm:$0x3] %v5684_v18  ;;  %v9429_v7 = vpack.c.bf16 %v5792_v61, %v5791_v60  ;;  %v5779_v46 = vld [vmem:[%s13887_s5 + $0x2c0] sm:$0xff]  ;;  %v9431_v5 = vpack.c.bf16 %v5810_v49, %v5809_v29  ;;  %v9401_v59 = vpack.c.bf16 %v5762_v63, %v5761_v26  ;;  %v5812_v1 = vld [vmem:[%s13887_s5 + $0x3c8] sm:$0xff]  ;;  %v5813_v21 = vld [vmem:[%s13887_s5 + $0x3d0] sm:$0xff] }
 0x4d8   :  { %6316 = vmatprep.mubr.f32.mxu1 %v5991_v28  ;;  %9396 = vmatprep.subr.bf16.mxu0 %v9395_v30  ;;  %v9403_v20 = vpack.c.bf16 %v5780_v55, %v5779_v46  ;;  %v5764_v25 = vld [vmem:[%s13887_s5 + $0x248] sm:$0xff]  ;;  %v9433_v58 = vpack.c.bf16 %v5794_v2, %v5793_v54  ;;  %v9435_v13 = vpack.c.bf16 %v5812_v1, %v5811_v53  ;;  %v5814_v3 = vld [vmem:[%s13887_s5 + $0x3d8] sm:$0xff]  ;;  %v5765_v39 = vld [vmem:[%s13887_s5 + $0x250] sm:$0xff] }
 0x4d9   :  { %9426 = vmatpush3.bf16.msra.mxu1 %v9425_v8  ;;  %v5796_v6 = vld [vmem:[%s13887_s5 + $0x348] sm:$0xff]  ;;  %v9405_v10 = vpack.c.bf16 %v5764_v25, %v5763_v51  ;;  %v9407_v22 = vpack.c.bf16 %v5782_v48, %v5781_v42  ;;  %v5766_v27 = vld [vmem:[%s13887_s5 + $0x258] sm:$0xff]  ;;  %v5783_v23 = vld [vmem:[%s13887_s5 + $0x2e0] sm:$0xff]  ;;  %v9439_v16 = vpack.c.bf16 %v5814_v3, %v5813_v21 }
 0x4da   :  { %9428 = vmatprep.subr.bf16.mxu1 %v9427_v14  ;;  %v9437_v47 = vpack.c.bf16 %v5796_v6, %v5795_v37  ;;  %v5784_v15 = vld [vmem:[%s13887_s5 + $0x2e8] sm:$0xff]  ;;  %v5797_v34 = vld [vmem:[%s13887_s5 + $0x350] sm:$0xff]  ;;  %v5798_v52 = vld [vmem:[%s13887_s5 + $0x358] sm:$0xff]  ;;  %v9409_v24 = vpack.c.bf16 %v5766_v27, %v5765_v39 }
 0x4db   :  { %9398 = vmatpush3.bf16.msra.mxu0 %v9397_v9  ;;  %v5815_v11 = vld [vmem:[%s13887_s5 + $0x3e0] sm:$0xff]  ;;  %v5816_v32 = vld [vmem:[%s13887_s5 + $0x3e8] sm:$0xff]  ;;  %v9411_v33 = vpack.c.bf16 %v5784_v15, %v5783_v23  ;;  %v9441_v50 = vpack.c.bf16 %v5798_v52, %v5797_v34  ;;  %v5785_v30 = vld [vmem:[%s13887_s5 + $0x2f0] sm:$0xff] }
 0x4dc   :  { %9400 = vmatprep.subr.bf16.mxu0 %v9399_v44  ;;  %v5767_v31 = vld [vmem:[%s13887_s5 + $0x260] sm:$0xff]  ;;  %v5768_v4 = vld [vmem:[%s13887_s5 + $0x268] sm:$0xff]  ;;  %v5786_v12 = vld [vmem:[%s13887_s5 + $0x2f8] sm:$0xff]  ;;  %v9443_v45 = vpack.c.bf16 %v5816_v32, %v5815_v11 }
 0x4dd   :  { %9430 = vmatpush3.bf16.msra.mxu1 %v9429_v7  ;;  %v5799_v62 = vld [vmem:[%s13887_s5 + $0x360] sm:$0xff]  ;;  %v5800_v56 = vld [vmem:[%s13887_s5 + $0x368] sm:$0xff]  ;;  %v9413_v43 = vpack.c.bf16 %v5768_v4, %v5767_v31  ;;  %v5817_v40 = vld [vmem:[%s13887_s5 + $0x3f0] sm:$0xff]  ;;  %v9415_v0 = vpack.c.bf16 %v5786_v12, %v5785_v30 }
 0x4de   :  { %9432 = vmatprep.subr.bf16.mxu1 %v9431_v5  ;;  %v5818_v17 = vld [vmem:[%s13887_s5 + $0x3f8] sm:$0xff]  ;;  %v5769_v8 = vld [vmem:[%s13887_s5 + $0x270] sm:$0xff]  ;;  %v9445_v38 = vpack.c.bf16 %v5800_v56, %v5799_v62  ;;  %v5835_v28 = vld [vmem:[%s13887_s5 + $0x480] sm:$0xff] }
 0x4df   :  { %9402 = vmatpush3.bf16.msra.mxu0 %v9401_v59  ;;  %v5770_v57 = vld [vmem:[%s13887_s5 + $0x278] sm:$0xff]  ;;  %v5689_v36 = vld [vmem:[#allocation7 + $0x10] sm:$0xff]  ;;  %v5836_v14 = vld [vmem:[%s13887_s5 + $0x488] sm:$0xff]  ;;  %v9447_v60 = vpack.c.bf16 %v5818_v17, %v5817_v40 }
 0x4e0   :  { %9404 = vmatprep.subr.bf16.mxu0 %v9403_v20  ;;  %v5801_v61 = vld [vmem:[%s13887_s5 + $0x370] sm:$0xff]  ;;  %v5802_v18 = vld [vmem:[%s13887_s5 + $0x378] sm:$0xff]  ;;  %v9417_v9 = vpack.c.bf16 %v5770_v57, %v5769_v8  ;;  %v5867_v29 = vld [vmem:[%s13887_s5 + $0x580] sm:$0xff]  ;;  %v5992_v44 = vcombine.high %v5689_v36, %v5689_v36  ;;  %v9451_v26 = vpack.c.bf16 %v5836_v14, %v5835_v28  ;;  %v13425_v55 = vrot.slane %v5689_v36, %v13143_v19 }
 0x4e1   :  { %9434 = vmatpush3.bf16.msra.mxu1 %v9433_v58  ;;  %v5868_v49 = vld [vmem:[%s13887_s5 + $0x588] sm:$0xff]  ;;  %v5819_v63 = vld [vmem:[%s13887_s5 + $0x400] sm:$0xff]  ;;  %v9449_v46 = vpack.c.bf16 %v5802_v18, %v5801_v61  ;;  %v5837_v5 = vld [vmem:[%s13887_s5 + $0x490] sm:$0xff] }
 0x4e2   :  { %9436 = vmatprep.subr.bf16.mxu1 %v9435_v13  ;;  %v5820_v7 = vld [vmem:[%s13887_s5 + $0x408] sm:$0xff]  ;;  %v5838_v54 = vld [vmem:[%s13887_s5 + $0x498] sm:$0xff]  ;;  %v9483_v2 = vpack.c.bf16 %v5868_v49, %v5867_v29  ;;  %v5851_v59 = vld [vmem:[%s13887_s5 + $0x500] sm:$0xff]  ;;  %v13440_v20 = vrot.slane %v5992_v44, %v13143_v19  ;;  %v6007_v13 = vcombine.high %v13425_v55, %v13425_v55 }
 0x4e3   :  { %9406 = vmatpush3.bf16.msra.mxu0 %v9405_v10  ;;  %v5852_v53 = vld [vmem:[%s13887_s5 + $0x508] sm:$0xff]  ;;  %v9453_v1 = vpack.c.bf16 %v5820_v7, %v5819_v63  ;;  %v5869_v51 = vld [vmem:[%s13887_s5 + $0x590] sm:$0xff]  ;;  %v5870_v25 = vld [vmem:[%s13887_s5 + $0x598] sm:$0xff]  ;;  %v9455_v58 = vpack.c.bf16 %v5838_v54, %v5837_v5 }
 0x4e4   :  { %9408 = vmatprep.subr.bf16.mxu0 %v9407_v22  ;;  %v5821_v42 = vld [vmem:[%s13887_s5 + $0x410] sm:$0xff]  ;;  %v5822_v48 = vld [vmem:[%s13887_s5 + $0x418] sm:$0xff]  ;;  %v9485_v37 = vpack.c.bf16 %v5852_v53, %v5851_v59  ;;  %v5839_v6 = vld [vmem:[%s13887_s5 + $0x4a0] sm:$0xff]  ;;  %v9487_v21 = vpack.c.bf16 %v5870_v25, %v5869_v51  ;;  %v6008_v39 = vcombine.high %v13440_v20, %v13440_v20 }
 0x4e5   :  { %9438 = vmatpush3.bf16.msra.mxu1 %v9437_v47  ;;  %v5840_v10 = vld [vmem:[%s13887_s5 + $0x4a8] sm:$0xff]  ;;  %v5853_v3 = vld [vmem:[%s13887_s5 + $0x510] sm:$0xff]  ;;  %v5854_v22 = vld [vmem:[%s13887_s5 + $0x518] sm:$0xff]  ;;  %v9457_v27 = vpack.c.bf16 %v5822_v48, %v5821_v42 }
 0x4e6   :  { %9440 = vmatprep.subr.bf16.mxu1 %v9439_v16  ;;  %v5872_v47 = vld [vmem:[%s13887_s5 + $0x5a8] sm:$0xff]  ;;  %v9459_v23 = vpack.c.bf16 %v5840_v10, %v5839_v6  ;;  %v5823_v15 = vld [vmem:[%s13887_s5 + $0x420] sm:$0xff]  ;;  %v9489_v34 = vpack.c.bf16 %v5854_v22, %v5853_v3  ;;  %v5841_v52 = vld [vmem:[%s13887_s5 + $0x4b0] sm:$0xff] }
 0x4e7   :  { %9410 = vmatpush3.bf16.msra.mxu0 %v9409_v24  ;;  %v5824_v16 = vld [vmem:[%s13887_s5 + $0x428] sm:$0xff]  ;;  %v5855_v11 = vld [vmem:[%s13887_s5 + $0x520] sm:$0xff]  ;;  %v5873_v31 = vld [vmem:[%s13887_s5 + $0x5b0] sm:$0xff] }
 0x4e8   :  { %9412 = vmatprep.subr.bf16.mxu0 %v9411_v33  ;;  %v5856_v32 = vld [vmem:[%s13887_s5 + $0x528] sm:$0xff]  ;;  %v9461_v33 = vpack.c.bf16 %v5824_v16, %v5823_v15  ;;  %v5874_v4 = vld [vmem:[%s13887_s5 + $0x5b8] sm:$0xff]  ;;  %v5825_v30 = vld [vmem:[%s13887_s5 + $0x430] sm:$0xff] }
 0x4e9   :  { %9442 = vmatpush3.bf16.msra.mxu1 %v9441_v50  ;;  %v5826_v12 = vld [vmem:[%s13887_s5 + $0x438] sm:$0xff]  ;;  %v5843_v62 = vld [vmem:[%s13887_s5 + $0x4c0] sm:$0xff]  ;;  %v5844_v56 = vld [vmem:[%s13887_s5 + $0x4c8] sm:$0xff] }
 0x4ea   :  { %9444 = vmatprep.subr.bf16.mxu1 %v9443_v45  ;;  %v9493_v45 = vpack.c.bf16 %v5856_v32, %v5855_v11  ;;  %v5857_v40 = vld [vmem:[%s13887_s5 + $0x530] sm:$0xff]  ;;  %v5858_v17 = vld [vmem:[%s13887_s5 + $0x538] sm:$0xff]  ;;  %v5875_v8 = vld [vmem:[%s13887_s5 + $0x5c0] sm:$0xff]  ;;  %v9467_v36 = vpack.c.bf16 %v5844_v56, %v5843_v62 }
 0x4eb   :  { %9414 = vmatpush3.bf16.msra.mxu0 %v9413_v43  ;;  %v9495_v43 = vpack.c.bf16 %v5874_v4, %v5873_v31  ;;  %v5876_v57 = vld [vmem:[%s13887_s5 + $0x5c8] sm:$0xff]  ;;  %v9497_v14 = vpack.c.bf16 %v5858_v17, %v5857_v40  ;;  %v5846_v61 = vld [vmem:[%s13887_s5 + $0x4d8] sm:$0xff]  ;;  %v5877_v44 = vld [vmem:[%s13887_s5 + $0x5d0] sm:$0xff] }
 0x4ec   :  { %9416 = vmatprep.subr.bf16.mxu0 %v9415_v0  ;;  %v9465_v0 = vpack.c.bf16 %v5826_v12, %v5825_v30  ;;  %v5828_v28 = vld [vmem:[%s13887_s5 + $0x448] sm:$0xff]  ;;  %v9499_v18 = vpack.c.bf16 %v5876_v57, %v5875_v8  ;;  %v5829_v7 = vld [vmem:[%s13887_s5 + $0x450] sm:$0xff]  ;;  %v5847_v54 = vld [vmem:[%s13887_s5 + $0x4e0] sm:$0xff] }
 0x4ed   :  { %9446 = vmatpush3.bf16.msra.mxu1 %v9445_v38  ;;  %v5827_v38 = vld [vmem:[%s13887_s5 + $0x440] sm:$0xff]  ;;  %v5860_v29 = vld [vmem:[%s13887_s5 + $0x548] sm:$0xff]  ;;  %v5861_v53 = vld [vmem:[%s13887_s5 + $0x550] sm:$0xff] }
 0x4ee   :  { %9448 = vmatprep.subr.bf16.mxu1 %v9447_v60  ;;  %v5845_v60 = vld [vmem:[%s13887_s5 + $0x4d0] sm:$0xff]  ;;  %v9469_v49 = vpack.c.bf16 %v5828_v28, %v5827_v38  ;;  %v5879_v25 = vld [vmem:[%s13887_s5 + $0x5e0] sm:$0xff]  ;;  %v5850_v10 = vld [vmem:[%s13887_s5 + $0x4f8] sm:$0xff] }
 0x4ef   :  { %9418 = vmatpush3.bf16.msra.mxu0 %v9417_v9  ;;  %v5859_v9 = vld [vmem:[%s13887_s5 + $0x540] sm:$0xff]  ;;  %v9471_v63 = vpack.c.bf16 %v5846_v61, %v5845_v60  ;;  %v5849_v6 = vld [vmem:[%s13887_s5 + $0x4f0] sm:$0xff]  ;;  %v5864_v22 = vld [vmem:[%s13887_s5 + $0x568] sm:$0xff] }
 0x4f0   :  { %9452 = vmatprep.subr.bf16.mxu0 %v9451_v26  ;;  %v5878_v26 = vld [vmem:[%s13887_s5 + $0x5d8] sm:$0xff]  ;;  %v9501_v5 = vpack.c.bf16 %v5860_v29, %v5859_v9  ;;  %v5831_v48 = vld [vmem:[%s13887_s5 + $0x460] sm:$0xff]  ;;  %v5865_v11 = vld [vmem:[%s13887_s5 + $0x570] sm:$0xff] }
 0x4f1   :  { %9450 = vmatpush3.bf16.msra.mxu1 %v9449_v46  ;;  %v5830_v46 = vld [vmem:[%s13887_s5 + $0x458] sm:$0xff]  ;;  %v9503_v59 = vpack.c.bf16 %v5878_v26, %v5877_v44  ;;  %v5863_v3 = vld [vmem:[%s13887_s5 + $0x560] sm:$0xff]  ;;  %v5932_v4 = vld [vmem:[%s13887_s5 + $0x788] sm:$0xff] }
 0x4f2   :  { %6247 = vmatmul.mubr.f32.vlgmr.msra.gmra.mrb[18].mxu0 %v13231_v41  ;;  %9484 = vmatprep.subr.bf16.mxu1 %v9483_v2  ;;  %v5871_v41 = vld [vmem:[%s13887_s5 + $0x5a0] sm:$0xff]  ;;  %v5848_v2 = vld [vmem:[%s13887_s5 + $0x4e8] sm:$0xff]  ;;  %v9473_v51 = vpack.c.bf16 %v5830_v46, %v5829_v7  ;;  %v5834_v15 = vld [vmem:[%s13887_s5 + $0x478] sm:$0xff] }
 0x4f3   :  { %9454 = vmatpush3.bf16.msra.mxu0 %v9453_v1  ;;  %6386 = vmatprep.mubr.f32.mxu0 %v6007_v13  ;;  %v9491_v24 = vpack.c.bf16 %v5872_v47, %v5871_v41  ;;  %v5862_v1 = vld [vmem:[%s13887_s5 + $0x558] sm:$0xff]  ;;  %v9475_v42 = vpack.c.bf16 %v5848_v2, %v5847_v54  ;;  %v5832_v13 = vld [vmem:[%s13887_s5 + $0x468] sm:$0xff]  ;;  %v9479_v47 = vpack.c.bf16 %v5850_v10, %v5849_v6  ;;  %v5931_v31 = vld [vmem:[%s13887_s5 + $0x780] sm:$0xff] }
 0x4f4   :  { %6317 = vmatmul.mubr.f32.vlgmr.msra.gmra.mrb[210].mxu1 %v13258_v35  ;;  %9456 = vmatprep.subr.bf16.mxu0 %v9455_v58  ;;  %v5842_v35 = vld [vmem:[%s13887_s5 + $0x4b8] sm:$0xff]  ;;  %v5880_v58 = vld [vmem:[%s13887_s5 + $0x5e8] sm:$0xff]  ;;  %v5883_v12 = vld [vmem:[%s13887_s5 + $0x600] sm:$0xff]  ;;  %v9547_v17 = vpack.c.bf16 %v5932_v4, %v5931_v31 }
 0x4f5   :  { %9486 = vmatpush3.bf16.msra.mxu1 %v9485_v37  ;;  %6456 = vmatprep.mubr.f32.mxu1 %v6008_v39  ;;  %v9463_v50 = vpack.c.bf16 %v5842_v35, %v5841_v52  ;;  %v9505_v37 = vpack.c.bf16 %v5862_v1, %v5861_v53  ;;  %v9477_v39 = vpack.c.bf16 %v5832_v13, %v5831_v48  ;;  %v5882_v41 = vld [vmem:[%s13887_s5 + $0x5f8] sm:$0xff]  ;;  %v5899_v52 = vld [vmem:[%s13887_s5 + $0x680] sm:$0xff]  ;;  %v5900_v35 = vld [vmem:[%s13887_s5 + $0x688] sm:$0xff] }
 0x4f6   :  { %9488 = vmatprep.subr.bf16.mxu1 %v9487_v21  ;;  %v9507_v21 = vpack.c.bf16 %v5880_v58, %v5879_v25  ;;  %v5690_v16 = vld [vmem:[#allocation7 + $0x18] sm:$0xff]  ;;  %v9515_v30 = vpack.c.bf16 %v5900_v35, %v5899_v52  ;;  %v5916_v8 = vld [vmem:[%s13887_s5 + $0x708] sm:$0xff]  ;;  %v5933_v38 = vld [vmem:[%s13887_s5 + $0x790] sm:$0xff] }
 0x4f7   :  { %9458 = vmatpush3.bf16.msra.mxu0 %v9457_v27  ;;  %v5881_v27 = vld [vmem:[%s13887_s5 + $0x5f0] sm:$0xff]  ;;  %v5866_v32 = vld [vmem:[%s13887_s5 + $0x578] sm:$0xff]  ;;  %v13629_v56 = vrot.slane %v5690_v16, %v13143_v19  ;;  %v5903_v9 = vld [vmem:[%s13887_s5 + $0x6a0] sm:$0xff] }
 0x4f8   :  { %9460 = vmatprep.subr.bf16.mxu0 %v9459_v23  ;;  %v5833_v23 = vld [vmem:[%s13887_s5 + $0x470] sm:$0xff]  ;;  %v9513_v62 = vpack.c.bf16 %v5866_v32, %v5865_v11  ;;  %v5902_v40 = vld [vmem:[%s13887_s5 + $0x698] sm:$0xff]  ;;  %v5904_v29 = vld [vmem:[%s13887_s5 + $0x6a8] sm:$0xff] }
 0x4f9   :  { %9490 = vmatpush3.bf16.msra.mxu1 %v9489_v34  ;;  %v9509_v34 = vpack.c.bf16 %v5864_v22, %v5863_v3  ;;  %v5934_v28 = vld [vmem:[%s13887_s5 + $0x798] sm:$0xff]  ;;  %v5885_v60 = vld [vmem:[%s13887_s5 + $0x610] sm:$0xff]  ;;  %v5936_v46 = vld [vmem:[%s13887_s5 + $0x7a8] sm:$0xff] }
 0x4fa   :  { %9492 = vmatprep.subr.bf16.mxu1 %v9491_v24  ;;  %v9511_v24 = vpack.c.bf16 %v5882_v41, %v5881_v27  ;;  %v5886_v61 = vld [vmem:[%s13887_s5 + $0x618] sm:$0xff]  ;;  %v5917_v44 = vld [vmem:[%s13887_s5 + $0x710] sm:$0xff]  ;;  %v5887_v54 = vld [vmem:[%s13887_s5 + $0x620] sm:$0xff] }
 0x4fb   :  { %9462 = vmatpush3.bf16.msra.mxu0 %v9461_v33  ;;  %v9481_v33 = vpack.c.bf16 %v5834_v15, %v5833_v23  ;;  %v5918_v26 = vld [vmem:[%s13887_s5 + $0x718] sm:$0xff]  ;;  %v9521_v7 = vpack.c.bf16 %v5886_v61, %v5885_v60  ;;  %v5888_v2 = vld [vmem:[%s13887_s5 + $0x628] sm:$0xff]  ;;  %v5905_v53 = vld [vmem:[%s13887_s5 + $0x6b0] sm:$0xff] }
 0x4fc   :  { %9464 = vmatprep.subr.bf16.mxu0 %v9463_v50  ;;  %v6009_v50 = vcombine.high %v5690_v16, %v5690_v16  ;;  %v5920_v25 = vld [vmem:[%s13887_s5 + $0x728] sm:$0xff]  ;;  %v9525_v58 = vpack.c.bf16 %v5888_v2, %v5887_v54  ;;  %v5938_v48 = vld [vmem:[%s13887_s5 + $0x7b8] sm:$0xff]  ;;  %v5891_v16 = vld [vmem:[%s13887_s5 + $0x640] sm:$0xff] }
 0x4fd   :  { %9494 = vmatpush3.bf16.msra.mxu1 %v9493_v45  ;;  %v5884_v45 = vld [vmem:[%s13887_s5 + $0x608] sm:$0xff]  ;;  %v5890_v6 = vld [vmem:[%s13887_s5 + $0x638] sm:$0xff]  ;;  %v5909_v35 = vld [vmem:[%s13887_s5 + $0x6d0] sm:$0xff] }
 0x4fe   :  { %9496 = vmatprep.subr.bf16.mxu1 %v9495_v43  ;;  %v5901_v43 = vld [vmem:[%s13887_s5 + $0x690] sm:$0xff]  ;;  %v9517_v57 = vpack.c.bf16 %v5884_v45, %v5883_v12  ;;  %v5908_v3 = vld [vmem:[%s13887_s5 + $0x6c8] sm:$0xff]  ;;  %v5922_v27 = vld [vmem:[%s13887_s5 + $0x738] sm:$0xff] }
 0x4ff   :  { %9466 = vmatpush3.bf16.msra.mxu0 %v9465_v0  ;;  %v5915_v0 = vld [vmem:[%s13887_s5 + $0x700] sm:$0xff]  ;;  %v5940_v23 = vld [vmem:[%s13887_s5 + $0x7c8] sm:$0xff]  ;;  %v5941_v4 = vld [vmem:[%s13887_s5 + $0x7d0] sm:$0xff] }
 0x500   :  { %9468 = vmatprep.subr.bf16.mxu0 %v9467_v36  ;;  %v13644_v36 = vrot.slane %v6009_v50, %v13143_v19  ;;  %v6024_v19 = vcombine.high %v13629_v56, %v13629_v56  ;;  %v5923_v32 = vld [vmem:[%s13887_s5 + $0x740] sm:$0xff]  ;;  %v5942_v50 = vld [vmem:[%s13887_s5 + $0x7d8] sm:$0xff]  ;;  %v5893_v12 = vld [vmem:[%s13887_s5 + $0x650] sm:$0xff] }
 0x501   :  { %9498 = vmatpush3.bf16.msra.mxu1 %v9497_v14  ;;  %v9519_v14 = vpack.c.bf16 %v5902_v40, %v5901_v43  ;;  %v5894_v45 = vld [vmem:[%s13887_s5 + $0x658] sm:$0xff]  ;;  %v5911_v43 = vld [vmem:[%s13887_s5 + $0x6e0] sm:$0xff]  ;;  %v5912_v40 = vld [vmem:[%s13887_s5 + $0x6e8] sm:$0xff] }
 0x502   :  { %9500 = vmatprep.subr.bf16.mxu1 %v9499_v18  ;;  %v9549_v18 = vpack.c.bf16 %v5916_v8, %v5915_v0  ;;  %v5925_v0 = vld [vmem:[%s13887_s5 + $0x750] sm:$0xff]  ;;  %v5926_v8 = vld [vmem:[%s13887_s5 + $0x758] sm:$0xff]  ;;  %v5895_v60 = vld [vmem:[%s13887_s5 + $0x660] sm:$0xff] }
 0x503   :  { %9470 = vmatpush3.bf16.msra.mxu0 %v9469_v49  ;;  %v9551_v49 = vpack.c.bf16 %v5934_v28, %v5933_v38  ;;  %v5943_v38 = vld [vmem:[%s13887_s5 + $0x7e0] sm:$0xff]  ;;  %v5944_v28 = vld [vmem:[%s13887_s5 + $0x7e8] sm:$0xff] }
 0x504   :  { %9472 = vmatprep.subr.bf16.mxu0 %v9471_v63  ;;  %v6025_v63 = vcombine.high %v13644_v36, %v13644_v36  ;;  %v5896_v61 = vld [vmem:[%s13887_s5 + $0x668] sm:$0xff] }
 0x505   :  { %9502 = vmatpush3.bf16.msra.mxu1 %v9501_v5  ;;  %v9523_v5 = vpack.c.bf16 %v5904_v29, %v5903_v9  ;;  %v5914_v9 = vld [vmem:[%s13887_s5 + $0x6f8] sm:$0xff]  ;;  %v9571_v29 = vpack.c.bf16 %v5944_v28, %v5943_v38 }
 0x506   :  { %9504 = vmatprep.subr.bf16.mxu1 %v9503_v59  ;;  %v9553_v59 = vpack.c.bf16 %v5918_v26, %v5917_v44  ;;  %v5928_v44 = vld [vmem:[%s13887_s5 + $0x768] sm:$0xff]  ;;  %v9541_v26 = vpack.c.bf16 %v5896_v61, %v5895_v60 }
 0x507   :  { %9474 = vmatpush3.bf16.msra.mxu0 %v9473_v51  ;;  %v5919_v51 = vld [vmem:[%s13887_s5 + $0x720] sm:$0xff] }
 0x508   :  { %9476 = vmatprep.subr.bf16.mxu0 %v9475_v42  ;;  %v5937_v42 = vld [vmem:[%s13887_s5 + $0x7b0] sm:$0xff]  ;;  %v9557_v10 = vpack.c.bf16 %v5920_v25, %v5919_v51  ;;  %v6603_v51 = vld [vmem:[%s13889_s7] sm:$0xff]  ;;  %v6604_v25 = vld [vmem:[%s13889_s7 + $0x8] sm:$0xff] }
 0x509   :  { %9506 = vmatpush3.bf16.msra.mxu1 %v9505_v37  ;;  %v5889_v37 = vld [vmem:[%s13887_s5 + $0x630] sm:$0xff]  ;;  %v9559_v22 = vpack.c.bf16 %v5938_v48, %v5937_v42  ;;  %v9909_v42 = vmov 0.0|0.0   ;;  %v9580_v48 = vpack.c.bf16 %v6604_v25, %v6603_v51 }
 0x50a   :  { %9508 = vmatprep.subr.bf16.mxu1 %v9507_v21  ;;  %v5907_v21 = vld [vmem:[%s13887_s5 + $0x6c0] sm:$0xff]  ;;  %v9529_v41 = vpack.c.bf16 %v5890_v6, %v5889_v37  ;;  %v6608_v37 = vld [vmem:[%s13889_s7 + $0x28] sm:$0xff] }
 0x50b   :  { %9478 = vmatpush3.bf16.msra.mxu0 %v9477_v39  ;;  %v5921_v39 = vld [vmem:[%s13887_s5 + $0x730] sm:$0xff]  ;;  %v9531_v15 = vpack.c.bf16 %v5908_v3, %v5907_v21  ;;  %v6610_v21 = vld [vmem:[%s13889_s7 + $0x38] sm:$0xff] }
 0x50c   :  { %9480 = vmatprep.subr.bf16.mxu0 %v9479_v47  ;;  %v5939_v47 = vld [vmem:[%s13887_s5 + $0x7c0] sm:$0xff]  ;;  %v9561_v52 = vpack.c.bf16 %v5922_v27, %v5921_v39  ;;  %v6612_v39 = vld [vmem:[%s13889_s7 + $0x48] sm:$0xff] }
 0x50d   :  { %9510 = vmatpush3.bf16.msra.mxu1 %v9509_v34  ;;  %v5892_v34 = vld [vmem:[%s13887_s5 + $0x648] sm:$0xff]  ;;  %v9563_v11 = vpack.c.bf16 %v5940_v23, %v5939_v47  ;;  %v6614_v47 = vld [vmem:[%s13889_s7 + $0x58] sm:$0xff] }
 0x50e   :  { %9512 = vmatprep.subr.bf16.mxu1 %v9511_v24  ;;  %v5910_v24 = vld [vmem:[%s13887_s5 + $0x6d8] sm:$0xff]  ;;  %v9533_v31 = vpack.c.bf16 %v5892_v34, %v5891_v16  ;;  %v6616_v16 = vld [vmem:[%s13889_s7 + $0x68] sm:$0xff]  ;;  %v6617_v34 = vld [vmem:[%s13889_s7 + $0x70] sm:$0xff] }
 0x50f   :  { %9482 = vmatpush3.bf16.msra.mxu0 %v9481_v33  ;;  %v5924_v33 = vld [vmem:[%s13887_s5 + $0x748] sm:$0xff] }
 0x510   :  { %9516 = vmatprep.subr.bf16.mxu0 %v9515_v30  ;;  %v9535_v30 = vpack.c.bf16 %v5910_v24, %v5909_v35  ;;  %v6618_v35 = vld [vmem:[%s13889_s7 + $0x78] sm:$0xff]  ;;  %v9911_v24 = vmov 0.0  }
 0x511   :  { %9514 = vmatpush3.bf16.msra.mxu1 %v9513_v62  ;;  %v9565_v62 = vpack.c.bf16 %v5924_v33, %v5923_v32  ;;  %v6889_v33 = vld [vmem:[%s13888_s6] ss:$0 sm:$0xff] }
 0x512   :  { %6387 = vmatmul.mubr.f32.vlgmr.msra.gmra.mrb[20].mxu0 %v13425_v55  ;;  %9548 = vmatprep.subr.bf16.mxu1 %v9547_v17  ;;  %v5935_v55 = vld [vmem:[%s13887_s5 + $0x7a0] sm:$0xff]  ;;  %v9567_v17 = vpack.c.bf16 %v5942_v50, %v5941_v4 }
 0x513   :  { %9518 = vmatpush3.bf16.msra.mxu0 %v9517_v57  ;;  %6526 = vmatprep.mubr.f32.mxu0 %v6024_v19  ;;  %v9555_v1 = vpack.c.bf16 %v5936_v46, %v5935_v55  ;;  %v9537_v57 = vpack.c.bf16 %v5894_v45, %v5893_v12  ;;  %v9569_v19 = vpack.c.bf16 %v5926_v8, %v5925_v0  ;;  %v5897_v46 = vld [vmem:[%s13887_s5 + $0x670] sm:$0xff] }
 0x514   :  { %6457 = vmatmul.mubr.f32.vlgmr.msra.gmra.mrb[212].mxu1 %v13440_v20  ;;  %9520 = vmatprep.subr.bf16.mxu0 %v9519_v14  ;;  %v5906_v20 = vld [vmem:[%s13887_s5 + $0x6b8] sm:$0xff]  ;;  %v9539_v14 = vpack.c.bf16 %v5912_v40, %v5911_v43 }
 0x515   :  { %9550 = vmatpush3.bf16.msra.mxu1 %v9549_v18  ;;  %6596 = vmatprep.mubr.f32.mxu1 %v6025_v63  ;;  %v9527_v13 = vpack.c.bf16 %v5906_v20, %v5905_v53  ;;  %v5913_v18 = vld [vmem:[%s13887_s5 + $0x6f0] sm:$0xff]  ;;  %v5930_v53 = vld [vmem:[%s13887_s5 + $0x778] sm:$0xff] }
 0x516   :  { %9552 = vmatprep.subr.bf16.mxu1 %v9551_v49  ;;  %v5927_v49 = vld [vmem:[%s13887_s5 + $0x760] sm:$0xff]  ;;  %v5945_v63 = vld [vmem:[%s13887_s5 + $0x7f0] sm:$0xff]  ;;  %v9543_v55 = vpack.c.bf16 %v5914_v9, %v5913_v18 }
 0x517   :  { %9522 = vmatpush3.bf16.msra.mxu0 %v9521_v7  ;;  %v5946_v7 = vld [vmem:[%s13887_s5 + $0x7f8] sm:$0xff]  ;;  %v9573_v54 = vpack.c.bf16 %v5928_v44, %v5927_v49 }
 0x518   :  { %9524 = vmatprep.subr.bf16.mxu0 %v9523_v5  ;;  %v5898_v5 = vld [vmem:[%s13887_s5 + $0x678] sm:$0xff]  ;;  %v9575_v2 = vpack.c.bf16 %v5946_v7, %v5945_v63 }
 0x519   :  { %9554 = vmatpush3.bf16.msra.mxu1 %v9553_v59  ;;  %v5929_v59 = vld [vmem:[%s13887_s5 + $0x770] sm:$0xff]  ;;  %v9545_v20 = vpack.c.bf16 %v5898_v5, %v5897_v46 }
 0x51a   :  { %9556 = vmatprep.subr.bf16.mxu1 %v9555_v1  ;;  %v9577_v1 = vpack.c.bf16 %v5930_v53, %v5929_v59  ;;  %v6890_v59 = vld [vmem:[%s13890_s8] ss:$0 sm:$0xff] }
 0x51b   :  { %9526 = vmatpush3.bf16.msra.mxu0 %v9525_v58  ;;  %v6605_v58 = vld [vmem:[%s13889_s7 + $0x10] sm:$0xff] }
 0x51c   :  { %9528 = vmatprep.subr.bf16.mxu0 %v9527_v13  ;;  %v6607_v13 = vld [vmem:[%s13889_s7 + $0x20] sm:$0xff] }
 0x51d   :  { %9558 = vmatpush3.bf16.msra.mxu1 %v9557_v10  ;;  %v9586_v6 = vpack.c.bf16 %v6608_v37, %v6607_v13  ;;  %v6609_v10 = vld [vmem:[%s13889_s7 + $0x30] sm:$0xff] }
 0x51e   :  { %9560 = vmatprep.subr.bf16.mxu1 %v9559_v22  ;;  %v9589_v3 = vpack.c.bf16 %v6610_v21, %v6609_v10  ;;  %v6611_v22 = vld [vmem:[%s13889_s7 + $0x40] sm:$0xff] }
 0x51f   :  { %9530 = vmatpush3.bf16.msra.mxu0 %v9529_v41  ;;  %v9592_v27 = vpack.c.bf16 %v6612_v39, %v6611_v22  ;;  %v6613_v41 = vld [vmem:[%s13889_s7 + $0x50] sm:$0xff] }
 0x520   :  { %9532 = vmatprep.subr.bf16.mxu0 %v9531_v15  ;;  %v9595_v23 = vpack.c.bf16 %v6614_v47, %v6613_v41  ;;  %v6615_v15 = vld [vmem:[%s13889_s7 + $0x60] sm:$0xff] }
 0x521   :  { %9562 = vmatpush3.bf16.msra.mxu1 %v9561_v52  ;;  %v9598_v52 = vpack.c.bf16 %v6616_v16, %v6615_v15 }
 0x522   :  { %9564 = vmatprep.subr.bf16.mxu1 %v9563_v11  ;;  %v9601_v11 = vpack.c.bf16 %v6618_v35, %v6617_v34 }
 0x523   :  { %9534 = vmatpush3.bf16.msra.mxu0 %v9533_v31 }
 0x524   :  { %9536 = vmatprep.subr.bf16.mxu0 %v9535_v30 }
 0x525   :  { %9566 = vmatpush3.bf16.msra.mxu1 %v9565_v62 }
 0x526   :  { %9568 = vmatprep.subr.bf16.mxu1 %v9567_v17 }
 0x527   :  { %9538 = vmatpush3.bf16.msra.mxu0 %v9537_v57 }
 0x528   :  { %9540 = vmatprep.subr.bf16.mxu0 %v9539_v14 }
 0x529   :  { %9570 = vmatpush3.bf16.msra.mxu1 %v9569_v19 }
 0x52a   :  { %9572 = vmatprep.subr.bf16.mxu1 %v9571_v29 }
 0x52b   :  { %9542 = vmatpush3.bf16.msra.mxu0 %v9541_v26 }
 0x52c   :  { %9544 = vmatprep.subr.bf16.mxu0 %v9543_v55 }
 0x52d   :  { %9574 = vmatpush3.bf16.msra.mxu1 %v9573_v54 }
 0x52e   :  { %9576 = vmatprep.subr.bf16.mxu1 %v9575_v2 }
 0x52f   :  { %9546 = vmatpush3.bf16.msra.mxu0 %v9545_v20 }
 0x530   :  { %9579 = vmatprep.subr.bf16.mxu0 %v9909_v42 }
 0x531   :  { %9578 = vmatpush3.bf16.msra.mxu1 %v9577_v1 }
 0x532   :  { %6527 = vmatmul.mubr.f32.vlgmr.msra.gmra.mrb[22].mxu0 %v13629_v56  ;;  %v6606_v56 = vld [vmem:[%s13889_s7 + $0x18] sm:$0xff] }
 0x533   :  { %9581 = vmatpush3.bf16.msra.mxu0 %v9580_v48  ;;  %8832 = vmatprep.mubr.msk.f32.mxu0 %vm9910_vm5, %v9911_v24 }
 0x534   :  { %6597 = vmatmul.mubr.f32.vlgmr.msra.gmra.mrb[214].mxu1 %v13644_v36  ;;  %v9583_v36 = vpack.c.bf16 %v6606_v56, %v6605_v58  ;;  %9582 = vmatprep.subr.bf16.mxu0 %v9909_v42 }
 0x537   :  { %9584 = vmatpush3.bf16.msra.mxu0 %v9583_v36 }
 0x538   :  { %9585 = vmatprep.subr.bf16.mxu0 %v9909_v42 }
 0x53b   :  { %9587 = vmatpush3.bf16.msra.mxu0 %v9586_v6 }
 0x53c   :  { %9588 = vmatprep.subr.bf16.mxu0 %v9909_v42 }
 0x53f   :  { %9590 = vmatpush3.bf16.msra.mxu0 %v9589_v3 }
 0x540   :  { %9591 = vmatprep.subr.bf16.mxu0 %v9909_v42 }
 0x543   :  { %9593 = vmatpush3.bf16.msra.mxu0 %v9592_v27 }
 0x544   :  { %9594 = vmatprep.subr.bf16.mxu0 %v9909_v42 }
 0x547   :  { %9596 = vmatpush3.bf16.msra.mxu0 %v9595_v23 }
 0x548   :  { %9597 = vmatprep.subr.bf16.mxu0 %v9909_v42 }
 0x54b   :  { %9599 = vmatpush3.bf16.msra.mxu0 %v9598_v52 }
 0x54c   :  { %9600 = vmatprep.subr.bf16.mxu0 %v9909_v42 }
 0x54f   :  { %9602 = vmatpush3.bf16.msra.mxu0 %v9601_v11 }
 0x5a4   :  { %v8031_v32 = vpop.f32.mrb[16].mxu0 }
 0x5a5   :  { %v8032_v31 = vpop.f32.mrb[17].mxu0 }
 0x5a6   :  { %v8033_v4 = vadd.f32 %v8032_v31, %v8031_v32 }
 0x5a7   :  { %v8066_v50 = vpop.f32.mrb[208].mxu1 }
 0x5a8   :  { %v8067_v30 = vpop.f32.mrb[209].mxu1  ;;  %v6109_v12 = vadd.f32 %v8033_v4, %v6889_v33 }
 0x5a9   :  { %v8068_v45 = vadd.f32 %v8067_v30, %v8066_v50 }
 0x5ab   :  { %v6179_v62 = vadd.f32 %v8068_v45, %v6109_v12 }
 0x5c5   :  { %v8101_v43 = vpop.f32.mrb[18].mxu0 }
 0x5c6   :  { %v8102_v40 = vpop.f32.mrb[19].mxu0 }
 0x5c7   :  { %v8103_v17 = vadd.f32 %v8102_v40, %v8101_v43  ;;  %v8136_v0 = vpop.f32.mrb[210].mxu1 }
 0x5c8   :  { %v8137_v8 = vpop.f32.mrb[211].mxu1 }
 0x5c9   :  { %v6249_v57 = vadd.f32 %v8103_v17, %v6179_v62  ;;  %v8138_v38 = vadd.f32 %v8137_v8, %v8136_v0 }
 0x5cb   :  { %v6319_v28 = vadd.f32 %v8138_v38, %v6249_v57 }
 0x5e5   :  { %v8171_v14 = vpop.f32.mrb[20].mxu0 }
 0x5e6   :  { %v8172_v60 = vpop.f32.mrb[21].mxu0 }
 0x5e7   :  { %v8173_v61 = vadd.f32 %v8172_v60, %v8171_v14  ;;  %v8206_v19 = vpop.f32.mrb[212].mxu1 }
 0x5e8   :  { %v8207_v18 = vpop.f32.mrb[213].mxu1 }
 0x5e9   :  { %v6389_v9 = vadd.f32 %v8173_v61, %v6319_v28  ;;  %v8208_v29 = vadd.f32 %v8207_v18, %v8206_v19 }
 0x5eb   :  { %v6459_v49 = vadd.f32 %v8208_v29, %v6389_v9 }
 0x605   :  { %v8241_v44 = vpop.f32.mrb[22].mxu0 }
 0x606   :  { %v8242_v26 = vpop.f32.mrb[23].mxu0 }
 0x607   :  { %v8243_v63 = vadd.f32 %v8242_v26, %v8241_v44  ;;  %v8276_v7 = vpop.f32.mrb[214].mxu1 }
 0x608   :  { %v8277_v55 = vpop.f32.mrb[215].mxu1 }
 0x609   :  { %v6529_v46 = vadd.f32 %v8243_v63, %v6459_v49  ;;  %v8278_v5 = vadd.f32 %v8277_v55, %v8276_v7 }
 0x60b   :  { %v6599_v54 = vadd.f32 %v8278_v5, %v6529_v46 }
 0x60d   :  { %v6602_v2 = vmax.f32 %v6599_v54, 0.0 }
 0x60f   :  { %8833 = vmatmul.mubr.f32.vlgmr.msra.gmra.mrb[24].mxu0 %v6602_v2 }
 0x6e2   :  { %v6692_v53 = vpop.f32.mrb[24].mxu0 }
 0x6e3   :  { %v6693_v20 = vadd.f32 %v6890_v59, %v6692_v53  ;;  %v8834_v1 = vpop.f32.mrb[25].mxu0 }
 0x6e5   :  { %6696 = vst [vmem:[#allocation8] sm:$0x3] %v6693_v20 }
 0x6e6   :  { %9895 = shalt.err (!%p9892_p4)
}
 0x6e7   :  { %s9896_s30 = scalar_lea.hbm %s13891_s9, 32 }
 0x6e8   :  { %p9897_p5 = scmp.ne.s32.totalorder %s13891_s9, %s9896_s30  ;;  %p9900_p6 = scmp.lt.u32.totalorder %s9896_s30, %s13891_s9 }
 0x6ea   :  { %p9902_p7 = pnand %p9900_p6, %p9897_p5 }
 0x6ec   :  { %9905 = shalt.err (!%p9902_p7)
}
 0x6ed   :  { %6706 = dma.vmem_to_hbm [thread:$0]  %s6704_s26, 32, %s13891_s9, [#allocation9]  }
 0x6ee   :  { %9906 = dma.done.wait [#allocation9], 32  }
 0x6ef   :  { %9907 = vsyncadd [#allocation9], 4294967264 }
 0x6f0   :  { %6710 = vsyncpa [#allocation9], 1 }

</bundles_post_ra>
